<compile_context>
chip_gen: v6e
topology: v6e:2x2x1
jax: 0.10.0
libtpu: 0.0.40
codegen_flags: <defaults>
</compile_context>

<pallas_src>
import functools

import jax
import jax.numpy as jnp
from jax import lax
from jax.experimental import pallas as pl
from jax.experimental.pallas import tpu as pltpu


def _round_up(x, m):
    return (x + m - 1) // m * m


def _pad2d(a, rows, cols, dtype):
    a = a.astype(dtype)
    if a.shape == (rows, cols):
        return a
    return jnp.zeros((rows, cols), dtype).at[:a.shape[0], :a.shape[1]].set(a)


def _pick_chunk(s, target=8):
    t = min(target, s)
    while s % t:
        t -= 1
    return t


@functools.lru_cache(maxsize=None)
def _vmem_limit_bytes():
    """Generation-aware scoped-VMEM limit (v5e/v6e: 128 MiB, v7x: 64 MiB/TC)."""
    try:
        cap = int(pltpu.get_tpu_info().vmem_capacity_bytes)
        return int(min(100 * 1024 * 1024, int(cap * 0.7)))
    except Exception:
        return 64 * 1024 * 1024


def _probe_kernel(x_ref, o_ref):
    o_ref[...] = x_ref[...]


@functools.lru_cache(maxsize=None)
def _single_buffering_supported():
    """True iff BlockSpec(pipeline_mode=pl.Buffered(1)) lowers on this jax."""
    try:
        spec = pl.BlockSpec((8, 128), lambda i: (0, 0),
                            pipeline_mode=pl.Buffered(buffer_count=1))
        fn = pl.pallas_call(
            _probe_kernel,
            out_shape=jax.ShapeDtypeStruct((8, 128), jnp.float32),
            grid=(1,),
            in_specs=[spec],
            out_specs=pl.BlockSpec((8, 128), lambda i: (0, 0)))
        jax.block_until_ready(fn(jnp.zeros((8, 128), jnp.float32)))
        return True
    except Exception:
        return False


def _const_spec(shape, index_map):
    """BlockSpec for resident weight blocks: single-buffer them so only one
    copy lives in VMEM (~38 MiB/direction LSTM weights must fit v7x's 64 MiB)."""
    if _single_buffering_supported():
        return pl.BlockSpec(shape, index_map,
                            pipeline_mode=pl.Buffered(buffer_count=1))
    return pl.BlockSpec(shape, index_map)


# ---------------------------------------------------------------------------
# Tiled linear layer:  y = x @ W^T + b  (PyTorch nn.Linear), optional fused
# activation. bf16 MXU operands, f32 accumulation in VMEM scratch.
# ---------------------------------------------------------------------------
def _linear_kernel(x_ref, wt_ref, b_ref, o_ref, acc_ref, *, act):
    k = pl.program_id(2)

    @pl.when(k == 0)
    def _():
        acc_ref[...] = jnp.zeros_like(acc_ref)

    acc_ref[...] += jnp.dot(x_ref[...], wt_ref[...],
                            preferred_element_type=jnp.float32)

    @pl.when(k == pl.num_programs(2) - 1)
    def _():
        y = acc_ref[...] + b_ref[...]
        if act == "relu":
            y = jnp.maximum(y, 0.0)
        elif act == "tanh":
            y = jnp.tanh(y)
        o_ref[...] = y.astype(o_ref.dtype)


def pallas_linear(x, w, b, act="none", tm=256, tn=256, tk=512):
    M, K = x.shape
    N = w.shape[0]
    tm = min(tm, _round_up(M, 8))
    tn = min(tn, _round_up(N, 128))
    tk = min(tk, _round_up(K, 128))
    Mp, Kp, Np = _round_up(M, tm), _round_up(K, tk), _round_up(N, tn)
    xp = _pad2d(x, Mp, Kp, jnp.bfloat16)
    wtp = _pad2d(jnp.transpose(w), Kp, Np, jnp.bfloat16)
    bp = _pad2d(b.reshape(1, N), 1, Np, jnp.float32)
    out = pl.pallas_call(
        functools.partial(_linear_kernel, act=act),
        out_shape=jax.ShapeDtypeStruct((Mp, Np), jnp.float32),
        grid=(Mp // tm, Np // tn, Kp // tk),
        in_specs=[pl.BlockSpec((tm, tk), lambda i, j, k: (i, k)),
                  pl.BlockSpec((tk, tn), lambda i, j, k: (k, j)),
                  pl.BlockSpec((1, tn), lambda i, j, k: (0, j))],
        out_specs=pl.BlockSpec((tm, tn), lambda i, j, k: (i, j)),
        scratch_shapes=[pltpu.VMEM((tm, tn), jnp.float32)],
        compiler_params=pltpu.CompilerParams(
            dimension_semantics=("parallel", "parallel", "arbitrary"),
            vmem_limit_bytes=_vmem_limit_bytes()),
    )(xp, wtp, bp)
    return out[:M, :N]


# ---------------------------------------------------------------------------
# Bidirectional LSTM, time-chunked.  grid = (direction, S//T); direction is
# "parallel" (megacore on v7x), time-chunk is the sequential recurrence.
# Per grid step: one big (T*B, Din) @ W_ih matmul for the whole chunk, then an
# unrolled T-step recurrence doing only h @ W_hh.  The backward direction's
# time reversal is chunk-reversed by the index_map and step-reversed by the
# in-kernel index; both directions store straight into the (S, B, 2H) bf16
# output (lane-dense, H % 128 == 0).  PyTorch gate order: i, f, g, o.
# ---------------------------------------------------------------------------
def _bilstm_kernel(x_ref, wih_ref, whh_ref, b_ref, out_ref,
                   h_sc, c_sc, gx_sc, *, T):
    d = pl.program_id(0)          # 0 = forward, 1 = backward (time-reversed)
    chunk = pl.program_id(1)

    @pl.when(chunk == 0)
    def _():
        h_sc[...] = jnp.zeros_like(h_sc)
        c_sc[...] = jnp.zeros_like(c_sc)

    B, H = h_sc.shape
    Din = x_ref.shape[-1]
    H4 = 4 * H

    # Input-gate matmul for the whole chunk (M = T*B rows on the MXU), off the
    # serial h-dependency chain; bias added once.
    x_chunk = x_ref[...].reshape(T * B, Din)                       # bf16
    gx = jnp.dot(x_chunk, wih_ref[0], preferred_element_type=jnp.float32)
    gx_sc[...] = gx.reshape(T, B, H4) + b_ref[0]

    whh = whh_ref[0]                                               # (H, 4H) bf16

    def step(t, carry):
        h, c = carry
        tau = t + d * (T - 1 - 2 * t)          # t for fwd, T-1-t for bwd
        gates = gx_sc[tau] + jnp.dot(h.astype(jnp.bfloat16), whh,
                                     preferred_element_type=jnp.float32)
        i = jax.nn.sigmoid(gates[:, 0:H])
        f = jax.nn.sigmoid(gates[:, H:2 * H])
        g = jnp.tanh(gates[:, 2 * H:3 * H])
        o = jax.nn.sigmoid(gates[:, 3 * H:4 * H])
        c = f * c + i * g
        h = o * jnp.tanh(c)
        out_ref[tau] = h.astype(out_ref.dtype)
        return h, c

    h_fin, c_fin = lax.fori_loop(0, T, step, (h_sc[...], c_sc[...]),
                                 unroll=True)
    h_sc[...] = h_fin
    c_sc[...] = c_fin


def bilstm(x_sbd, p, *, chunk_target=8):
    """Bidirectional LSTM over (S, B, Din) -> (S, B, 2H) bf16."""
    S, B, Din = x_sbd.shape
    H = p["w_hh_f"].shape[1]
    # Lane-dense output stores require H % 128 == 0 (production 1500 -> pad to
    # 1536 with zero rows/cols in W_ih/W_hh/bias so padded units stay 0).
    assert H % 128 == 0, "pad hidden size to a multiple of 128"

    Bp = _round_up(B, 8)
    x = x_sbd.astype(jnp.bfloat16)
    if Bp != B:
        x = jnp.concatenate(
            [x, jnp.zeros((S, Bp - B, Din), jnp.bfloat16)], axis=1)

    T = _pick_chunk(S, chunk_target)
    C = S // T

    wih = jnp.stack([p["w_ih_f"].T, p["w_ih_b"].T]).astype(jnp.bfloat16)
    whh = jnp.stack([p["w_hh_f"].T, p["w_hh_b"].T]).astype(jnp.bfloat16)
    bias = jnp.stack([(p["b_ih_f"] + p["b_hh_f"]).reshape(1, 4 * H),
                      (p["b_ih_b"] + p["b_hh_b"]).reshape(1, 4 * H)]
                     ).astype(jnp.float32)

    def t_idx(d, c):               # chunk c fwd, C-1-c for the bwd direction
        return c + d * (C - 1 - 2 * c)

    out = pl.pallas_call(
        functools.partial(_bilstm_kernel, T=T),
        out_shape=jax.ShapeDtypeStruct((S, Bp, 2 * H), jnp.bfloat16),
        grid=(2, C),
        in_specs=[pl.BlockSpec((T, Bp, Din), lambda d, c: (t_idx(d, c), 0, 0)),
                  _const_spec((1, Din, 4 * H), lambda d, c: (d, 0, 0)),
                  _const_spec((1, H, 4 * H), lambda d, c: (d, 0, 0)),
                  _const_spec((1, 1, 4 * H), lambda d, c: (d, 0, 0))],
        out_specs=pl.BlockSpec((T, Bp, H), lambda d, c: (t_idx(d, c), 0, d)),
        scratch_shapes=[pltpu.VMEM((Bp, H), jnp.float32),
                        pltpu.VMEM((Bp, H), jnp.float32),
                        pltpu.VMEM((T, Bp, 4 * H), jnp.float32)],
        compiler_params=pltpu.CompilerParams(
            dimension_semantics=("parallel", "arbitrary"),
            vmem_limit_bytes=_vmem_limit_bytes()),
    )(x, wih, whh, bias)
    return out if Bp == B else out[:, :B]


# ---------------------------------------------------------------------------
# SoftmaxAttention (ESIM soft alignment), one batch element per grid step.
# Inputs/outputs bf16; attn21 is a softmax of sim over axis 0 (no transpose
# materialized); transposed contraction expressed with lax.dot_general (MXU).
# ---------------------------------------------------------------------------
def _attention_kernel(x1_ref, x2_ref, m1c_ref, m2c_ref, m2r_ref,
                      a1_ref, a2_ref):
    x1 = x1_ref[0]                              # (S1, D) bf16
    x2 = x2_ref[0]                              # (S2, D) bf16
    m1c = m1c_ref[0]                            # (S1, 1) f32
    m2c = m2c_ref[0]                            # (S2, 1) f32
    m2r = m2r_ref[0]                            # (1, S2) f32

    sim = lax.dot_general(x1, x2, (((1,), (1,)), ((), ())),
                          preferred_element_type=jnp.float32)       # (S1,S2)

    # masked_softmax over S2: softmax(sim * mask), re-mask, renormalize.
    masked12 = sim * m2r
    e12 = jnp.exp(masked12 - jnp.max(masked12, axis=1, keepdims=True))
    p12 = e12 * pl.reciprocal(jnp.sum(e12, axis=1, keepdims=True), approx=True)
    p12 = p12 * m2r
    p12 = p12 / (jnp.sum(p12, axis=1, keepdims=True) + 1e-13)   # exact renorm

    # masked_softmax over S1 (columns of sim).
    masked21 = sim * m1c
    e21 = jnp.exp(masked21 - jnp.max(masked21, axis=0, keepdims=True))
    p21 = e21 * pl.reciprocal(jnp.sum(e21, axis=0, keepdims=True), approx=True)
    p21 = p21 * m1c
    p21 = p21 / (jnp.sum(p21, axis=0, keepdims=True) + 1e-13)

    a1 = lax.dot_general(p12.astype(jnp.bfloat16), x2,
                         (((1,), (0,)), ((), ())),
                         preferred_element_type=jnp.float32) * m1c  # (S1,D)
    a2 = lax.dot_general(p21.astype(jnp.bfloat16), x1,
                         (((0,), (0,)), ((), ())),
                         preferred_element_type=jnp.float32) * m2c  # (S2,D)
    a1_ref[0] = a1.astype(a1_ref.dtype)
    a2_ref[0] = a2.astype(a2_ref.dtype)


def softmax_attention(x1_bt, m1, x2_bt, m2):
    # TODO(synk): for long sequences, tile over S1 and stream S2 flash-style;
    # one batch element per step is fine at these sizes.
    B, S1, D = x1_bt.shape
    S2 = x2_bt.shape[1]
    m1c = m1.reshape(B, S1, 1).astype(jnp.float32)
    m2c = m2.reshape(B, S2, 1).astype(jnp.float32)
    m2r = m2.reshape(B, 1, S2).astype(jnp.float32)
    return pl.pallas_call(
        _attention_kernel,
        out_shape=(jax.ShapeDtypeStruct((B, S1, D), jnp.bfloat16),
                   jax.ShapeDtypeStruct((B, S2, D), jnp.bfloat16)),
        grid=(B,),
        in_specs=[pl.BlockSpec((1, S1, D), lambda b: (b, 0, 0)),
                  pl.BlockSpec((1, S2, D), lambda b: (b, 0, 0)),
                  pl.BlockSpec((1, S1, 1), lambda b: (b, 0, 0)),
                  pl.BlockSpec((1, S2, 1), lambda b: (b, 0, 0)),
                  pl.BlockSpec((1, 1, S2), lambda b: (b, 0, 0))],
        out_specs=(pl.BlockSpec((1, S1, D), lambda b: (b, 0, 0)),
                   pl.BlockSpec((1, S2, D), lambda b: (b, 0, 0))),
        compiler_params=pltpu.CompilerParams(
            dimension_semantics=("parallel",),
            vmem_limit_bytes=_vmem_limit_bytes()),
    )(x1_bt.astype(jnp.bfloat16), x2_bt.astype(jnp.bfloat16), m1c, m2c, m2r)


# ---------------------------------------------------------------------------
# Fused ESIM enhancement + projection:
#   relu([x, a, x-a, x*a] @ proj_w^T + b) without the (., 8H) concat in HBM.
# bf16 activations; the (x-a)/(x*a) features are built once per row block
# into VMEM scratch under @pl.when(j == 0).
# ---------------------------------------------------------------------------
def _enhance_project_kernel(x_ref, a_ref, w1_ref, w2_ref, w3_ref, w4_ref,
                            b_ref, o_ref, xd_sc, xp_sc):
    j = pl.program_id(1)

    @pl.when(j == 0)
    def _():
        x = x_ref[...]
        a = a_ref[...]
        xd_sc[...] = x - a
        xp_sc[...] = x * a

    acc = jnp.dot(x_ref[...], w1_ref[...], preferred_element_type=jnp.float32)
    acc += jnp.dot(a_ref[...], w2_ref[...], preferred_element_type=jnp.float32)
    acc += jnp.dot(xd_sc[...], w3_ref[...], preferred_element_type=jnp.float32)
    acc += jnp.dot(xp_sc[...], w4_ref[...], preferred_element_type=jnp.float32)
    o_ref[...] = jnp.maximum(acc + b_ref[...], 0.0).astype(o_ref.dtype)


def enhance_project(x2d, a2d, w, b, tm=256, tn=256):
    M, D2 = x2d.shape                          # D2 = 2H
    H = w.shape[0]
    tm = min(tm, _round_up(M, 8))
    tn = min(tn, _round_up(H, 128))
    Mp, Np, D2p = _round_up(M, tm), _round_up(H, tn), _round_up(D2, 128)

    xp = _pad2d(x2d, Mp, D2p, jnp.bfloat16)
    ap = _pad2d(a2d, Mp, D2p, jnp.bfloat16)
    wt = jnp.transpose(w)                      # (4*D2, H)
    wchunks = [_pad2d(wt[c * D2:(c + 1) * D2], D2p, Np, jnp.bfloat16)
               for c in range(4)]
    bp = _pad2d(b.reshape(1, H), 1, Np, jnp.float32)

    out = pl.pallas_call(
        _enhance_project_kernel,
        out_shape=jax.ShapeDtypeStruct((Mp, Np), jnp.bfloat16),
        grid=(Mp // tm, Np // tn),
        in_specs=[pl.BlockSpec((tm, D2p), lambda i, j: (i, 0)),
                  pl.BlockSpec((tm, D2p), lambda i, j: (i, 0)),
                  pl.BlockSpec((D2p, tn), lambda i, j: (0, j)),
                  pl.BlockSpec((D2p, tn), lambda i, j: (0, j)),
                  pl.BlockSpec((D2p, tn), lambda i, j: (0, j)),
                  pl.BlockSpec((D2p, tn), lambda i, j: (0, j)),
                  pl.BlockSpec((1, tn), lambda i, j: (0, j))],
        out_specs=pl.BlockSpec((tm, tn), lambda i, j: (i, j)),
        scratch_shapes=[pltpu.VMEM((tm, D2p), jnp.bfloat16),
                        pltpu.VMEM((tm, D2p), jnp.bfloat16)],
        compiler_params=pltpu.CompilerParams(
            dimension_semantics=("parallel", "arbitrary"),
            vmem_limit_bytes=_vmem_limit_bytes()),
    )(xp, ap, *wchunks, bp)
    return out[:M, :H]


# ---------------------------------------------------------------------------
# Masked average + masked max pooling over time; (S, B, D) layout so the
# reduction runs over the leading axis (pure VPU accumulation).
# ---------------------------------------------------------------------------
def _pool_kernel(v_ref, m_ref, avg_ref, max_ref):
    v = v_ref[...].astype(jnp.float32)                  # (S, B, D)
    m = m_ref[...]                                      # (S, B, 1)
    avg_ref[...] = jnp.sum(v * m, axis=0) / jnp.sum(m, axis=0)
    max_ref[...] = jnp.max(jnp.where(m > 0.0, v, -1000000.0), axis=0)


def masked_pool(v_sbd, mask_sb):
    S, B, D = v_sbd.shape
    m = mask_sb.reshape(S, B, 1).astype(jnp.float32)
    return pl.pallas_call(
        _pool_kernel,
        out_shape=(jax.ShapeDtypeStruct((B, D), jnp.float32),
                   jax.ShapeDtypeStruct((B, D), jnp.float32)),
        grid=(1,),
        in_specs=[pl.BlockSpec((S, B, D), lambda i: (0, 0, 0)),
                  pl.BlockSpec((S, B, 1), lambda i: (0, 0, 0))],
        out_specs=(pl.BlockSpec((B, D), lambda i: (0, 0)),
                   pl.BlockSpec((B, D), lambda i: (0, 0))),
        compiler_params=pltpu.CompilerParams(
            vmem_limit_bytes=_vmem_limit_bytes()),
    )(v_sbd, m)


# ---------------------------------------------------------------------------
# Final log_softmax (tiny (B, 3) tensor).
# ---------------------------------------------------------------------------
def _log_softmax_kernel(x_ref, o_ref):
    x = x_ref[...]
    z = x - jnp.max(x, axis=-1, keepdims=True)
    o_ref[...] = z - jnp.log(jnp.sum(jnp.exp(z), axis=-1, keepdims=True))


def pallas_log_softmax(x):
    B, N = x.shape
    return pl.pallas_call(
        _log_softmax_kernel,
        out_shape=jax.ShapeDtypeStruct((B, N), jnp.float32),
        grid=(1,),
        in_specs=[pl.BlockSpec((B, N), lambda i: (0, 0))],
        out_specs=pl.BlockSpec((B, N), lambda i: (0, 0)),
    )(x)


# ---------------------------------------------------------------------------
# Full forward pass (dropout layers are identity at inference).
# ---------------------------------------------------------------------------
def finetune_forward(params, tokens1, tokens2):
    B, S1 = tokens1.shape
    S2 = tokens2.shape[1]

    # get_mask: non-padding positions (token id != 0), float32 (ESIM convention)
    m1 = (tokens1 != 0).astype(jnp.float32)            # (B, S1)
    m2 = (tokens2 != 0).astype(jnp.float32)            # (B, S2)

    emb = params["embedding"]
    x1 = jnp.take(emb, tokens1.T, axis=0)              # (S1, B, E)  XLA gather
    x2 = jnp.take(emb, tokens2.T, axis=0)              # (S2, B, E)

    # Both sentences share one LSTM pass (batch-concat) when padded lengths
    # match; otherwise fall back to per-sentence calls (exact reference
    # semantics: the LSTM always runs over each sentence's own padded length).
    fuse = (S1 == S2)
    if fuse:
        enc = bilstm(jnp.concatenate([x1, x2], axis=1), params["enc"])  # (S,2B,2H)
        enc_bt = jnp.transpose(enc, (1, 0, 2))                          # (2B,S,2H)
        x1_bt, x2_bt = enc_bt[:B], enc_bt[B:]
    else:
        x1_bt = jnp.transpose(bilstm(x1, params["enc"]), (1, 0, 2))
        x2_bt = jnp.transpose(bilstm(x2, params["enc"]), (1, 0, 2))

    a1_bt, a2_bt = softmax_attention(x1_bt, m1, x2_bt, m2)    # bf16 (B,S,2H)

    D2 = x1_bt.shape[-1]
    if fuse:
        xcat = enc_bt.reshape(2 * B * S1, D2)
    else:
        xcat = jnp.concatenate([x1_bt.reshape(B * S1, D2),
                                x2_bt.reshape(B * S2, D2)], axis=0)
    acat = jnp.concatenate([a1_bt.reshape(B * S1, D2),
                            a2_bt.reshape(B * S2, D2)], axis=0)
    proj = enhance_project(xcat, acat, params["proj_w"], params["proj_b"])
    Hh = proj.shape[-1]
    p1 = jnp.transpose(proj[:B * S1].reshape(B, S1, Hh), (1, 0, 2))  # (S1,B,H)
    p2 = jnp.transpose(proj[B * S1:].reshape(B, S2, Hh), (1, 0, 2))  # (S2,B,H)

    if fuse:
        v_all = bilstm(jnp.concatenate([p1, p2], axis=1), params["comp"])
        mcat = jnp.concatenate([m1, m2], axis=0).T                   # (S, 2B)
        avg, mx = masked_pool(v_all, mcat)                           # (2B, 2H)
        v_a_avg, v_b_avg = avg[:B], avg[B:]
        v_a_max, v_b_max = mx[:B], mx[B:]
    else:
        v_ai = bilstm(p1, params["comp"])
        v_bj = bilstm(p2, params["comp"])
        v_a_avg, v_a_max = masked_pool(v_ai, m1.T)
        v_b_avg, v_b_max = masked_pool(v_bj, m2.T)

    v = jnp.concatenate([v_a_avg, v_a_max, v_b_avg, v_b_max], axis=1)  # (B,8H)

    # TODO(synk): nn.Dropout layers are stochastic in train mode; treated as
    # identity here (inference semantics).
    h = pallas_linear(v, params["cls_w1"], params["cls_b1"], act="tanh")
    logits = pallas_linear(h, params["cls_w2"], params["cls_b2"], act="none")
    return pallas_log_softmax(logits)


# ---------------------------------------------------------------------------
# Deterministic parameter init (shapes follow the module; hidden size shrunk
# to a 128-multiple per the lane-alignment guidance).
# ---------------------------------------------------------------------------
def init_params(key, vocab, embed_dim, hidden):
    H = hidden
    keys = iter(jax.random.split(key, 64))

    def p(shape, scale=0.1):
        return scale * jax.random.normal(next(keys), shape, jnp.float32)

    def lstm_params(din):
        return {
            "w_ih_f": p((4 * H, din)), "w_hh_f": p((4 * H, H)),
            "b_ih_f": p((4 * H,)), "b_hh_f": p((4 * H,)),
            "w_ih_b": p((4 * H, din)), "w_hh_b": p((4 * H, H)),
            "b_ih_b": p((4 * H,)), "b_hh_b": p((4 * H,)),
        }

    return {
        "embedding": p((vocab, embed_dim), 1.0),
        "enc": lstm_params(embed_dim),          # Seq2SeqEncoder(LSTM, E, H, bidir)
        "proj_w": p((H, 4 * 2 * H)), "proj_b": p((H,)),
        "comp": lstm_params(H),                 # Seq2SeqEncoder(LSTM, H, H, bidir)
        "cls_w1": p((H, 2 * 4 * H)), "cls_b1": p((H,)),
        "cls_w2": p((3, H)), "cls_b2": p((3,)),
    }


if __name__ == "__main__":
    B, S1, S2 = 8, 16, 16
    vocab, E, H = 50, 64, 128       # hidden 1500 in the original (pad to 1536)

    # Warm the capability probes eagerly (outside any trace).
    _ = _single_buffering_supported()
    _ = _vmem_limit_bytes()

    key = jax.random.PRNGKey(0)
    kp, k1, k2 = jax.random.split(key, 3)
    params = init_params(kp, vocab, E, H)

    tokens1 = jax.random.randint(k1, (B, S1), 1, vocab, dtype=jnp.int32)
    tokens2 = jax.random.randint(k2, (B, S2), 1, vocab, dtype=jnp.int32)
    # pad the tails with token id 0 so the masks are non-trivial (and differ)
    tokens1 = tokens1.at[:, S1 - 3:].set(0)
    tokens2 = tokens2.at[:, S2 - 5:].set(0)

    fwd = jax.jit(functools.partial(finetune_forward, params))
    out = jax.block_until_ready(fwd(tokens1, tokens2))
    assert out.shape == (B, 3) and out.dtype == jnp.float32
    assert bool(jnp.all(jnp.isfinite(out)))
    print("KERNEL_OK")
</pallas_src>

<mosaic_0001>
module attributes {stable_mosaic.version = 11 : i64} {
  func.func @_probe_kernel(%arg0: i32, %arg1: memref<8x128xf32, #tpu.memory_space<vmem>>, %arg2: memref<8x128xf32, #tpu.memory_space<vmem>>) attributes {dimension_semantics = [#tpu.dimension_semantics<arbitrary>], iteration_bounds = array<i64: 1>, scalar_prefetch = 0 : i64, scratch_operands = 0 : i64, tpu.core_type = #tpu.core_type<tc>, window_params = [{pipeline_mode = #tpu.pipeline_mode<synchronous>, transform_indices = @transform_0, window_bounds = array<i64: 8, 128>}, {pipeline_mode = #tpu.pipeline_mode<synchronous>, transform_indices = @transform_1, window_bounds = array<i64: 8, 128>}]} {
    %c0 = arith.constant 0 : index
    %c0_0 = arith.constant 0 : index
    %0 = vector.load %arg1[%c0, %c0_0] : memref<8x128xf32, #tpu.memory_space<vmem>>, vector<8x128xf32>
    %c0_1 = arith.constant 0 : index
    %c0_2 = arith.constant 0 : index
    %1 = vector.load %arg2[%c0_1, %c0_2] : memref<8x128xf32, #tpu.memory_space<vmem>>, vector<8x128xf32>
    tpu.vector_store %arg2[%c0_1, %c0_2], %0 {strides = array<i32>} : memref<8x128xf32, #tpu.memory_space<vmem>>, vector<8x128xf32>,
    return
  }
  func.func @transform_0(%arg0: i32) -> (i32, i32) {
    %c0_i32 = arith.constant 0 : i32
    %c0_i32_0 = arith.constant 0 : i32
    %c0_i32_1 = arith.constant 0 : i32
    return %c0_i32, %c0_i32_0 : i32, i32
  }
  func.func @transform_1(%arg0: i32) -> (i32, i32) {
    %c0_i32 = arith.constant 0 : i32
    %c0_i32_0 = arith.constant 0 : i32
    %c0_i32_1 = arith.constant 0 : i32
    return %c0_i32, %c0_i32_0 : i32, i32
  }
}

module attributes {stable_mosaic.version = 11 : i64} {
  func.func @_bilstm_kernel(%arg0: i32, %arg1: i32, %arg2: memref<8x16x64xbf16, #tpu.memory_space<vmem>>, %arg3: memref<1x64x512xbf16, #tpu.memory_space<vmem>>, %arg4: memref<1x128x512xbf16, #tpu.memory_space<vmem>>, %arg5: memref<1x1x512xf32, #tpu.memory_space<vmem>>, %arg6: memref<8x16x128xbf16, #tpu.memory_space<vmem>>, %arg7: memref<16x128xf32, #tpu.memory_space<vmem>>, %arg8: memref<16x128xf32, #tpu.memory_space<vmem>>, %arg9: memref<8x16x512xf32, #tpu.memory_space<vmem>>) attributes {dimension_semantics = [#tpu.dimension_semantics<parallel>, #tpu.dimension_semantics<arbitrary>], iteration_bounds = array<i64: 2, 2>, scalar_prefetch = 0 : i64, scratch_operands = 3 : i64, tpu.core_type = #tpu.core_type<tc>, window_params = [{transform_indices = @transform_0, window_bounds = array<i64: 8, 16, 64>}, {transform_indices = @transform_1, window_bounds = array<i64: 1, 64, 512>}, {transform_indices = @transform_2, window_bounds = array<i64: 1, 128, 512>}, {transform_indices = @transform_3, window_bounds = array<i64: 1, 1, 512>}, {transform_indices = @transform_4, window_bounds = array<i64: 8, 16, 128>}]} {
    %c0_i32 = arith.constant 0 : i32
    %0 = arith.cmpi eq, %arg1, %c0_i32 : i32
    %1 = arith.extui %0 : i1 to i32
    %c0_i32_0 = arith.constant 0 : i32
    %2 = arith.cmpi ne, %1, %c0_i32_0 : i32
    scf.if %2 {
      %cst_104 = arith.constant 0.000000e+00 : f32
      %341 = vector.broadcast %cst_104 : f32 to vector<16x128xf32>
      %c0_105 = arith.constant 0 : index
      %c0_106 = arith.constant 0 : index
      %342 = vector.load %arg7[%c0_105, %c0_106] : memref<16x128xf32, #tpu.memory_space<vmem>>, vector<16x128xf32>
      tpu.vector_store %arg7[%c0_105, %c0_106], %341 {strides = array<i32>} : memref<16x128xf32, #tpu.memory_space<vmem>>, vector<16x128xf32>,
      %cst_107 = arith.constant 0.000000e+00 : f32
      %343 = vector.broadcast %cst_107 : f32 to vector<16x128xf32>
      %c0_108 = arith.constant 0 : index
      %c0_109 = arith.constant 0 : index
      %344 = vector.load %arg8[%c0_108, %c0_109] : memref<16x128xf32, #tpu.memory_space<vmem>>, vector<16x128xf32>
      tpu.vector_store %arg8[%c0_108, %c0_109], %343 {strides = array<i32>} : memref<16x128xf32, #tpu.memory_space<vmem>>, vector<16x128xf32>,
    } else {
    }
    %c0 = arith.constant 0 : index
    %c0_1 = arith.constant 0 : index
    %c0_2 = arith.constant 0 : index
    %3 = vector.load %arg2[%c0, %c0_1, %c0_2] : memref<8x16x64xbf16, #tpu.memory_space<vmem>>, vector<8x16x64xbf16>
    %4 = vector.shape_cast %3 : vector<8x16x64xbf16> to vector<128x64xbf16>
    %c0_3 = arith.constant 0 : index
    %c0_4 = arith.constant 0 : index
    %c0_5 = arith.constant 0 : index
    %5 = vector.load %arg3[%c0_3, %c0_4, %c0_5] : memref<1x64x512xbf16, #tpu.memory_space<vmem>>, vector<1x64x512xbf16>
    %6 = vector.shape_cast %5 : vector<1x64x512xbf16> to vector<64x512xbf16>
    %cst = arith.constant dense<0.000000e+00> : vector<128x512xf32>
    %7 = tpu.matmul %4, %6, %cst {dimension_numbers = #tpu.dot_dimension_numbers<[1], [0], [0], [1], [0, 0, 1, 1], [], []>} : vector<128x64xbf16>, vector<64x512xbf16>, vector<128x512xf32> -> vector<128x512xf32>
    %8 = vector.shape_cast %7 : vector<128x512xf32> to vector<8x16x512xf32>
    %c0_6 = arith.constant 0 : index
    %c0_7 = arith.constant 0 : index
    %c0_8 = arith.constant 0 : index
    %9 = vector.load %arg5[%c0_6, %c0_7, %c0_8] : memref<1x1x512xf32, #tpu.memory_space<vmem>>, vector<1x1x512xf32>
    %10 = vector.shape_cast %9 : vector<1x1x512xf32> to vector<1x512xf32>
    %11 = vector.shape_cast %10 : vector<1x512xf32> to vector<1x1x512xf32>
    %12 = vector.broadcast %11 : vector<1x1x512xf32> to vector<8x16x512xf32>
    %13 = arith.addf %8, %12 : vector<8x16x512xf32>
    %c0_9 = arith.constant 0 : index
    %c0_10 = arith.constant 0 : index
    %c0_11 = arith.constant 0 : index
    %14 = vector.load %arg9[%c0_9, %c0_10, %c0_11] : memref<8x16x512xf32, #tpu.memory_space<vmem>>, vector<8x16x512xf32>
    tpu.vector_store %arg9[%c0_9, %c0_10, %c0_11], %13 {strides = array<i32>} : memref<8x16x512xf32, #tpu.memory_space<vmem>>, vector<8x16x512xf32>,
    %c0_12 = arith.constant 0 : index
    %c0_13 = arith.constant 0 : index
    %c0_14 = arith.constant 0 : index
    %15 = vector.load %arg4[%c0_12, %c0_13, %c0_14] : memref<1x128x512xbf16, #tpu.memory_space<vmem>>, vector<1x128x512xbf16>
    %16 = vector.shape_cast %15 : vector<1x128x512xbf16> to vector<128x512xbf16>
    %c0_15 = arith.constant 0 : index
    %c0_16 = arith.constant 0 : index
    %17 = vector.load %arg7[%c0_15, %c0_16] : memref<16x128xf32, #tpu.memory_space<vmem>>, vector<16x128xf32>
    %c0_17 = arith.constant 0 : index
    %c0_18 = arith.constant 0 : index
    %18 = vector.load %arg8[%c0_17, %c0_18] : memref<16x128xf32, #tpu.memory_space<vmem>>, vector<16x128xf32>
    %c0_i32_19 = arith.constant 0 : i32
    %c2_i32 = arith.constant 2 : i32
    %19 = arith.muli %c2_i32, %c0_i32_19 : i32
    %c7_i32 = arith.constant 7 : i32
    %20 = arith.subi %c7_i32, %19 : i32
    %21 = arith.muli %arg0, %20 : i32
    %22 = arith.addi %c0_i32_19, %21 : i32
    %23 = arith.index_cast %22 : i32 to index
    %c0_20 = arith.constant 0 : index
    %c0_21 = arith.constant 0 : index
    %24 = vector.load %arg9[%23, %c0_20, %c0_21] : memref<8x16x512xf32, #tpu.memory_space<vmem>>, vector<1x16x512xf32>
    %25 = vector.shape_cast %24 : vector<1x16x512xf32> to vector<16x512xf32>
    %26 = arith.truncf %17 : vector<16x128xf32> to vector<16x128xbf16>
    %cst_22 = arith.constant dense<0.000000e+00> : vector<16x512xf32>
    %27 = tpu.matmul %26, %16, %cst_22 {dimension_numbers = #tpu.dot_dimension_numbers<[1], [0], [0], [1], [0, 0, 1, 1], [], []>} : vector<16x128xbf16>, vector<128x512xbf16>, vector<16x512xf32> -> vector<16x512xf32>
    %28 = arith.addf %25, %27 : vector<16x512xf32>
    %29 = vector.extract_strided_slice %28 {offsets = [0, 0], sizes = [16, 128], strides = [1, 1]} : vector<16x512xf32> to vector<16x128xf32>
    %30 = arith.negf %29 : vector<16x128xf32>
    %31 = math.exp %30 : vector<16x128xf32>
    %cst_23 = arith.constant 1.000000e+00 : f32
    %32 = vector.broadcast %cst_23 : f32 to vector<16x128xf32>
    %33 = arith.addf %32, %31 : vector<16x128xf32>
    %34 = arith.divf %32, %33 : vector<16x128xf32>
    %35 = vector.extract_strided_slice %28 {offsets = [0, 128], sizes = [16, 128], strides = [1, 1]} : vector<16x512xf32> to vector<16x128xf32>
    %36 = arith.negf %35 : vector<16x128xf32>
    %37 = math.exp %36 : vector<16x128xf32>
    %cst_24 = arith.constant 1.000000e+00 : f32
    %38 = vector.broadcast %cst_24 : f32 to vector<16x128xf32>
    %39 = arith.addf %38, %37 : vector<16x128xf32>
    %40 = arith.divf %38, %39 : vector<16x128xf32>
    %41 = vector.extract_strided_slice %28 {offsets = [0, 256], sizes = [16, 128], strides = [1, 1]} : vector<16x512xf32> to vector<16x128xf32>
    %42 = math.tanh %41 : vector<16x128xf32>
    %43 = vector.extract_strided_slice %28 {offsets = [0, 384], sizes = [16, 128], strides = [1, 1]} : vector<16x512xf32> to vector<16x128xf32>
    %44 = arith.negf %43 : vector<16x128xf32>
    %45 = math.exp %44 : vector<16x128xf32>
    %cst_25 = arith.constant 1.000000e+00 : f32
    %46 = vector.broadcast %cst_25 : f32 to vector<16x128xf32>
    %47 = arith.addf %46, %45 : vector<16x128xf32>
    %48 = arith.divf %46, %47 : vector<16x128xf32>
    %49 = arith.mulf %40, %18 : vector<16x128xf32>
    %50 = arith.mulf %34, %42 : vector<16x128xf32>
    %51 = arith.addf %49, %50 : vector<16x128xf32>
    %52 = math.tanh %51 : vector<16x128xf32>
    %53 = arith.mulf %48, %52 : vector<16x128xf32>
    %54 = arith.truncf %53 : vector<16x128xf32> to vector<16x128xbf16>
    %55 = arith.index_cast %22 : i32 to index
    %c0_26 = arith.constant 0 : index
    %c0_27 = arith.constant 0 : index
    %56 = vector.load %arg6[%55, %c0_26, %c0_27] : memref<8x16x128xbf16, #tpu.memory_space<vmem>>, vector<1x16x128xbf16>
    %57 = vector.shape_cast %56 : vector<1x16x128xbf16> to vector<16x128xbf16>
    %58 = vector.shape_cast %54 : vector<16x128xbf16> to vector<1x16x128xbf16>
    tpu.vector_store %arg6[%55, %c0_26, %c0_27], %58 {strides = array<i32>} : memref<8x16x128xbf16, #tpu.memory_space<vmem>>, vector<1x16x128xbf16>,
    %c1_i32 = arith.constant 1 : i32
    %c2_i32_28 = arith.constant 2 : i32
    %59 = arith.muli %c2_i32_28, %c1_i32 : i32
    %c7_i32_29 = arith.constant 7 : i32
    %60 = arith.subi %c7_i32_29, %59 : i32
    %61 = arith.muli %arg0, %60 : i32
    %62 = arith.addi %c1_i32, %61 : i32
    %63 = arith.index_cast %62 : i32 to index
    %c0_30 = arith.constant 0 : index
    %c0_31 = arith.constant 0 : index
    %64 = vector.load %arg9[%63, %c0_30, %c0_31] : memref<8x16x512xf32, #tpu.memory_space<vmem>>, vector<1x16x512xf32>
    %65 = vector.shape_cast %64 : vector<1x16x512xf32> to vector<16x512xf32>
    %66 = arith.truncf %53 : vector<16x128xf32> to vector<16x128xbf16>
    %cst_32 = arith.constant dense<0.000000e+00> : vector<16x512xf32>
    %67 = tpu.matmul %66, %16, %cst_32 {dimension_numbers = #tpu.dot_dimension_numbers<[1], [0], [0], [1], [0, 0, 1, 1], [], []>} : vector<16x128xbf16>, vector<128x512xbf16>, vector<16x512xf32> -> vector<16x512xf32>
    %68 = arith.addf %65, %67 : vector<16x512xf32>
    %69 = vector.extract_strided_slice %68 {offsets = [0, 0], sizes = [16, 128], strides = [1, 1]} : vector<16x512xf32> to vector<16x128xf32>
    %70 = arith.negf %69 : vector<16x128xf32>
    %71 = math.exp %70 : vector<16x128xf32>
    %cst_33 = arith.constant 1.000000e+00 : f32
    %72 = vector.broadcast %cst_33 : f32 to vector<16x128xf32>
    %73 = arith.addf %72, %71 : vector<16x128xf32>
    %74 = arith.divf %72, %73 : vector<16x128xf32>
    %75 = vector.extract_strided_slice %68 {offsets = [0, 128], sizes = [16, 128], strides = [1, 1]} : vector<16x512xf32> to vector<16x128xf32>
    %76 = arith.negf %75 : vector<16x128xf32>
    %77 = math.exp %76 : vector<16x128xf32>
    %cst_34 = arith.constant 1.000000e+00 : f32
    %78 = vector.broadcast %cst_34 : f32 to vector<16x128xf32>
    %79 = arith.addf %78, %77 : vector<16x128xf32>
    %80 = arith.divf %78, %79 : vector<16x128xf32>
    %81 = vector.extract_strided_slice %68 {offsets = [0, 256], sizes = [16, 128], strides = [1, 1]} : vector<16x512xf32> to vector<16x128xf32>
    %82 = math.tanh %81 : vector<16x128xf32>
    %83 = vector.extract_strided_slice %68 {offsets = [0, 384], sizes = [16, 128], strides = [1, 1]} : vector<16x512xf32> to vector<16x128xf32>
    %84 = arith.negf %83 : vector<16x128xf32>
    %85 = math.exp %84 : vector<16x128xf32>
    %cst_35 = arith.constant 1.000000e+00 : f32
    %86 = vector.broadcast %cst_35 : f32 to vector<16x128xf32>
    %87 = arith.addf %86, %85 : vector<16x128xf32>
    %88 = arith.divf %86, %87 : vector<16x128xf32>
    %89 = arith.mulf %80, %51 : vector<16x128xf32>
    %90 = arith.mulf %74, %82 : vector<16x128xf32>
    %91 = arith.addf %89, %90 : vector<16x128xf32>
    %92 = math.tanh %91 : vector<16x128xf32>
    %93 = arith.mulf %88, %92 : vector<16x128xf32>
    %94 = arith.truncf %93 : vector<16x128xf32> to vector<16x128xbf16>
    %95 = arith.index_cast %62 : i32 to index
    %c0_36 = arith.constant 0 : index
    %c0_37 = arith.constant 0 : index
    %96 = vector.load %arg6[%95, %c0_36, %c0_37] : memref<8x16x128xbf16, #tpu.memory_space<vmem>>, vector<1x16x128xbf16>
    %97 = vector.shape_cast %96 : vector<1x16x128xbf16> to vector<16x128xbf16>
    %98 = vector.shape_cast %94 : vector<16x128xbf16> to vector<1x16x128xbf16>
    tpu.vector_store %arg6[%95, %c0_36, %c0_37], %98 {strides = array<i32>} : memref<8x16x128xbf16, #tpu.memory_space<vmem>>, vector<1x16x128xbf16>,
    %c2_i32_38 = arith.constant 2 : i32
    %c2_i32_39 = arith.constant 2 : i32
    %99 = arith.muli %c2_i32_39, %c2_i32_38 : i32
    %c7_i32_40 = arith.constant 7 : i32
    %100 = arith.subi %c7_i32_40, %99 : i32
    %101 = arith.muli %arg0, %100 : i32
    %102 = arith.addi %c2_i32_38, %101 : i32
    %103 = arith.index_cast %102 : i32 to index
    %c0_41 = arith.constant 0 : index
    %c0_42 = arith.constant 0 : index
    %104 = vector.load %arg9[%103, %c0_41, %c0_42] : memref<8x16x512xf32, #tpu.memory_space<vmem>>, vector<1x16x512xf32>
    %105 = vector.shape_cast %104 : vector<1x16x512xf32> to vector<16x512xf32>
    %106 = arith.truncf %93 : vector<16x128xf32> to vector<16x128xbf16>
    %cst_43 = arith.constant dense<0.000000e+00> : vector<16x512xf32>
    %107 = tpu.matmul %106, %16, %cst_43 {dimension_numbers = #tpu.dot_dimension_numbers<[1], [0], [0], [1], [0, 0, 1, 1], [], []>} : vector<16x128xbf16>, vector<128x512xbf16>, vector<16x512xf32> -> vector<16x512xf32>
    %108 = arith.addf %105, %107 : vector<16x512xf32>
    %109 = vector.extract_strided_slice %108 {offsets = [0, 0], sizes = [16, 128], strides = [1, 1]} : vector<16x512xf32> to vector<16x128xf32>
    %110 = arith.negf %109 : vector<16x128xf32>
    %111 = math.exp %110 : vector<16x128xf32>
    %cst_44 = arith.constant 1.000000e+00 : f32
    %112 = vector.broadcast %cst_44 : f32 to vector<16x128xf32>
    %113 = arith.addf %112, %111 : vector<16x128xf32>
    %114 = arith.divf %112, %113 : vector<16x128xf32>
    %115 = vector.extract_strided_slice %108 {offsets = [0, 128], sizes = [16, 128], strides = [1, 1]} : vector<16x512xf32> to vector<16x128xf32>
    %116 = arith.negf %115 : vector<16x128xf32>
    %117 = math.exp %116 : vector<16x128xf32>
    %cst_45 = arith.constant 1.000000e+00 : f32
    %118 = vector.broadcast %cst_45 : f32 to vector<16x128xf32>
    %119 = arith.addf %118, %117 : vector<16x128xf32>
    %120 = arith.divf %118, %119 : vector<16x128xf32>
    %121 = vector.extract_strided_slice %108 {offsets = [0, 256], sizes = [16, 128], strides = [1, 1]} : vector<16x512xf32> to vector<16x128xf32>
    %122 = math.tanh %121 : vector<16x128xf32>
    %123 = vector.extract_strided_slice %108 {offsets = [0, 384], sizes = [16, 128], strides = [1, 1]} : vector<16x512xf32> to vector<16x128xf32>
    %124 = arith.negf %123 : vector<16x128xf32>
    %125 = math.exp %124 : vector<16x128xf32>
    %cst_46 = arith.constant 1.000000e+00 : f32
    %126 = vector.broadcast %cst_46 : f32 to vector<16x128xf32>
    %127 = arith.addf %126, %125 : vector<16x128xf32>
    %128 = arith.divf %126, %127 : vector<16x128xf32>
    %129 = arith.mulf %120, %91 : vector<16x128xf32>
    %130 = arith.mulf %114, %122 : vector<16x128xf32>
    %131 = arith.addf %129, %130 : vector<16x128xf32>
    %132 = math.tanh %131 : vector<16x128xf32>
    %133 = arith.mulf %128, %132 : vector<16x128xf32>
    %134 = arith.truncf %133 : vector<16x128xf32> to vector<16x128xbf16>
    %135 = arith.index_cast %102 : i32 to index
    %c0_47 = arith.constant 0 : index
    %c0_48 = arith.constant 0 : index
    %136 = vector.load %arg6[%135, %c0_47, %c0_48] : memref<8x16x128xbf16, #tpu.memory_space<vmem>>, vector<1x16x128xbf16>
    %137 = vector.shape_cast %136 : vector<1x16x128xbf16> to vector<16x128xbf16>
    %138 = vector.shape_cast %134 : vector<16x128xbf16> to vector<1x16x128xbf16>
    tpu.vector_store %arg6[%135, %c0_47, %c0_48], %138 {strides = array<i32>} : memref<8x16x128xbf16, #tpu.memory_space<vmem>>, vector<1x16x128xbf16>,
    %c3_i32 = arith.constant 3 : i32
    %c2_i32_49 = arith.constant 2 : i32
    %139 = arith.muli %c2_i32_49, %c3_i32 : i32
    %c7_i32_50 = arith.constant 7 : i32
    %140 = arith.subi %c7_i32_50, %139 : i32
    %141 = arith.muli %arg0, %140 : i32
    %142 = arith.addi %c3_i32, %141 : i32
    %143 = arith.index_cast %142 : i32 to index
    %c0_51 = arith.constant 0 : index
    %c0_52 = arith.constant 0 : index
    %144 = vector.load %arg9[%143, %c0_51, %c0_52] : memref<8x16x512xf32, #tpu.memory_space<vmem>>, vector<1x16x512xf32>
    %145 = vector.shape_cast %144 : vector<1x16x512xf32> to vector<16x512xf32>
    %146 = arith.truncf %133 : vector<16x128xf32> to vector<16x128xbf16>
    %cst_53 = arith.constant dense<0.000000e+00> : vector<16x512xf32>
    %147 = tpu.matmul %146, %16, %cst_53 {dimension_numbers = #tpu.dot_dimension_numbers<[1], [0], [0], [1], [0, 0, 1, 1], [], []>} : vector<16x128xbf16>, vector<128x512xbf16>, vector<16x512xf32> -> vector<16x512xf32>
    %148 = arith.addf %145, %147 : vector<16x512xf32>
    %149 = vector.extract_strided_slice %148 {offsets = [0, 0], sizes = [16, 128], strides = [1, 1]} : vector<16x512xf32> to vector<16x128xf32>
    %150 = arith.negf %149 : vector<16x128xf32>
    %151 = math.exp %150 : vector<16x128xf32>
    %cst_54 = arith.constant 1.000000e+00 : f32
    %152 = vector.broadcast %cst_54 : f32 to vector<16x128xf32>
    %153 = arith.addf %152, %151 : vector<16x128xf32>
    %154 = arith.divf %152, %153 : vector<16x128xf32>
    %155 = vector.extract_strided_slice %148 {offsets = [0, 128], sizes = [16, 128], strides = [1, 1]} : vector<16x512xf32> to vector<16x128xf32>
    %156 = arith.negf %155 : vector<16x128xf32>
    %157 = math.exp %156 : vector<16x128xf32>
    %cst_55 = arith.constant 1.000000e+00 : f32
    %158 = vector.broadcast %cst_55 : f32 to vector<16x128xf32>
    %159 = arith.addf %158, %157 : vector<16x128xf32>
    %160 = arith.divf %158, %159 : vector<16x128xf32>
    %161 = vector.extract_strided_slice %148 {offsets = [0, 256], sizes = [16, 128], strides = [1, 1]} : vector<16x512xf32> to vector<16x128xf32>
    %162 = math.tanh %161 : vector<16x128xf32>
    %163 = vector.extract_strided_slice %148 {offsets = [0, 384], sizes = [16, 128], strides = [1, 1]} : vector<16x512xf32> to vector<16x128xf32>
    %164 = arith.negf %163 : vector<16x128xf32>
    %165 = math.exp %164 : vector<16x128xf32>
    %cst_56 = arith.constant 1.000000e+00 : f32
    %166 = vector.broadcast %cst_56 : f32 to vector<16x128xf32>
    %167 = arith.addf %166, %165 : vector<16x128xf32>
    %168 = arith.divf %166, %167 : vector<16x128xf32>
    %169 = arith.mulf %160, %131 : vector<16x128xf32>
    %170 = arith.mulf %154, %162 : vector<16x128xf32>
    %171 = arith.addf %169, %170 : vector<16x128xf32>
    %172 = math.tanh %171 : vector<16x128xf32>
    %173 = arith.mulf %168, %172 : vector<16x128xf32>
    %174 = arith.truncf %173 : vector<16x128xf32> to vector<16x128xbf16>
    %175 = arith.index_cast %142 : i32 to index
    %c0_57 = arith.constant 0 : index
    %c0_58 = arith.constant 0 : index
    %176 = vector.load %arg6[%175, %c0_57, %c0_58] : memref<8x16x128xbf16, #tpu.memory_space<vmem>>, vector<1x16x128xbf16>
    %177 = vector.shape_cast %176 : vector<1x16x128xbf16> to vector<16x128xbf16>
    %178 = vector.shape_cast %174 : vector<16x128xbf16> to vector<1x16x128xbf16>
    tpu.vector_store %arg6[%175, %c0_57, %c0_58], %178 {strides = array<i32>} : memref<8x16x128xbf16, #tpu.memory_space<vmem>>, vector<1x16x128xbf16>,
    %c4_i32 = arith.constant 4 : i32
    %c2_i32_59 = arith.constant 2 : i32
    %179 = arith.muli %c2_i32_59, %c4_i32 : i32
    %c7_i32_60 = arith.constant 7 : i32
    %180 = arith.subi %c7_i32_60, %179 : i32
    %181 = arith.muli %arg0, %180 : i32
    %182 = arith.addi %c4_i32, %181 : i32
    %183 = arith.index_cast %182 : i32 to index
    %c0_61 = arith.constant 0 : index
    %c0_62 = arith.constant 0 : index
    %184 = vector.load %arg9[%183, %c0_61, %c0_62] : memref<8x16x512xf32, #tpu.memory_space<vmem>>, vector<1x16x512xf32>
    %185 = vector.shape_cast %184 : vector<1x16x512xf32> to vector<16x512xf32>
    %186 = arith.truncf %173 : vector<16x128xf32> to vector<16x128xbf16>
    %cst_63 = arith.constant dense<0.000000e+00> : vector<16x512xf32>
    %187 = tpu.matmul %186, %16, %cst_63 {dimension_numbers = #tpu.dot_dimension_numbers<[1], [0], [0], [1], [0, 0, 1, 1], [], []>} : vector<16x128xbf16>, vector<128x512xbf16>, vector<16x512xf32> -> vector<16x512xf32>
    %188 = arith.addf %185, %187 : vector<16x512xf32>
    %189 = vector.extract_strided_slice %188 {offsets = [0, 0], sizes = [16, 128], strides = [1, 1]} : vector<16x512xf32> to vector<16x128xf32>
    %190 = arith.negf %189 : vector<16x128xf32>
    %191 = math.exp %190 : vector<16x128xf32>
    %cst_64 = arith.constant 1.000000e+00 : f32
    %192 = vector.broadcast %cst_64 : f32 to vector<16x128xf32>
    %193 = arith.addf %192, %191 : vector<16x128xf32>
    %194 = arith.divf %192, %193 : vector<16x128xf32>
    %195 = vector.extract_strided_slice %188 {offsets = [0, 128], sizes = [16, 128], strides = [1, 1]} : vector<16x512xf32> to vector<16x128xf32>
    %196 = arith.negf %195 : vector<16x128xf32>
    %197 = math.exp %196 : vector<16x128xf32>
    %cst_65 = arith.constant 1.000000e+00 : f32
    %198 = vector.broadcast %cst_65 : f32 to vector<16x128xf32>
    %199 = arith.addf %198, %197 : vector<16x128xf32>
    %200 = arith.divf %198, %199 : vector<16x128xf32>
    %201 = vector.extract_strided_slice %188 {offsets = [0, 256], sizes = [16, 128], strides = [1, 1]} : vector<16x512xf32> to vector<16x128xf32>
    %202 = math.tanh %201 : vector<16x128xf32>
    %203 = vector.extract_strided_slice %188 {offsets = [0, 384], sizes = [16, 128], strides = [1, 1]} : vector<16x512xf32> to vector<16x128xf32>
    %204 = arith.negf %203 : vector<16x128xf32>
    %205 = math.exp %204 : vector<16x128xf32>
    %cst_66 = arith.constant 1.000000e+00 : f32
    %206 = vector.broadcast %cst_66 : f32 to vector<16x128xf32>
    %207 = arith.addf %206, %205 : vector<16x128xf32>
    %208 = arith.divf %206, %207 : vector<16x128xf32>
    %209 = arith.mulf %200, %171 : vector<16x128xf32>
    %210 = arith.mulf %194, %202 : vector<16x128xf32>
    %211 = arith.addf %209, %210 : vector<16x128xf32>
    %212 = math.tanh %211 : vector<16x128xf32>
    %213 = arith.mulf %208, %212 : vector<16x128xf32>
    %214 = arith.truncf %213 : vector<16x128xf32> to vector<16x128xbf16>
    %215 = arith.index_cast %182 : i32 to index
    %c0_67 = arith.constant 0 : index
    %c0_68 = arith.constant 0 : index
    %216 = vector.load %arg6[%215, %c0_67, %c0_68] : memref<8x16x128xbf16, #tpu.memory_space<vmem>>, vector<1x16x128xbf16>
    %217 = vector.shape_cast %216 : vector<1x16x128xbf16> to vector<16x128xbf16>
    %218 = vector.shape_cast %214 : vector<16x128xbf16> to vector<1x16x128xbf16>
    tpu.vector_store %arg6[%215, %c0_67, %c0_68], %218 {strides = array<i32>} : memref<8x16x128xbf16, #tpu.memory_space<vmem>>, vector<1x16x128xbf16>,
    %c5_i32 = arith.constant 5 : i32
    %c2_i32_69 = arith.constant 2 : i32
    %219 = arith.muli %c2_i32_69, %c5_i32 : i32
    %c7_i32_70 = arith.constant 7 : i32
    %220 = arith.subi %c7_i32_70, %219 : i32
    %221 = arith.muli %arg0, %220 : i32
    %222 = arith.addi %c5_i32, %221 : i32
    %223 = arith.index_cast %222 : i32 to index
    %c0_71 = arith.constant 0 : index
    %c0_72 = arith.constant 0 : index
    %224 = vector.load %arg9[%223, %c0_71, %c0_72] : memref<8x16x512xf32, #tpu.memory_space<vmem>>, vector<1x16x512xf32>
    %225 = vector.shape_cast %224 : vector<1x16x512xf32> to vector<16x512xf32>
    %226 = arith.truncf %213 : vector<16x128xf32> to vector<16x128xbf16>
    %cst_73 = arith.constant dense<0.000000e+00> : vector<16x512xf32>
    %227 = tpu.matmul %226, %16, %cst_73 {dimension_numbers = #tpu.dot_dimension_numbers<[1], [0], [0], [1], [0, 0, 1, 1], [], []>} : vector<16x128xbf16>, vector<128x512xbf16>, vector<16x512xf32> -> vector<16x512xf32>
    %228 = arith.addf %225, %227 : vector<16x512xf32>
    %229 = vector.extract_strided_slice %228 {offsets = [0, 0], sizes = [16, 128], strides = [1, 1]} : vector<16x512xf32> to vector<16x128xf32>
    %230 = arith.negf %229 : vector<16x128xf32>
    %231 = math.exp %230 : vector<16x128xf32>
    %cst_74 = arith.constant 1.000000e+00 : f32
    %232 = vector.broadcast %cst_74 : f32 to vector<16x128xf32>
    %233 = arith.addf %232, %231 : vector<16x128xf32>
    %234 = arith.divf %232, %233 : vector<16x128xf32>
    %235 = vector.extract_strided_slice %228 {offsets = [0, 128], sizes = [16, 128], strides = [1, 1]} : vector<16x512xf32> to vector<16x128xf32>
    %236 = arith.negf %235 : vector<16x128xf32>
    %237 = math.exp %236 : vector<16x128xf32>
    %cst_75 = arith.constant 1.000000e+00 : f32
    %238 = vector.broadcast %cst_75 : f32 to vector<16x128xf32>
    %239 = arith.addf %238, %237 : vector<16x128xf32>
    %240 = arith.divf %238, %239 : vector<16x128xf32>
    %241 = vector.extract_strided_slice %228 {offsets = [0, 256], sizes = [16, 128], strides = [1, 1]} : vector<16x512xf32> to vector<16x128xf32>
    %242 = math.tanh %241 : vector<16x128xf32>
    %243 = vector.extract_strided_slice %228 {offsets = [0, 384], sizes = [16, 128], strides = [1, 1]} : vector<16x512xf32> to vector<16x128xf32>
    %244 = arith.negf %243 : vector<16x128xf32>
    %245 = math.exp %244 : vector<16x128xf32>
    %cst_76 = arith.constant 1.000000e+00 : f32
    %246 = vector.broadcast %cst_76 : f32 to vector<16x128xf32>
    %247 = arith.addf %246, %245 : vector<16x128xf32>
    %248 = arith.divf %246, %247 : vector<16x128xf32>
    %249 = arith.mulf %240, %211 : vector<16x128xf32>
    %250 = arith.mulf %234, %242 : vector<16x128xf32>
    %251 = arith.addf %249, %250 : vector<16x128xf32>
    %252 = math.tanh %251 : vector<16x128xf32>
    %253 = arith.mulf %248, %252 : vector<16x128xf32>
    %254 = arith.truncf %253 : vector<16x128xf32> to vector<16x128xbf16>
    %255 = arith.index_cast %222 : i32 to index
    %c0_77 = arith.constant 0 : index
    %c0_78 = arith.constant 0 : index
    %256 = vector.load %arg6[%255, %c0_77, %c0_78] : memref<8x16x128xbf16, #tpu.memory_space<vmem>>, vector<1x16x128xbf16>
    %257 = vector.shape_cast %256 : vector<1x16x128xbf16> to vector<16x128xbf16>
    %258 = vector.shape_cast %254 : vector<16x128xbf16> to vector<1x16x128xbf16>
    tpu.vector_store %arg6[%255, %c0_77, %c0_78], %258 {strides = array<i32>} : memref<8x16x128xbf16, #tpu.memory_space<vmem>>, vector<1x16x128xbf16>,
    %c6_i32 = arith.constant 6 : i32
    %c2_i32_79 = arith.constant 2 : i32
    %259 = arith.muli %c2_i32_79, %c6_i32 : i32
    %c7_i32_80 = arith.constant 7 : i32
    %260 = arith.subi %c7_i32_80, %259 : i32
    %261 = arith.muli %arg0, %260 : i32
    %262 = arith.addi %c6_i32, %261 : i32
    %263 = arith.index_cast %262 : i32 to index
    %c0_81 = arith.constant 0 : index
    %c0_82 = arith.constant 0 : index
    %264 = vector.load %arg9[%263, %c0_81, %c0_82] : memref<8x16x512xf32, #tpu.memory_space<vmem>>, vector<1x16x512xf32>
    %265 = vector.shape_cast %264 : vector<1x16x512xf32> to vector<16x512xf32>
    %266 = arith.truncf %253 : vector<16x128xf32> to vector<16x128xbf16>
    %cst_83 = arith.constant dense<0.000000e+00> : vector<16x512xf32>
    %267 = tpu.matmul %266, %16, %cst_83 {dimension_numbers = #tpu.dot_dimension_numbers<[1], [0], [0], [1], [0, 0, 1, 1], [], []>} : vector<16x128xbf16>, vector<128x512xbf16>, vector<16x512xf32> -> vector<16x512xf32>
    %268 = arith.addf %265, %267 : vector<16x512xf32>
    %269 = vector.extract_strided_slice %268 {offsets = [0, 0], sizes = [16, 128], strides = [1, 1]} : vector<16x512xf32> to vector<16x128xf32>
    %270 = arith.negf %269 : vector<16x128xf32>
    %271 = math.exp %270 : vector<16x128xf32>
    %cst_84 = arith.constant 1.000000e+00 : f32
    %272 = vector.broadcast %cst_84 : f32 to vector<16x128xf32>
    %273 = arith.addf %272, %271 : vector<16x128xf32>
    %274 = arith.divf %272, %273 : vector<16x128xf32>
    %275 = vector.extract_strided_slice %268 {offsets = [0, 128], sizes = [16, 128], strides = [1, 1]} : vector<16x512xf32> to vector<16x128xf32>
    %276 = arith.negf %275 : vector<16x128xf32>
    %277 = math.exp %276 : vector<16x128xf32>
    %cst_85 = arith.constant 1.000000e+00 : f32
    %278 = vector.broadcast %cst_85 : f32 to vector<16x128xf32>
    %279 = arith.addf %278, %277 : vector<16x128xf32>
    %280 = arith.divf %278, %279 : vector<16x128xf32>
    %281 = vector.extract_strided_slice %268 {offsets = [0, 256], sizes = [16, 128], strides = [1, 1]} : vector<16x512xf32> to vector<16x128xf32>
    %282 = math.tanh %281 : vector<16x128xf32>
    %283 = vector.extract_strided_slice %268 {offsets = [0, 384], sizes = [16, 128], strides = [1, 1]} : vector<16x512xf32> to vector<16x128xf32>
    %284 = arith.negf %283 : vector<16x128xf32>
    %285 = math.exp %284 : vector<16x128xf32>
    %cst_86 = arith.constant 1.000000e+00 : f32
    %286 = vector.broadcast %cst_86 : f32 to vector<16x128xf32>
    %287 = arith.addf %286, %285 : vector<16x128xf32>
    %288 = arith.divf %286, %287 : vector<16x128xf32>
    %289 = arith.mulf %280, %251 : vector<16x128xf32>
    %290 = arith.mulf %274, %282 : vector<16x128xf32>
    %291 = arith.addf %289, %290 : vector<16x128xf32>
    %292 = math.tanh %291 : vector<16x128xf32>
    %293 = arith.mulf %288, %292 : vector<16x128xf32>
    %294 = arith.truncf %293 : vector<16x128xf32> to vector<16x128xbf16>
    %295 = arith.index_cast %262 : i32 to index
    %c0_87 = arith.constant 0 : index
    %c0_88 = arith.constant 0 : index
    %296 = vector.load %arg6[%295, %c0_87, %c0_88] : memref<8x16x128xbf16, #tpu.memory_space<vmem>>, vector<1x16x128xbf16>
    %297 = vector.shape_cast %296 : vector<1x16x128xbf16> to vector<16x128xbf16>
    %298 = vector.shape_cast %294 : vector<16x128xbf16> to vector<1x16x128xbf16>
    tpu.vector_store %arg6[%295, %c0_87, %c0_88], %298 {strides = array<i32>} : memref<8x16x128xbf16, #tpu.memory_space<vmem>>, vector<1x16x128xbf16>,
    %c7_i32_89 = arith.constant 7 : i32
    %c2_i32_90 = arith.constant 2 : i32
    %299 = arith.muli %c2_i32_90, %c7_i32_89 : i32
    %c7_i32_91 = arith.constant 7 : i32
    %300 = arith.subi %c7_i32_91, %299 : i32
    %301 = arith.muli %arg0, %300 : i32
    %302 = arith.addi %c7_i32_89, %301 : i32
    %303 = arith.index_cast %302 : i32 to index
    %c0_92 = arith.constant 0 : index
    %c0_93 = arith.constant 0 : index
    %304 = vector.load %arg9[%303, %c0_92, %c0_93] : memref<8x16x512xf32, #tpu.memory_space<vmem>>, vector<1x16x512xf32>
    %305 = vector.shape_cast %304 : vector<1x16x512xf32> to vector<16x512xf32>
    %306 = arith.truncf %293 : vector<16x128xf32> to vector<16x128xbf16>
    %cst_94 = arith.constant dense<0.000000e+00> : vector<16x512xf32>
    %307 = tpu.matmul %306, %16, %cst_94 {dimension_numbers = #tpu.dot_dimension_numbers<[1], [0], [0], [1], [0, 0, 1, 1], [], []>} : vector<16x128xbf16>, vector<128x512xbf16>, vector<16x512xf32> -> vector<16x512xf32>
    %308 = arith.addf %305, %307 : vector<16x512xf32>
    %309 = vector.extract_strided_slice %308 {offsets = [0, 0], sizes = [16, 128], strides = [1, 1]} : vector<16x512xf32> to vector<16x128xf32>
    %310 = arith.negf %309 : vector<16x128xf32>
    %311 = math.exp %310 : vector<16x128xf32>
    %cst_95 = arith.constant 1.000000e+00 : f32
    %312 = vector.broadcast %cst_95 : f32 to vector<16x128xf32>
    %313 = arith.addf %312, %311 : vector<16x128xf32>
    %314 = arith.divf %312, %313 : vector<16x128xf32>
    %315 = vector.extract_strided_slice %308 {offsets = [0, 128], sizes = [16, 128], strides = [1, 1]} : vector<16x512xf32> to vector<16x128xf32>
    %316 = arith.negf %315 : vector<16x128xf32>
    %317 = math.exp %316 : vector<16x128xf32>
    %cst_96 = arith.constant 1.000000e+00 : f32
    %318 = vector.broadcast %cst_96 : f32 to vector<16x128xf32>
    %319 = arith.addf %318, %317 : vector<16x128xf32>
    %320 = arith.divf %318, %319 : vector<16x128xf32>
    %321 = vector.extract_strided_slice %308 {offsets = [0, 256], sizes = [16, 128], strides = [1, 1]} : vector<16x512xf32> to vector<16x128xf32>
    %322 = math.tanh %321 : vector<16x128xf32>
    %323 = vector.extract_strided_slice %308 {offsets = [0, 384], sizes = [16, 128], strides = [1, 1]} : vector<16x512xf32> to vector<16x128xf32>
    %324 = arith.negf %323 : vector<16x128xf32>
    %325 = math.exp %324 : vector<16x128xf32>
    %cst_97 = arith.constant 1.000000e+00 : f32
    %326 = vector.broadcast %cst_97 : f32 to vector<16x128xf32>
    %327 = arith.addf %326, %325 : vector<16x128xf32>
    %328 = arith.divf %326, %327 : vector<16x128xf32>
    %329 = arith.mulf %320, %291 : vector<16x128xf32>
    %330 = arith.mulf %314, %322 : vector<16x128xf32>
    %331 = arith.addf %329, %330 : vector<16x128xf32>
    %332 = math.tanh %331 : vector<16x128xf32>
    %333 = arith.mulf %328, %332 : vector<16x128xf32>
    %334 = arith.truncf %333 : vector<16x128xf32> to vector<16x128xbf16>
    %335 = arith.index_cast %302 : i32 to index
    %c0_98 = arith.constant 0 : index
    %c0_99 = arith.constant 0 : index
    %336 = vector.load %arg6[%335, %c0_98, %c0_99] : memref<8x16x128xbf16, #tpu.memory_space<vmem>>, vector<1x16x128xbf16>
    %337 = vector.shape_cast %336 : vector<1x16x128xbf16> to vector<16x128xbf16>
    %338 = vector.shape_cast %334 : vector<16x128xbf16> to vector<1x16x128xbf16>
    tpu.vector_store %arg6[%335, %c0_98, %c0_99], %338 {strides = array<i32>} : memref<8x16x128xbf16, #tpu.memory_space<vmem>>, vector<1x16x128xbf16>,
    %c8_i32 = arith.constant 8 : i32
    %c0_100 = arith.constant 0 : index
    %c0_101 = arith.constant 0 : index
    %339 = vector.load %arg7[%c0_100, %c0_101] : memref<16x128xf32, #tpu.memory_space<vmem>>, vector<16x128xf32>
    tpu.vector_store %arg7[%c0_100, %c0_101], %333 {strides = array<i32>} : memref<16x128xf32, #tpu.memory_space<vmem>>, vector<16x128xf32>,
    %c0_102 = arith.constant 0 : index
    %c0_103 = arith.constant 0 : index
    %340 = vector.load %arg8[%c0_102, %c0_103] : memref<16x128xf32, #tpu.memory_space<vmem>>, vector<16x128xf32>
    tpu.vector_store %arg8[%c0_102, %c0_103], %331 {strides = array<i32>} : memref<16x128xf32, #tpu.memory_space<vmem>>, vector<16x128xf32>,
    return
  }
  func.func @transform_0(%arg0: i32, %arg1: i32) -> (i32, i32, i32) {
    %c2_i32 = arith.constant 2 : i32
    %0 = arith.muli %c2_i32, %arg1 : i32
    %c1_i32 = arith.constant 1 : i32
    %1 = arith.subi %c1_i32, %0 : i32
    %2 = arith.muli %arg0, %1 : i32
    %3 = arith.addi %arg1, %2 : i32
    %c0_i32 = arith.constant 0 : i32
    %c0_i32_0 = arith.constant 0 : i32
    %c0_i32_1 = arith.constant 0 : i32
    return %3, %c0_i32, %c0_i32_0 : i32, i32, i32
  }
  func.func @transform_1(%arg0: i32, %arg1: i32) -> (i32, i32, i32) {
    %c0_i32 = arith.constant 0 : i32
    %c0_i32_0 = arith.constant 0 : i32
    %c0_i32_1 = arith.constant 0 : i32
    return %arg0, %c0_i32, %c0_i32_0 : i32, i32, i32
  }
  func.func @transform_2(%arg0: i32, %arg1: i32) -> (i32, i32, i32) {
    %c0_i32 = arith.constant 0 : i32
    %c0_i32_0 = arith.constant 0 : i32
    %c0_i32_1 = arith.constant 0 : i32
    return %arg0, %c0_i32, %c0_i32_0 : i32, i32, i32
  }
  func.func @transform_3(%arg0: i32, %arg1: i32) -> (i32, i32, i32) {
    %c0_i32 = arith.constant 0 : i32
    %c0_i32_0 = arith.constant 0 : i32
    %c0_i32_1 = arith.constant 0 : i32
    return %arg0, %c0_i32, %c0_i32_0 : i32, i32, i32
  }
  func.func @transform_4(%arg0: i32, %arg1: i32) -> (i32, i32, i32) {
    %c2_i32 = arith.constant 2 : i32
    %0 = arith.muli %c2_i32, %arg1 : i32
    %c1_i32 = arith.constant 1 : i32
    %1 = arith.subi %c1_i32, %0 : i32
    %2 = arith.muli %arg0, %1 : i32
    %3 = arith.addi %arg1, %2 : i32
    %c0_i32 = arith.constant 0 : i32
    %c0_i32_0 = arith.constant 0 : i32
    return %3, %c0_i32, %arg0 : i32, i32, i32
  }
}

module attributes {stable_mosaic.version = 11 : i64} {
  func.func @_enhance_project_kernel(%arg0: i32, %arg1: i32, %arg2: memref<256x256xbf16, #tpu.memory_space<vmem>>, %arg3: memref<256x256xbf16, #tpu.memory_space<vmem>>, %arg4: memref<256x128xbf16, #tpu.memory_space<vmem>>, %arg5: memref<256x128xbf16, #tpu.memory_space<vmem>>, %arg6: memref<256x128xbf16, #tpu.memory_space<vmem>>, %arg7: memref<256x128xbf16, #tpu.memory_space<vmem>>, %arg8: memref<1x128xf32, #tpu.memory_space<vmem>>, %arg9: memref<256x128xbf16, #tpu.memory_space<vmem>>, %arg10: memref<256x256xbf16, #tpu.memory_space<vmem>>, %arg11: memref<256x256xbf16, #tpu.memory_space<vmem>>) attributes {dimension_semantics = [#tpu.dimension_semantics<parallel>, #tpu.dimension_semantics<arbitrary>], iteration_bounds = array<i64: 1, 1>, scalar_prefetch = 0 : i64, scratch_operands = 2 : i64, tpu.core_type = #tpu.core_type<tc>, window_params = [{transform_indices = @transform_0, window_bounds = array<i64: 256, 256>}, {transform_indices = @transform_1, window_bounds = array<i64: 256, 256>}, {transform_indices = @transform_2, window_bounds = array<i64: 256, 128>}, {transform_indices = @transform_3, window_bounds = array<i64: 256, 128>}, {transform_indices = @transform_4, window_bounds = array<i64: 256, 128>}, {transform_indices = @transform_5, window_bounds = array<i64: 256, 128>}, {transform_indices = @transform_6, window_bounds = array<i64: 1, 128>}, {transform_indices = @transform_7, window_bounds = array<i64: 256, 128>}]} {
    %c0_i32 = arith.constant 0 : i32
    %0 = arith.cmpi eq, %arg1, %c0_i32 : i32
    %1 = arith.extui %0 : i1 to i32
    %c0_i32_0 = arith.constant 0 : i32
    %2 = arith.cmpi ne, %1, %c0_i32_0 : i32
    scf.if %2 {
      %c0_24 = arith.constant 0 : index
      %c0_25 = arith.constant 0 : index
      %25 = vector.load %arg2[%c0_24, %c0_25] : memref<256x256xbf16, #tpu.memory_space<vmem>>, vector<256x256xbf16>
      %c0_26 = arith.constant 0 : index
      %c0_27 = arith.constant 0 : index
      %26 = vector.load %arg3[%c0_26, %c0_27] : memref<256x256xbf16, #tpu.memory_space<vmem>>, vector<256x256xbf16>
      %27 = arith.subf %25, %26 : vector<256x256xbf16>
      %c0_28 = arith.constant 0 : index
      %c0_29 = arith.constant 0 : index
      %28 = vector.load %arg10[%c0_28, %c0_29] : memref<256x256xbf16, #tpu.memory_space<vmem>>, vector<256x256xbf16>
      tpu.vector_store %arg10[%c0_28, %c0_29], %27 {strides = array<i32>} : memref<256x256xbf16, #tpu.memory_space<vmem>>, vector<256x256xbf16>,
      %29 = arith.mulf %25, %26 : vector<256x256xbf16>
      %c0_30 = arith.constant 0 : index
      %c0_31 = arith.constant 0 : index
      %30 = vector.load %arg11[%c0_30, %c0_31] : memref<256x256xbf16, #tpu.memory_space<vmem>>, vector<256x256xbf16>
      tpu.vector_store %arg11[%c0_30, %c0_31], %29 {strides = array<i32>} : memref<256x256xbf16, #tpu.memory_space<vmem>>, vector<256x256xbf16>,
    } else {
    }
    %c0 = arith.constant 0 : index
    %c0_1 = arith.constant 0 : index
    %3 = vector.load %arg2[%c0, %c0_1] : memref<256x256xbf16, #tpu.memory_space<vmem>>, vector<256x256xbf16>
    %c0_2 = arith.constant 0 : index
    %c0_3 = arith.constant 0 : index
    %4 = vector.load %arg4[%c0_2, %c0_3] : memref<256x128xbf16, #tpu.memory_space<vmem>>, vector<256x128xbf16>
    %cst = arith.constant dense<0.000000e+00> : vector<256x128xf32>
    %5 = tpu.matmul %3, %4, %cst {dimension_numbers = #tpu.dot_dimension_numbers<[1], [0], [0], [1], [0, 0, 1, 1], [], []>} : vector<256x256xbf16>, vector<256x128xbf16>, vector<256x128xf32> -> vector<256x128xf32>
    %c0_4 = arith.constant 0 : index
    %c0_5 = arith.constant 0 : index
    %6 = vector.load %arg3[%c0_4, %c0_5] : memref<256x256xbf16, #tpu.memory_space<vmem>>, vector<256x256xbf16>
    %c0_6 = arith.constant 0 : index
    %c0_7 = arith.constant 0 : index
    %7 = vector.load %arg5[%c0_6, %c0_7] : memref<256x128xbf16, #tpu.memory_space<vmem>>, vector<256x128xbf16>
    %cst_8 = arith.constant dense<0.000000e+00> : vector<256x128xf32>
    %8 = tpu.matmul %6, %7, %cst_8 {dimension_numbers = #tpu.dot_dimension_numbers<[1], [0], [0], [1], [0, 0, 1, 1], [], []>} : vector<256x256xbf16>, vector<256x128xbf16>, vector<256x128xf32> -> vector<256x128xf32>
    %9 = arith.addf %5, %8 : vector<256x128xf32>
    %c0_9 = arith.constant 0 : index
    %c0_10 = arith.constant 0 : index
    %10 = vector.load %arg10[%c0_9, %c0_10] : memref<256x256xbf16, #tpu.memory_space<vmem>>, vector<256x256xbf16>
    %c0_11 = arith.constant 0 : index
    %c0_12 = arith.constant 0 : index
    %11 = vector.load %arg6[%c0_11, %c0_12] : memref<256x128xbf16, #tpu.memory_space<vmem>>, vector<256x128xbf16>
    %cst_13 = arith.constant dense<0.000000e+00> : vector<256x128xf32>
    %12 = tpu.matmul %10, %11, %cst_13 {dimension_numbers = #tpu.dot_dimension_numbers<[1], [0], [0], [1], [0, 0, 1, 1], [], []>} : vector<256x256xbf16>, vector<256x128xbf16>, vector<256x128xf32> -> vector<256x128xf32>
    %13 = arith.addf %9, %12 : vector<256x128xf32>
    %c0_14 = arith.constant 0 : index
    %c0_15 = arith.constant 0 : index
    %14 = vector.load %arg11[%c0_14, %c0_15] : memref<256x256xbf16, #tpu.memory_space<vmem>>, vector<256x256xbf16>
    %c0_16 = arith.constant 0 : index
    %c0_17 = arith.constant 0 : index
    %15 = vector.load %arg7[%c0_16, %c0_17] : memref<256x128xbf16, #tpu.memory_space<vmem>>, vector<256x128xbf16>
    %cst_18 = arith.constant dense<0.000000e+00> : vector<256x128xf32>
    %16 = tpu.matmul %14, %15, %cst_18 {dimension_numbers = #tpu.dot_dimension_numbers<[1], [0], [0], [1], [0, 0, 1, 1], [], []>} : vector<256x256xbf16>, vector<256x128xbf16>, vector<256x128xf32> -> vector<256x128xf32>
    %17 = arith.addf %13, %16 : vector<256x128xf32>
    %c0_19 = arith.constant 0 : index
    %c0_20 = arith.constant 0 : index
    %18 = vector.load %arg8[%c0_19, %c0_20] : memref<1x128xf32, #tpu.memory_space<vmem>>, vector<1x128xf32>
    %19 = vector.broadcast %18 : vector<1x128xf32> to vector<256x128xf32>
    %20 = arith.addf %17, %19 : vector<256x128xf32>
    %cst_21 = arith.constant 0.000000e+00 : f32
    %21 = vector.broadcast %cst_21 : f32 to vector<256x128xf32>
    %22 = arith.maximumf %20, %21 : vector<256x128xf32>
    %23 = arith.truncf %22 : vector<256x128xf32> to vector<256x128xbf16>
    %c0_22 = arith.constant 0 : index
    %c0_23 = arith.constant 0 : index
    %24 = vector.load %arg9[%c0_22, %c0_23] : memref<256x128xbf16, #tpu.memory_space<vmem>>, vector<256x128xbf16>
    tpu.vector_store %arg9[%c0_22, %c0_23], %23 {strides = array<i32>} : memref<256x128xbf16, #tpu.memory_space<vmem>>, vector<256x128xbf16>,
    return
  }
  func.func @transform_0(%arg0: i32, %arg1: i32) -> (i32, i32) {
    %c0_i32 = arith.constant 0 : i32
    %c0_i32_0 = arith.constant 0 : i32
    return %arg0, %c0_i32 : i32, i32
  }
  func.func @transform_1(%arg0: i32, %arg1: i32) -> (i32, i32) {
    %c0_i32 = arith.constant 0 : i32
    %c0_i32_0 = arith.constant 0 : i32
    return %arg0, %c0_i32 : i32, i32
  }
  func.func @transform_2(%arg0: i32, %arg1: i32) -> (i32, i32) {
    %c0_i32 = arith.constant 0 : i32
    %c0_i32_0 = arith.constant 0 : i32
    return %c0_i32, %arg1 : i32, i32
  }
  func.func @transform_3(%arg0: i32, %arg1: i32) -> (i32, i32) {
    %c0_i32 = arith.constant 0 : i32
    %c0_i32_0 = arith.constant 0 : i32
    return %c0_i32, %arg1 : i32, i32
  }
  func.func @transform_4(%arg0: i32, %arg1: i32) -> (i32, i32) {
    %c0_i32 = arith.constant 0 : i32
    %c0_i32_0 = arith.constant 0 : i32
    return %c0_i32, %arg1 : i32, i32
  }
  func.func @transform_5(%arg0: i32, %arg1: i32) -> (i32, i32) {
    %c0_i32 = arith.constant 0 : i32
    %c0_i32_0 = arith.constant 0 : i32
    return %c0_i32, %arg1 : i32, i32
  }
  func.func @transform_6(%arg0: i32, %arg1: i32) -> (i32, i32) {
    %c0_i32 = arith.constant 0 : i32
    %c0_i32_0 = arith.constant 0 : i32
    return %c0_i32, %arg1 : i32, i32
  }
  func.func @transform_7(%arg0: i32, %arg1: i32) -> (i32, i32) {
    %c0_i32 = arith.constant 0 : i32
    return %arg0, %arg1 : i32, i32
  }
}

module attributes {stable_mosaic.version = 11 : i64} {
  func.func @_attention_kernel(%arg0: i32, %arg1: memref<1x16x256xbf16, #tpu.memory_space<vmem>>, %arg2: memref<1x16x256xbf16, #tpu.memory_space<vmem>>, %arg3: memref<1x16x1xf32, #tpu.memory_space<vmem>>, %arg4: memref<1x16x1xf32, #tpu.memory_space<vmem>>, %arg5: memref<1x1x16xf32, #tpu.memory_space<vmem>>, %arg6: memref<1x16x256xbf16, #tpu.memory_space<vmem>>, %arg7: memref<1x16x256xbf16, #tpu.memory_space<vmem>>) attributes {dimension_semantics = [#tpu.dimension_semantics<parallel>], iteration_bounds = array<i64: 8>, scalar_prefetch = 0 : i64, scratch_operands = 0 : i64, tpu.core_type = #tpu.core_type<tc>, window_params = [{transform_indices = @transform_0, window_bounds = array<i64: 1, 16, 256>}, {transform_indices = @transform_1, window_bounds = array<i64: 1, 16, 256>}, {transform_indices = @transform_2, window_bounds = array<i64: 1, 16, 1>}, {transform_indices = @transform_3, window_bounds = array<i64: 1, 16, 1>}, {transform_indices = @transform_4, window_bounds = array<i64: 1, 1, 16>}, {transform_indices = @transform_5, window_bounds = array<i64: 1, 16, 256>}, {transform_indices = @transform_6, window_bounds = array<i64: 1, 16, 256>}]} {
    %c0 = arith.constant 0 : index
    %c0_0 = arith.constant 0 : index
    %c0_1 = arith.constant 0 : index
    %0 = vector.load %arg1[%c0, %c0_0, %c0_1] : memref<1x16x256xbf16, #tpu.memory_space<vmem>>, vector<1x16x256xbf16>
    %1 = vector.shape_cast %0 : vector<1x16x256xbf16> to vector<16x256xbf16>
    %c0_2 = arith.constant 0 : index
    %c0_3 = arith.constant 0 : index
    %c0_4 = arith.constant 0 : index
    %2 = vector.load %arg2[%c0_2, %c0_3, %c0_4] : memref<1x16x256xbf16, #tpu.memory_space<vmem>>, vector<1x16x256xbf16>
    %3 = vector.shape_cast %2 : vector<1x16x256xbf16> to vector<16x256xbf16>
    %c0_5 = arith.constant 0 : index
    %c0_6 = arith.constant 0 : index
    %c0_7 = arith.constant 0 : index
    %4 = vector.load %arg3[%c0_5, %c0_6, %c0_7] : memref<1x16x1xf32, #tpu.memory_space<vmem>>, vector<1x16x1xf32>
    %5 = vector.shape_cast %4 : vector<1x16x1xf32> to vector<16x1xf32>
    %c0_8 = arith.constant 0 : index
    %c0_9 = arith.constant 0 : index
    %c0_10 = arith.constant 0 : index
    %6 = vector.load %arg4[%c0_8, %c0_9, %c0_10] : memref<1x16x1xf32, #tpu.memory_space<vmem>>, vector<1x16x1xf32>
    %7 = vector.shape_cast %6 : vector<1x16x1xf32> to vector<16x1xf32>
    %c0_11 = arith.constant 0 : index
    %c0_12 = arith.constant 0 : index
    %c0_13 = arith.constant 0 : index
    %8 = vector.load %arg5[%c0_11, %c0_12, %c0_13] : memref<1x1x16xf32, #tpu.memory_space<vmem>>, vector<1x1x16xf32>
    %9 = vector.shape_cast %8 : vector<1x1x16xf32> to vector<1x16xf32>
    %cst = arith.constant dense<0.000000e+00> : vector<16x16xf32>
    %10 = tpu.matmul %1, %3, %cst {dimension_numbers = #tpu.dot_dimension_numbers<[1], [1], [0], [0], [0, 0, 1, 0], [], []>} : vector<16x256xbf16>, vector<16x256xbf16>, vector<16x16xf32> -> vector<16x16xf32>
    %11 = vector.broadcast %9 : vector<1x16xf32> to vector<16x16xf32>
    %12 = arith.mulf %10, %11 : vector<16x16xf32>
    %cst_14 = arith.constant dense<0xFF800000> : vector<16xf32>
    %13 = vector.multi_reduction <maximumf>, %12, %cst_14 [1] : vector<16x16xf32> to vector<16xf32>
    %14 = vector.shape_cast %13 : vector<16xf32> to vector<16x1xf32>
    %15 = vector.broadcast %14 : vector<16x1xf32> to vector<16x16xf32>
    %16 = arith.subf %12, %15 : vector<16x16xf32>
    %17 = math.exp %16 : vector<16x16xf32>
    %cst_15 = arith.constant dense<0.000000e+00> : vector<16xf32>
    %18 = vector.multi_reduction <add>, %17, %cst_15 [1] : vector<16x16xf32> to vector<16xf32>
    %19 = vector.shape_cast %18 : vector<16xf32> to vector<16x1xf32>
    %20 = tpu.reciprocal %19 {approx = true} : vector<16x1xf32> -> vector<16x1xf32>
    %21 = vector.broadcast %20 : vector<16x1xf32> to vector<16x16xf32>
    %22 = arith.mulf %17, %21 : vector<16x16xf32>
    %23 = vector.broadcast %9 : vector<1x16xf32> to vector<16x16xf32>
    %24 = arith.mulf %22, %23 : vector<16x16xf32>
    %cst_16 = arith.constant dense<0.000000e+00> : vector<16xf32>
    %25 = vector.multi_reduction <add>, %24, %cst_16 [1] : vector<16x16xf32> to vector<16xf32>
    %26 = vector.shape_cast %25 : vector<16xf32> to vector<16x1xf32>
    %cst_17 = arith.constant 9.99999982E-14 : f32
    %27 = vector.broadcast %cst_17 : f32 to vector<16x1xf32>
    %28 = arith.addf %26, %27 : vector<16x1xf32>
    %29 = vector.broadcast %28 : vector<16x1xf32> to vector<16x16xf32>
    %30 = arith.divf %24, %29 : vector<16x16xf32>
    %31 = vector.broadcast %5 : vector<16x1xf32> to vector<16x16xf32>
    %32 = arith.mulf %10, %31 : vector<16x16xf32>
    %cst_18 = arith.constant dense<0xFF800000> : vector<16xf32>
    %33 = vector.multi_reduction <maximumf>, %32, %cst_18 [0] : vector<16x16xf32> to vector<16xf32>
    %34 = vector.shape_cast %33 : vector<16xf32> to vector<1x16xf32>
    %35 = vector.broadcast %34 : vector<1x16xf32> to vector<16x16xf32>
    %36 = arith.subf %32, %35 : vector<16x16xf32>
    %37 = math.exp %36 : vector<16x16xf32>
    %cst_19 = arith.constant dense<0.000000e+00> : vector<16xf32>
    %38 = vector.multi_reduction <add>, %37, %cst_19 [0] : vector<16x16xf32> to vector<16xf32>
    %39 = vector.shape_cast %38 : vector<16xf32> to vector<1x16xf32>
    %40 = tpu.reciprocal %39 {approx = true} : vector<1x16xf32> -> vector<1x16xf32>
    %41 = vector.broadcast %40 : vector<1x16xf32> to vector<16x16xf32>
    %42 = arith.mulf %37, %41 : vector<16x16xf32>
    %43 = vector.broadcast %5 : vector<16x1xf32> to vector<16x16xf32>
    %44 = arith.mulf %42, %43 : vector<16x16xf32>
    %cst_20 = arith.constant dense<0.000000e+00> : vector<16xf32>
    %45 = vector.multi_reduction <add>, %44, %cst_20 [0] : vector<16x16xf32> to vector<16xf32>
    %46 = vector.shape_cast %45 : vector<16xf32> to vector<1x16xf32>
    %cst_21 = arith.constant 9.99999982E-14 : f32
    %47 = vector.broadcast %cst_21 : f32 to vector<1x16xf32>
    %48 = arith.addf %46, %47 : vector<1x16xf32>
    %49 = vector.broadcast %48 : vector<1x16xf32> to vector<16x16xf32>
    %50 = arith.divf %44, %49 : vector<16x16xf32>
    %51 = arith.truncf %30 : vector<16x16xf32> to vector<16x16xbf16>
    %cst_22 = arith.constant dense<0.000000e+00> : vector<16x256xf32>
    %52 = tpu.matmul %51, %3, %cst_22 {dimension_numbers = #tpu.dot_dimension_numbers<[1], [0], [0], [1], [0, 0, 1, 1], [], []>} : vector<16x16xbf16>, vector<16x256xbf16>, vector<16x256xf32> -> vector<16x256xf32>
    %53 = vector.broadcast %5 : vector<16x1xf32> to vector<16x256xf32>
    %54 = arith.mulf %52, %53 : vector<16x256xf32>
    %55 = arith.truncf %50 : vector<16x16xf32> to vector<16x16xbf16>
    %cst_23 = arith.constant dense<0.000000e+00> : vector<16x256xf32>
    %56 = tpu.matmul %55, %1, %cst_23 {dimension_numbers = #tpu.dot_dimension_numbers<[0], [0], [1], [1], [0, 1, 1, 1], [], []>} : vector<16x16xbf16>, vector<16x256xbf16>, vector<16x256xf32> -> vector<16x256xf32>
    %57 = vector.broadcast %7 : vector<16x1xf32> to vector<16x256xf32>
    %58 = arith.mulf %56, %57 : vector<16x256xf32>
    %59 = arith.truncf %54 : vector<16x256xf32> to vector<16x256xbf16>
    %c0_24 = arith.constant 0 : index
    %c0_25 = arith.constant 0 : index
    %c0_26 = arith.constant 0 : index
    %60 = vector.load %arg6[%c0_24, %c0_25, %c0_26] : memref<1x16x256xbf16, #tpu.memory_space<vmem>>, vector<1x16x256xbf16>
    %61 = vector.shape_cast %60 : vector<1x16x256xbf16> to vector<16x256xbf16>
    %62 = vector.shape_cast %59 : vector<16x256xbf16> to vector<1x16x256xbf16>
    tpu.vector_store %arg6[%c0_24, %c0_25, %c0_26], %62 {strides = array<i32>} : memref<1x16x256xbf16, #tpu.memory_space<vmem>>, vector<1x16x256xbf16>,
    %63 = arith.truncf %58 : vector<16x256xf32> to vector<16x256xbf16>
    %c0_27 = arith.constant 0 : index
    %c0_28 = arith.constant 0 : index
    %c0_29 = arith.constant 0 : index
    %64 = vector.load %arg7[%c0_27, %c0_28, %c0_29] : memref<1x16x256xbf16, #tpu.memory_space<vmem>>, vector<1x16x256xbf16>
    %65 = vector.shape_cast %64 : vector<1x16x256xbf16> to vector<16x256xbf16>
    %66 = vector.shape_cast %63 : vector<16x256xbf16> to vector<1x16x256xbf16>
    tpu.vector_store %arg7[%c0_27, %c0_28, %c0_29], %66 {strides = array<i32>} : memref<1x16x256xbf16, #tpu.memory_space<vmem>>, vector<1x16x256xbf16>,
    return
  }
  func.func @transform_0(%arg0: i32) -> (i32, i32, i32) {
    %c0_i32 = arith.constant 0 : i32
    %c0_i32_0 = arith.constant 0 : i32
    %c0_i32_1 = arith.constant 0 : i32
    return %arg0, %c0_i32, %c0_i32_0 : i32, i32, i32
  }
  func.func @transform_1(%arg0: i32) -> (i32, i32, i32) {
    %c0_i32 = arith.constant 0 : i32
    %c0_i32_0 = arith.constant 0 : i32
    %c0_i32_1 = arith.constant 0 : i32
    return %arg0, %c0_i32, %c0_i32_0 : i32, i32, i32
  }
  func.func @transform_2(%arg0: i32) -> (i32, i32, i32) {
    %c0_i32 = arith.constant 0 : i32
    %c0_i32_0 = arith.constant 0 : i32
    %c0_i32_1 = arith.constant 0 : i32
    return %arg0, %c0_i32, %c0_i32_0 : i32, i32, i32
  }
  func.func @transform_3(%arg0: i32) -> (i32, i32, i32) {
    %c0_i32 = arith.constant 0 : i32
    %c0_i32_0 = arith.constant 0 : i32
    %c0_i32_1 = arith.constant 0 : i32
    return %arg0, %c0_i32, %c0_i32_0 : i32, i32, i32
  }
  func.func @transform_4(%arg0: i32) -> (i32, i32, i32) {
    %c0_i32 = arith.constant 0 : i32
    %c0_i32_0 = arith.constant 0 : i32
    %c0_i32_1 = arith.constant 0 : i32
    return %arg0, %c0_i32, %c0_i32_0 : i32, i32, i32
  }
  func.func @transform_5(%arg0: i32) -> (i32, i32, i32) {
    %c0_i32 = arith.constant 0 : i32
    %c0_i32_0 = arith.constant 0 : i32
    %c0_i32_1 = arith.constant 0 : i32
    return %arg0, %c0_i32, %c0_i32_0 : i32, i32, i32
  }
  func.func @transform_6(%arg0: i32) -> (i32, i32, i32) {
    %c0_i32 = arith.constant 0 : i32
    %c0_i32_0 = arith.constant 0 : i32
    %c0_i32_1 = arith.constant 0 : i32
    return %arg0, %c0_i32, %c0_i32_0 : i32, i32, i32
  }
}

module attributes {stable_mosaic.version = 11 : i64} {
  func.func @_bilstm_kernel(%arg0: i32, %arg1: i32, %arg2: memref<8x16x128xbf16, #tpu.memory_space<vmem>>, %arg3: memref<1x128x512xbf16, #tpu.memory_space<vmem>>, %arg4: memref<1x128x512xbf16, #tpu.memory_space<vmem>>, %arg5: memref<1x1x512xf32, #tpu.memory_space<vmem>>, %arg6: memref<8x16x128xbf16, #tpu.memory_space<vmem>>, %arg7: memref<16x128xf32, #tpu.memory_space<vmem>>, %arg8: memref<16x128xf32, #tpu.memory_space<vmem>>, %arg9: memref<8x16x512xf32, #tpu.memory_space<vmem>>) attributes {dimension_semantics = [#tpu.dimension_semantics<parallel>, #tpu.dimension_semantics<arbitrary>], iteration_bounds = array<i64: 2, 2>, scalar_prefetch = 0 : i64, scratch_operands = 3 : i64, tpu.core_type = #tpu.core_type<tc>, window_params = [{transform_indices = @transform_0, window_bounds = array<i64: 8, 16, 128>}, {transform_indices = @transform_1, window_bounds = array<i64: 1, 128, 512>}, {transform_indices = @transform_2, window_bounds = array<i64: 1, 128, 512>}, {transform_indices = @transform_3, window_bounds = array<i64: 1, 1, 512>}, {transform_indices = @transform_4, window_bounds = array<i64: 8, 16, 128>}]} {
    %c0_i32 = arith.constant 0 : i32
    %0 = arith.cmpi eq, %arg1, %c0_i32 : i32
    %1 = arith.extui %0 : i1 to i32
    %c0_i32_0 = arith.constant 0 : i32
    %2 = arith.cmpi ne, %1, %c0_i32_0 : i32
    scf.if %2 {
      %cst_104 = arith.constant 0.000000e+00 : f32
      %341 = vector.broadcast %cst_104 : f32 to vector<16x128xf32>
      %c0_105 = arith.constant 0 : index
      %c0_106 = arith.constant 0 : index
      %342 = vector.load %arg7[%c0_105, %c0_106] : memref<16x128xf32, #tpu.memory_space<vmem>>, vector<16x128xf32>
      tpu.vector_store %arg7[%c0_105, %c0_106], %341 {strides = array<i32>} : memref<16x128xf32, #tpu.memory_space<vmem>>, vector<16x128xf32>,
      %cst_107 = arith.constant 0.000000e+00 : f32
      %343 = vector.broadcast %cst_107 : f32 to vector<16x128xf32>
      %c0_108 = arith.constant 0 : index
      %c0_109 = arith.constant 0 : index
      %344 = vector.load %arg8[%c0_108, %c0_109] : memref<16x128xf32, #tpu.memory_space<vmem>>, vector<16x128xf32>
      tpu.vector_store %arg8[%c0_108, %c0_109], %343 {strides = array<i32>} : memref<16x128xf32, #tpu.memory_space<vmem>>, vector<16x128xf32>,
    } else {
    }
    %c0 = arith.constant 0 : index
    %c0_1 = arith.constant 0 : index
    %c0_2 = arith.constant 0 : index
    %3 = vector.load %arg2[%c0, %c0_1, %c0_2] : memref<8x16x128xbf16, #tpu.memory_space<vmem>>, vector<8x16x128xbf16>
    %4 = vector.shape_cast %3 : vector<8x16x128xbf16> to vector<128x128xbf16>
    %c0_3 = arith.constant 0 : index
    %c0_4 = arith.constant 0 : index
    %c0_5 = arith.constant 0 : index
    %5 = vector.load %arg3[%c0_3, %c0_4, %c0_5] : memref<1x128x512xbf16, #tpu.memory_space<vmem>>, vector<1x128x512xbf16>
    %6 = vector.shape_cast %5 : vector<1x128x512xbf16> to vector<128x512xbf16>
    %cst = arith.constant dense<0.000000e+00> : vector<128x512xf32>
    %7 = tpu.matmul %4, %6, %cst {dimension_numbers = #tpu.dot_dimension_numbers<[1], [0], [0], [1], [0, 0, 1, 1], [], []>} : vector<128x128xbf16>, vector<128x512xbf16>, vector<128x512xf32> -> vector<128x512xf32>
    %8 = vector.shape_cast %7 : vector<128x512xf32> to vector<8x16x512xf32>
    %c0_6 = arith.constant 0 : index
    %c0_7 = arith.constant 0 : index
    %c0_8 = arith.constant 0 : index
    %9 = vector.load %arg5[%c0_6, %c0_7, %c0_8] : memref<1x1x512xf32, #tpu.memory_space<vmem>>, vector<1x1x512xf32>
    %10 = vector.shape_cast %9 : vector<1x1x512xf32> to vector<1x512xf32>
    %11 = vector.shape_cast %10 : vector<1x512xf32> to vector<1x1x512xf32>
    %12 = vector.broadcast %11 : vector<1x1x512xf32> to vector<8x16x512xf32>
    %13 = arith.addf %8, %12 : vector<8x16x512xf32>
    %c0_9 = arith.constant 0 : index
    %c0_10 = arith.constant 0 : index
    %c0_11 = arith.constant 0 : index
    %14 = vector.load %arg9[%c0_9, %c0_10, %c0_11] : memref<8x16x512xf32, #tpu.memory_space<vmem>>, vector<8x16x512xf32>
    tpu.vector_store %arg9[%c0_9, %c0_10, %c0_11], %13 {strides = array<i32>} : memref<8x16x512xf32, #tpu.memory_space<vmem>>, vector<8x16x512xf32>,
    %c0_12 = arith.constant 0 : index
    %c0_13 = arith.constant 0 : index
    %c0_14 = arith.constant 0 : index
    %15 = vector.load %arg4[%c0_12, %c0_13, %c0_14] : memref<1x128x512xbf16, #tpu.memory_space<vmem>>, vector<1x128x512xbf16>
    %16 = vector.shape_cast %15 : vector<1x128x512xbf16> to vector<128x512xbf16>
    %c0_15 = arith.constant 0 : index
    %c0_16 = arith.constant 0 : index
    %17 = vector.load %arg7[%c0_15, %c0_16] : memref<16x128xf32, #tpu.memory_space<vmem>>, vector<16x128xf32>
    %c0_17 = arith.constant 0 : index
    %c0_18 = arith.constant 0 : index
    %18 = vector.load %arg8[%c0_17, %c0_18] : memref<16x128xf32, #tpu.memory_space<vmem>>, vector<16x128xf32>
    %c0_i32_19 = arith.constant 0 : i32
    %c2_i32 = arith.constant 2 : i32
    %19 = arith.muli %c2_i32, %c0_i32_19 : i32
    %c7_i32 = arith.constant 7 : i32
    %20 = arith.subi %c7_i32, %19 : i32
    %21 = arith.muli %arg0, %20 : i32
    %22 = arith.addi %c0_i32_19, %21 : i32
    %23 = arith.index_cast %22 : i32 to index
    %c0_20 = arith.constant 0 : index
    %c0_21 = arith.constant 0 : index
    %24 = vector.load %arg9[%23, %c0_20, %c0_21] : memref<8x16x512xf32, #tpu.memory_space<vmem>>, vector<1x16x512xf32>
    %25 = vector.shape_cast %24 : vector<1x16x512xf32> to vector<16x512xf32>
    %26 = arith.truncf %17 : vector<16x128xf32> to vector<16x128xbf16>
    %cst_22 = arith.constant dense<0.000000e+00> : vector<16x512xf32>
    %27 = tpu.matmul %26, %16, %cst_22 {dimension_numbers = #tpu.dot_dimension_numbers<[1], [0], [0], [1], [0, 0, 1, 1], [], []>} : vector<16x128xbf16>, vector<128x512xbf16>, vector<16x512xf32> -> vector<16x512xf32>
    %28 = arith.addf %25, %27 : vector<16x512xf32>
    %29 = vector.extract_strided_slice %28 {offsets = [0, 0], sizes = [16, 128], strides = [1, 1]} : vector<16x512xf32> to vector<16x128xf32>
    %30 = arith.negf %29 : vector<16x128xf32>
    %31 = math.exp %30 : vector<16x128xf32>
    %cst_23 = arith.constant 1.000000e+00 : f32
    %32 = vector.broadcast %cst_23 : f32 to vector<16x128xf32>
    %33 = arith.addf %32, %31 : vector<16x128xf32>
    %34 = arith.divf %32, %33 : vector<16x128xf32>
    %35 = vector.extract_strided_slice %28 {offsets = [0, 128], sizes = [16, 128], strides = [1, 1]} : vector<16x512xf32> to vector<16x128xf32>
    %36 = arith.negf %35 : vector<16x128xf32>
    %37 = math.exp %36 : vector<16x128xf32>
    %cst_24 = arith.constant 1.000000e+00 : f32
    %38 = vector.broadcast %cst_24 : f32 to vector<16x128xf32>
    %39 = arith.addf %38, %37 : vector<16x128xf32>
    %40 = arith.divf %38, %39 : vector<16x128xf32>
    %41 = vector.extract_strided_slice %28 {offsets = [0, 256], sizes = [16, 128], strides = [1, 1]} : vector<16x512xf32> to vector<16x128xf32>
    %42 = math.tanh %41 : vector<16x128xf32>
    %43 = vector.extract_strided_slice %28 {offsets = [0, 384], sizes = [16, 128], strides = [1, 1]} : vector<16x512xf32> to vector<16x128xf32>
    %44 = arith.negf %43 : vector<16x128xf32>
    %45 = math.exp %44 : vector<16x128xf32>
    %cst_25 = arith.constant 1.000000e+00 : f32
    %46 = vector.broadcast %cst_25 : f32 to vector<16x128xf32>
    %47 = arith.addf %46, %45 : vector<16x128xf32>
    %48 = arith.divf %46, %47 : vector<16x128xf32>
    %49 = arith.mulf %40, %18 : vector<16x128xf32>
    %50 = arith.mulf %34, %42 : vector<16x128xf32>
    %51 = arith.addf %49, %50 : vector<16x128xf32>
    %52 = math.tanh %51 : vector<16x128xf32>
    %53 = arith.mulf %48, %52 : vector<16x128xf32>
    %54 = arith.truncf %53 : vector<16x128xf32> to vector<16x128xbf16>
    %55 = arith.index_cast %22 : i32 to index
    %c0_26 = arith.constant 0 : index
    %c0_27 = arith.constant 0 : index
    %56 = vector.load %arg6[%55, %c0_26, %c0_27] : memref<8x16x128xbf16, #tpu.memory_space<vmem>>, vector<1x16x128xbf16>
    %57 = vector.shape_cast %56 : vector<1x16x128xbf16> to vector<16x128xbf16>
    %58 = vector.shape_cast %54 : vector<16x128xbf16> to vector<1x16x128xbf16>
    tpu.vector_store %arg6[%55, %c0_26, %c0_27], %58 {strides = array<i32>} : memref<8x16x128xbf16, #tpu.memory_space<vmem>>, vector<1x16x128xbf16>,
    %c1_i32 = arith.constant 1 : i32
    %c2_i32_28 = arith.constant 2 : i32
    %59 = arith.muli %c2_i32_28, %c1_i32 : i32
    %c7_i32_29 = arith.constant 7 : i32
    %60 = arith.subi %c7_i32_29, %59 : i32
    %61 = arith.muli %arg0, %60 : i32
    %62 = arith.addi %c1_i32, %61 : i32
    %63 = arith.index_cast %62 : i32 to index
    %c0_30 = arith.constant 0 : index
    %c0_31 = arith.constant 0 : index
    %64 = vector.load %arg9[%63, %c0_30, %c0_31] : memref<8x16x512xf32, #tpu.memory_space<vmem>>, vector<1x16x512xf32>
    %65 = vector.shape_cast %64 : vector<1x16x512xf32> to vector<16x512xf32>
    %66 = arith.truncf %53 : vector<16x128xf32> to vector<16x128xbf16>
    %cst_32 = arith.constant dense<0.000000e+00> : vector<16x512xf32>
    %67 = tpu.matmul %66, %16, %cst_32 {dimension_numbers = #tpu.dot_dimension_numbers<[1], [0], [0], [1], [0, 0, 1, 1], [], []>} : vector<16x128xbf16>, vector<128x512xbf16>, vector<16x512xf32> -> vector<16x512xf32>
    %68 = arith.addf %65, %67 : vector<16x512xf32>
    %69 = vector.extract_strided_slice %68 {offsets = [0, 0], sizes = [16, 128], strides = [1, 1]} : vector<16x512xf32> to vector<16x128xf32>
    %70 = arith.negf %69 : vector<16x128xf32>
    %71 = math.exp %70 : vector<16x128xf32>
    %cst_33 = arith.constant 1.000000e+00 : f32
    %72 = vector.broadcast %cst_33 : f32 to vector<16x128xf32>
    %73 = arith.addf %72, %71 : vector<16x128xf32>
    %74 = arith.divf %72, %73 : vector<16x128xf32>
    %75 = vector.extract_strided_slice %68 {offsets = [0, 128], sizes = [16, 128], strides = [1, 1]} : vector<16x512xf32> to vector<16x128xf32>
    %76 = arith.negf %75 : vector<16x128xf32>
    %77 = math.exp %76 : vector<16x128xf32>
    %cst_34 = arith.constant 1.000000e+00 : f32
    %78 = vector.broadcast %cst_34 : f32 to vector<16x128xf32>
    %79 = arith.addf %78, %77 : vector<16x128xf32>
    %80 = arith.divf %78, %79 : vector<16x128xf32>
    %81 = vector.extract_strided_slice %68 {offsets = [0, 256], sizes = [16, 128], strides = [1, 1]} : vector<16x512xf32> to vector<16x128xf32>
    %82 = math.tanh %81 : vector<16x128xf32>
    %83 = vector.extract_strided_slice %68 {offsets = [0, 384], sizes = [16, 128], strides = [1, 1]} : vector<16x512xf32> to vector<16x128xf32>
    %84 = arith.negf %83 : vector<16x128xf32>
    %85 = math.exp %84 : vector<16x128xf32>
    %cst_35 = arith.constant 1.000000e+00 : f32
    %86 = vector.broadcast %cst_35 : f32 to vector<16x128xf32>
    %87 = arith.addf %86, %85 : vector<16x128xf32>
    %88 = arith.divf %86, %87 : vector<16x128xf32>
    %89 = arith.mulf %80, %51 : vector<16x128xf32>
    %90 = arith.mulf %74, %82 : vector<16x128xf32>
    %91 = arith.addf %89, %90 : vector<16x128xf32>
    %92 = math.tanh %91 : vector<16x128xf32>
    %93 = arith.mulf %88, %92 : vector<16x128xf32>
    %94 = arith.truncf %93 : vector<16x128xf32> to vector<16x128xbf16>
    %95 = arith.index_cast %62 : i32 to index
    %c0_36 = arith.constant 0 : index
    %c0_37 = arith.constant 0 : index
    %96 = vector.load %arg6[%95, %c0_36, %c0_37] : memref<8x16x128xbf16, #tpu.memory_space<vmem>>, vector<1x16x128xbf16>
    %97 = vector.shape_cast %96 : vector<1x16x128xbf16> to vector<16x128xbf16>
    %98 = vector.shape_cast %94 : vector<16x128xbf16> to vector<1x16x128xbf16>
    tpu.vector_store %arg6[%95, %c0_36, %c0_37], %98 {strides = array<i32>} : memref<8x16x128xbf16, #tpu.memory_space<vmem>>, vector<1x16x128xbf16>,
    %c2_i32_38 = arith.constant 2 : i32
    %c2_i32_39 = arith.constant 2 : i32
    %99 = arith.muli %c2_i32_39, %c2_i32_38 : i32
    %c7_i32_40 = arith.constant 7 : i32
    %100 = arith.subi %c7_i32_40, %99 : i32
    %101 = arith.muli %arg0, %100 : i32
    %102 = arith.addi %c2_i32_38, %101 : i32
    %103 = arith.index_cast %102 : i32 to index
    %c0_41 = arith.constant 0 : index
    %c0_42 = arith.constant 0 : index
    %104 = vector.load %arg9[%103, %c0_41, %c0_42] : memref<8x16x512xf32, #tpu.memory_space<vmem>>, vector<1x16x512xf32>
    %105 = vector.shape_cast %104 : vector<1x16x512xf32> to vector<16x512xf32>
    %106 = arith.truncf %93 : vector<16x128xf32> to vector<16x128xbf16>
    %cst_43 = arith.constant dense<0.000000e+00> : vector<16x512xf32>
    %107 = tpu.matmul %106, %16, %cst_43 {dimension_numbers = #tpu.dot_dimension_numbers<[1], [0], [0], [1], [0, 0, 1, 1], [], []>} : vector<16x128xbf16>, vector<128x512xbf16>, vector<16x512xf32> -> vector<16x512xf32>
    %108 = arith.addf %105, %107 : vector<16x512xf32>
    %109 = vector.extract_strided_slice %108 {offsets = [0, 0], sizes = [16, 128], strides = [1, 1]} : vector<16x512xf32> to vector<16x128xf32>
    %110 = arith.negf %109 : vector<16x128xf32>
    %111 = math.exp %110 : vector<16x128xf32>
    %cst_44 = arith.constant 1.000000e+00 : f32
    %112 = vector.broadcast %cst_44 : f32 to vector<16x128xf32>
    %113 = arith.addf %112, %111 : vector<16x128xf32>
    %114 = arith.divf %112, %113 : vector<16x128xf32>
    %115 = vector.extract_strided_slice %108 {offsets = [0, 128], sizes = [16, 128], strides = [1, 1]} : vector<16x512xf32> to vector<16x128xf32>
    %116 = arith.negf %115 : vector<16x128xf32>
    %117 = math.exp %116 : vector<16x128xf32>
    %cst_45 = arith.constant 1.000000e+00 : f32
    %118 = vector.broadcast %cst_45 : f32 to vector<16x128xf32>
    %119 = arith.addf %118, %117 : vector<16x128xf32>
    %120 = arith.divf %118, %119 : vector<16x128xf32>
    %121 = vector.extract_strided_slice %108 {offsets = [0, 256], sizes = [16, 128], strides = [1, 1]} : vector<16x512xf32> to vector<16x128xf32>
    %122 = math.tanh %121 : vector<16x128xf32>
    %123 = vector.extract_strided_slice %108 {offsets = [0, 384], sizes = [16, 128], strides = [1, 1]} : vector<16x512xf32> to vector<16x128xf32>
    %124 = arith.negf %123 : vector<16x128xf32>
    %125 = math.exp %124 : vector<16x128xf32>
    %cst_46 = arith.constant 1.000000e+00 : f32
    %126 = vector.broadcast %cst_46 : f32 to vector<16x128xf32>
    %127 = arith.addf %126, %125 : vector<16x128xf32>
    %128 = arith.divf %126, %127 : vector<16x128xf32>
    %129 = arith.mulf %120, %91 : vector<16x128xf32>
    %130 = arith.mulf %114, %122 : vector<16x128xf32>
    %131 = arith.addf %129, %130 : vector<16x128xf32>
    %132 = math.tanh %131 : vector<16x128xf32>
    %133 = arith.mulf %128, %132 : vector<16x128xf32>
    %134 = arith.truncf %133 : vector<16x128xf32> to vector<16x128xbf16>
    %135 = arith.index_cast %102 : i32 to index
    %c0_47 = arith.constant 0 : index
    %c0_48 = arith.constant 0 : index
    %136 = vector.load %arg6[%135, %c0_47, %c0_48] : memref<8x16x128xbf16, #tpu.memory_space<vmem>>, vector<1x16x128xbf16>
    %137 = vector.shape_cast %136 : vector<1x16x128xbf16> to vector<16x128xbf16>
    %138 = vector.shape_cast %134 : vector<16x128xbf16> to vector<1x16x128xbf16>
    tpu.vector_store %arg6[%135, %c0_47, %c0_48], %138 {strides = array<i32>} : memref<8x16x128xbf16, #tpu.memory_space<vmem>>, vector<1x16x128xbf16>,
    %c3_i32 = arith.constant 3 : i32
    %c2_i32_49 = arith.constant 2 : i32
    %139 = arith.muli %c2_i32_49, %c3_i32 : i32
    %c7_i32_50 = arith.constant 7 : i32
    %140 = arith.subi %c7_i32_50, %139 : i32
    %141 = arith.muli %arg0, %140 : i32
    %142 = arith.addi %c3_i32, %141 : i32
    %143 = arith.index_cast %142 : i32 to index
    %c0_51 = arith.constant 0 : index
    %c0_52 = arith.constant 0 : index
    %144 = vector.load %arg9[%143, %c0_51, %c0_52] : memref<8x16x512xf32, #tpu.memory_space<vmem>>, vector<1x16x512xf32>
    %145 = vector.shape_cast %144 : vector<1x16x512xf32> to vector<16x512xf32>
    %146 = arith.truncf %133 : vector<16x128xf32> to vector<16x128xbf16>
    %cst_53 = arith.constant dense<0.000000e+00> : vector<16x512xf32>
    %147 = tpu.matmul %146, %16, %cst_53 {dimension_numbers = #tpu.dot_dimension_numbers<[1], [0], [0], [1], [0, 0, 1, 1], [], []>} : vector<16x128xbf16>, vector<128x512xbf16>, vector<16x512xf32> -> vector<16x512xf32>
    %148 = arith.addf %145, %147 : vector<16x512xf32>
    %149 = vector.extract_strided_slice %148 {offsets = [0, 0], sizes = [16, 128], strides = [1, 1]} : vector<16x512xf32> to vector<16x128xf32>
    %150 = arith.negf %149 : vector<16x128xf32>
    %151 = math.exp %150 : vector<16x128xf32>
    %cst_54 = arith.constant 1.000000e+00 : f32
    %152 = vector.broadcast %cst_54 : f32 to vector<16x128xf32>
    %153 = arith.addf %152, %151 : vector<16x128xf32>
    %154 = arith.divf %152, %153 : vector<16x128xf32>
    %155 = vector.extract_strided_slice %148 {offsets = [0, 128], sizes = [16, 128], strides = [1, 1]} : vector<16x512xf32> to vector<16x128xf32>
    %156 = arith.negf %155 : vector<16x128xf32>
    %157 = math.exp %156 : vector<16x128xf32>
    %cst_55 = arith.constant 1.000000e+00 : f32
    %158 = vector.broadcast %cst_55 : f32 to vector<16x128xf32>
    %159 = arith.addf %158, %157 : vector<16x128xf32>
    %160 = arith.divf %158, %159 : vector<16x128xf32>
    %161 = vector.extract_strided_slice %148 {offsets = [0, 256], sizes = [16, 128], strides = [1, 1]} : vector<16x512xf32> to vector<16x128xf32>
    %162 = math.tanh %161 : vector<16x128xf32>
    %163 = vector.extract_strided_slice %148 {offsets = [0, 384], sizes = [16, 128], strides = [1, 1]} : vector<16x512xf32> to vector<16x128xf32>
    %164 = arith.negf %163 : vector<16x128xf32>
    %165 = math.exp %164 : vector<16x128xf32>
    %cst_56 = arith.constant 1.000000e+00 : f32
    %166 = vector.broadcast %cst_56 : f32 to vector<16x128xf32>
    %167 = arith.addf %166, %165 : vector<16x128xf32>
    %168 = arith.divf %166, %167 : vector<16x128xf32>
    %169 = arith.mulf %160, %131 : vector<16x128xf32>
    %170 = arith.mulf %154, %162 : vector<16x128xf32>
    %171 = arith.addf %169, %170 : vector<16x128xf32>
    %172 = math.tanh %171 : vector<16x128xf32>
    %173 = arith.mulf %168, %172 : vector<16x128xf32>
    %174 = arith.truncf %173 : vector<16x128xf32> to vector<16x128xbf16>
    %175 = arith.index_cast %142 : i32 to index
    %c0_57 = arith.constant 0 : index
    %c0_58 = arith.constant 0 : index
    %176 = vector.load %arg6[%175, %c0_57, %c0_58] : memref<8x16x128xbf16, #tpu.memory_space<vmem>>, vector<1x16x128xbf16>
    %177 = vector.shape_cast %176 : vector<1x16x128xbf16> to vector<16x128xbf16>
    %178 = vector.shape_cast %174 : vector<16x128xbf16> to vector<1x16x128xbf16>
    tpu.vector_store %arg6[%175, %c0_57, %c0_58], %178 {strides = array<i32>} : memref<8x16x128xbf16, #tpu.memory_space<vmem>>, vector<1x16x128xbf16>,
    %c4_i32 = arith.constant 4 : i32
    %c2_i32_59 = arith.constant 2 : i32
    %179 = arith.muli %c2_i32_59, %c4_i32 : i32
    %c7_i32_60 = arith.constant 7 : i32
    %180 = arith.subi %c7_i32_60, %179 : i32
    %181 = arith.muli %arg0, %180 : i32
    %182 = arith.addi %c4_i32, %181 : i32
    %183 = arith.index_cast %182 : i32 to index
    %c0_61 = arith.constant 0 : index
    %c0_62 = arith.constant 0 : index
    %184 = vector.load %arg9[%183, %c0_61, %c0_62] : memref<8x16x512xf32, #tpu.memory_space<vmem>>, vector<1x16x512xf32>
    %185 = vector.shape_cast %184 : vector<1x16x512xf32> to vector<16x512xf32>
    %186 = arith.truncf %173 : vector<16x128xf32> to vector<16x128xbf16>
    %cst_63 = arith.constant dense<0.000000e+00> : vector<16x512xf32>
    %187 = tpu.matmul %186, %16, %cst_63 {dimension_numbers = #tpu.dot_dimension_numbers<[1], [0], [0], [1], [0, 0, 1, 1], [], []>} : vector<16x128xbf16>, vector<128x512xbf16>, vector<16x512xf32> -> vector<16x512xf32>
    %188 = arith.addf %185, %187 : vector<16x512xf32>
    %189 = vector.extract_strided_slice %188 {offsets = [0, 0], sizes = [16, 128], strides = [1, 1]} : vector<16x512xf32> to vector<16x128xf32>
    %190 = arith.negf %189 : vector<16x128xf32>
    %191 = math.exp %190 : vector<16x128xf32>
    %cst_64 = arith.constant 1.000000e+00 : f32
    %192 = vector.broadcast %cst_64 : f32 to vector<16x128xf32>
    %193 = arith.addf %192, %191 : vector<16x128xf32>
    %194 = arith.divf %192, %193 : vector<16x128xf32>
    %195 = vector.extract_strided_slice %188 {offsets = [0, 128], sizes = [16, 128], strides = [1, 1]} : vector<16x512xf32> to vector<16x128xf32>
    %196 = arith.negf %195 : vector<16x128xf32>
    %197 = math.exp %196 : vector<16x128xf32>
    %cst_65 = arith.constant 1.000000e+00 : f32
    %198 = vector.broadcast %cst_65 : f32 to vector<16x128xf32>
    %199 = arith.addf %198, %197 : vector<16x128xf32>
    %200 = arith.divf %198, %199 : vector<16x128xf32>
    %201 = vector.extract_strided_slice %188 {offsets = [0, 256], sizes = [16, 128], strides = [1, 1]} : vector<16x512xf32> to vector<16x128xf32>
    %202 = math.tanh %201 : vector<16x128xf32>
    %203 = vector.extract_strided_slice %188 {offsets = [0, 384], sizes = [16, 128], strides = [1, 1]} : vector<16x512xf32> to vector<16x128xf32>
    %204 = arith.negf %203 : vector<16x128xf32>
    %205 = math.exp %204 : vector<16x128xf32>
    %cst_66 = arith.constant 1.000000e+00 : f32
    %206 = vector.broadcast %cst_66 : f32 to vector<16x128xf32>
    %207 = arith.addf %206, %205 : vector<16x128xf32>
    %208 = arith.divf %206, %207 : vector<16x128xf32>
    %209 = arith.mulf %200, %171 : vector<16x128xf32>
    %210 = arith.mulf %194, %202 : vector<16x128xf32>
    %211 = arith.addf %209, %210 : vector<16x128xf32>
    %212 = math.tanh %211 : vector<16x128xf32>
    %213 = arith.mulf %208, %212 : vector<16x128xf32>
    %214 = arith.truncf %213 : vector<16x128xf32> to vector<16x128xbf16>
    %215 = arith.index_cast %182 : i32 to index
    %c0_67 = arith.constant 0 : index
    %c0_68 = arith.constant 0 : index
    %216 = vector.load %arg6[%215, %c0_67, %c0_68] : memref<8x16x128xbf16, #tpu.memory_space<vmem>>, vector<1x16x128xbf16>
    %217 = vector.shape_cast %216 : vector<1x16x128xbf16> to vector<16x128xbf16>
    %218 = vector.shape_cast %214 : vector<16x128xbf16> to vector<1x16x128xbf16>
    tpu.vector_store %arg6[%215, %c0_67, %c0_68], %218 {strides = array<i32>} : memref<8x16x128xbf16, #tpu.memory_space<vmem>>, vector<1x16x128xbf16>,
    %c5_i32 = arith.constant 5 : i32
    %c2_i32_69 = arith.constant 2 : i32
    %219 = arith.muli %c2_i32_69, %c5_i32 : i32
    %c7_i32_70 = arith.constant 7 : i32
    %220 = arith.subi %c7_i32_70, %219 : i32
    %221 = arith.muli %arg0, %220 : i32
    %222 = arith.addi %c5_i32, %221 : i32
    %223 = arith.index_cast %222 : i32 to index
    %c0_71 = arith.constant 0 : index
    %c0_72 = arith.constant 0 : index
    %224 = vector.load %arg9[%223, %c0_71, %c0_72] : memref<8x16x512xf32, #tpu.memory_space<vmem>>, vector<1x16x512xf32>
    %225 = vector.shape_cast %224 : vector<1x16x512xf32> to vector<16x512xf32>
    %226 = arith.truncf %213 : vector<16x128xf32> to vector<16x128xbf16>
    %cst_73 = arith.constant dense<0.000000e+00> : vector<16x512xf32>
    %227 = tpu.matmul %226, %16, %cst_73 {dimension_numbers = #tpu.dot_dimension_numbers<[1], [0], [0], [1], [0, 0, 1, 1], [], []>} : vector<16x128xbf16>, vector<128x512xbf16>, vector<16x512xf32> -> vector<16x512xf32>
    %228 = arith.addf %225, %227 : vector<16x512xf32>
    %229 = vector.extract_strided_slice %228 {offsets = [0, 0], sizes = [16, 128], strides = [1, 1]} : vector<16x512xf32> to vector<16x128xf32>
    %230 = arith.negf %229 : vector<16x128xf32>
    %231 = math.exp %230 : vector<16x128xf32>
    %cst_74 = arith.constant 1.000000e+00 : f32
    %232 = vector.broadcast %cst_74 : f32 to vector<16x128xf32>
    %233 = arith.addf %232, %231 : vector<16x128xf32>
    %234 = arith.divf %232, %233 : vector<16x128xf32>
    %235 = vector.extract_strided_slice %228 {offsets = [0, 128], sizes = [16, 128], strides = [1, 1]} : vector<16x512xf32> to vector<16x128xf32>
    %236 = arith.negf %235 : vector<16x128xf32>
    %237 = math.exp %236 : vector<16x128xf32>
    %cst_75 = arith.constant 1.000000e+00 : f32
    %238 = vector.broadcast %cst_75 : f32 to vector<16x128xf32>
    %239 = arith.addf %238, %237 : vector<16x128xf32>
    %240 = arith.divf %238, %239 : vector<16x128xf32>
    %241 = vector.extract_strided_slice %228 {offsets = [0, 256], sizes = [16, 128], strides = [1, 1]} : vector<16x512xf32> to vector<16x128xf32>
    %242 = math.tanh %241 : vector<16x128xf32>
    %243 = vector.extract_strided_slice %228 {offsets = [0, 384], sizes = [16, 128], strides = [1, 1]} : vector<16x512xf32> to vector<16x128xf32>
    %244 = arith.negf %243 : vector<16x128xf32>
    %245 = math.exp %244 : vector<16x128xf32>
    %cst_76 = arith.constant 1.000000e+00 : f32
    %246 = vector.broadcast %cst_76 : f32 to vector<16x128xf32>
    %247 = arith.addf %246, %245 : vector<16x128xf32>
    %248 = arith.divf %246, %247 : vector<16x128xf32>
    %249 = arith.mulf %240, %211 : vector<16x128xf32>
    %250 = arith.mulf %234, %242 : vector<16x128xf32>
    %251 = arith.addf %249, %250 : vector<16x128xf32>
    %252 = math.tanh %251 : vector<16x128xf32>
    %253 = arith.mulf %248, %252 : vector<16x128xf32>
    %254 = arith.truncf %253 : vector<16x128xf32> to vector<16x128xbf16>
    %255 = arith.index_cast %222 : i32 to index
    %c0_77 = arith.constant 0 : index
    %c0_78 = arith.constant 0 : index
    %256 = vector.load %arg6[%255, %c0_77, %c0_78] : memref<8x16x128xbf16, #tpu.memory_space<vmem>>, vector<1x16x128xbf16>
    %257 = vector.shape_cast %256 : vector<1x16x128xbf16> to vector<16x128xbf16>
    %258 = vector.shape_cast %254 : vector<16x128xbf16> to vector<1x16x128xbf16>
    tpu.vector_store %arg6[%255, %c0_77, %c0_78], %258 {strides = array<i32>} : memref<8x16x128xbf16, #tpu.memory_space<vmem>>, vector<1x16x128xbf16>,
    %c6_i32 = arith.constant 6 : i32
    %c2_i32_79 = arith.constant 2 : i32
    %259 = arith.muli %c2_i32_79, %c6_i32 : i32
    %c7_i32_80 = arith.constant 7 : i32
    %260 = arith.subi %c7_i32_80, %259 : i32
    %261 = arith.muli %arg0, %260 : i32
    %262 = arith.addi %c6_i32, %261 : i32
    %263 = arith.index_cast %262 : i32 to index
    %c0_81 = arith.constant 0 : index
    %c0_82 = arith.constant 0 : index
    %264 = vector.load %arg9[%263, %c0_81, %c0_82] : memref<8x16x512xf32, #tpu.memory_space<vmem>>, vector<1x16x512xf32>
    %265 = vector.shape_cast %264 : vector<1x16x512xf32> to vector<16x512xf32>
    %266 = arith.truncf %253 : vector<16x128xf32> to vector<16x128xbf16>
    %cst_83 = arith.constant dense<0.000000e+00> : vector<16x512xf32>
    %267 = tpu.matmul %266, %16, %cst_83 {dimension_numbers = #tpu.dot_dimension_numbers<[1], [0], [0], [1], [0, 0, 1, 1], [], []>} : vector<16x128xbf16>, vector<128x512xbf16>, vector<16x512xf32> -> vector<16x512xf32>
    %268 = arith.addf %265, %267 : vector<16x512xf32>
    %269 = vector.extract_strided_slice %268 {offsets = [0, 0], sizes = [16, 128], strides = [1, 1]} : vector<16x512xf32> to vector<16x128xf32>
    %270 = arith.negf %269 : vector<16x128xf32>
    %271 = math.exp %270 : vector<16x128xf32>
    %cst_84 = arith.constant 1.000000e+00 : f32
    %272 = vector.broadcast %cst_84 : f32 to vector<16x128xf32>
    %273 = arith.addf %272, %271 : vector<16x128xf32>
    %274 = arith.divf %272, %273 : vector<16x128xf32>
    %275 = vector.extract_strided_slice %268 {offsets = [0, 128], sizes = [16, 128], strides = [1, 1]} : vector<16x512xf32> to vector<16x128xf32>
    %276 = arith.negf %275 : vector<16x128xf32>
    %277 = math.exp %276 : vector<16x128xf32>
    %cst_85 = arith.constant 1.000000e+00 : f32
    %278 = vector.broadcast %cst_85 : f32 to vector<16x128xf32>
    %279 = arith.addf %278, %277 : vector<16x128xf32>
    %280 = arith.divf %278, %279 : vector<16x128xf32>
    %281 = vector.extract_strided_slice %268 {offsets = [0, 256], sizes = [16, 128], strides = [1, 1]} : vector<16x512xf32> to vector<16x128xf32>
    %282 = math.tanh %281 : vector<16x128xf32>
    %283 = vector.extract_strided_slice %268 {offsets = [0, 384], sizes = [16, 128], strides = [1, 1]} : vector<16x512xf32> to vector<16x128xf32>
    %284 = arith.negf %283 : vector<16x128xf32>
    %285 = math.exp %284 : vector<16x128xf32>
    %cst_86 = arith.constant 1.000000e+00 : f32
    %286 = vector.broadcast %cst_86 : f32 to vector<16x128xf32>
    %287 = arith.addf %286, %285 : vector<16x128xf32>
    %288 = arith.divf %286, %287 : vector<16x128xf32>
    %289 = arith.mulf %280, %251 : vector<16x128xf32>
    %290 = arith.mulf %274, %282 : vector<16x128xf32>
    %291 = arith.addf %289, %290 : vector<16x128xf32>
    %292 = math.tanh %291 : vector<16x128xf32>
    %293 = arith.mulf %288, %292 : vector<16x128xf32>
    %294 = arith.truncf %293 : vector<16x128xf32> to vector<16x128xbf16>
    %295 = arith.index_cast %262 : i32 to index
    %c0_87 = arith.constant 0 : index
    %c0_88 = arith.constant 0 : index
    %296 = vector.load %arg6[%295, %c0_87, %c0_88] : memref<8x16x128xbf16, #tpu.memory_space<vmem>>, vector<1x16x128xbf16>
    %297 = vector.shape_cast %296 : vector<1x16x128xbf16> to vector<16x128xbf16>
    %298 = vector.shape_cast %294 : vector<16x128xbf16> to vector<1x16x128xbf16>
    tpu.vector_store %arg6[%295, %c0_87, %c0_88], %298 {strides = array<i32>} : memref<8x16x128xbf16, #tpu.memory_space<vmem>>, vector<1x16x128xbf16>,
    %c7_i32_89 = arith.constant 7 : i32
    %c2_i32_90 = arith.constant 2 : i32
    %299 = arith.muli %c2_i32_90, %c7_i32_89 : i32
    %c7_i32_91 = arith.constant 7 : i32
    %300 = arith.subi %c7_i32_91, %299 : i32
    %301 = arith.muli %arg0, %300 : i32
    %302 = arith.addi %c7_i32_89, %301 : i32
    %303 = arith.index_cast %302 : i32 to index
    %c0_92 = arith.constant 0 : index
    %c0_93 = arith.constant 0 : index
    %304 = vector.load %arg9[%303, %c0_92, %c0_93] : memref<8x16x512xf32, #tpu.memory_space<vmem>>, vector<1x16x512xf32>
    %305 = vector.shape_cast %304 : vector<1x16x512xf32> to vector<16x512xf32>
    %306 = arith.truncf %293 : vector<16x128xf32> to vector<16x128xbf16>
    %cst_94 = arith.constant dense<0.000000e+00> : vector<16x512xf32>
    %307 = tpu.matmul %306, %16, %cst_94 {dimension_numbers = #tpu.dot_dimension_numbers<[1], [0], [0], [1], [0, 0, 1, 1], [], []>} : vector<16x128xbf16>, vector<128x512xbf16>, vector<16x512xf32> -> vector<16x512xf32>
    %308 = arith.addf %305, %307 : vector<16x512xf32>
    %309 = vector.extract_strided_slice %308 {offsets = [0, 0], sizes = [16, 128], strides = [1, 1]} : vector<16x512xf32> to vector<16x128xf32>
    %310 = arith.negf %309 : vector<16x128xf32>
    %311 = math.exp %310 : vector<16x128xf32>
    %cst_95 = arith.constant 1.000000e+00 : f32
    %312 = vector.broadcast %cst_95 : f32 to vector<16x128xf32>
    %313 = arith.addf %312, %311 : vector<16x128xf32>
    %314 = arith.divf %312, %313 : vector<16x128xf32>
    %315 = vector.extract_strided_slice %308 {offsets = [0, 128], sizes = [16, 128], strides = [1, 1]} : vector<16x512xf32> to vector<16x128xf32>
    %316 = arith.negf %315 : vector<16x128xf32>
    %317 = math.exp %316 : vector<16x128xf32>
    %cst_96 = arith.constant 1.000000e+00 : f32
    %318 = vector.broadcast %cst_96 : f32 to vector<16x128xf32>
    %319 = arith.addf %318, %317 : vector<16x128xf32>
    %320 = arith.divf %318, %319 : vector<16x128xf32>
    %321 = vector.extract_strided_slice %308 {offsets = [0, 256], sizes = [16, 128], strides = [1, 1]} : vector<16x512xf32> to vector<16x128xf32>
    %322 = math.tanh %321 : vector<16x128xf32>
    %323 = vector.extract_strided_slice %308 {offsets = [0, 384], sizes = [16, 128], strides = [1, 1]} : vector<16x512xf32> to vector<16x128xf32>
    %324 = arith.negf %323 : vector<16x128xf32>
    %325 = math.exp %324 : vector<16x128xf32>
    %cst_97 = arith.constant 1.000000e+00 : f32
    %326 = vector.broadcast %cst_97 : f32 to vector<16x128xf32>
    %327 = arith.addf %326, %325 : vector<16x128xf32>
    %328 = arith.divf %326, %327 : vector<16x128xf32>
    %329 = arith.mulf %320, %291 : vector<16x128xf32>
    %330 = arith.mulf %314, %322 : vector<16x128xf32>
    %331 = arith.addf %329, %330 : vector<16x128xf32>
    %332 = math.tanh %331 : vector<16x128xf32>
    %333 = arith.mulf %328, %332 : vector<16x128xf32>
    %334 = arith.truncf %333 : vector<16x128xf32> to vector<16x128xbf16>
    %335 = arith.index_cast %302 : i32 to index
    %c0_98 = arith.constant 0 : index
    %c0_99 = arith.constant 0 : index
    %336 = vector.load %arg6[%335, %c0_98, %c0_99] : memref<8x16x128xbf16, #tpu.memory_space<vmem>>, vector<1x16x128xbf16>
    %337 = vector.shape_cast %336 : vector<1x16x128xbf16> to vector<16x128xbf16>
    %338 = vector.shape_cast %334 : vector<16x128xbf16> to vector<1x16x128xbf16>
    tpu.vector_store %arg6[%335, %c0_98, %c0_99], %338 {strides = array<i32>} : memref<8x16x128xbf16, #tpu.memory_space<vmem>>, vector<1x16x128xbf16>,
    %c8_i32 = arith.constant 8 : i32
    %c0_100 = arith.constant 0 : index
    %c0_101 = arith.constant 0 : index
    %339 = vector.load %arg7[%c0_100, %c0_101] : memref<16x128xf32, #tpu.memory_space<vmem>>, vector<16x128xf32>
    tpu.vector_store %arg7[%c0_100, %c0_101], %333 {strides = array<i32>} : memref<16x128xf32, #tpu.memory_space<vmem>>, vector<16x128xf32>,
    %c0_102 = arith.constant 0 : index
    %c0_103 = arith.constant 0 : index
    %340 = vector.load %arg8[%c0_102, %c0_103] : memref<16x128xf32, #tpu.memory_space<vmem>>, vector<16x128xf32>
    tpu.vector_store %arg8[%c0_102, %c0_103], %331 {strides = array<i32>} : memref<16x128xf32, #tpu.memory_space<vmem>>, vector<16x128xf32>,
    return
  }
  func.func @transform_0(%arg0: i32, %arg1: i32) -> (i32, i32, i32) {
    %c2_i32 = arith.constant 2 : i32
    %0 = arith.muli %c2_i32, %arg1 : i32
    %c1_i32 = arith.constant 1 : i32
    %1 = arith.subi %c1_i32, %0 : i32
    %2 = arith.muli %arg0, %1 : i32
    %3 = arith.addi %arg1, %2 : i32
    %c0_i32 = arith.constant 0 : i32
    %c0_i32_0 = arith.constant 0 : i32
    %c0_i32_1 = arith.constant 0 : i32
    return %3, %c0_i32, %c0_i32_0 : i32, i32, i32
  }
  func.func @transform_1(%arg0: i32, %arg1: i32) -> (i32, i32, i32) {
    %c0_i32 = arith.constant 0 : i32
    %c0_i32_0 = arith.constant 0 : i32
    %c0_i32_1 = arith.constant 0 : i32
    return %arg0, %c0_i32, %c0_i32_0 : i32, i32, i32
  }
  func.func @transform_2(%arg0: i32, %arg1: i32) -> (i32, i32, i32) {
    %c0_i32 = arith.constant 0 : i32
    %c0_i32_0 = arith.constant 0 : i32
    %c0_i32_1 = arith.constant 0 : i32
    return %arg0, %c0_i32, %c0_i32_0 : i32, i32, i32
  }
  func.func @transform_3(%arg0: i32, %arg1: i32) -> (i32, i32, i32) {
    %c0_i32 = arith.constant 0 : i32
    %c0_i32_0 = arith.constant 0 : i32
    %c0_i32_1 = arith.constant 0 : i32
    return %arg0, %c0_i32, %c0_i32_0 : i32, i32, i32
  }
  func.func @transform_4(%arg0: i32, %arg1: i32) -> (i32, i32, i32) {
    %c2_i32 = arith.constant 2 : i32
    %0 = arith.muli %c2_i32, %arg1 : i32
    %c1_i32 = arith.constant 1 : i32
    %1 = arith.subi %c1_i32, %0 : i32
    %2 = arith.muli %arg0, %1 : i32
    %3 = arith.addi %arg1, %2 : i32
    %c0_i32 = arith.constant 0 : i32
    %c0_i32_0 = arith.constant 0 : i32
    return %3, %c0_i32, %arg0 : i32, i32, i32
  }
}

module attributes {stable_mosaic.version = 11 : i64} {
  func.func @_pool_kernel(%arg0: i32, %arg1: memref<16x16x256xbf16, #tpu.memory_space<vmem>>, %arg2: memref<16x16x1xf32, #tpu.memory_space<vmem>>, %arg3: memref<16x256xf32, #tpu.memory_space<vmem>>, %arg4: memref<16x256xf32, #tpu.memory_space<vmem>>) attributes {dimension_semantics = [#tpu.dimension_semantics<arbitrary>], iteration_bounds = array<i64: 1>, scalar_prefetch = 0 : i64, scratch_operands = 0 : i64, tpu.core_type = #tpu.core_type<tc>, window_params = [{pipeline_mode = #tpu.pipeline_mode<synchronous>, transform_indices = @transform_0, window_bounds = array<i64: 16, 16, 256>}, {pipeline_mode = #tpu.pipeline_mode<synchronous>, transform_indices = @transform_1, window_bounds = array<i64: 16, 16, 1>}, {pipeline_mode = #tpu.pipeline_mode<synchronous>, transform_indices = @transform_2, window_bounds = array<i64: 16, 256>}, {pipeline_mode = #tpu.pipeline_mode<synchronous>, transform_indices = @transform_3, window_bounds = array<i64: 16, 256>}]} {
    %c0 = arith.constant 0 : index
    %c0_0 = arith.constant 0 : index
    %c0_1 = arith.constant 0 : index
    %0 = vector.load %arg1[%c0, %c0_0, %c0_1] : memref<16x16x256xbf16, #tpu.memory_space<vmem>>, vector<16x16x256xbf16>
    %1 = arith.extf %0 : vector<16x16x256xbf16> to vector<16x16x256xf32>
    %c0_2 = arith.constant 0 : index
    %c0_3 = arith.constant 0 : index
    %c0_4 = arith.constant 0 : index
    %2 = vector.load %arg2[%c0_2, %c0_3, %c0_4] : memref<16x16x1xf32, #tpu.memory_space<vmem>>, vector<16x16x1xf32>
    %3 = vector.broadcast %2 : vector<16x16x1xf32> to vector<16x16x256xf32>
    %4 = arith.mulf %1, %3 : vector<16x16x256xf32>
    %cst = arith.constant dense<0.000000e+00> : vector<16x256xf32>
    %5 = vector.multi_reduction <add>, %4, %cst [0] : vector<16x16x256xf32> to vector<16x256xf32>
    %cst_5 = arith.constant dense<0.000000e+00> : vector<16x1xf32>
    %6 = vector.multi_reduction <add>, %2, %cst_5 [0] : vector<16x16x1xf32> to vector<16x1xf32>
    %7 = vector.broadcast %6 : vector<16x1xf32> to vector<16x256xf32>
    %8 = arith.divf %5, %7 : vector<16x256xf32>
    %c0_6 = arith.constant 0 : index
    %c0_7 = arith.constant 0 : index
    %9 = vector.load %arg3[%c0_6, %c0_7] : memref<16x256xf32, #tpu.memory_space<vmem>>, vector<16x256xf32>
    tpu.vector_store %arg3[%c0_6, %c0_7], %8 {strides = array<i32>} : memref<16x256xf32, #tpu.memory_space<vmem>>, vector<16x256xf32>,
    %cst_8 = arith.constant 0.000000e+00 : f32
    %10 = vector.broadcast %cst_8 : f32 to vector<16x16x1xf32>
    %11 = arith.cmpf ogt, %2, %10 : vector<16x16x1xf32>
    %cst_9 = arith.constant -1.000000e+06 : f32
    %12 = vector.shape_cast %11 : vector<16x16x1xi1> to vector<16x16x1xi1>
    %13 = vector.broadcast %12 : vector<16x16x1xi1> to vector<16x16x256xi1>
    %14 = vector.broadcast %cst_9 : f32 to vector<16x16x256xf32>
    %15 = arith.select %13, %1, %14 : vector<16x16x256xi1>, vector<16x16x256xf32>
    %cst_10 = arith.constant dense<0xFF800000> : vector<16x256xf32>
    %16 = vector.multi_reduction <maximumf>, %15, %cst_10 [0] : vector<16x16x256xf32> to vector<16x256xf32>
    %c0_11 = arith.constant 0 : index
    %c0_12 = arith.constant 0 : index
    %17 = vector.load %arg4[%c0_11, %c0_12] : memref<16x256xf32, #tpu.memory_space<vmem>>, vector<16x256xf32>
    tpu.vector_store %arg4[%c0_11, %c0_12], %16 {strides = array<i32>} : memref<16x256xf32, #tpu.memory_space<vmem>>, vector<16x256xf32>,
    return
  }
  func.func @transform_0(%arg0: i32) -> (i32, i32, i32) {
    %c0_i32 = arith.constant 0 : i32
    %c0_i32_0 = arith.constant 0 : i32
    %c0_i32_1 = arith.constant 0 : i32
    %c0_i32_2 = arith.constant 0 : i32
    return %c0_i32, %c0_i32_0, %c0_i32_1 : i32, i32, i32
  }
  func.func @transform_1(%arg0: i32) -> (i32, i32, i32) {
    %c0_i32 = arith.constant 0 : i32
    %c0_i32_0 = arith.constant 0 : i32
    %c0_i32_1 = arith.constant 0 : i32
    %c0_i32_2 = arith.constant 0 : i32
    return %c0_i32, %c0_i32_0, %c0_i32_1 : i32, i32, i32
  }
  func.func @transform_2(%arg0: i32) -> (i32, i32) {
    %c0_i32 = arith.constant 0 : i32
    %c0_i32_0 = arith.constant 0 : i32
    %c0_i32_1 = arith.constant 0 : i32
    return %c0_i32, %c0_i32_0 : i32, i32
  }
  func.func @transform_3(%arg0: i32) -> (i32, i32) {
    %c0_i32 = arith.constant 0 : i32
    %c0_i32_0 = arith.constant 0 : i32
    %c0_i32_1 = arith.constant 0 : i32
    return %c0_i32, %c0_i32_0 : i32, i32
  }
}

module attributes {stable_mosaic.version = 11 : i64} {
  func.func @_linear_kernel(%arg0: i32, %arg1: i32, %arg2: i32, %arg3: memref<8x512xbf16, #tpu.memory_space<vmem>>, %arg4: memref<512x128xbf16, #tpu.memory_space<vmem>>, %arg5: memref<1x128xf32, #tpu.memory_space<vmem>>, %arg6: memref<8x128xf32, #tpu.memory_space<vmem>>, %arg7: memref<8x128xf32, #tpu.memory_space<vmem>>) attributes {dimension_semantics = [#tpu.dimension_semantics<parallel>, #tpu.dimension_semantics<parallel>, #tpu.dimension_semantics<arbitrary>], iteration_bounds = array<i64: 1, 1, 2>, scalar_prefetch = 0 : i64, scratch_operands = 1 : i64, tpu.core_type = #tpu.core_type<tc>, window_params = [{transform_indices = @transform_0, window_bounds = array<i64: 8, 512>}, {transform_indices = @transform_1, window_bounds = array<i64: 512, 128>}, {transform_indices = @transform_2, window_bounds = array<i64: 1, 128>}, {transform_indices = @transform_3, window_bounds = array<i64: 8, 128>}]} {
    %c0_i32 = arith.constant 0 : i32
    %0 = arith.cmpi eq, %arg2, %c0_i32 : i32
    %1 = arith.extui %0 : i1 to i32
    %c0_i32_0 = arith.constant 0 : i32
    %2 = arith.cmpi ne, %1, %c0_i32_0 : i32
    scf.if %2 {
      %cst_9 = arith.constant 0.000000e+00 : f32
      %12 = vector.broadcast %cst_9 : f32 to vector<8x128xf32>
      %c0_10 = arith.constant 0 : index
      %c0_11 = arith.constant 0 : index
      %13 = vector.load %arg7[%c0_10, %c0_11] : memref<8x128xf32, #tpu.memory_space<vmem>>, vector<8x128xf32>
      tpu.vector_store %arg7[%c0_10, %c0_11], %12 {strides = array<i32>} : memref<8x128xf32, #tpu.memory_space<vmem>>, vector<8x128xf32>,
    } else {
    }
    %c0 = arith.constant 0 : index
    %c0_1 = arith.constant 0 : index
    %3 = vector.load %arg7[%c0, %c0_1] : memref<8x128xf32, #tpu.memory_space<vmem>>, vector<8x128xf32>
    %c0_2 = arith.constant 0 : index
    %c0_3 = arith.constant 0 : index
    %4 = vector.load %arg3[%c0_2, %c0_3] : memref<8x512xbf16, #tpu.memory_space<vmem>>, vector<8x512xbf16>
    %c0_4 = arith.constant 0 : index
    %c0_5 = arith.constant 0 : index
    %5 = vector.load %arg4[%c0_4, %c0_5] : memref<512x128xbf16, #tpu.memory_space<vmem>>, vector<512x128xbf16>
    %cst = arith.constant dense<0.000000e+00> : vector<8x128xf32>
    %6 = tpu.matmul %4, %5, %cst {dimension_numbers = #tpu.dot_dimension_numbers<[1], [0], [0], [1], [0, 0, 1, 1], [], []>} : vector<8x512xbf16>, vector<512x128xbf16>, vector<8x128xf32> -> vector<8x128xf32>
    %7 = arith.addf %3, %6 : vector<8x128xf32>
    %c0_6 = arith.constant 0 : index
    %c0_7 = arith.constant 0 : index
    %8 = vector.load %arg7[%c0_6, %c0_7] : memref<8x128xf32, #tpu.memory_space<vmem>>, vector<8x128xf32>
    tpu.vector_store %arg7[%c0_6, %c0_7], %7 {strides = array<i32>} : memref<8x128xf32, #tpu.memory_space<vmem>>, vector<8x128xf32>,
    %c1_i32 = arith.constant 1 : i32
    %9 = arith.cmpi eq, %arg2, %c1_i32 : i32
    %10 = arith.extui %9 : i1 to i32
    %c0_i32_8 = arith.constant 0 : i32
    %11 = arith.cmpi ne, %10, %c0_i32_8 : i32
    scf.if %11 {
      %c0_9 = arith.constant 0 : index
      %c0_10 = arith.constant 0 : index
      %12 = vector.load %arg7[%c0_9, %c0_10] : memref<8x128xf32, #tpu.memory_space<vmem>>, vector<8x128xf32>
      %c0_11 = arith.constant 0 : index
      %c0_12 = arith.constant 0 : index
      %13 = vector.load %arg5[%c0_11, %c0_12] : memref<1x128xf32, #tpu.memory_space<vmem>>, vector<1x128xf32>
      %14 = vector.broadcast %13 : vector<1x128xf32> to vector<8x128xf32>
      %15 = arith.addf %12, %14 : vector<8x128xf32>
      %16 = math.tanh %15 : vector<8x128xf32>
      %c0_13 = arith.constant 0 : index
      %c0_14 = arith.constant 0 : index
      %17 = vector.load %arg6[%c0_13, %c0_14] : memref<8x128xf32, #tpu.memory_space<vmem>>, vector<8x128xf32>
      tpu.vector_store %arg6[%c0_13, %c0_14], %16 {strides = array<i32>} : memref<8x128xf32, #tpu.memory_space<vmem>>, vector<8x128xf32>,
    } else {
    }
    return
  }
  func.func @transform_0(%arg0: i32, %arg1: i32, %arg2: i32) -> (i32, i32) {
    %c0_i32 = arith.constant 0 : i32
    return %arg0, %arg2 : i32, i32
  }
  func.func @transform_1(%arg0: i32, %arg1: i32, %arg2: i32) -> (i32, i32) {
    %c0_i32 = arith.constant 0 : i32
    return %arg2, %arg1 : i32, i32
  }
  func.func @transform_2(%arg0: i32, %arg1: i32, %arg2: i32) -> (i32, i32) {
    %c0_i32 = arith.constant 0 : i32
    %c0_i32_0 = arith.constant 0 : i32
    return %c0_i32, %arg1 : i32, i32
  }
  func.func @transform_3(%arg0: i32, %arg1: i32, %arg2: i32) -> (i32, i32) {
    %c0_i32 = arith.constant 0 : i32
    return %arg0, %arg1 : i32, i32
  }
}

module attributes {stable_mosaic.version = 11 : i64} {
  func.func @_log_softmax_kernel(%arg0: i32, %arg1: memref<8x3xf32, #tpu.memory_space<vmem>>, %arg2: memref<8x3xf32, #tpu.memory_space<vmem>>) attributes {dimension_semantics = [#tpu.dimension_semantics<arbitrary>], iteration_bounds = array<i64: 1>, scalar_prefetch = 0 : i64, scratch_operands = 0 : i64, tpu.core_type = #tpu.core_type<tc>, window_params = [{pipeline_mode = #tpu.pipeline_mode<synchronous>, transform_indices = @transform_0, window_bounds = array<i64: 8, 3>}, {pipeline_mode = #tpu.pipeline_mode<synchronous>, transform_indices = @transform_1, window_bounds = array<i64: 8, 3>}]} {
    %c0 = arith.constant 0 : index
    %c0_0 = arith.constant 0 : index
    %0 = vector.load %arg1[%c0, %c0_0] : memref<8x3xf32, #tpu.memory_space<vmem>>, vector<8x3xf32>
    %cst = arith.constant dense<0xFF800000> : vector<8xf32>
    %1 = vector.multi_reduction <maximumf>, %0, %cst [1] : vector<8x3xf32> to vector<8xf32>
    %2 = vector.shape_cast %1 : vector<8xf32> to vector<8x1xf32>
    %3 = vector.broadcast %2 : vector<8x1xf32> to vector<8x3xf32>
    %4 = arith.subf %0, %3 : vector<8x3xf32>
    %5 = math.exp %4 : vector<8x3xf32>
    %cst_1 = arith.constant dense<0.000000e+00> : vector<8xf32>
    %6 = vector.multi_reduction <add>, %5, %cst_1 [1] : vector<8x3xf32> to vector<8xf32>
    %7 = vector.shape_cast %6 : vector<8xf32> to vector<8x1xf32>
    %8 = math.log %7 : vector<8x1xf32>
    %9 = vector.broadcast %8 : vector<8x1xf32> to vector<8x3xf32>
    %10 = arith.subf %4, %9 : vector<8x3xf32>
    %c0_2 = arith.constant 0 : index
    %c0_3 = arith.constant 0 : index
    %11 = vector.load %arg2[%c0_2, %c0_3] : memref<8x3xf32, #tpu.memory_space<vmem>>, vector<8x3xf32>
    tpu.vector_store %arg2[%c0_2, %c0_3], %10 {strides = array<i32>} : memref<8x3xf32, #tpu.memory_space<vmem>>, vector<8x3xf32>,
    return
  }
  func.func @transform_0(%arg0: i32) -> (i32, i32) {
    %c0_i32 = arith.constant 0 : i32
    %c0_i32_0 = arith.constant 0 : i32
    %c0_i32_1 = arith.constant 0 : i32
    return %c0_i32, %c0_i32_0 : i32, i32
  }
  func.func @transform_1(%arg0: i32) -> (i32, i32) {
    %c0_i32 = arith.constant 0 : i32
    %c0_i32_0 = arith.constant 0 : i32
    %c0_i32_1 = arith.constant 0 : i32
    return %c0_i32, %c0_i32_0 : i32, i32
  }
}

module attributes {stable_mosaic.version = 11 : i64} {
  func.func @_linear_kernel(%arg0: i32, %arg1: i32, %arg2: i32, %arg3: memref<8x128xbf16, #tpu.memory_space<vmem>>, %arg4: memref<128x128xbf16, #tpu.memory_space<vmem>>, %arg5: memref<1x128xf32, #tpu.memory_space<vmem>>, %arg6: memref<8x128xf32, #tpu.memory_space<vmem>>, %arg7: memref<8x128xf32, #tpu.memory_space<vmem>>) attributes {dimension_semantics = [#tpu.dimension_semantics<parallel>, #tpu.dimension_semantics<parallel>, #tpu.dimension_semantics<arbitrary>], iteration_bounds = array<i64: 1, 1, 1>, scalar_prefetch = 0 : i64, scratch_operands = 1 : i64, tpu.core_type = #tpu.core_type<tc>, window_params = [{transform_indices = @transform_0, window_bounds = array<i64: 8, 128>}, {transform_indices = @transform_1, window_bounds = array<i64: 128, 128>}, {transform_indices = @transform_2, window_bounds = array<i64: 1, 128>}, {transform_indices = @transform_3, window_bounds = array<i64: 8, 128>}]} {
    %c0_i32 = arith.constant 0 : i32
    %0 = arith.cmpi eq, %arg2, %c0_i32 : i32
    %1 = arith.extui %0 : i1 to i32
    %c0_i32_0 = arith.constant 0 : i32
    %2 = arith.cmpi ne, %1, %c0_i32_0 : i32
    scf.if %2 {
      %cst_10 = arith.constant 0.000000e+00 : f32
      %12 = vector.broadcast %cst_10 : f32 to vector<8x128xf32>
      %c0_11 = arith.constant 0 : index
      %c0_12 = arith.constant 0 : index
      %13 = vector.load %arg7[%c0_11, %c0_12] : memref<8x128xf32, #tpu.memory_space<vmem>>, vector<8x128xf32>
      tpu.vector_store %arg7[%c0_11, %c0_12], %12 {strides = array<i32>} : memref<8x128xf32, #tpu.memory_space<vmem>>, vector<8x128xf32>,
    } else {
    }
    %c0 = arith.constant 0 : index
    %c0_1 = arith.constant 0 : index
    %3 = vector.load %arg7[%c0, %c0_1] : memref<8x128xf32, #tpu.memory_space<vmem>>, vector<8x128xf32>
    %c0_2 = arith.constant 0 : index
    %c0_3 = arith.constant 0 : index
    %4 = vector.load %arg3[%c0_2, %c0_3] : memref<8x128xbf16, #tpu.memory_space<vmem>>, vector<8x128xbf16>
    %c0_4 = arith.constant 0 : index
    %c0_5 = arith.constant 0 : index
    %5 = vector.load %arg4[%c0_4, %c0_5] : memref<128x128xbf16, #tpu.memory_space<vmem>>, vector<128x128xbf16>
    %cst = arith.constant dense<0.000000e+00> : vector<8x128xf32>
    %6 = tpu.matmul %4, %5, %cst {dimension_numbers = #tpu.dot_dimension_numbers<[1], [0], [0], [1], [0, 0, 1, 1], [], []>} : vector<8x128xbf16>, vector<128x128xbf16>, vector<8x128xf32> -> vector<8x128xf32>
    %7 = arith.addf %3, %6 : vector<8x128xf32>
    %c0_6 = arith.constant 0 : index
    %c0_7 = arith.constant 0 : index
    %8 = vector.load %arg7[%c0_6, %c0_7] : memref<8x128xf32, #tpu.memory_space<vmem>>, vector<8x128xf32>
    tpu.vector_store %arg7[%c0_6, %c0_7], %7 {strides = array<i32>} : memref<8x128xf32, #tpu.memory_space<vmem>>, vector<8x128xf32>,
    %c0_i32_8 = arith.constant 0 : i32
    %9 = arith.cmpi eq, %arg2, %c0_i32_8 : i32
    %10 = arith.extui %9 : i1 to i32
    %c0_i32_9 = arith.constant 0 : i32
    %11 = arith.cmpi ne, %10, %c0_i32_9 : i32
    scf.if %11 {
      %c0_10 = arith.constant 0 : index
      %c0_11 = arith.constant 0 : index
      %12 = vector.load %arg7[%c0_10, %c0_11] : memref<8x128xf32, #tpu.memory_space<vmem>>, vector<8x128xf32>
      %c0_12 = arith.constant 0 : index
      %c0_13 = arith.constant 0 : index
      %13 = vector.load %arg5[%c0_12, %c0_13] : memref<1x128xf32, #tpu.memory_space<vmem>>, vector<1x128xf32>
      %14 = vector.broadcast %13 : vector<1x128xf32> to vector<8x128xf32>
      %15 = arith.addf %12, %14 : vector<8x128xf32>
      %c0_14 = arith.constant 0 : index
      %c0_15 = arith.constant 0 : index
      %16 = vector.load %arg6[%c0_14, %c0_15] : memref<8x128xf32, #tpu.memory_space<vmem>>, vector<8x128xf32>
      tpu.vector_store %arg6[%c0_14, %c0_15], %15 {strides = array<i32>} : memref<8x128xf32, #tpu.memory_space<vmem>>, vector<8x128xf32>,
    } else {
    }
    return
  }
  func.func @transform_0(%arg0: i32, %arg1: i32, %arg2: i32) -> (i32, i32) {
    %c0_i32 = arith.constant 0 : i32
    return %arg0, %arg2 : i32, i32
  }
  func.func @transform_1(%arg0: i32, %arg1: i32, %arg2: i32) -> (i32, i32) {
    %c0_i32 = arith.constant 0 : i32
    return %arg2, %arg1 : i32, i32
  }
  func.func @transform_2(%arg0: i32, %arg1: i32, %arg2: i32) -> (i32, i32) {
    %c0_i32 = arith.constant 0 : i32
    %c0_i32_0 = arith.constant 0 : i32
    return %c0_i32, %arg1 : i32, i32
  }
  func.func @transform_3(%arg0: i32, %arg1: i32, %arg2: i32) -> (i32, i32) {
    %c0_i32 = arith.constant 0 : i32
    return %arg0, %arg1 : i32, i32
  }
}

</mosaic_0001>

<bundles_post_ra>
// kernel: tpu_custom_call.1
= control target key start
LH: loop header
LB: loop body
LE: loop exit
PB: predicated region body
PF: predicated region fallthrough
CT: control target
= control target key end

     0   :  { %6 = vsyncpa [#allocation3], 0  ;;  %s102_s0 = inlined_call_operand.hbm [shape: f32[8,128], index: 0, kind: input, shape index: {}]   ;;  %s103_s1 = inlined_call_operand.hbm [shape: f32[8,128], index: 1, kind: output, shape index: {}]  }
   0x1   :  { %7 = vsyncpa [#allocation4], 0  ;;  %s84_s6 = smov [#allocation2]  }
   0x2   :  { %s14_s7 = sshll.u32 %s84_s6, 4  ;;  %s15_s7 = int_to_ptr.vmem [resolvable:$true] %s14_s7 }
   0x3   :  { %s48_s8 = scalar_lea.vmem %s15_s7, 128  ;;  %p53_p1 = scmp.lt.s32.totalorder %s15_s7, %s15_s7 }
   0x4   :  { %p49_p0 = scmp.ne.s32.totalorder %s15_s7, %s48_s8  ;;  %p54_p2 = scmp.lt.s32.totalorder %s48_s8, %s48_s8 }
   0x6   :  { %p55_p3 = por %p54_p2, %p53_p1 }
   0x8   :  { %p56_p4 = pnand %p55_p3, %p49_p0 }
   0xa   :  { %59 = shalt.err (!%p56_p4)
}
   0xb   :  { %17 = dma.hbm_to_vmem [thread:$0]  %s102_s0, 128, %s15_s7, [#allocation3]  }
   0xc   :  { %80 = dma.done.wait [#allocation3], 128  }
   0xd   :  { %81 = vsyncadd [#allocation3], 4294967168  ;;  %s85_s11 = smov [#allocation5]   ;;  %v21_v0 = vld [vmem:[#allocation2] sm:$0xff] }
   0xe   :  { %s29_s12 = sshll.u32 %s85_s11, 4  ;;  %22 = vst [vmem:[#allocation5] sm:$0xff] %v21_v0  ;;  %s30_s12 = int_to_ptr.vmem [resolvable:$true] %s29_s12 }
   0xf   :  { %s60_s13 = scalar_lea.vmem %s30_s12, 128  ;;  %p65_p6 = scmp.lt.s32.totalorder %s30_s12, %s30_s12 }
  0x10   :  { %p61_p5 = scmp.ne.s32.totalorder %s30_s12, %s60_s13  ;;  %p66_p7 = scmp.lt.s32.totalorder %s60_s13, %s60_s13 }
  0x12   :  { %p67_p8 = por %p66_p7, %p65_p6 }
  0x14   :  { %p68_p9 = pnand %p67_p8, %p61_p5 }
  0x16   :  { %71 = shalt.err (!%p68_p9)
}
  0x17   :  { %32 = dma.vmem_to_hbm [thread:$0]  %s30_s12, 128, %s103_s1, [#allocation4]  }
  0x18   :  { %82 = dma.done.wait [#allocation4], 128  }
  0x19   :  { %83 = vsyncadd [#allocation4], 4294967168 }
  0x1a   :  { %36 = vsyncpa [#allocation3], 1 }
  0x1b   :  { %37 = vsyncpa [#allocation4], 1 }

// kernel: finetune_forward.9
= control target key start
LH: loop header
LB: loop body
LE: loop exit
PB: predicated region body
PF: predicated region fallthrough
CT: control target
= control target key end

     0   :  { %s919_s21 = smov 0   ;;  %s999_s0 = inlined_call_operand.vmem [shape: bf16[8,16,256], index: 0, kind: input, shape index: {}]   ;;  %s1000_s1 = inlined_call_operand.vmem [shape: bf16[8,16,256], index: 1, kind: input, shape index: {}]   ;;  %s1001_s2 = inlined_call_operand.vmem [shape: f32[8,16,1], index: 2, kind: input, shape index: {}]   ;;  %s1002_s3 = inlined_call_operand.vmem [shape: f32[8,16,1], index: 3, kind: input, shape index: {}]   ;;  %s1003_s4 = inlined_call_operand.vmem [shape: f32[8,1,16], index: 4, kind: input, shape index: {}]   ;;  %s1004_s5 = inlined_call_operand.vmem [shape: bf16[8,16,256], index: 5, kind: output, shape index: {0}]   ;;  %s1005_s6 = inlined_call_operand.vmem [shape: bf16[8,16,256], index: 6, kind: output, shape index: {1}]  }
   0x1 LB: > { %s798_s22 = sadd.s32 4294967295, %s881_s21   ;;  %p802_p0 = scmp.ge.s32.totalorder %s881_s21, 1  ;;  %s881_s21 = sphi %s919_s21, %s17_s21  }
   0x2   : > { %p253_p1 = scmp.lt.s32.totalorder %s881_s21, 9 }
   0x4   : > { %p254_p2 = pnand %p802_p0, %p253_p1 }
   0x5   : > { %p306_p3 = scmp.lt.s32.totalorder (!%p254_p2), %s798_s22, 7 }
   0x6   : > { %257 = sbr.rel (%p254_p2) target bundleno = 907 (0x38b), region = 40 }
   0xb   : > { %v883_v0 = vmov 0   ;;  %s1007_s22 = smov (!%p306_p3, %s798_s22), 7  ;;  %vm418_vm0 = vcmask 130048  }
   0xc   : > { %847 = vset.pattern.permute.xlu1 %v883_v0  ;;  %545 = vmatprep.mubr.bf16.mxu1 %v883_v0  ;;  %s929_s23 = sshll.u32 %s1007_s22, 4  ;;  %s328_s11 = scalar_lea.vmem %s1003_s4, %s1007_s22 }
   0xd   : > { %s315_s26 = scalar_lea.vmem %s1000_s1, %s929_s23  ;;  %s310_s29 = scalar_lea.vmem %s999_s0, %s929_s23  ;;  %v951_v8 = vld [vmem:[%s328_s11] ss:$0 sm:$0xff] }
   0xe   : > { %v849_v1 = vld [vmem:[%s315_s26 + $0x4] ss:$8 sps:$4 sm:$0xff]   ;;  %s320_s8 = scalar_lea.vmem %s1001_s2, %s929_s23  ;;  %v851_v2 = vld [vmem:[%s315_s26] ss:$8 sps:$4 sm:$0xff]   ;;  %s325_s14 = scalar_lea.vmem %s1002_s3, %s929_s23 }
   0xf   : > { %383 = vmatprep.subr.bf16.mxu0 %v849_v1  ;;  %v854_v3 = vld [vmem:[%s310_s29 + $0x4] ss:$8 sps:$4 sm:$0xff]   ;;  %527 = vmatprep.subr.bf16.mxu1 %v849_v1  ;;  %v943_v6 = vld [vmem:[%s310_s29] ss:$8 sps:$4 sm:$0xff]   ;;  %s333_s17 = scalar_lea.vmem %s1004_s5, %s929_s23  ;;  %s338_s20 = scalar_lea.vmem %s1005_s6, %s929_s23 }
  0x10   : > { %v344_v4 = vld [vmem:[%s320_s8] sm:$0xff]  ;;  %384 = vmatpush1.bf16.xpose.msra.mxu0 %v851_v2  ;;  %401 = vmatprep.mubr.bf16.mxu0 %v854_v3  ;;  %v345_v5 = vld [vmem:[%s320_s8 + $0x8] sm:$0xff] }
  0x11   : > { %457 = vperm.xlu1 %847, %v344_v4   ;;  %528 = vmatpush1.bf16.msra.mxu1 %v851_v2 }
  0x12   : > { %594 = vmatprep.subr.bf16.mxu1 %v854_v3 }
  0x15   : > { %462 = vperm.xlu1 %847, %v345_v5  }
  0x17   : > { %402 = vmatmul.mubr.bf16.vlgmr.msra.gmra.mxu0 %v943_v6 }
  0x8c   : > { %v949_v7 = vpop.permute.xlu1 %457 }
  0x90   : > { %v954_v12 = vpop.permute.xlu1 %462 }
  0xd7   : > { %v403_v9 = vpop.f32.mrf.mxu0 }
  0xd8   : > { %v416_v10 = vmul.f32 %v951_v8, %v403_v9  ;;  %v465_v13 = vmul.f32 %v949_v7, %v403_v9 }
  0xd9   : > { %v405_v11 = vpop.f32.mrf.mxu0 }
  0xda   : > { %v419_v14 = vsel %vm418_vm0, %v416_v10, -inf  ;;  %v467_v19 = vsel %vm418_vm0, %v465_v13, -inf }
  0xdb   : > { %420 = vmax.xlane.f32.xlu0 %v419_v14  ;;  %v406_v15 = vpop.f32.mrf.mxu0 }
  0xdc   : > { %v417_v16 = vmul.f32 %v951_v8, %v406_v15  ;;  %v466_v17 = vmul.f32 %v954_v12, %v406_v15  ;;  %v346_v15 = vld [vmem:[%s325_s14] sm:$0xff] }
  0xdd   : > { %v408_v18 = vpop.f32.mrf.mxu0 }
  0xde   : > { %v468_v20 = vsel %vm418_vm0, %v466_v17, -inf  ;;  %v422_v21 = vsel %vm418_vm0, %v417_v16, -inf }
  0xdf   : > { %v469_v22 = vmax.f32 %v467_v19, %v468_v20  ;;  %423 = vmax.xlane.f32.xlu0 %v422_v21 }
  0xe1   : > { %v470_v23 = vrot.slane %v469_v22, 4 }
  0xe3   : > { %v471_v24 = vmax.f32 %v469_v22, %v470_v23 }
  0xe5   : > { %v472_v25 = vrot.slane %v471_v24, 2 }
  0xe7   : > { %v473_v26 = vmax.f32 %v471_v24, %v472_v25 }
  0xe9   : > { %v474_v27 = vrot.slane %v473_v26, 1 }
  0xeb   : > { %v475_v28 = vmax.f32 %v473_v26, %v474_v27 }
  0xed   : > { %v476_v29 = vsub.f32 %v465_v13, %v475_v28  ;;  %v477_v30 = vsub.f32 %v466_v17, %v475_v28 }
  0xef   : > { %v478_v31 = vmul.f32 1.442695, %v476_v29  ;;  %v480_v32 = vmul.f32 1.442695, %v477_v30 }
  0xf1   : > { %855 = vpow2.f32 %v478_v31 }
  0xf2   : > { %857 = vpow2.f32 %v480_v32 }
  0xfe   : > { %v856_v33 = vpop.eup %855 }
  0xff   : > { %v858_v34 = vpop.eup %857  ;;  %v482_v35 = vsel %vm418_vm0, %v856_v33, 0.0 }
 0x100   : > { %v483_v36 = vsel %vm418_vm0, %v858_v34, 0.0 }
 0x101   : > { %v484_v37 = vadd.f32 %v483_v36, %v482_v35 }
 0x103   : > { %v485_v38 = vrot.slane %v484_v37, 4 }
 0x105   : > { %v486_v39 = vadd.f32 %v485_v38, %v484_v37 }
 0x107   : > { %v487_v40 = vrot.slane %v486_v39, 2 }
 0x109   : > { %v488_v41 = vadd.f32 %v487_v40, %v486_v39 }
 0x10b   : > { %v489_v42 = vrot.slane %v488_v41, 1 }
 0x10d   : > { %v490_v43 = vadd.f32 %v489_v42, %v488_v41 }
 0x10f   : > { %859 = vrcp.f32 %v490_v43 }
 0x11c   : > { %v860_v44 = vpop.eup %859 }
 0x11d   : > { %v492_v45 = vmul.f32 %v860_v44, %v856_v33  ;;  %v493_v46 = vmul.f32 %v860_v44, %v858_v34 }
 0x11f   : > { %v494_v47 = vmul.f32 %v492_v45, %v949_v7  ;;  %v495_v48 = vmul.f32 %v493_v46, %v954_v12 }
 0x121   : > { %v496_v49 = vsel %vm418_vm0, %v494_v47, 0.0  ;;  %v497_v50 = vsel %vm418_vm0, %v495_v48, 0.0 }
 0x122   : > { %v498_v51 = vadd.f32 %v497_v50, %v496_v49 }
 0x124   : > { %v499_v52 = vrot.slane %v498_v51, 4 }
 0x126   : > { %v500_v53 = vadd.f32 %v499_v52, %v498_v51 }
 0x128   : > { %v501_v54 = vrot.slane %v500_v53, 2 }
 0x12a   : > { %v502_v55 = vadd.f32 %v501_v54, %v500_v53 }
 0x12c   : > { %v503_v56 = vrot.slane %v502_v55, 1 }
 0x12e   : > { %v504_v57 = vadd.f32 %v503_v56, %v502_v55 }
 0x130   : > { %v505_v58 = vadd.f32 1e-13, %v504_v57 }
 0x132   : > { %861 = vrcp.f32 %v505_v58 }
 0x13f   : > { %v862_v59 = vpop.eup %861 }
 0x140   : > { %v507_v60 = vmul.f32 %v862_v59, %v494_v47  ;;  %v508_v61 = vmul.f32 %v862_v59, %v495_v48 }
 0x142   : > { %v560_v62 = vpack.c.bf16 %v508_v61, %v507_v60 }
 0x164   : > { %v421_v63 = vpop.xlane.xlu0 %420 }
 0x165   : > { %v425_v1 = vsub.f32 %v416_v10, %v421_v63  ;;  %v347_v10 = vld [vmem:[%s325_s14 + $0x8] sm:$0xff] }
 0x167   : > { %v427_v2 = vmul.f32 1.442695, %v425_v1 }
 0x168   : > { %v424_v3 = vpop.xlane.xlu0 %423 }
 0x169   : > { %863 = vpow2.f32 %v427_v2  ;;  %v426_v4 = vsub.f32 %v417_v16, %v424_v3 }
 0x16b   : > { %v429_v5 = vmul.f32 1.442695, %v426_v4 }
 0x16d   : > { %865 = vpow2.f32 %v429_v5 }
 0x176   : > { %v864_v9 = vpop.eup %863 }
 0x177   : > { %v431_v11 = vsel %vm418_vm0, %v864_v9, 0.0 }
 0x178   : > { %432 = vadd.xlane.f32.xlu0 %v431_v11 }
 0x17a   : > { %v866_v13 = vpop.eup %865 }
 0x17b   : > { %v434_v14 = vsel %vm418_vm0, %v866_v13, 0.0 }
 0x17c   : > { %435 = vadd.xlane.f32.xlu1 %v434_v14 }
 0x18d   : > { %625 = vperm.xlu1 %847, %v346_v15  }
 0x191   : > { %630 = vperm.xlu1 %847, %v347_v10  }
 0x201   : > { %v433_v17 = vpop.xlane.xlu0 %432 }
 0x202   : > { %867 = vrcp.f32 %v433_v17 }
 0x205   : > { %v436_v16 = vpop.xlane.xlu1 %435 }
 0x206   : > { %869 = vrcp.f32 %v436_v16 }
 0x209   : > { %v626_v42 = vpop.permute.xlu1 %625 }
 0x20d   : > { %v631_v49 = vpop.permute.xlu1 %630 }
 0x20f   : > { %v868_v18 = vpop.eup %867 }
 0x210   : > { %v439_v19 = vmul.f32 %v868_v18, %v864_v9 }
 0x212   : > { %v441_v20 = vmul.f32 %v951_v8, %v439_v19 }
 0x213   : > { %v870_v21 = vpop.eup %869 }
 0x214   : > { %v443_v22 = vsel %vm418_vm0, %v441_v20, 0.0  ;;  %v440_v23 = vmul.f32 %v870_v21, %v866_v13 }
 0x215   : > { %444 = vadd.xlane.f32.xlu0 %v443_v22 }
 0x216   : > { %v442_v24 = vmul.f32 %v951_v8, %v440_v23 }
 0x218   : > { %v446_v25 = vsel %vm418_vm0, %v442_v24, 0.0 }
 0x219   : > { %447 = vadd.xlane.f32.xlu0 %v446_v25 }
 0x246   : > { %561 = vxpose.xlu0.c.b16.start.end [1/1] (short) (narrow) %v560_v62, 16 }
 0x24f   : > { %848 = vset.pattern.permute.xlu0 %v883_v0 }
 0x29e   : > { %v445_v26 = vpop.xlane.xlu0 %444 }
 0x29f   : > { %v449_v27 = vadd.f32 1e-13, %v445_v26 }
 0x2a1   : > { %871 = vrcp.f32 %v449_v27 }
 0x2a2   : > { %v448_v28 = vpop.xlane.xlu0 %447 }
 0x2a3   : > { %v450_v29 = vadd.f32 1e-13, %v448_v28 }
 0x2a5   : > { %873 = vrcp.f32 %v450_v29 }
 0x2a8   : > { %v569_v8 = vpop.trf.xlu0 }
 0x2ae   : > { %v872_v30 = vpop.eup %871 }
 0x2af   : > { %v452_v32 = vmul.f32 %v872_v30, %v441_v20 }
 0x2b2   : > { %v874_v31 = vpop.eup %873 }
 0x2b3   : > { %v454_v33 = vmul.f32 %v874_v31, %v442_v24 }
 0x2b5   : > { %v509_v34 = vpack.c.bf16 %v454_v33, %v452_v32 }
 0x2b7   : > { %820 = vmatmul.mubr.msk.bf16.vlgmr.msra.gmra.mxu1 %vm418_vm0, %v509_v34 }
 0x2b8   : > { %595 = vmatpush1.bf16.msra.mxu1 %v943_v6  ;;  %612 = vmatprep.mubr.bf16.mxu1 %v883_v0 }
 0x2bf   : > { %821 = vmatmul.mubr.msk.bf16.vlgmr.msra.gmra.mxu1 %vm418_vm0, %v569_v8 }
 0x377   : > { %v547_v35 = vpop.f32.mrf.mxu1 }
 0x378   : > { %v556_v37 = vmul.f32 %v547_v35, %v949_v7 }
 0x379   : > { %v549_v36 = vpop.f32.mrf.mxu1 }
 0x37a   : > { %v557_v38 = vmul.f32 %v549_v36, %v949_v7 }
 0x37b   : > { %v551_v39 = vpop.f32.mrf.mxu1 }
 0x37c   : > { %v834_v40 = vpack.c.bf16 %v557_v38, %v556_v37  ;;  %v558_v0 = vmul.f32 %v551_v39, %v954_v12 }
 0x37d   : > { %v553_v41 = vpop.f32.mrf.mxu1 }
 0x37e   : > { %649 = vst [vmem:[%s333_s17] sm:$0xff] %v834_v40  ;;  %v559_v6 = vmul.f32 %v553_v41, %v954_v12 }
 0x37f   : > { %v614_v43 = vpop.f32.mrf.mxu1 }
 0x380   : > { %v835_v44 = vpack.c.bf16 %v559_v6, %v558_v0  ;;  %v633_v46 = vmul.f32 %v626_v42, %v614_v43 }
 0x381   : > { %v616_v45 = vpop.f32.mrf.mxu1 }
 0x382   : > { %650 = vst [vmem:[%s333_s17 + $0x8] sm:$0xff] %v835_v44  ;;  %v634_v47 = vmul.f32 %v626_v42, %v616_v45 }
 0x383   : > { %v618_v7 = vpop.f32.mrf.mxu1 }
 0x384   : > { %v836_v48 = vpack.c.bf16 %v634_v47, %v633_v46  ;;  %v635_v51 = vmul.f32 %v631_v49, %v618_v7 }
 0x385   : > { %v620_v50 = vpop.f32.mrf.mxu1 }
 0x386   : > { %663 = vst [vmem:[%s338_s20] sm:$0xff] %v836_v48  ;;  %v636_v52 = vmul.f32 %v631_v49, %v620_v50 }
 0x388   : > { %v837_v53 = vpack.c.bf16 %v636_v52, %v635_v51 }
 0x38a   : > { %664 = vst [vmem:[%s338_s20 + $0x8] sm:$0xff] %v837_v53 }
 0x38b PF: > { %s17_s21 = sadd.s32 1, %s881_s21  }
 0x38c   : > { %p14_p4 = scmp.ge.s32.totalorder %s17_s21, 10  }
 0x38e   :  { %16 = sbr.rel (!%p14_p4) target bundleno = 1 (0x1), region = 94 }

// kernel: finetune_forward.8
= control target key start
LH: loop header
LB: loop body
LE: loop exit
PB: predicated region body
PF: predicated region fallthrough
CT: control target
= control target key end

     0   :  { %s3507_s15 = smov 0   ;;  %s3509_s16 = smov 0   ;;  %s4392_s0 = inlined_call_operand.vmem [shape: bf16[16,16,64], index: 0, kind: input, shape index: {}]   ;;  %s4393_s1 = inlined_call_operand.vmem [shape: bf16[2,64,512], index: 1, kind: input, shape index: {}]   ;;  %s4394_s2 = inlined_call_operand.vmem [shape: bf16[2,128,512], index: 2, kind: input, shape index: {}]   ;;  %s4395_s3 = inlined_call_operand.vmem [shape: f32[2,1,512], index: 3, kind: input, shape index: {}]   ;;  %s4396_s4 = inlined_call_operand.vmem [shape: bf16[16,16,256], index: 4, kind: output, shape index: {}]  }
   0x1   :  { %s3511_s17 = smov 0   ;;  %s3513_s18 = smov 0  }
   0x2   :  { %s3515_s19 = smov 0   ;;  %s3517_s20 = smov 0  }
   0x3   :  { %s3519_s21 = smov 0  }
   0x4 LB: > { %4401 = sst [smem:[#allocation6_spill]] %s3470_s19  ;;  %s23_s22 = sadd.s32 1, %s3470_s19  ;;  %s3478_s21 = sphi %s3519_s21, %s14_s21   ;;  %s3474_s20 = sphi %s3517_s20, %s4409_s20   ;;  %s3470_s19 = sphi %s3515_s19, %s4408_s19   ;;  %s3466_s18 = sphi %s3513_s18, %s4407_s18   ;;  %s3462_s17 = sphi %s3511_s17, %s4406_s17   ;;  %s3458_s16 = sphi %s3509_s16, %s4411_s16   ;;  %s3454_s15 = sphi %s3507_s15, %s4410_s15  }
   0x5   : > { %4402 = sst [smem:[#allocation7_spill]] %s3474_s20  ;;  %p24_p0 = scmp.ge.s32.totalorder %s23_s22, 2 }
   0x6   : > { %s26_s23 = sadd.s32 1, %s3474_s20  ;;  %s2685_s24 = sadd.s32 4294967295, %s3478_s21  }
   0x7   : > { %s2689_s25 = sshll.u32 %s3470_s19, 1  ;;  %s4413_s22 = smov (%p24_p0, %s23_s22), 0 }
   0x8   : > { %4403 = sst [smem:[#allocation8_spill]] %s4413_s22  ;;  %s4415_s23 = smov (!%p24_p0, %s26_s23), %s3474_s20 }
   0x9   : > { %s143_s26 = ssub.s32 1, %s2689_s25  ;;  %s2690_s27 = sshll.u32 %s4413_s22, 1 }
   0xa   : > { %p28_p1 = scmp.ge.s32.totalorder %s4415_s23, 2  ;;  %s144_s28 = smul.u32 %s3474_s20, %s143_s26 }
   0xb   : > { %s147_s29 = ssub.s32 1, %s2690_s27  ;;  %p165_p2 = scmp.ne.s32.totalorder %s3458_s16, %s3454_s15 }
   0xc   : > { %s4417_s23 = smov (%p28_p1, %s4415_s23), 0  ;;  %s145_s30 = sadd.s32 %s3470_s19, %s144_s28 }
   0xd   : > { %4404 = sst [smem:[#allocation9_spill]] %s4417_s23  ;;  %p166_p3 = scmp.eq.s32.totalorder %s2685_s24, 3 }
   0xe   : > { %s148_s5 = smul.u32 %s147_s29, %s4417_s23  ;;  %s151_s6 = ssub.s32 %s3474_s20, %s4417_s23 }
   0xf   : > { %p3559_p4 = por %p166_p3, %p165_p2  ;;  %p2693_p5 = scmp.ge.s32.totalorder %s3478_s21, 1 }
  0x10   : > { %s149_s8 = sadd.s32 %s148_s5, %s4413_s22  ;;  %p231_p6 = scmp.lt.s32.totalorder %s3478_s21, 5 }
  0x11   : > { %s150_s9 = ssub.s32 %s145_s30, %s149_s8  ;;  %s155_s10 = sadd.s32 1, %s3458_s16 }
  0x12   : > { %s152_s11 = sor.u32 %s151_s6, %s150_s9  ;;  %p232_p7 = pnand %p2693_p5, %p231_p6 }
  0x13   : > { %p153_p8 = scmp.eq.s32.totalorder %s152_s11, 0  ;;  %s272_s13 = sand.u32 (!%p232_p7), 1, %s3454_s15  }
  0x14   : > { %235 = sbr.rel (%p232_p7) target bundleno = 2187 (0x88b), region = 36  ;;  %s2695_s14 = sshll.u32 (!%p232_p7), %s3462_s17, 1 }
  0x15   : > { %s3568_s12 = scalar_select %p153_p8, %s3458_s16, %s155_s10  }
  0x16   : > { %s2694_s24 = sshll.u32 (!%p232_p7), %s272_s13, 6  ;;  %s276_s25 = ssub.s32 (!%p232_p7), 1, %s2695_s14 }
  0x17   : > { %s277_s26 = smul.u32 (!%p232_p7), %s3466_s18, %s276_s25  ;;  %p290_p9 = scmp.lt.s32.totalorder (!%p232_p7), %s3466_s18, 1 }
  0x18   : > { %s3599_s19 = scalar_lea.vmem (!%p232_p7), [#allocation5], %s2694_s24  ;;  %p2704_p11 = scmp.ne.s32.totalorder (!%p232_p7), %s3462_s17, 0 }
  0x19   : > { %s3575_s27 = sadd.s32 %s3462_s17, %s277_s26 }
  0x1a   : > { %s2696_s28 = sshll.u32 %s3575_s27, 3 }
  0x1b   : > { %p280_p10 = scmp.lt.s32.totalorder %s2696_s28, 15 }
  0x1c   : > { %s291_s29 = scalar_select %p290_p9, %s3466_s18, 1 }
  0x1d   : > { %s4419_s28 = smov (!%p280_p10, %s2696_s28), 15 }
  0x1e   : > { %s2929_s30 = sshll.u32 %s291_s29, 7  ;;  %s2930_s5 = sshll.u32 %s291_s29, 8 }
  0x1f   : > { %s2928_s6 = sshll.u32 %s4419_s28, 3  ;;  %s3582_s10 = scalar_lea.vmem %s4393_s1, %s2929_s30 }
  0x20   : > { %s3587_s13 = scalar_lea.vmem %s4392_s0, %s2928_s6  ;;  %s3592_s26 = scalar_lea.vmem %s4394_s2, %s2930_s5 }
  0x21   : > { %s2703_s23 = sshll.u32 %s291_s29, 2  ;;  %313 = sbr.rel (%p2704_p11) target bundleno = 41 (0x29), region = 40 }
  0x22   : > { %s3597_s28 = scalar_lea.vmem %s4395_s3, %s2703_s23 }
  0x26   : > { %v3480_v0 = vmov 0.0  }
  0x27   : > { %314 = vst [vmem:[#allocation2] sm:$0xff] %v3480_v0  ;;  %315 = vst [vmem:[#allocation2 + $0x8] sm:$0xff] %v3480_v0 }
  0x28   : > { %316 = vst [vmem:[#allocation3 + $0x8] sm:$0xff] %v3480_v0  ;;  %317 = vst [vmem:[#allocation3] sm:$0xff] %v3480_v0 }
  0x29 PF: > { %v3056_v1 = vld [vmem:[%s3582_s10 + $0x64] ss:$16 sps:$4 sm:$0xff]   ;;  %v3058_v2 = vld [vmem:[%s3582_s10 + $0x6c] ss:$16 sps:$4 sm:$0xff]   ;;  %v3481_v3 = vmov 0   ;;  %vm470_vm0 = vcmask 523264   ;;  %v723_v61 = vlaneseq }
  0x2a   : > { %527 = vmatprep.mubr.bf16.mxu0 %v3481_v3  ;;  %640 = vmatprep.mubr.bf16.mxu1 %v3481_v3  ;;  %v3060_v4 = vld [vmem:[%s3582_s10 + $0x60] ss:$16 sps:$4 sm:$0xff]   ;;  %v3061_v5 = vld [vmem:[%s3582_s10 + $0x68] ss:$16 sps:$4 sm:$0xff]   ;;  %v3062_v6 = vld [vmem:[%s3582_s10 + $0x44] ss:$16 sps:$4 sm:$0xff]  }
  0x2b   : > { %503 = vmatprep.subr.bf16.mxu0 %v3056_v1  ;;  %616 = vmatprep.subr.bf16.mxu1 %v3058_v2  ;;  %v3064_v7 = vld [vmem:[%s3582_s10 + $0x4c] ss:$16 sps:$4 sm:$0xff]   ;;  %v3066_v8 = vld [vmem:[%s3582_s10 + $0x40] ss:$16 sps:$4 sm:$0xff]   ;;  %v3067_v9 = vld [vmem:[%s3582_s10 + $0x48] ss:$16 sps:$4 sm:$0xff]  }
  0x2c   : > { %504 = vmatpush1.bf16.msra.mxu0 %v3060_v4  ;;  %617 = vmatpush1.bf16.msra.mxu1 %v3061_v5  ;;  %v3068_v10 = vld [vmem:[%s3582_s10 + $0x24] ss:$16 sps:$4 sm:$0xff]   ;;  %v3070_v11 = vld [vmem:[%s3582_s10 + $0x2c] ss:$16 sps:$4 sm:$0xff]   ;;  %v3072_v12 = vld [vmem:[%s3582_s10 + $0x20] ss:$16 sps:$4 sm:$0xff]  }
  0x2d   : > { %505 = vmatprep.subr.bf16.mxu0 %v3062_v6  ;;  %618 = vmatprep.subr.bf16.mxu1 %v3064_v7  ;;  %v3073_v13 = vld [vmem:[%s3582_s10 + $0x28] ss:$16 sps:$4 sm:$0xff]   ;;  %v3074_v14 = vld [vmem:[%s3582_s10 + $0x4] ss:$16 sps:$4 sm:$0xff]   ;;  %v3076_v15 = vld [vmem:[%s3582_s10 + $0xc] ss:$16 sps:$4 sm:$0xff]  }
  0x2e   : > { %v3078_v16 = vld [vmem:[%s3582_s10] ss:$16 sps:$4 sm:$0xff]   ;;  %v3079_v17 = vld [vmem:[%s3582_s10 + $0x8] ss:$16 sps:$4 sm:$0xff]   ;;  %v3621_v18 = vld [vmem:[%s3592_s26 + $0xe4] ss:$16 sps:$4 sm:$0xff]  }
  0x2f   : > { %v3080_v19 = vld [vmem:[%s3587_s13] sm:$0xff]   ;;  %v3632_v22 = vld [vmem:[%s3592_s26 + $0xec] ss:$16 sps:$4 sm:$0xff]   ;;  %v3637_v23 = vld [vmem:[%s3592_s26 + $0xe8] ss:$16 sps:$4 sm:$0xff]   ;;  %v724_v62 = vshrl.u32 %v723_v61, 7 }
  0x30   : > { %506 = vmatpush1.bf16.msra.mxu0 %v3066_v8  ;;  %619 = vmatpush1.bf16.msra.mxu1 %v3067_v9  ;;  %v3625_v20 = vld [vmem:[%s3592_s26 + $0xe0] ss:$16 sps:$4 sm:$0xff]   ;;  %v3629_v21 = vld [vmem:[%s3592_s26 + $0xc4] ss:$16 sps:$4 sm:$0xff]   ;;  %v3651_v26 = vld [vmem:[%s3592_s26 + $0xcc] ss:$16 sps:$4 sm:$0xff]  }
  0x31   : > { %507 = vmatprep.subr.bf16.mxu0 %v3068_v10  ;;  %620 = vmatprep.subr.bf16.mxu1 %v3070_v11  ;;  %v3642_v24 = vld [vmem:[%s3592_s26 + $0xc0] ss:$16 sps:$4 sm:$0xff]   ;;  %v3647_v25 = vld [vmem:[%s3592_s26 + $0xa4] ss:$16 sps:$4 sm:$0xff]   ;;  %v3084_v27 = vld [vmem:[%s3587_s13 + $0x8] sm:$0xff]   ;;  %v725_v63 = vsub.s32 0, %v724_v62 }
  0x32   : > { %v3657_v28 = vld [vmem:[%s3592_s26 + $0xa0] ss:$16 sps:$4 sm:$0xff]   ;;  %v3660_v29 = vld [vmem:[%s3592_s26 + $0x84] ss:$16 sps:$4 sm:$0xff]   ;;  %v3665_v30 = vld [vmem:[%s3592_s26 + $0xc8] ss:$16 sps:$4 sm:$0xff]  }
  0x33   : > { %v3668_v31 = vld [vmem:[%s3592_s26 + $0xac] ss:$16 sps:$4 sm:$0xff]   ;;  %v3675_v32 = vld [vmem:[%s3592_s26 + $0x80] ss:$16 sps:$4 sm:$0xff]   ;;  %v3680_v33 = vld [vmem:[%s3592_s26 + $0x64] ss:$16 sps:$4 sm:$0xff]  }
  0x34   : > { %508 = vmatpush1.bf16.msra.mxu0 %v3072_v12  ;;  %621 = vmatpush1.bf16.msra.mxu1 %v3073_v13  ;;  %v3683_v34 = vld [vmem:[%s3592_s26 + $0xa8] ss:$16 sps:$4 sm:$0xff]   ;;  %v3688_v35 = vld [vmem:[%s3592_s26 + $0x8c] ss:$16 sps:$4 sm:$0xff]   ;;  %v3088_v36 = vld [vmem:[%s3587_s13 + $0x10] sm:$0xff]   ;;  %v733_v0 = vsub.s32 2, %v724_v62 }
  0x35   : > { %509 = vmatprep.subr.bf16.mxu0 %v3074_v14  ;;  %622 = vmatprep.subr.bf16.mxu1 %v3076_v15  ;;  %v3693_v37 = vld [vmem:[%s3592_s26 + $0x60] ss:$16 sps:$4 sm:$0xff]   ;;  %v3697_v38 = vld [vmem:[%s3592_s26 + $0x88] ss:$16 sps:$4 sm:$0xff]   ;;  %v3701_v39 = vld [vmem:[%s3592_s26 + $0x44] ss:$16 sps:$4 sm:$0xff]  }
  0x36   : > { %v3705_v40 = vld [vmem:[%s3592_s26 + $0x6c] ss:$16 sps:$4 sm:$0xff]   ;;  %v3712_v41 = vld [vmem:[%s3592_s26 + $0x40] ss:$16 sps:$4 sm:$0xff]   ;;  %v3717_v42 = vld [vmem:[%s3592_s26 + $0x68] ss:$16 sps:$4 sm:$0xff]  }
  0x37   : > { %v3721_v43 = vld [vmem:[%s3592_s26 + $0x24] ss:$16 sps:$4 sm:$0xff]   ;;  %v3725_v44 = vld [vmem:[%s3592_s26 + $0x4c] ss:$16 sps:$4 sm:$0xff]   ;;  %v3730_v46 = vld [vmem:[%s3592_s26 + $0x20] ss:$16 sps:$4 sm:$0xff]  }
  0x38   : > { %510 = vmatpush1.bf16.msra.mxu0 %v3078_v16  ;;  %623 = vmatpush1.bf16.msra.mxu1 %v3079_v17  ;;  %v3095_v45 = vld [vmem:[%s3587_s13 + $0x18] sm:$0xff]   ;;  %v3739_v48 = vld [vmem:[%s3592_s26 + $0x4] ss:$16 sps:$4 sm:$0xff]   ;;  %v3751_v50 = vld [vmem:[%s3592_s26] ss:$16 sps:$4 sm:$0xff]   ;;  %v729_v2 = vsub.s32 1, %v724_v62 }
  0x39   : > { %1080 = vmatprep.subr.bf16.mxu0 %v3621_v18  ;;  %1123 = vmatprep.subr.bf16.mxu1 %v3632_v22  ;;  %v3734_v47 = vld [vmem:[%s3592_s26 + $0x48] ss:$16 sps:$4 sm:$0xff]   ;;  %v3742_v49 = vld [vmem:[%s3592_s26 + $0x2c] ss:$16 sps:$4 sm:$0xff]   ;;  %v3102_v53 = vld [vmem:[%s3587_s13 + $0x20] sm:$0xff]   ;;  %v737_v4 = vsub.s32 3, %v724_v62 }
  0x3a   : > { %v3754_v51 = vld [vmem:[%s3592_s26 + $0x28] ss:$16 sps:$4 sm:$0xff]   ;;  %v3759_v52 = vld [vmem:[%s3592_s26 + $0xc] ss:$16 sps:$4 sm:$0xff]   ;;  %v3116_v56 = vld [vmem:[%s3587_s13 + $0x30] sm:$0xff]   ;;  %s2931_s17 = smul.u32 448, %s3466_s18 }
  0x3b   : > { %2729 = vmatmul.mubr.msk.bf16.vlgmr.msra.gmra.mxu0 %vm470_vm0, %v3080_v19  ;;  %2737 = vmatmul.mubr.msk.bf16.vlgmr.msra.gmra.mxu1 %vm470_vm0, %v3080_v19  ;;  %v3765_v54 = vld [vmem:[%s3592_s26 + $0x8] ss:$16 sps:$4 sm:$0xff]   ;;  %v903_v58 = vld [vmem:[#allocation2] sm:$0xff]  ;;  %s2934_s22 = smul.u32 56, %s3466_s18  ;;  %s2829_s15 = sshll.u32 %s3466_s18, 6 }
  0x3c   : > { %1081 = vmatpush1.bf16.msra.mxu0 %v3625_v20  ;;  %537 = vmatprep.mubr.bf16.mxu0 %v3481_v3  ;;  %v3109_v55 = vld [vmem:[%s3587_s13 + $0x28] sm:$0xff]   ;;  %v3126_v57 = vld [vmem:[%s3587_s13 + $0x38] sm:$0xff]   ;;  %v721_v1 = vld [vmem:[%s3597_s28] sm:$0xf]  ;;  %s910_s20 = scalar_lea.vmem [#allocation4], %s2931_s17  ;;  %s2789_s24 = smul.u32 320, %s3466_s18 }
  0x3d   : > { %650 = vmatprep.mubr.bf16.mxu1 %v3481_v3  ;;  %1082 = vmatprep.subr.bf16.mxu0 %v3629_v21  ;;  %v904_v59 = vld [vmem:[#allocation2 + $0x8] sm:$0xff]  ;;  %v3825_v5 = vrot.slane %v721_v1, %v725_v63  ;;  %v3827_v6 = vrot.slane %v721_v1, %v733_v0  ;;  %v3829_v7 = vrot.slane %v721_v1, %v729_v2  ;;  %s1232_s23 = scalar_lea.vmem %s3599_s19, %s2934_s22 [#allocation5]  ;;  %s2806_s30 = smul.u32 40, %s3466_s18 }
  0x3e   : > { %1124 = vmatpush1.bf16.msra.mxu1 %v3637_v23  ;;  %v919_v60 = vpack.c.bf16 %v904_v59, %v903_v58  ;;  %v3831_v8 = vrot.slane %v721_v1, %v737_v4  ;;  %s3944_s29 = scalar_lea.vmem [#allocation4], %s2789_s24  ;;  %s2809_s6 = smul.u32 192, %s3466_s18 }
  0x3f   : > { %1125 = vmatprep.subr.bf16.mxu1 %v3651_v26  ;;  %s2578_s5 = scalar_lea.vmem %s3599_s19, %s2806_s30 [#allocation5]  ;;  %s2826_s9 = smul.u32 24, %s3466_s18 }
  0x40   : > { %1083 = vmatpush1.bf16.msra.mxu0 %v3642_v24  ;;  %s4077_s8 = scalar_lea.vmem [#allocation4], %s2809_s6  ;;  %s4147_s11 = scalar_lea.vmem [#allocation4], %s2829_s15 }
  0x41   : > { %1084 = vmatprep.subr.bf16.mxu0 %v3647_v25  ;;  %s2586_s10 = scalar_lea.vmem %s3599_s19, %s2826_s9 [#allocation5]  ;;  %s2846_s13 = sshll.u32 %s3466_s18, 3 }
  0x42   : > { %1126 = vmatpush1.bf16.msra.mxu1 %v3665_v30  ;;  %s2592_s14 = scalar_lea.vmem %s3599_s19, %s2846_s13 [#allocation5]  ;;  %s1738_s25 = ssub.s32 4, %s3466_s18 }
  0x43   : > { %2730 = vmatmul.mubr.msk.bf16.gmra.mxu0 %vm470_vm0, %v3084_v27  ;;  %2738 = vmatmul.mubr.msk.bf16.gmra.mxu1 %vm470_vm0, %v3084_v27  ;;  %s2944_s17 = sshll.u32 %s1738_s25, 3  ;;  %s2861_s22 = smul.u32 4294967104, %s3466_s18 }
  0x44   : > { %547 = vmatprep.mubr.bf16.mxu0 %v3481_v3  ;;  %660 = vmatprep.mubr.bf16.mxu1 %v3481_v3  ;;  %s2878_s24 = smul.u32 4294967272, %s3466_s18  ;;  %s2951_s13 = sshll.u32 (%p3559_p4), %s3575_s27, 5 }
  0x45   : > { %1085 = vmatpush1.bf16.msra.mxu0 %v3657_v28  ;;  %1127 = vmatprep.subr.bf16.mxu1 %v3668_v31  ;;  %s2881_s30 = smul.u32 4294966976, %s3466_s18 }
  0x46   : > { %1086 = vmatprep.subr.bf16.mxu0 %v3660_v29  ;;  %1128 = vmatpush1.bf16.msra.mxu1 %v3683_v34  ;;  %s2898_s6 = smul.u32 4294967256, %s3466_s18 }
  0x47   : > { %1129 = vmatprep.subr.bf16.mxu1 %v3688_v35  ;;  %s2901_s9 = smul.u32 4294966848, %s3466_s18 }
  0x48   : > { %s2918_s15 = smul.u32 4294967240, %s3466_s18 }
  0x49   : > { %1087 = vmatpush1.bf16.msra.mxu0 %v3675_v32 }
  0x4a   : > { %1088 = vmatprep.subr.bf16.mxu0 %v3680_v33  ;;  %1130 = vmatpush1.bf16.msra.mxu1 %v3697_v38 }
  0x4b   : > { %2731 = vmatmul.mubr.msk.bf16.gmra.mxu0 %vm470_vm0, %v3088_v36  ;;  %2739 = vmatmul.mubr.msk.bf16.gmra.mxu1 %vm470_vm0, %v3088_v36 }
  0x4c   : > { %557 = vmatprep.mubr.bf16.mxu0 %v3481_v3  ;;  %670 = vmatprep.mubr.bf16.mxu1 %v3481_v3 }
  0x4d   : > { %1089 = vmatpush1.bf16.msra.mxu0 %v3693_v37  ;;  %1131 = vmatprep.subr.bf16.mxu1 %v3705_v40 }
  0x4e   : > { %1090 = vmatprep.subr.bf16.mxu0 %v3701_v39  ;;  %1132 = vmatpush1.bf16.msra.mxu1 %v3717_v42 }
  0x4f   : > { %1133 = vmatprep.subr.bf16.mxu1 %v3725_v44 }
  0x51   : > { %1091 = vmatpush1.bf16.msra.mxu0 %v3712_v41 }
  0x52   : > { %1092 = vmatprep.subr.bf16.mxu0 %v3721_v43  ;;  %1134 = vmatpush1.bf16.msra.mxu1 %v3734_v47 }
  0x53   : > { %2732 = vmatmul.mubr.msk.bf16.gmra.mxu0 %vm470_vm0, %v3095_v45  ;;  %2740 = vmatmul.mubr.msk.bf16.gmra.mxu1 %vm470_vm0, %v3095_v45 }
  0x54   : > { %567 = vmatprep.mubr.bf16.mxu0 %v3481_v3  ;;  %680 = vmatprep.mubr.bf16.mxu1 %v3481_v3 }
  0x55   : > { %1093 = vmatpush1.bf16.msra.mxu0 %v3730_v46  ;;  %1135 = vmatprep.subr.bf16.mxu1 %v3742_v49 }
  0x56   : > { %1094 = vmatprep.subr.bf16.mxu0 %v3739_v48  ;;  %1136 = vmatpush1.bf16.msra.mxu1 %v3754_v51 }
  0x57   : > { %1137 = vmatprep.subr.bf16.mxu1 %v3759_v52 }
  0x59   : > { %1095 = vmatpush1.bf16.msra.mxu0 %v3751_v50 }
  0x5a   : > { %1248 = vmatprep.subr.bf16.mxu0 %v3621_v18  ;;  %1138 = vmatpush1.bf16.msra.mxu1 %v3765_v54 }
  0x5b   : > { %2733 = vmatmul.mubr.msk.bf16.gmra.mxu0 %vm470_vm0, %v3102_v53  ;;  %2741 = vmatmul.mubr.msk.bf16.gmra.mxu1 %vm470_vm0, %v3102_v53 }
  0x5c   : > { %577 = vmatprep.mubr.bf16.mxu0 %v3481_v3  ;;  %690 = vmatprep.mubr.bf16.mxu1 %v3481_v3 }
  0x5d   : > { %1291 = vmatprep.subr.bf16.mxu1 %v3632_v22 }
  0x63   : > { %2734 = vmatmul.mubr.msk.bf16.gmra.mxu0 %vm470_vm0, %v3109_v55  ;;  %2742 = vmatmul.mubr.msk.bf16.gmra.mxu1 %vm470_vm0, %v3109_v55 }
  0x64   : > { %587 = vmatprep.mubr.bf16.mxu0 %v3481_v3  ;;  %700 = vmatprep.mubr.bf16.mxu1 %v3481_v3 }
  0x6b   : > { %2735 = vmatmul.mubr.msk.bf16.gmra.mxu0 %vm470_vm0, %v3116_v56  ;;  %2743 = vmatmul.mubr.msk.bf16.gmra.mxu1 %vm470_vm0, %v3116_v56 }
  0x6c   : > { %597 = vmatprep.mubr.bf16.mxu0 %v3481_v3  ;;  %710 = vmatprep.mubr.bf16.mxu1 %v3481_v3 }
  0x73   : > { %2736 = vmatmul.mubr.msk.bf16.gmra.mxu0 %vm470_vm0, %v3126_v57  ;;  %2744 = vmatmul.mubr.msk.bf16.gmra.mxu1 %vm470_vm0, %v3126_v57 }
  0x74   : > { %1112 = vmatprep.mubr.bf16.mxu0 %v3481_v3  ;;  %1155 = vmatprep.mubr.bf16.mxu1 %v3481_v3 }
  0x7b   : > { %1113 = vmatmul.mubr.bf16.vlgmr.msra.gmra.mxu0 %v919_v60  ;;  %1156 = vmatmul.mubr.bf16.vlgmr.msra.gmra.mxu1 %v919_v60 }
  0x7c   : > { %1249 = vmatpush1.bf16.msra.mxu0 %v3625_v20  ;;  %1292 = vmatpush1.bf16.msra.mxu1 %v3637_v23 }
  0x7d   : > { %1250 = vmatprep.subr.bf16.mxu0 %v3629_v21  ;;  %1293 = vmatprep.subr.bf16.mxu1 %v3651_v26 }
  0x7e   : > { %1280 = vmatprep.mubr.bf16.mxu0 %v3481_v3  ;;  %1323 = vmatprep.mubr.bf16.mxu1 %v3481_v3 }
  0x80   : > { %1251 = vmatpush1.bf16.msra.mxu0 %v3642_v24  ;;  %1294 = vmatpush1.bf16.msra.mxu1 %v3665_v30 }
  0x81   : > { %1252 = vmatprep.subr.bf16.mxu0 %v3647_v25  ;;  %1295 = vmatprep.subr.bf16.mxu1 %v3668_v31 }
  0x84   : > { %1253 = vmatpush1.bf16.msra.mxu0 %v3657_v28  ;;  %1296 = vmatpush1.bf16.msra.mxu1 %v3683_v34 }
  0x85   : > { %1254 = vmatprep.subr.bf16.mxu0 %v3660_v29  ;;  %1297 = vmatprep.subr.bf16.mxu1 %v3688_v35 }
  0x88   : > { %1255 = vmatpush1.bf16.msra.mxu0 %v3675_v32  ;;  %1298 = vmatpush1.bf16.msra.mxu1 %v3697_v38 }
  0x89   : > { %1256 = vmatprep.subr.bf16.mxu0 %v3680_v33  ;;  %1299 = vmatprep.subr.bf16.mxu1 %v3705_v40 }
  0x8c   : > { %1257 = vmatpush1.bf16.msra.mxu0 %v3693_v37  ;;  %1300 = vmatpush1.bf16.msra.mxu1 %v3717_v42 }
  0x8d   : > { %1258 = vmatprep.subr.bf16.mxu0 %v3701_v39  ;;  %1301 = vmatprep.subr.bf16.mxu1 %v3725_v44 }
  0x90   : > { %1259 = vmatpush1.bf16.msra.mxu0 %v3712_v41  ;;  %1302 = vmatpush1.bf16.msra.mxu1 %v3734_v47 }
  0x91   : > { %1260 = vmatprep.subr.bf16.mxu0 %v3721_v43  ;;  %1303 = vmatprep.subr.bf16.mxu1 %v3742_v49 }
  0x94   : > { %1261 = vmatpush1.bf16.msra.mxu0 %v3730_v46  ;;  %1304 = vmatpush1.bf16.msra.mxu1 %v3754_v51 }
  0x95   : > { %1262 = vmatprep.subr.bf16.mxu0 %v3739_v48  ;;  %1305 = vmatprep.subr.bf16.mxu1 %v3759_v52 }
  0x98   : > { %1263 = vmatpush1.bf16.msra.mxu0 %v3751_v50  ;;  %1306 = vmatpush1.bf16.msra.mxu1 %v3765_v54 }
  0x99   : > { %1416 = vmatprep.subr.bf16.mxu0 %v3621_v18  ;;  %1459 = vmatprep.subr.bf16.mxu1 %v3632_v22 }
  0xfb   : > { %v529_v9 = vpop.f32.mrf.mxu0  ;;  %v642_v10 = vpop.f32.mrf.mxu1 }
  0xfc   : > { %v743_v11 = vadd.f32 %v3825_v5, %v529_v9  ;;  %v745_v12 = vadd.f32 %v3827_v6, %v642_v10 }
  0xfd   : > { %v531_v13 = vpop.f32.mrf.mxu0  ;;  %v644_v14 = vpop.f32.mrf.mxu1 }
  0xfe   : > { %807 = vst [vmem:[#allocation4] sm:$0xff] %v743_v11  ;;  %809 = vst [vmem:[#allocation4 + $0x10] sm:$0xff] %v745_v12  ;;  %v744_v15 = vadd.f32 %v3829_v7, %v531_v13  ;;  %v746_v16 = vadd.f32 %v3831_v8, %v644_v14 }
  0xff   : > { %v533_v17 = vpop.f32.mrf.mxu0  ;;  %v646_v18 = vpop.f32.mrf.mxu1 }
 0x100   : > { %808 = vst [vmem:[#allocation4 + $0x8] sm:$0xff] %v744_v15  ;;  %810 = vst [vmem:[#allocation4 + $0x18] sm:$0xff] %v746_v16  ;;  %v747_v19 = vadd.f32 %v3825_v5, %v533_v17  ;;  %v749_v27 = vadd.f32 %v3827_v6, %v646_v18 }
 0x101   : > { %v535_v36 = vpop.f32.mrf.mxu0  ;;  %v648_v45 = vpop.f32.mrf.mxu1 }
 0x102   : > { %811 = vst [vmem:[#allocation4 + $0x20] sm:$0xff] %v747_v19  ;;  %813 = vst [vmem:[#allocation4 + $0x30] sm:$0xff] %v749_v27  ;;  %v748_v53 = vadd.f32 %v3829_v7, %v535_v36  ;;  %v750_v55 = vadd.f32 %v3831_v8, %v648_v45 }
 0x103   : > { %v539_v56 = vpop.f32.mrf.mxu0  ;;  %v652_v57 = vpop.f32.mrf.mxu1 }
 0x104   : > { %812 = vst [vmem:[#allocation4 + $0x28] sm:$0xff] %v748_v53  ;;  %814 = vst [vmem:[#allocation4 + $0x38] sm:$0xff] %v750_v55  ;;  %v751_v58 = vadd.f32 %v3825_v5, %v539_v56  ;;  %v753_v59 = vadd.f32 %v3827_v6, %v652_v57 }
 0x105   : > { %v541_v60 = vpop.f32.mrf.mxu0  ;;  %v654_v61 = vpop.f32.mrf.mxu1 }
 0x106   : > { %815 = vst [vmem:[#allocation4 + $0x40] sm:$0xff] %v751_v58  ;;  %817 = vst [vmem:[#allocation4 + $0x50] sm:$0xff] %v753_v59  ;;  %v752_v62 = vadd.f32 %v3829_v7, %v541_v60  ;;  %v754_v63 = vadd.f32 %v3831_v8, %v654_v61 }
 0x107   : > { %v543_v0 = vpop.f32.mrf.mxu0  ;;  %v656_v1 = vpop.f32.mrf.mxu1 }
 0x108   : > { %816 = vst [vmem:[#allocation4 + $0x48] sm:$0xff] %v752_v62  ;;  %818 = vst [vmem:[#allocation4 + $0x58] sm:$0xff] %v754_v63  ;;  %v755_v2 = vadd.f32 %v3825_v5, %v543_v0  ;;  %v757_v4 = vadd.f32 %v3827_v6, %v656_v1 }
 0x109   : > { %v545_v9 = vpop.f32.mrf.mxu0  ;;  %v658_v10 = vpop.f32.mrf.mxu1 }
 0x10a   : > { %819 = vst [vmem:[#allocation4 + $0x60] sm:$0xff] %v755_v2  ;;  %821 = vst [vmem:[#allocation4 + $0x70] sm:$0xff] %v757_v4  ;;  %v756_v11 = vadd.f32 %v3829_v7, %v545_v9  ;;  %v758_v12 = vadd.f32 %v3831_v8, %v658_v10 }
 0x10b   : > { %v549_v13 = vpop.f32.mrf.mxu0  ;;  %v662_v14 = vpop.f32.mrf.mxu1 }
 0x10c   : > { %820 = vst [vmem:[#allocation4 + $0x68] sm:$0xff] %v756_v11  ;;  %822 = vst [vmem:[#allocation4 + $0x78] sm:$0xff] %v758_v12  ;;  %v759_v15 = vadd.f32 %v3825_v5, %v549_v13  ;;  %v761_v16 = vadd.f32 %v3827_v6, %v662_v14 }
 0x10d   : > { %v551_v17 = vpop.f32.mrf.mxu0  ;;  %v664_v18 = vpop.f32.mrf.mxu1 }
 0x10e   : > { %823 = vst [vmem:[#allocation4 + $0x80] sm:$0xff] %v759_v15  ;;  %825 = vst [vmem:[#allocation4 + $0x90] sm:$0xff] %v761_v16  ;;  %v760_v19 = vadd.f32 %v3829_v7, %v551_v17  ;;  %v762_v27 = vadd.f32 %v3831_v8, %v664_v18 }
 0x10f   : > { %v553_v36 = vpop.f32.mrf.mxu0  ;;  %v666_v45 = vpop.f32.mrf.mxu1 }
 0x110   : > { %824 = vst [vmem:[#allocation4 + $0x88] sm:$0xff] %v760_v19  ;;  %826 = vst [vmem:[#allocation4 + $0x98] sm:$0xff] %v762_v27  ;;  %v763_v53 = vadd.f32 %v3825_v5, %v553_v36  ;;  %v765_v55 = vadd.f32 %v3827_v6, %v666_v45 }
 0x111   : > { %v555_v56 = vpop.f32.mrf.mxu0  ;;  %v668_v57 = vpop.f32.mrf.mxu1 }
 0x112   : > { %827 = vst [vmem:[#allocation4 + $0xa0] sm:$0xff] %v763_v53  ;;  %829 = vst [vmem:[#allocation4 + $0xb0] sm:$0xff] %v765_v55  ;;  %v764_v58 = vadd.f32 %v3829_v7, %v555_v56  ;;  %v766_v59 = vadd.f32 %v3831_v8, %v668_v57 }
 0x113   : > { %v559_v60 = vpop.f32.mrf.mxu0  ;;  %v672_v61 = vpop.f32.mrf.mxu1 }
 0x114   : > { %828 = vst [vmem:[#allocation4 + $0xa8] sm:$0xff] %v764_v58  ;;  %830 = vst [vmem:[#allocation4 + $0xb8] sm:$0xff] %v766_v59  ;;  %v767_v62 = vadd.f32 %v3825_v5, %v559_v60  ;;  %v769_v63 = vadd.f32 %v3827_v6, %v672_v61 }
 0x115   : > { %v561_v0 = vpop.f32.mrf.mxu0  ;;  %v674_v1 = vpop.f32.mrf.mxu1 }
 0x116   : > { %831 = vst [vmem:[#allocation4 + $0xc0] sm:$0xff] %v767_v62  ;;  %833 = vst [vmem:[#allocation4 + $0xd0] sm:$0xff] %v769_v63  ;;  %v768_v2 = vadd.f32 %v3829_v7, %v561_v0  ;;  %v770_v4 = vadd.f32 %v3831_v8, %v674_v1 }
 0x117   : > { %v563_v9 = vpop.f32.mrf.mxu0  ;;  %v676_v10 = vpop.f32.mrf.mxu1 }
 0x118   : > { %832 = vst [vmem:[#allocation4 + $0xc8] sm:$0xff] %v768_v2  ;;  %834 = vst [vmem:[#allocation4 + $0xd8] sm:$0xff] %v770_v4  ;;  %v771_v11 = vadd.f32 %v3825_v5, %v563_v9  ;;  %v773_v12 = vadd.f32 %v3827_v6, %v676_v10 }
 0x119   : > { %v565_v13 = vpop.f32.mrf.mxu0  ;;  %v678_v14 = vpop.f32.mrf.mxu1 }
 0x11a   : > { %835 = vst [vmem:[#allocation4 + $0xe0] sm:$0xff] %v771_v11  ;;  %837 = vst [vmem:[#allocation4 + $0xf0] sm:$0xff] %v773_v12  ;;  %v772_v15 = vadd.f32 %v3829_v7, %v565_v13  ;;  %v774_v16 = vadd.f32 %v3831_v8, %v678_v14 }
 0x11b   : > { %v569_v17 = vpop.f32.mrf.mxu0  ;;  %v682_v18 = vpop.f32.mrf.mxu1 }
 0x11c   : > { %836 = vst [vmem:[#allocation4 + $0xe8] sm:$0xff] %v772_v15  ;;  %838 = vst [vmem:[#allocation4 + $0xf8] sm:$0xff] %v774_v16  ;;  %v775_v19 = vadd.f32 %v3825_v5, %v569_v17  ;;  %v777_v27 = vadd.f32 %v3827_v6, %v682_v18 }
 0x11d   : > { %v571_v36 = vpop.f32.mrf.mxu0  ;;  %v684_v45 = vpop.f32.mrf.mxu1 }
 0x11e   : > { %839 = vst [vmem:[#allocation4 + $0x100] sm:$0xff] %v775_v19  ;;  %841 = vst [vmem:[#allocation4 + $0x110] sm:$0xff] %v777_v27  ;;  %v776_v53 = vadd.f32 %v3829_v7, %v571_v36  ;;  %v778_v55 = vadd.f32 %v3831_v8, %v684_v45 }
 0x11f   : > { %v573_v56 = vpop.f32.mrf.mxu0  ;;  %v686_v57 = vpop.f32.mrf.mxu1 }
 0x120   : > { %840 = vst [vmem:[#allocation4 + $0x108] sm:$0xff] %v776_v53  ;;  %842 = vst [vmem:[#allocation4 + $0x118] sm:$0xff] %v778_v55  ;;  %v779_v58 = vadd.f32 %v3825_v5, %v573_v56  ;;  %v781_v59 = vadd.f32 %v3827_v6, %v686_v57 }
 0x121   : > { %v575_v60 = vpop.f32.mrf.mxu0  ;;  %v688_v61 = vpop.f32.mrf.mxu1 }
 0x122   : > { %843 = vst [vmem:[#allocation4 + $0x120] sm:$0xff] %v779_v58  ;;  %845 = vst [vmem:[#allocation4 + $0x130] sm:$0xff] %v781_v59  ;;  %v780_v62 = vadd.f32 %v3829_v7, %v575_v60  ;;  %v782_v63 = vadd.f32 %v3831_v8, %v688_v61 }
 0x123   : > { %v579_v0 = vpop.f32.mrf.mxu0  ;;  %v692_v1 = vpop.f32.mrf.mxu1 }
 0x124   : > { %844 = vst [vmem:[#allocation4 + $0x128] sm:$0xff] %v780_v62  ;;  %846 = vst [vmem:[#allocation4 + $0x138] sm:$0xff] %v782_v63  ;;  %v783_v2 = vadd.f32 %v3825_v5, %v579_v0  ;;  %v785_v4 = vadd.f32 %v3827_v6, %v692_v1 }
 0x125   : > { %v581_v9 = vpop.f32.mrf.mxu0  ;;  %v694_v10 = vpop.f32.mrf.mxu1 }
 0x126   : > { %847 = vst [vmem:[#allocation4 + $0x140] sm:$0xff] %v783_v2  ;;  %849 = vst [vmem:[#allocation4 + $0x150] sm:$0xff] %v785_v4  ;;  %v784_v11 = vadd.f32 %v3829_v7, %v581_v9  ;;  %v786_v12 = vadd.f32 %v3831_v8, %v694_v10 }
 0x127   : > { %v583_v13 = vpop.f32.mrf.mxu0  ;;  %v696_v14 = vpop.f32.mrf.mxu1 }
 0x128   : > { %848 = vst [vmem:[#allocation4 + $0x148] sm:$0xff] %v784_v11  ;;  %850 = vst [vmem:[#allocation4 + $0x158] sm:$0xff] %v786_v12  ;;  %v787_v15 = vadd.f32 %v3825_v5, %v583_v13  ;;  %v789_v16 = vadd.f32 %v3827_v6, %v696_v14 }
 0x129   : > { %v585_v17 = vpop.f32.mrf.mxu0  ;;  %v698_v18 = vpop.f32.mrf.mxu1 }
 0x12a   : > { %851 = vst [vmem:[#allocation4 + $0x160] sm:$0xff] %v787_v15  ;;  %853 = vst [vmem:[#allocation4 + $0x170] sm:$0xff] %v789_v16  ;;  %v788_v19 = vadd.f32 %v3829_v7, %v585_v17  ;;  %v790_v27 = vadd.f32 %v3831_v8, %v698_v18 }
 0x12b   : > { %v589_v36 = vpop.f32.mrf.mxu0  ;;  %v702_v45 = vpop.f32.mrf.mxu1 }
 0x12c   : > { %852 = vst [vmem:[#allocation4 + $0x168] sm:$0xff] %v788_v19  ;;  %854 = vst [vmem:[#allocation4 + $0x178] sm:$0xff] %v790_v27  ;;  %v791_v53 = vadd.f32 %v3825_v5, %v589_v36  ;;  %v793_v55 = vadd.f32 %v3827_v6, %v702_v45 }
 0x12d   : > { %v591_v56 = vpop.f32.mrf.mxu0  ;;  %v704_v57 = vpop.f32.mrf.mxu1 }
 0x12e   : > { %855 = vst [vmem:[#allocation4 + $0x180] sm:$0xff] %v791_v53  ;;  %857 = vst [vmem:[#allocation4 + $0x190] sm:$0xff] %v793_v55  ;;  %v792_v58 = vadd.f32 %v3829_v7, %v591_v56  ;;  %v794_v59 = vadd.f32 %v3831_v8, %v704_v57 }
 0x12f   : > { %v593_v60 = vpop.f32.mrf.mxu0  ;;  %v706_v61 = vpop.f32.mrf.mxu1 }
 0x130   : > { %856 = vst [vmem:[#allocation4 + $0x188] sm:$0xff] %v792_v58  ;;  %858 = vst [vmem:[#allocation4 + $0x198] sm:$0xff] %v794_v59  ;;  %v795_v62 = vadd.f32 %v3825_v5, %v593_v60  ;;  %v797_v63 = vadd.f32 %v3827_v6, %v706_v61 }
 0x131   : > { %v595_v0 = vpop.f32.mrf.mxu0  ;;  %v708_v1 = vpop.f32.mrf.mxu1 }
 0x132   : > { %859 = vst [vmem:[#allocation4 + $0x1a0] sm:$0xff] %v795_v62  ;;  %861 = vst [vmem:[#allocation4 + $0x1b0] sm:$0xff] %v797_v63  ;;  %v796_v2 = vadd.f32 %v3829_v7, %v595_v0  ;;  %v798_v4 = vadd.f32 %v3831_v8, %v708_v1 }
 0x133   : > { %v599_v9 = vpop.f32.mrf.mxu0  ;;  %v712_v10 = vpop.f32.mrf.mxu1 }
 0x134   : > { %860 = vst [vmem:[#allocation4 + $0x1a8] sm:$0xff] %v796_v2  ;;  %862 = vst [vmem:[#allocation4 + $0x1b8] sm:$0xff] %v798_v4  ;;  %v799_v11 = vadd.f32 %v3825_v5, %v599_v9  ;;  %v801_v12 = vadd.f32 %v3827_v6, %v712_v10 }
 0x135   : > { %v601_v13 = vpop.f32.mrf.mxu0  ;;  %v714_v14 = vpop.f32.mrf.mxu1 }
 0x136   : > { %863 = vst [vmem:[#allocation4 + $0x1c0] sm:$0xff] %v799_v11  ;;  %865 = vst [vmem:[#allocation4 + $0x1d0] sm:$0xff] %v801_v12  ;;  %v800_v15 = vadd.f32 %v3829_v7, %v601_v13  ;;  %v802_v16 = vadd.f32 %v3831_v8, %v714_v14 }
 0x137   : > { %v603_v17 = vpop.f32.mrf.mxu0  ;;  %v716_v18 = vpop.f32.mrf.mxu1 }
 0x138   : > { %864 = vst [vmem:[#allocation4 + $0x1c8] sm:$0xff] %v800_v15  ;;  %866 = vst [vmem:[#allocation4 + $0x1d8] sm:$0xff] %v802_v16  ;;  %v803_v19 = vadd.f32 %v3825_v5, %v603_v17  ;;  %v805_v27 = vadd.f32 %v3827_v6, %v716_v18 }
 0x139   : > { %v605_v36 = vpop.f32.mrf.mxu0  ;;  %v718_v45 = vpop.f32.mrf.mxu1 }
 0x13a   : > { %867 = vst [vmem:[#allocation4 + $0x1e0] sm:$0xff] %v803_v19  ;;  %869 = vst [vmem:[#allocation4 + $0x1f0] sm:$0xff] %v805_v27  ;;  %v804_v53 = vadd.f32 %v3829_v7, %v605_v36  ;;  %v806_v55 = vadd.f32 %v3831_v8, %v718_v45 }
 0x13b   : > { %v1114_v56 = vpop.f32.mrf.mxu0  ;;  %v1157_v58 = vpop.f32.mrf.mxu1 }
 0x13c   : > { %868 = vst [vmem:[#allocation4 + $0x1e8] sm:$0xff] %v804_v53  ;;  %870 = vst [vmem:[#allocation4 + $0x1f8] sm:$0xff] %v806_v55 }
 0x13d   : > { %v1116_v57 = vpop.f32.mrf.mxu0  ;;  %v1159_v63 = vpop.f32.mrf.mxu1 }
 0x13f   : > { %v1118_v59 = vpop.f32.mrf.mxu0  ;;  %v1161_v11 = vpop.f32.mrf.mxu1 }
 0x141   : > { %v1120_v1 = vpop.f32.mrf.mxu0  ;;  %v1163_v14 = vpop.f32.mrf.mxu1 }
 0x143   : > { %v911_v60 = vld [vmem:[%s910_s20] sm:$0xff]  ;;  %v912_v5 = vld [vmem:[%s910_s20 + $0x8] sm:$0xff]  ;;  %v914_v12 = vld [vmem:[%s910_s20 + $0x18] sm:$0xff] }
 0x144   : > { %v1166_v61 = vadd.f32 %v1114_v56, %v911_v60  ;;  %v1167_v6 = vadd.f32 %v1116_v57, %v912_v5  ;;  %v915_v62 = vld [vmem:[%s910_s20 + $0x20] sm:$0xff]  ;;  %v916_v0 = vld [vmem:[%s910_s20 + $0x28] sm:$0xff]  ;;  %v918_v13 = vld [vmem:[%s910_s20 + $0x38] sm:$0xff]  ;;  %v1169_v16 = vadd.f32 %v1159_v63, %v914_v12 }
 0x145   : > { %v1170_v2 = vadd.f32 %v1118_v59, %v915_v62  ;;  %v1171_v7 = vadd.f32 %v1120_v1, %v916_v0  ;;  %v913_v15 = vld [vmem:[%s910_s20 + $0x10] sm:$0xff]  ;;  %v1173_v18 = vadd.f32 %v1163_v14, %v918_v13  ;;  %v905_v0 = vld [vmem:[#allocation3 + $0x8] sm:$0xff] }
 0x146   : > { %v2779_v4 = vmul.f32 -1.442695, %v1166_v61  ;;  %v2781_v8 = vmul.f32 -1.442695, %v1167_v6  ;;  %v917_v17 = vld [vmem:[%s910_s20 + $0x30] sm:$0xff]  ;;  %v1168_v19 = vadd.f32 %v1157_v58, %v913_v15  ;;  %s1902_s20 = scalar_lea.vmem %s3599_s19, %s2944_s17 [#allocation5] }
 0x147   : > { %v2780_v9 = vmul.f32 -1.442695, %v1170_v2  ;;  %v2782_v10 = vmul.f32 -1.442695, %v1171_v7  ;;  %v2783_v27 = vmul.f32 -1.442695, %v1169_v16  ;;  %v1172_v36 = vadd.f32 %v1161_v11, %v917_v17 }
 0x148   : > { %3136 = vpow2.f32 %v2779_v4  ;;  %v2784_v45 = vmul.f32 -1.442695, %v1173_v18 }
 0x149   : > { %3138 = vpow2.f32 %v2781_v8 }
 0x14a   : > { %3140 = vpow2.f32 %v2780_v9  ;;  %v906_v9 = vld [vmem:[#allocation3] sm:$0xff] }
 0x14b   : > { %3142 = vpow2.f32 %v2782_v10 }
 0x14c   : > { %3144 = vtanh.f32 %v1168_v19 }
 0x14d   : > { %3146 = vpow2.f32 %v2783_v27 }
 0x14e   : > { %3148 = vtanh.f32 %v1172_v36 }
 0x14f   : > { %3150 = vpow2.f32 %v2784_v45 }
 0x155   : > { %v3137_v53 = vpop.eup %3136 }
 0x156   : > { %v3139_v55 = vpop.eup %3138  ;;  %v1180_v56 = vadd.f32 1.0, %v3137_v53 }
 0x157   : > { %v3141_v57 = vpop.eup %3140  ;;  %v1192_v59 = vadd.f32 1.0, %v3139_v55 }
 0x158   : > { %3152 = vrcp.f32 %v1180_v56  ;;  %v1181_v60 = vadd.f32 1.0, %v3141_v57  ;;  %v3143_v5 = vpop.eup %3142 }
 0x159   : > { %3154 = vrcp.f32 %v1192_v59  ;;  %v1193_v61 = vadd.f32 1.0, %v3143_v5  ;;  %v3145_v58 = vpop.eup %3144 }
 0x15a   : > { %3156 = vrcp.f32 %v1181_v60  ;;  %v3147_v6 = vpop.eup %3146 }
 0x15b   : > { %3158 = vrcp.f32 %v1193_v61  ;;  %v3149_v62 = vpop.eup %3148  ;;  %v1206_v10 = vadd.f32 1.0, %v3147_v6 }
 0x15c   : > { %v3151_v63 = vpop.eup %3150 }
 0x15d   : > { %v1207_v14 = vadd.f32 1.0, %v3151_v63 }
 0x165   : > { %v3153_v1 = vpop.eup %3152 }
 0x166   : > { %v3155_v2 = vpop.eup %3154  ;;  %v1214_v7 = vmul.f32 %v3153_v1, %v3145_v58  ;;  %v2796_v58 = vld [vmem:[%s3944_s29 + $0x70] sm:$0xff] }
 0x167   : > { %v3157_v4 = vpop.eup %3156  ;;  %v1212_v8 = vmul.f32 %v3155_v2, %v905_v0 }
 0x168   : > { %v1215_v11 = vmul.f32 %v3157_v4, %v3149_v62  ;;  %v3159_v12 = vpop.eup %3158 }
 0x169   : > { %v3898_v13 = vadd.f32 %v1214_v7, %v1212_v8  ;;  %v1213_v15 = vmul.f32 %v3159_v12, %v906_v9 }
 0x16b   : > { %3160 = vtanh.f32 %v3898_v13  ;;  %v3901_v16 = vadd.f32 %v1215_v11, %v1213_v15 }
 0x16c   : > { %3162 = vrcp.f32 %v1206_v10 }
 0x16d   : > { %3164 = vrcp.f32 %v1207_v14 }
 0x16e   : > { %3166 = vtanh.f32 %v3901_v16 }
 0x178   : > { %v3161_v17 = vpop.eup %3160 }
 0x179   : > { %v3163_v18 = vpop.eup %3162 }
 0x17a   : > { %v3165_v19 = vpop.eup %3164  ;;  %v1220_v27 = vmul.f32 %v3163_v18, %v3161_v17 }
 0x17b   : > { %v3167_v36 = vpop.eup %3166 }
 0x17c   : > { %v1221_v45 = vmul.f32 %v3167_v36, %v3165_v19 }
 0x17e   : > { %v1222_v53 = vpack.c.bf16 %v1221_v45, %v1220_v27 }
 0x180   : > { %2956 = vst [vmem:[%s1232_s23] sm:$0xff] %v1222_v53   ;;  %1281 = vmatmul.mubr.bf16.vlgmr.msra.gmra.mxu0 %v1222_v53  ;;  %1324 = vmatmul.mubr.bf16.vlgmr.msra.gmra.mxu1 %v1222_v53  ;;  %s4260_s23 = scalar_lea.vmem [#allocation4], %s2861_s22 }
 0x181   : > { %1417 = vmatpush1.bf16.msra.mxu0 %v3625_v20  ;;  %1460 = vmatpush1.bf16.msra.mxu1 %v3637_v23  ;;  %v3939_v20 = vld [vmem:[%s3592_s26 + $0xe4] ss:$16 sps:$4 sm:$0xff]  }
 0x182   : > { %1418 = vmatprep.subr.bf16.mxu0 %v3629_v21  ;;  %1461 = vmatprep.subr.bf16.mxu1 %v3651_v26  ;;  %v2790_v21 = vld [vmem:[%s3944_s29 + $0x40] sm:$0xff]  ;;  %v2791_v26 = vld [vmem:[%s3944_s29 + $0x48] sm:$0xff] }
 0x183   : > { %1448 = vmatprep.mubr.bf16.mxu0 %v3481_v3  ;;  %1491 = vmatprep.mubr.bf16.mxu1 %v3481_v3 }
 0x185   : > { %1419 = vmatpush1.bf16.msra.mxu0 %v3642_v24  ;;  %1462 = vmatpush1.bf16.msra.mxu1 %v3665_v30 }
 0x186   : > { %1420 = vmatprep.subr.bf16.mxu0 %v3647_v25  ;;  %1463 = vmatprep.subr.bf16.mxu1 %v3668_v31  ;;  %v2794_v31 = vld [vmem:[%s3944_s29 + $0x60] sm:$0xff] }
 0x189   : > { %1421 = vmatpush1.bf16.msra.mxu0 %v3657_v28  ;;  %1464 = vmatpush1.bf16.msra.mxu1 %v3683_v34 }
 0x18a   : > { %1422 = vmatprep.subr.bf16.mxu0 %v3660_v29  ;;  %1465 = vmatprep.subr.bf16.mxu1 %v3688_v35  ;;  %v2795_v35 = vld [vmem:[%s3944_s29 + $0x68] sm:$0xff] }
 0x18d   : > { %1423 = vmatpush1.bf16.msra.mxu0 %v3675_v32  ;;  %1466 = vmatpush1.bf16.msra.mxu1 %v3697_v38 }
 0x18e   : > { %1424 = vmatprep.subr.bf16.mxu0 %v3680_v33  ;;  %1467 = vmatprep.subr.bf16.mxu1 %v3705_v40 }
 0x191   : > { %1425 = vmatpush1.bf16.msra.mxu0 %v3693_v37  ;;  %1468 = vmatpush1.bf16.msra.mxu1 %v3717_v42  ;;  %v2793_v42 = vld [vmem:[%s3944_s29 + $0x58] sm:$0xff] }
 0x192   : > { %1426 = vmatprep.subr.bf16.mxu0 %v3701_v39  ;;  %1469 = vmatprep.subr.bf16.mxu1 %v3725_v44 }
 0x195   : > { %1427 = vmatpush1.bf16.msra.mxu0 %v3712_v41  ;;  %1470 = vmatpush1.bf16.msra.mxu1 %v3734_v47  ;;  %v2797_v47 = vld [vmem:[%s3944_s29 + $0x78] sm:$0xff] }
 0x196   : > { %1428 = vmatprep.subr.bf16.mxu0 %v3721_v43  ;;  %1471 = vmatprep.subr.bf16.mxu1 %v3742_v49 }
 0x199   : > { %1429 = vmatpush1.bf16.msra.mxu0 %v3730_v46  ;;  %1472 = vmatpush1.bf16.msra.mxu1 %v3754_v51  ;;  %v2792_v46 = vld [vmem:[%s3944_s29 + $0x50] sm:$0xff]  ;;  %s2604_s29 = scalar_lea.vmem %s3599_s19, %s2878_s24 [#allocation5] }
 0x19a   : > { %1430 = vmatprep.subr.bf16.mxu0 %v3739_v48  ;;  %1473 = vmatprep.subr.bf16.mxu1 %v3759_v52 }
 0x19d   : > { %1431 = vmatpush1.bf16.msra.mxu0 %v3751_v50  ;;  %1474 = vmatpush1.bf16.msra.mxu1 %v3765_v54 }
 0x19e   : > { %1583 = vmatprep.subr.bf16.mxu0 %v3939_v20  ;;  %1626 = vmatprep.subr.bf16.mxu1 %v3632_v22 }
 0x240   : > { %v1282_v23 = vpop.f32.mrf.mxu0  ;;  %v1325_v25 = vpop.f32.mrf.mxu1 }
 0x241   : > { %v1334_v24 = vadd.f32 %v2790_v21, %v1282_v23  ;;  %v1336_v48 = vadd.f32 %v2792_v46, %v1325_v25  ;;  %v4039_v46 = vld [vmem:[%s3592_s26 + $0x44] ss:$16 sps:$4 sm:$0xff]  }
 0x242   : > { %v1284_v28 = vpop.f32.mrf.mxu0  ;;  %v1327_v33 = vpop.f32.mrf.mxu1 }
 0x243   : > { %v2798_v29 = vmul.f32 -1.442695, %v1334_v24  ;;  %v1335_v30 = vadd.f32 %v2791_v26, %v1284_v28  ;;  %v1337_v44 = vadd.f32 %v2793_v42, %v1327_v33  ;;  %v3965_v26 = vld [vmem:[%s3592_s26 + $0xe0] ss:$16 sps:$4 sm:$0xff]   ;;  %v3969_v28 = vld [vmem:[%s3592_s26 + $0xe8] ss:$16 sps:$4 sm:$0xff]  }
 0x244   : > { %v1286_v32 = vpop.f32.mrf.mxu0  ;;  %v1329_v40 = vpop.f32.mrf.mxu1  ;;  %v3995_v33 = vld [vmem:[%s3592_s26 + $0xac] ss:$16 sps:$4 sm:$0xff]  }
 0x245   : > { %3168 = vpow2.f32 %v2798_v29  ;;  %v2800_v22 = vmul.f32 -1.442695, %v1335_v30  ;;  %v1338_v34 = vadd.f32 %v2794_v31, %v1286_v32  ;;  %v2802_v57 = vmul.f32 -1.442695, %v1337_v44  ;;  %v3973_v29 = vld [vmem:[%s3592_s26 + $0xc4] ss:$16 sps:$4 sm:$0xff]  }
 0x246   : > { %v1288_v37 = vpop.f32.mrf.mxu0  ;;  %v1331_v43 = vpop.f32.mrf.mxu1  ;;  %v1340_v62 = vadd.f32 %v2796_v58, %v1329_v40  ;;  %v3977_v30 = vld [vmem:[%s3592_s26 + $0xcc] ss:$16 sps:$4 sm:$0xff]   ;;  %v3983_v31 = vld [vmem:[%s3592_s26 + $0xc0] ss:$16 sps:$4 sm:$0xff]   ;;  %v3987_v32 = vld [vmem:[%s3592_s26 + $0xc8] ss:$16 sps:$4 sm:$0xff]  }
 0x247   : > { %3170 = vpow2.f32 %v2800_v22  ;;  %v2799_v38 = vmul.f32 -1.442695, %v1338_v34  ;;  %v1339_v39 = vadd.f32 %v2795_v35, %v1288_v37  ;;  %v1341_v55 = vadd.f32 %v2797_v47, %v1331_v43  ;;  %v3991_v22 = vld [vmem:[%s3592_s26 + $0xa4] ss:$16 sps:$4 sm:$0xff]   ;;  %v3999_v34 = vld [vmem:[%s3592_s26 + $0xa0] ss:$16 sps:$4 sm:$0xff]  }
 0x248   : > { %v4003_v35 = vld [vmem:[%s3592_s26 + $0xa8] ss:$16 sps:$4 sm:$0xff]   ;;  %v4007_v37 = vld [vmem:[%s3592_s26 + $0x84] ss:$16 sps:$4 sm:$0xff]   ;;  %v4027_v42 = vld [vmem:[%s3592_s26 + $0x6c] ss:$16 sps:$4 sm:$0xff]  }
 0x249   : > { %3172 = vpow2.f32 %v2799_v38  ;;  %v2801_v41 = vmul.f32 -1.442695, %v1339_v39  ;;  %v2803_v5 = vmul.f32 -1.442695, %v1341_v55  ;;  %v4011_v38 = vld [vmem:[%s3592_s26 + $0x8c] ss:$16 sps:$4 sm:$0xff]  }
 0x24a   : > { %v4015_v39 = vld [vmem:[%s3592_s26 + $0x80] ss:$16 sps:$4 sm:$0xff]   ;;  %v4019_v40 = vld [vmem:[%s3592_s26 + $0x88] ss:$16 sps:$4 sm:$0xff]   ;;  %v4043_v47 = vld [vmem:[%s3592_s26 + $0x4c] ss:$16 sps:$4 sm:$0xff]  }
 0x24b   : > { %3174 = vpow2.f32 %v2801_v41  ;;  %v4023_v41 = vld [vmem:[%s3592_s26 + $0x64] ss:$16 sps:$4 sm:$0xff]   ;;  %v4031_v43 = vld [vmem:[%s3592_s26 + $0x60] ss:$16 sps:$4 sm:$0xff]   ;;  %v4035_v44 = vld [vmem:[%s3592_s26 + $0x68] ss:$16 sps:$4 sm:$0xff]  }
 0x24c   : > { %3176 = vtanh.f32 %v1336_v48  ;;  %v4047_v48 = vld [vmem:[%s3592_s26 + $0x40] ss:$16 sps:$4 sm:$0xff]   ;;  %v4051_v55 = vld [vmem:[%s3592_s26 + $0x48] ss:$16 sps:$4 sm:$0xff]  }
 0x252   : > { %v3169_v56 = vpop.eup %3168 }
 0x253   : > { %v1348_v59 = vadd.f32 1.0, %v3169_v56  ;;  %v4055_v56 = vld [vmem:[%s3592_s26 + $0x24] ss:$16 sps:$4 sm:$0xff]  }
 0x254   : > { %v3171_v60 = vpop.eup %3170 }
 0x255   : > { %3178 = vrcp.f32 %v1348_v59  ;;  %v1360_v61 = vadd.f32 1.0, %v3171_v60  ;;  %v4065_v59 = vld [vmem:[%s3592_s26 + $0x4] ss:$16 sps:$4 sm:$0xff]   ;;  %v4073_v60 = vld [vmem:[%s3592_s26 + $0xec] ss:$16 sps:$4 sm:$0xff]  }
 0x256   : > { %v3173_v6 = vpop.eup %3172  ;;  %3180 = vpow2.f32 %v2802_v57  ;;  %v4060_v57 = vld [vmem:[%s3592_s26 + $0x20] ss:$16 sps:$4 sm:$0xff]  }
 0x257   : > { %3182 = vrcp.f32 %v1360_v61  ;;  %v1349_v63 = vadd.f32 1.0, %v3173_v6  ;;  %v2814_v6 = vld [vmem:[%s4077_s8 + $0xa0] sm:$0xff] }
 0x258   : > { %v3175_v0 = vpop.eup %3174  ;;  %3184 = vpow2.f32 %v2803_v5 }
 0x259   : > { %3186 = vrcp.f32 %v1349_v63  ;;  %v1361_v1 = vadd.f32 1.0, %v3175_v0  ;;  %v3177_v2 = vpop.eup %3176 }
 0x25a   : > { %3188 = vtanh.f32 %v1340_v62 }
 0x25b   : > { %3190 = vrcp.f32 %v1361_v1 }
 0x262   : > { %v3179_v7 = vpop.eup %3178 }
 0x263   : > { %v3181_v4 = vpop.eup %3180  ;;  %v1382_v10 = vmul.f32 %v3179_v7, %v3177_v2  ;;  %v2815_v2 = vld [vmem:[%s4077_s8 + $0xa8] sm:$0xff] }
 0x264   : > { %v3183_v8 = vpop.eup %3182  ;;  %v1374_v14 = vadd.f32 1.0, %v3181_v4 }
 0x265   : > { %v3185_v9 = vpop.eup %3184  ;;  %v1380_v11 = vmul.f32 %v3183_v8, %v3898_v13 }
 0x266   : > { %v3187_v12 = vpop.eup %3186  ;;  %v1375_v19 = vadd.f32 1.0, %v3185_v9  ;;  %3192 = vrcp.f32 %v1374_v14 }
 0x267   : > { %v3189_v15 = vpop.eup %3188  ;;  %v3955_v17 = vadd.f32 %v1382_v10, %v1380_v11  ;;  %v2813_v11 = vld [vmem:[%s4077_s8 + $0x98] sm:$0xff] }
 0x268   : > { %v3191_v18 = vpop.eup %3190  ;;  %v1383_v27 = vmul.f32 %v3189_v15, %v3187_v12  ;;  %v2812_v15 = vld [vmem:[%s4077_s8 + $0x90] sm:$0xff] }
 0x269   : > { %v1381_v36 = vmul.f32 %v3191_v18, %v3901_v16  ;;  %3194 = vtanh.f32 %v3955_v17  ;;  %v2817_v18 = vld [vmem:[%s4077_s8 + $0xb8] sm:$0xff] }
 0x26a   : > { %3196 = vrcp.f32 %v1375_v19 }
 0x26b   : > { %v3958_v45 = vadd.f32 %v1383_v27, %v1381_v36 }
 0x26d   : > { %3198 = vtanh.f32 %v3958_v45 }
 0x273   : > { %v3193_v13 = vpop.eup %3192 }
 0x276   : > { %v3195_v53 = vpop.eup %3194 }
 0x277   : > { %v3197_v21 = vpop.eup %3196  ;;  %v1388_v24 = vmul.f32 %v3195_v53, %v3193_v13 }
 0x27a   : > { %v3199_v23 = vpop.eup %3198 }
 0x27b   : > { %v1389_v25 = vmul.f32 %v3199_v23, %v3197_v21 }
 0x27d   : > { %v1390_v16 = vpack.c.bf16 %v1389_v25, %v1388_v24  ;;  %v2816_v25 = vld [vmem:[%s4077_s8 + $0xb0] sm:$0xff] }
 0x27f   : > { %2992 = vst [vmem:[%s2578_s5 + $0x8] sm:$0xff] %v1390_v16   ;;  %1449 = vmatmul.mubr.bf16.vlgmr.msra.gmra.mxu0 %v1390_v16  ;;  %1492 = vmatmul.mubr.bf16.vlgmr.msra.gmra.mxu1 %v1390_v16  ;;  %s4313_s5 = scalar_lea.vmem [#allocation4], %s2881_s30 }
 0x280   : > { %1584 = vmatpush1.bf16.msra.mxu0 %v3965_v26  ;;  %1627 = vmatpush1.bf16.msra.mxu1 %v3969_v28 }
 0x281   : > { %1585 = vmatprep.subr.bf16.mxu0 %v3973_v29  ;;  %1628 = vmatprep.subr.bf16.mxu1 %v3977_v30 }
 0x282   : > { %1615 = vmatprep.mubr.bf16.mxu0 %v3481_v3  ;;  %1658 = vmatprep.mubr.bf16.mxu1 %v3481_v3 }
 0x284   : > { %1586 = vmatpush1.bf16.msra.mxu0 %v3983_v31  ;;  %1629 = vmatpush1.bf16.msra.mxu1 %v3987_v32 }
 0x285   : > { %1587 = vmatprep.subr.bf16.mxu0 %v3991_v22  ;;  %1630 = vmatprep.subr.bf16.mxu1 %v3995_v33 }
 0x288   : > { %1588 = vmatpush1.bf16.msra.mxu0 %v3999_v34  ;;  %1631 = vmatpush1.bf16.msra.mxu1 %v4003_v35 }
 0x289   : > { %1589 = vmatprep.subr.bf16.mxu0 %v4007_v37  ;;  %1632 = vmatprep.subr.bf16.mxu1 %v4011_v38 }
 0x28c   : > { %1590 = vmatpush1.bf16.msra.mxu0 %v4015_v39  ;;  %1633 = vmatpush1.bf16.msra.mxu1 %v4019_v40 }
 0x28d   : > { %1591 = vmatprep.subr.bf16.mxu0 %v4023_v41  ;;  %1634 = vmatprep.subr.bf16.mxu1 %v4027_v42 }
 0x290   : > { %1592 = vmatpush1.bf16.msra.mxu0 %v4031_v43  ;;  %1635 = vmatpush1.bf16.msra.mxu1 %v4035_v44 }
 0x291   : > { %1593 = vmatprep.subr.bf16.mxu0 %v4039_v46  ;;  %1636 = vmatprep.subr.bf16.mxu1 %v4043_v47 }
 0x294   : > { %1594 = vmatpush1.bf16.msra.mxu0 %v4047_v48  ;;  %1637 = vmatpush1.bf16.msra.mxu1 %v4051_v55 }
 0x295   : > { %1595 = vmatprep.subr.bf16.mxu0 %v4055_v56  ;;  %1638 = vmatprep.subr.bf16.mxu1 %v3742_v49  ;;  %v2810_v49 = vld [vmem:[%s4077_s8 + $0x80] sm:$0xff] }
 0x298   : > { %1596 = vmatpush1.bf16.msra.mxu0 %v4060_v57  ;;  %1639 = vmatpush1.bf16.msra.mxu1 %v3754_v51 }
 0x299   : > { %1597 = vmatprep.subr.bf16.mxu0 %v4065_v59  ;;  %1640 = vmatprep.subr.bf16.mxu1 %v3759_v52 }
 0x29c   : > { %1598 = vmatpush1.bf16.msra.mxu0 %v3751_v50  ;;  %1641 = vmatpush1.bf16.msra.mxu1 %v3765_v54  ;;  %v2811_v50 = vld [vmem:[%s4077_s8 + $0x88] sm:$0xff]  ;;  %s2612_s8 = scalar_lea.vmem %s3599_s19, %s2898_s6 [#allocation5] }
 0x29d   : > { %1750 = vmatprep.subr.bf16.mxu0 %v3939_v20  ;;  %1793 = vmatprep.subr.bf16.mxu1 %v4073_v60 }
 0x33f   : > { %v1450_v51 = vpop.f32.mrf.mxu0  ;;  %v1493_v5 = vpop.f32.mrf.mxu1 }
 0x340   : > { %v1502_v52 = vadd.f32 %v2810_v49, %v1450_v51  ;;  %v1504_v19 = vadd.f32 %v2812_v15, %v1493_v5 }
 0x341   : > { %v1452_v61 = vpop.f32.mrf.mxu0  ;;  %v1495_v0 = vpop.f32.mrf.mxu1 }
 0x342   : > { %v2818_v54 = vmul.f32 -1.442695, %v1502_v52  ;;  %v1503_v58 = vadd.f32 %v2811_v50, %v1452_v61  ;;  %v1505_v14 = vadd.f32 %v2813_v11, %v1495_v0 }
 0x343   : > { %v1454_v62 = vpop.f32.mrf.mxu0  ;;  %v1497_v9 = vpop.f32.mrf.mxu1 }
 0x344   : > { %3200 = vpow2.f32 %v2818_v54  ;;  %v2820_v63 = vmul.f32 -1.442695, %v1503_v58  ;;  %v1506_v1 = vadd.f32 %v2814_v6, %v1454_v62  ;;  %v2822_v13 = vmul.f32 -1.442695, %v1505_v14 }
 0x345   : > { %v1456_v7 = vpop.f32.mrf.mxu0  ;;  %v1499_v12 = vpop.f32.mrf.mxu1  ;;  %v1508_v49 = vadd.f32 %v2816_v25, %v1497_v9 }
 0x346   : > { %3202 = vpow2.f32 %v2820_v63  ;;  %v2819_v4 = vmul.f32 -1.442695, %v1506_v1  ;;  %v1507_v8 = vadd.f32 %v2815_v2, %v1456_v7  ;;  %v1509_v27 = vadd.f32 %v2817_v18, %v1499_v12 }
 0x348   : > { %3204 = vpow2.f32 %v2819_v4  ;;  %v2821_v10 = vmul.f32 -1.442695, %v1507_v8  ;;  %v2823_v23 = vmul.f32 -1.442695, %v1509_v27 }
 0x34a   : > { %3206 = vpow2.f32 %v2821_v10 }
 0x34b   : > { %3208 = vtanh.f32 %v1504_v19 }
 0x351   : > { %v3201_v36 = vpop.eup %3200 }
 0x352   : > { %v1516_v53 = vadd.f32 1.0, %v3201_v36  ;;  %v4128_v36 = vld [vmem:[%s3592_s26 + $0x28] ss:$16 sps:$4 sm:$0xff]  }
 0x353   : > { %v3203_v21 = vpop.eup %3202 }
 0x354   : > { %3210 = vrcp.f32 %v1516_v53  ;;  %v1528_v24 = vadd.f32 1.0, %v3203_v21  ;;  %v4137_v53 = vld [vmem:[%s3592_s26] ss:$16 sps:$4 sm:$0xff]   ;;  %v4141_v21 = vld [vmem:[%s3592_s26 + $0x8] ss:$16 sps:$4 sm:$0xff]  }
 0x355   : > { %v3205_v16 = vpop.eup %3204  ;;  %3212 = vpow2.f32 %v2822_v13  ;;  %v4133_v13 = vld [vmem:[%s3592_s26 + $0xc] ss:$16 sps:$4 sm:$0xff]  }
 0x356   : > { %3214 = vrcp.f32 %v1528_v24  ;;  %v1517_v51 = vadd.f32 1.0, %v3205_v16 }
 0x357   : > { %v3207_v52 = vpop.eup %3206  ;;  %3216 = vpow2.f32 %v2823_v23  ;;  %v2830_v23 = vld [vmem:[%s4147_s11 + $0xc0] sm:$0xff] }
 0x358   : > { %3218 = vrcp.f32 %v1517_v51  ;;  %v1529_v50 = vadd.f32 1.0, %v3207_v52  ;;  %v3209_v5 = vpop.eup %3208 }
 0x359   : > { %3220 = vtanh.f32 %v1508_v49  ;;  %v2831_v49 = vld [vmem:[%s4147_s11 + $0xc8] sm:$0xff] }
 0x35a   : > { %3222 = vrcp.f32 %v1529_v50 }
 0x361   : > { %v3211_v61 = vpop.eup %3210 }
 0x362   : > { %v3213_v54 = vpop.eup %3212  ;;  %v1550_v62 = vmul.f32 %v3211_v61, %v3209_v5  ;;  %v2834_v5 = vld [vmem:[%s4147_s11 + $0xe0] sm:$0xff] }
 0x363   : > { %v3215_v58 = vpop.eup %3214  ;;  %v1542_v1 = vadd.f32 1.0, %v3213_v54 }
 0x364   : > { %v3217_v6 = vpop.eup %3216  ;;  %v1548_v63 = vmul.f32 %v3215_v58, %v3955_v17 }
 0x365   : > { %v3219_v0 = vpop.eup %3218  ;;  %v1543_v8 = vadd.f32 1.0, %v3217_v6  ;;  %3224 = vrcp.f32 %v1542_v1 }
 0x366   : > { %v3221_v2 = vpop.eup %3220  ;;  %v4088_v7 = vadd.f32 %v1550_v62, %v1548_v63  ;;  %v2835_v62 = vld [vmem:[%s4147_s11 + $0xe8] sm:$0xff] }
 0x367   : > { %v3223_v4 = vpop.eup %3222  ;;  %v1551_v9 = vmul.f32 %v3221_v2, %v3219_v0 }
 0x368   : > { %v1549_v10 = vmul.f32 %v3223_v4, %v3958_v45  ;;  %3226 = vtanh.f32 %v4088_v7  ;;  %v4123_v45 = vld [vmem:[%s3592_s26 + $0x2c] ss:$16 sps:$4 sm:$0xff]   ;;  %s2941_s26 = sshll.u32 %s1738_s25, 6 }
 0x369   : > { %3228 = vrcp.f32 %v1543_v8  ;;  %v2833_v8 = vld [vmem:[%s4147_s11 + $0xd8] sm:$0xff]  ;;  %s4204_s28 = scalar_lea.vmem [#allocation4], %s2941_s26 }
 0x36a   : > { %v4091_v11 = vadd.f32 %v1551_v9, %v1549_v10 }
 0x36c   : > { %3230 = vtanh.f32 %v4091_v11 }
 0x372   : > { %v3225_v17 = vpop.eup %3224 }
 0x375   : > { %v3227_v12 = vpop.eup %3226 }
 0x376   : > { %v3229_v14 = vpop.eup %3228  ;;  %v1556_v18 = vmul.f32 %v3227_v12, %v3225_v17  ;;  %v2832_v17 = vld [vmem:[%s4147_s11 + $0xd0] sm:$0xff]  ;;  %v2837_v12 = vld [vmem:[%s4147_s11 + $0xf8] sm:$0xff] }
 0x379   : > { %v3231_v15 = vpop.eup %3230 }
 0x37a   : > { %v1557_v19 = vmul.f32 %v3231_v15, %v3229_v14 }
 0x37c   : > { %v1558_v27 = vpack.c.bf16 %v1557_v19, %v1556_v18 }
 0x37e   : > { %2993 = vst [vmem:[%s2586_s10 + $0x10] sm:$0xff] %v1558_v27   ;;  %1616 = vmatmul.mubr.bf16.vlgmr.msra.gmra.mxu0 %v1558_v27  ;;  %1659 = vmatmul.mubr.bf16.vlgmr.msra.gmra.mxu1 %v1558_v27  ;;  %s4334_s10 = scalar_lea.vmem [#allocation4], %s2901_s9 }
 0x37f   : > { %1751 = vmatpush1.bf16.msra.mxu0 %v3965_v26  ;;  %1794 = vmatpush1.bf16.msra.mxu1 %v3969_v28 }
 0x380   : > { %1752 = vmatprep.subr.bf16.mxu0 %v3973_v29  ;;  %1795 = vmatprep.subr.bf16.mxu1 %v3977_v30 }
 0x381   : > { %1782 = vmatprep.mubr.bf16.mxu0 %v3481_v3  ;;  %1825 = vmatprep.mubr.bf16.mxu1 %v3481_v3 }
 0x383   : > { %1753 = vmatpush1.bf16.msra.mxu0 %v3983_v31  ;;  %1796 = vmatpush1.bf16.msra.mxu1 %v3987_v32 }
 0x384   : > { %1754 = vmatprep.subr.bf16.mxu0 %v3991_v22  ;;  %1797 = vmatprep.subr.bf16.mxu1 %v3995_v33 }
 0x387   : > { %1755 = vmatpush1.bf16.msra.mxu0 %v3999_v34  ;;  %1798 = vmatpush1.bf16.msra.mxu1 %v4003_v35 }
 0x388   : > { %1756 = vmatprep.subr.bf16.mxu0 %v4007_v37  ;;  %1799 = vmatprep.subr.bf16.mxu1 %v4011_v38 }
 0x38b   : > { %1757 = vmatpush1.bf16.msra.mxu0 %v4015_v39  ;;  %1800 = vmatpush1.bf16.msra.mxu1 %v4019_v40 }
 0x38c   : > { %1758 = vmatprep.subr.bf16.mxu0 %v4023_v41  ;;  %1801 = vmatprep.subr.bf16.mxu1 %v4027_v42 }
 0x38f   : > { %1759 = vmatpush1.bf16.msra.mxu0 %v4031_v43  ;;  %1802 = vmatpush1.bf16.msra.mxu1 %v4035_v44 }
 0x390   : > { %1760 = vmatprep.subr.bf16.mxu0 %v4039_v46  ;;  %1803 = vmatprep.subr.bf16.mxu1 %v4043_v47 }
 0x393   : > { %1761 = vmatpush1.bf16.msra.mxu0 %v4047_v48  ;;  %1804 = vmatpush1.bf16.msra.mxu1 %v4051_v55 }
 0x394   : > { %1762 = vmatprep.subr.bf16.mxu0 %v4055_v56  ;;  %1805 = vmatprep.subr.bf16.mxu1 %v4123_v45 }
 0x397   : > { %1763 = vmatpush1.bf16.msra.mxu0 %v4060_v57  ;;  %1806 = vmatpush1.bf16.msra.mxu1 %v4128_v36 }
 0x398   : > { %1764 = vmatprep.subr.bf16.mxu0 %v4065_v59  ;;  %1807 = vmatprep.subr.bf16.mxu1 %v4133_v13 }
 0x39b   : > { %1765 = vmatpush1.bf16.msra.mxu0 %v4137_v53  ;;  %1808 = vmatpush1.bf16.msra.mxu1 %v4141_v21 }
 0x39c   : > { %1918 = vmatprep.subr.bf16.mxu0 %v3939_v20  ;;  %1961 = vmatprep.subr.bf16.mxu1 %v4073_v60 }
 0x43e   : > { %v1617_v24 = vpop.f32.mrf.mxu0  ;;  %v1660_v16 = vpop.f32.mrf.mxu1 }
 0x43f   : > { %v1669_v25 = vadd.f32 %v2830_v23, %v1617_v24  ;;  %v1671_v14 = vadd.f32 %v2832_v17, %v1660_v16 }
 0x440   : > { %v1619_v51 = vpop.f32.mrf.mxu0  ;;  %v1662_v58 = vpop.f32.mrf.mxu1 }
 0x441   : > { %v2838_v52 = vmul.f32 -1.442695, %v1669_v25  ;;  %v1670_v50 = vadd.f32 %v2831_v49, %v1619_v51  ;;  %v1672_v10 = vadd.f32 %v2833_v8, %v1662_v58  ;;  %v2836_v49 = vld [vmem:[%s4147_s11 + $0xf0] sm:$0xff]  ;;  %s2620_s11 = scalar_lea.vmem %s3599_s19, %s2918_s15 [#allocation5] }
 0x442   : > { %v1621_v61 = vpop.f32.mrf.mxu0  ;;  %v1664_v2 = vpop.f32.mrf.mxu1 }
 0x443   : > { %3232 = vpow2.f32 %v2838_v52  ;;  %v2840_v54 = vmul.f32 -1.442695, %v1670_v50  ;;  %v1673_v6 = vadd.f32 %v2834_v5, %v1621_v61  ;;  %v2842_v19 = vmul.f32 -1.442695, %v1672_v10 }
 0x444   : > { %v1623_v63 = vpop.f32.mrf.mxu0  ;;  %v1666_v9 = vpop.f32.mrf.mxu1  ;;  %v1675_v52 = vadd.f32 %v2836_v49, %v1664_v2 }
 0x445   : > { %3234 = vpow2.f32 %v2840_v54  ;;  %v2839_v0 = vmul.f32 -1.442695, %v1673_v6  ;;  %v1674_v1 = vadd.f32 %v2835_v62, %v1623_v63  ;;  %v1676_v15 = vadd.f32 %v2837_v12, %v1666_v9 }
 0x447   : > { %3236 = vpow2.f32 %v2839_v0  ;;  %v2841_v4 = vmul.f32 -1.442695, %v1674_v1  ;;  %v2843_v24 = vmul.f32 -1.442695, %v1676_v15 }
 0x449   : > { %3238 = vpow2.f32 %v2841_v4 }
 0x44a   : > { %3240 = vtanh.f32 %v1671_v14 }
 0x450   : > { %v3233_v18 = vpop.eup %3232 }
 0x451   : > { %v1683_v27 = vadd.f32 1.0, %v3233_v18 }
 0x452   : > { %v3235_v23 = vpop.eup %3234 }
 0x453   : > { %3242 = vrcp.f32 %v1683_v27  ;;  %v1695_v25 = vadd.f32 1.0, %v3235_v23 }
 0x454   : > { %v3237_v51 = vpop.eup %3236  ;;  %3244 = vpow2.f32 %v2842_v19 }
 0x455   : > { %3246 = vrcp.f32 %v1695_v25  ;;  %v1684_v50 = vadd.f32 1.0, %v3237_v51 }
 0x456   : > { %v3239_v5 = vpop.eup %3238  ;;  %3248 = vpow2.f32 %v2843_v24 }
 0x457   : > { %3250 = vrcp.f32 %v1684_v50  ;;  %v1696_v61 = vadd.f32 1.0, %v3239_v5  ;;  %v3241_v16 = vpop.eup %3240 }
 0x458   : > { %3252 = vtanh.f32 %v1675_v52  ;;  %v1743_v52 = vld [vmem:[%s4204_s28 + $0x8] sm:$0xff] }
 0x459   : > { %3254 = vrcp.f32 %v1696_v61 }
 0x460   : > { %v3243_v54 = vpop.eup %3242 }
 0x461   : > { %v3245_v58 = vpop.eup %3244  ;;  %v1717_v63 = vmul.f32 %v3243_v54, %v3241_v16  ;;  %v1746_v16 = vld [vmem:[%s4204_s28 + $0x20] sm:$0xff] }
 0x462   : > { %v3247_v6 = vpop.eup %3246  ;;  %v1709_v4 = vadd.f32 1.0, %v3245_v58 }
 0x463   : > { %v3249_v62 = vpop.eup %3248  ;;  %v1715_v0 = vmul.f32 %v3247_v6, %v4088_v7 }
 0x464   : > { %v3251_v1 = vpop.eup %3250  ;;  %v1710_v10 = vadd.f32 1.0, %v3249_v62  ;;  %3256 = vrcp.f32 %v1709_v4 }
 0x465   : > { %v3253_v2 = vpop.eup %3252  ;;  %v4158_v8 = vadd.f32 %v1717_v63, %v1715_v0  ;;  %v1747_v63 = vld [vmem:[%s4204_s28 + $0x28] sm:$0xff] }
 0x466   : > { %v3255_v9 = vpop.eup %3254  ;;  %v1718_v17 = vmul.f32 %v3253_v2, %v3251_v1 }
 0x467   : > { %v1716_v12 = vmul.f32 %v3255_v9, %v4091_v11  ;;  %3258 = vtanh.f32 %v4158_v8  ;;  %v1742_v11 = vld [vmem:[%s4204_s28] sm:$0xff] }
 0x468   : > { %3260 = vrcp.f32 %v1710_v10  ;;  %v1745_v10 = vld [vmem:[%s4204_s28 + $0x18] sm:$0xff] }
 0x469   : > { %v4161_v14 = vadd.f32 %v1718_v17, %v1716_v12 }
 0x46b   : > { %3262 = vtanh.f32 %v4161_v14 }
 0x471   : > { %v3257_v7 = vpop.eup %3256 }
 0x474   : > { %v3259_v15 = vpop.eup %3258 }
 0x475   : > { %v3261_v18 = vpop.eup %3260  ;;  %v1723_v27 = vmul.f32 %v3259_v15, %v3257_v7  ;;  %v1744_v7 = vld [vmem:[%s4204_s28 + $0x10] sm:$0xff]  ;;  %v1749_v15 = vld [vmem:[%s4204_s28 + $0x38] sm:$0xff] }
 0x478   : > { %v3263_v19 = vpop.eup %3262 }
 0x479   : > { %v1724_v23 = vmul.f32 %v3263_v19, %v3261_v18 }
 0x47b   : > { %v1725_v24 = vpack.c.bf16 %v1724_v23, %v1723_v27 }
 0x47d   : > { %2994 = vst [vmem:[%s2592_s14 + $0x18] sm:$0xff] %v1725_v24   ;;  %1783 = vmatmul.mubr.bf16.vlgmr.msra.gmra.mxu0 %v1725_v24  ;;  %1826 = vmatmul.mubr.bf16.vlgmr.msra.gmra.mxu1 %v1725_v24  ;;  %s2426_s14 = sadd.s32 (%p3559_p4), %s3466_s18, %s2951_s13 }
 0x47e   : > { %1919 = vmatpush1.bf16.msra.mxu0 %v3965_v26  ;;  %1962 = vmatpush1.bf16.msra.mxu1 %v3969_v28  ;;  %s2925_s7 = sshll.u32 (%p3559_p4), %s2426_s14, 2 }
 0x47f   : > { %1920 = vmatprep.subr.bf16.mxu0 %v3973_v29  ;;  %1963 = vmatprep.subr.bf16.mxu1 %v3977_v30 }
 0x480   : > { %1950 = vmatprep.mubr.bf16.mxu0 %v3481_v3  ;;  %1993 = vmatprep.mubr.bf16.mxu1 %v3481_v3 }
 0x482   : > { %1921 = vmatpush1.bf16.msra.mxu0 %v3983_v31  ;;  %1964 = vmatpush1.bf16.msra.mxu1 %v3987_v32 }
 0x483   : > { %1922 = vmatprep.subr.bf16.mxu0 %v3991_v22  ;;  %1965 = vmatprep.subr.bf16.mxu1 %v3995_v33 }
 0x486   : > { %1923 = vmatpush1.bf16.msra.mxu0 %v3999_v34  ;;  %1966 = vmatpush1.bf16.msra.mxu1 %v4003_v35 }
 0x487   : > { %1924 = vmatprep.subr.bf16.mxu0 %v4007_v37  ;;  %1967 = vmatprep.subr.bf16.mxu1 %v4011_v38 }
 0x48a   : > { %1925 = vmatpush1.bf16.msra.mxu0 %v4015_v39  ;;  %1968 = vmatpush1.bf16.msra.mxu1 %v4019_v40 }
 0x48b   : > { %1926 = vmatprep.subr.bf16.mxu0 %v4023_v41  ;;  %1969 = vmatprep.subr.bf16.mxu1 %v4027_v42 }
 0x48e   : > { %1927 = vmatpush1.bf16.msra.mxu0 %v4031_v43  ;;  %1970 = vmatpush1.bf16.msra.mxu1 %v4035_v44 }
 0x48f   : > { %1928 = vmatprep.subr.bf16.mxu0 %v4039_v46  ;;  %1971 = vmatprep.subr.bf16.mxu1 %v4043_v47 }
 0x492   : > { %1929 = vmatpush1.bf16.msra.mxu0 %v4047_v48  ;;  %1972 = vmatpush1.bf16.msra.mxu1 %v4051_v55 }
 0x493   : > { %1930 = vmatprep.subr.bf16.mxu0 %v4055_v56  ;;  %1973 = vmatprep.subr.bf16.mxu1 %v4123_v45 }
 0x496   : > { %1931 = vmatpush1.bf16.msra.mxu0 %v4060_v57  ;;  %1974 = vmatpush1.bf16.msra.mxu1 %v4128_v36 }
 0x497   : > { %1932 = vmatprep.subr.bf16.mxu0 %v4065_v59  ;;  %1975 = vmatprep.subr.bf16.mxu1 %v4133_v13 }
 0x49a   : > { %1933 = vmatpush1.bf16.msra.mxu0 %v4137_v53  ;;  %1976 = vmatpush1.bf16.msra.mxu1 %v4141_v21 }
 0x49b   : > { %2086 = vmatprep.subr.bf16.mxu0 %v3939_v20  ;;  %2129 = vmatprep.subr.bf16.mxu1 %v4073_v60 }
 0x53d   : > { %v1784_v25 = vpop.f32.mrf.mxu0  ;;  %v1827_v51 = vpop.f32.mrf.mxu1 }
 0x53e   : > { %v1836_v49 = vadd.f32 %v1784_v25, %v1742_v11  ;;  %v1838_v18 = vadd.f32 %v1827_v51, %v1744_v7 }
 0x53f   : > { %v1786_v50 = vpop.f32.mrf.mxu0  ;;  %v1829_v6 = vpop.f32.mrf.mxu1 }
 0x540   : > { %v2851_v5 = vmul.f32 -1.442695, %v1836_v49  ;;  %v1837_v61 = vadd.f32 %v1786_v50, %v1743_v52  ;;  %v1839_v12 = vadd.f32 %v1829_v6, %v1745_v10  ;;  %v1748_v52 = vld [vmem:[%s4204_s28 + $0x30] sm:$0xff]  ;;  %s2428_s28 = scalar_lea.vmem (%p3559_p4), %s4396_s4, %s2925_s7 }
 0x541   : > { %v1788_v54 = vpop.f32.mrf.mxu0  ;;  %v1831_v2 = vpop.f32.mrf.mxu1 }
 0x542   : > { %3264 = vpow2.f32 %v2851_v5  ;;  %v2853_v58 = vmul.f32 -1.442695, %v1837_v61  ;;  %v1840_v62 = vadd.f32 %v1788_v54, %v1746_v16  ;;  %v2855_v23 = vmul.f32 -1.442695, %v1839_v12 }
 0x543   : > { %v1790_v0 = vpop.f32.mrf.mxu0  ;;  %v1833_v17 = vpop.f32.mrf.mxu1  ;;  %v1842_v5 = vadd.f32 %v1831_v2, %v1748_v52 }
 0x544   : > { %3266 = vpow2.f32 %v2853_v58  ;;  %v2852_v1 = vmul.f32 -1.442695, %v1840_v62  ;;  %v1841_v4 = vadd.f32 %v1790_v0, %v1747_v63  ;;  %v1843_v19 = vadd.f32 %v1833_v17, %v1749_v15 }
 0x546   : > { %3268 = vpow2.f32 %v2852_v1  ;;  %v2854_v9 = vmul.f32 -1.442695, %v1841_v4  ;;  %v2856_v25 = vmul.f32 -1.442695, %v1843_v19 }
 0x548   : > { %3270 = vpow2.f32 %v2854_v9 }
 0x549   : > { %3272 = vtanh.f32 %v1838_v18 }
 0x54f   : > { %v3265_v27 = vpop.eup %3264 }
 0x550   : > { %v1850_v24 = vadd.f32 1.0, %v3265_v27 }
 0x551   : > { %v3267_v11 = vpop.eup %3266 }
 0x552   : > { %3274 = vrcp.f32 %v1850_v24  ;;  %v1862_v49 = vadd.f32 1.0, %v3267_v11 }
 0x553   : > { %v3269_v50 = vpop.eup %3268  ;;  %3276 = vpow2.f32 %v2855_v23 }
 0x554   : > { %3278 = vrcp.f32 %v1862_v49  ;;  %v1851_v61 = vadd.f32 1.0, %v3269_v50 }
 0x555   : > { %v3271_v16 = vpop.eup %3270  ;;  %3280 = vpow2.f32 %v2856_v25 }
 0x556   : > { %3282 = vrcp.f32 %v1851_v61  ;;  %v1863_v54 = vadd.f32 1.0, %v3271_v16  ;;  %v3273_v51 = vpop.eup %3272 }
 0x557   : > { %3284 = vtanh.f32 %v1842_v5  ;;  %v2863_v5 = vld [vmem:[%s4260_s23 + $0x148] sm:$0xff] }
 0x558   : > { %3286 = vrcp.f32 %v1863_v54 }
 0x55f   : > { %v3275_v58 = vpop.eup %3274 }
 0x560   : > { %v3277_v6 = vpop.eup %3276  ;;  %v1884_v0 = vmul.f32 %v3275_v58, %v3273_v51  ;;  %v2866_v51 = vld [vmem:[%s4260_s23 + $0x160] sm:$0xff] }
 0x561   : > { %v3279_v62 = vpop.eup %3278  ;;  %v1876_v9 = vadd.f32 1.0, %v3277_v6 }
 0x562   : > { %v3281_v63 = vpop.eup %3280  ;;  %v1882_v1 = vmul.f32 %v3279_v62, %v4158_v8  ;;  %v2867_v62 = vld [vmem:[%s4260_s23 + $0x168] sm:$0xff] }
 0x563   : > { %v3283_v4 = vpop.eup %3282  ;;  %v1877_v12 = vadd.f32 1.0, %v3281_v63  ;;  %3288 = vrcp.f32 %v1876_v9 }
 0x564   : > { %v3285_v2 = vpop.eup %3284  ;;  %v4215_v10 = vadd.f32 %v1884_v0, %v1882_v1 }
 0x565   : > { %v3287_v17 = vpop.eup %3286  ;;  %v1885_v7 = vmul.f32 %v3285_v2, %v3283_v4  ;;  %v2865_v2 = vld [vmem:[%s4260_s23 + $0x158] sm:$0xff] }
 0x566   : > { %v1883_v15 = vmul.f32 %v3287_v17, %v4161_v14  ;;  %3290 = vtanh.f32 %v4215_v10  ;;  %v2862_v14 = vld [vmem:[%s4260_s23 + $0x140] sm:$0xff] }
 0x567   : > { %3292 = vrcp.f32 %v1877_v12 }
 0x568   : > { %v4218_v18 = vadd.f32 %v1885_v7, %v1883_v15  ;;  %v2864_v7 = vld [vmem:[%s4260_s23 + $0x150] sm:$0xff]  ;;  %v2869_v15 = vld [vmem:[%s4260_s23 + $0x178] sm:$0xff] }
 0x56a   : > { %3294 = vtanh.f32 %v4218_v18 }
 0x570   : > { %v3289_v8 = vpop.eup %3288 }
 0x573   : > { %v3291_v19 = vpop.eup %3290 }
 0x574   : > { %v3293_v27 = vpop.eup %3292  ;;  %v1890_v24 = vmul.f32 %v3291_v19, %v3289_v8 }
 0x577   : > { %v3295_v23 = vpop.eup %3294 }
 0x578   : > { %v1891_v11 = vmul.f32 %v3295_v23, %v3293_v27 }
 0x57a   : > { %v1892_v25 = vpack.c.bf16 %v1891_v11, %v1890_v24 }
 0x57c   : > { %2976 = vst [vmem:[%s1902_s20] sm:$0xff] %v1892_v25   ;;  %1951 = vmatmul.mubr.bf16.vlgmr.msra.gmra.mxu0 %v1892_v25  ;;  %1994 = vmatmul.mubr.bf16.vlgmr.msra.gmra.mxu1 %v1892_v25 }
 0x57d   : > { %2087 = vmatpush1.bf16.msra.mxu0 %v3965_v26  ;;  %2130 = vmatpush1.bf16.msra.mxu1 %v3969_v28 }
 0x57e   : > { %2088 = vmatprep.subr.bf16.mxu0 %v3973_v29  ;;  %2131 = vmatprep.subr.bf16.mxu1 %v3977_v30 }
 0x57f   : > { %2118 = vmatprep.mubr.bf16.mxu0 %v3481_v3  ;;  %2161 = vmatprep.mubr.bf16.mxu1 %v3481_v3 }
 0x581   : > { %2089 = vmatpush1.bf16.msra.mxu0 %v3983_v31  ;;  %2132 = vmatpush1.bf16.msra.mxu1 %v3987_v32 }
 0x582   : > { %2090 = vmatprep.subr.bf16.mxu0 %v3991_v22  ;;  %2133 = vmatprep.subr.bf16.mxu1 %v3995_v33 }
 0x585   : > { %2091 = vmatpush1.bf16.msra.mxu0 %v3999_v34  ;;  %2134 = vmatpush1.bf16.msra.mxu1 %v4003_v35 }
 0x586   : > { %2092 = vmatprep.subr.bf16.mxu0 %v4007_v37  ;;  %2135 = vmatprep.subr.bf16.mxu1 %v4011_v38 }
 0x589   : > { %2093 = vmatpush1.bf16.msra.mxu0 %v4015_v39  ;;  %2136 = vmatpush1.bf16.msra.mxu1 %v4019_v40 }
 0x58a   : > { %2094 = vmatprep.subr.bf16.mxu0 %v4023_v41  ;;  %2137 = vmatprep.subr.bf16.mxu1 %v4027_v42 }
 0x58d   : > { %2095 = vmatpush1.bf16.msra.mxu0 %v4031_v43  ;;  %2138 = vmatpush1.bf16.msra.mxu1 %v4035_v44 }
 0x58e   : > { %2096 = vmatprep.subr.bf16.mxu0 %v4039_v46  ;;  %2139 = vmatprep.subr.bf16.mxu1 %v4043_v47 }
 0x591   : > { %2097 = vmatpush1.bf16.msra.mxu0 %v4047_v48  ;;  %2140 = vmatpush1.bf16.msra.mxu1 %v4051_v55 }
 0x592   : > { %2098 = vmatprep.subr.bf16.mxu0 %v4055_v56  ;;  %2141 = vmatprep.subr.bf16.mxu1 %v4123_v45 }
 0x595   : > { %2099 = vmatpush1.bf16.msra.mxu0 %v4060_v57  ;;  %2142 = vmatpush1.bf16.msra.mxu1 %v4128_v36 }
 0x596   : > { %2100 = vmatprep.subr.bf16.mxu0 %v4065_v59  ;;  %2143 = vmatprep.subr.bf16.mxu1 %v4133_v13 }
 0x599   : > { %2101 = vmatpush1.bf16.msra.mxu0 %v4137_v53  ;;  %2144 = vmatpush1.bf16.msra.mxu1 %v4141_v21 }
 0x59a   : > { %2254 = vmatprep.subr.bf16.mxu0 %v3939_v20  ;;  %2297 = vmatprep.subr.bf16.mxu1 %v4073_v60 }
 0x63c   : > { %v1952_v49 = vpop.f32.mrf.mxu0  ;;  %v1995_v50 = vpop.f32.mrf.mxu1 }
 0x63d   : > { %v2004_v52 = vadd.f32 %v2862_v14, %v1952_v49  ;;  %v2006_v8 = vadd.f32 %v2864_v7, %v1995_v50  ;;  %v2868_v49 = vld [vmem:[%s4260_s23 + $0x170] sm:$0xff] }
 0x63e   : > { %v1954_v61 = vpop.f32.mrf.mxu0  ;;  %v1997_v58 = vpop.f32.mrf.mxu1 }
 0x63f   : > { %v2870_v16 = vmul.f32 -1.442695, %v2004_v52  ;;  %v2005_v54 = vadd.f32 %v2863_v5, %v1954_v61  ;;  %v2007_v12 = vadd.f32 %v2865_v2, %v1997_v58 }
 0x640   : > { %v1956_v20 = vpop.f32.mrf.mxu0  ;;  %v1999_v4 = vpop.f32.mrf.mxu1 }
 0x641   : > { %3296 = vpow2.f32 %v2870_v16  ;;  %v2872_v60 = vmul.f32 -1.442695, %v2005_v54  ;;  %v2008_v6 = vadd.f32 %v2866_v51, %v1956_v20  ;;  %v2874_v23 = vmul.f32 -1.442695, %v2007_v12 }
 0x642   : > { %v1958_v63 = vpop.f32.mrf.mxu0  ;;  %v2001_v17 = vpop.f32.mrf.mxu1  ;;  %v2010_v5 = vadd.f32 %v2868_v49, %v1999_v4 }
 0x643   : > { %3298 = vpow2.f32 %v2872_v60  ;;  %v2871_v0 = vmul.f32 -1.442695, %v2008_v6  ;;  %v2009_v1 = vadd.f32 %v2867_v62, %v1958_v63  ;;  %v2011_v19 = vadd.f32 %v2869_v15, %v2001_v17 }
 0x645   : > { %3300 = vpow2.f32 %v2871_v0  ;;  %v2873_v9 = vmul.f32 -1.442695, %v2009_v1  ;;  %v2875_v25 = vmul.f32 -1.442695, %v2011_v19 }
 0x647   : > { %3302 = vpow2.f32 %v2873_v9 }
 0x648   : > { %3304 = vtanh.f32 %v2006_v8 }
 0x64e   : > { %v3297_v27 = vpop.eup %3296 }
 0x64f   : > { %v2018_v24 = vadd.f32 1.0, %v3297_v27 }
 0x650   : > { %v3299_v11 = vpop.eup %3298 }
 0x651   : > { %3306 = vrcp.f32 %v2018_v24  ;;  %v2030_v14 = vadd.f32 1.0, %v3299_v11  ;;  %v2888_v11 = vld [vmem:[%s4313_s5 + $0x1b0] sm:$0xff] }
 0x652   : > { %v3301_v52 = vpop.eup %3300  ;;  %3308 = vpow2.f32 %v2874_v23 }
 0x653   : > { %3310 = vrcp.f32 %v2030_v14  ;;  %v2019_v61 = vadd.f32 1.0, %v3301_v52 }
 0x654   : > { %v3303_v16 = vpop.eup %3302  ;;  %3312 = vpow2.f32 %v2875_v25 }
 0x655   : > { %3314 = vrcp.f32 %v2019_v61  ;;  %v2031_v54 = vadd.f32 1.0, %v3303_v16  ;;  %v3305_v50 = vpop.eup %3304 }
 0x656   : > { %3316 = vtanh.f32 %v2010_v5 }
 0x657   : > { %3318 = vrcp.f32 %v2031_v54 }
 0x65e   : > { %v3307_v51 = vpop.eup %3306 }
 0x65f   : > { %v3309_v20 = vpop.eup %3308  ;;  %v2052_v6 = vmul.f32 %v3307_v51, %v3305_v50 }
 0x660   : > { %v3311_v60 = vpop.eup %3310  ;;  %v2044_v0 = vadd.f32 1.0, %v3309_v20 }
 0x661   : > { %v3313_v58 = vpop.eup %3312  ;;  %v2050_v62 = vmul.f32 %v3311_v60, %v4215_v10 }
 0x662   : > { %v3315_v63 = vpop.eup %3314  ;;  %v2045_v2 = vadd.f32 1.0, %v3313_v58  ;;  %3320 = vrcp.f32 %v2044_v0 }
 0x663   : > { %v3317_v1 = vpop.eup %3316  ;;  %v4271_v4 = vadd.f32 %v2052_v6, %v2050_v62 }
 0x664   : > { %v3319_v9 = vpop.eup %3318  ;;  %v2053_v17 = vmul.f32 %v3317_v1, %v3315_v63 }
 0x665   : > { %v2051_v12 = vmul.f32 %v3319_v9, %v4218_v18  ;;  %3322 = vtanh.f32 %v4271_v4 }
 0x666   : > { %3324 = vrcp.f32 %v2045_v2 }
 0x667   : > { %v4274_v7 = vadd.f32 %v2053_v17, %v2051_v12 }
 0x669   : > { %3326 = vtanh.f32 %v4274_v7 }
 0x66f   : > { %v3321_v10 = vpop.eup %3320 }
 0x672   : > { %v3323_v15 = vpop.eup %3322 }
 0x673   : > { %v3325_v8 = vpop.eup %3324  ;;  %v2058_v27 = vmul.f32 %v3323_v15, %v3321_v10 }
 0x676   : > { %v3327_v19 = vpop.eup %3326 }
 0x677   : > { %v2059_v23 = vmul.f32 %v3327_v19, %v3325_v8 }
 0x679   : > { %v2060_v24 = vpack.c.bf16 %v2059_v23, %v2058_v27 }
 0x67b   : > { %2995 = vst [vmem:[%s2604_s29 + $0x28] sm:$0xff] %v2060_v24   ;;  %2119 = vmatmul.mubr.bf16.vlgmr.msra.gmra.mxu0 %v2060_v24  ;;  %2162 = vmatmul.mubr.bf16.vlgmr.msra.gmra.mxu1 %v2060_v24 }
 0x67c   : > { %2255 = vmatpush1.bf16.msra.mxu0 %v3965_v26  ;;  %2298 = vmatpush1.bf16.msra.mxu1 %v3969_v28 }
 0x67d   : > { %2256 = vmatprep.subr.bf16.mxu0 %v3973_v29  ;;  %2299 = vmatprep.subr.bf16.mxu1 %v3977_v30  ;;  %v2883_v30 = vld [vmem:[%s4313_s5 + $0x188] sm:$0xff] }
 0x67e   : > { %2286 = vmatprep.mubr.bf16.mxu0 %v3481_v3  ;;  %2329 = vmatprep.mubr.bf16.mxu1 %v3481_v3  ;;  %v2882_v3 = vld [vmem:[%s4313_s5 + $0x180] sm:$0xff] }
 0x680   : > { %2257 = vmatpush1.bf16.msra.mxu0 %v3983_v31  ;;  %2300 = vmatpush1.bf16.msra.mxu1 %v3987_v32 }
 0x681   : > { %2258 = vmatprep.subr.bf16.mxu0 %v3991_v22  ;;  %2301 = vmatprep.subr.bf16.mxu1 %v3995_v33  ;;  %v2886_v33 = vld [vmem:[%s4313_s5 + $0x1a0] sm:$0xff] }
 0x684   : > { %2259 = vmatpush1.bf16.msra.mxu0 %v3999_v34  ;;  %2302 = vmatpush1.bf16.msra.mxu1 %v4003_v35 }
 0x685   : > { %2260 = vmatprep.subr.bf16.mxu0 %v4007_v37  ;;  %2303 = vmatprep.subr.bf16.mxu1 %v4011_v38 }
 0x688   : > { %2261 = vmatpush1.bf16.msra.mxu0 %v4015_v39  ;;  %2304 = vmatpush1.bf16.msra.mxu1 %v4019_v40  ;;  %v2887_v39 = vld [vmem:[%s4313_s5 + $0x1a8] sm:$0xff] }
 0x689   : > { %2262 = vmatprep.subr.bf16.mxu0 %v4023_v41  ;;  %2305 = vmatprep.subr.bf16.mxu1 %v4027_v42 }
 0x68c   : > { %2263 = vmatpush1.bf16.msra.mxu0 %v4031_v43  ;;  %2306 = vmatpush1.bf16.msra.mxu1 %v4035_v44 }
 0x68d   : > { %2264 = vmatprep.subr.bf16.mxu0 %v4039_v46  ;;  %2307 = vmatprep.subr.bf16.mxu1 %v4043_v47  ;;  %v2885_v46 = vld [vmem:[%s4313_s5 + $0x198] sm:$0xff] }
 0x690   : > { %2265 = vmatpush1.bf16.msra.mxu0 %v4047_v48  ;;  %2308 = vmatpush1.bf16.msra.mxu1 %v4051_v55  ;;  %v2884_v55 = vld [vmem:[%s4313_s5 + $0x190] sm:$0xff] }
 0x691   : > { %2266 = vmatprep.subr.bf16.mxu0 %v4055_v56  ;;  %2309 = vmatprep.subr.bf16.mxu1 %v4123_v45  ;;  %v2889_v56 = vld [vmem:[%s4313_s5 + $0x1b8] sm:$0xff] }
 0x694   : > { %2267 = vmatpush1.bf16.msra.mxu0 %v4060_v57  ;;  %2310 = vmatpush1.bf16.msra.mxu1 %v4128_v36 }
 0x695   : > { %2268 = vmatprep.subr.bf16.mxu0 %v4065_v59  ;;  %2311 = vmatprep.subr.bf16.mxu1 %v4133_v13 }
 0x698   : > { %2269 = vmatpush1.bf16.msra.mxu0 %v4137_v53  ;;  %2312 = vmatpush1.bf16.msra.mxu1 %v4141_v21 }
 0x73b   : > { %v2120_v26 = vpop.f32.mrf.mxu0  ;;  %v2163_v29 = vpop.f32.mrf.mxu1 }
 0x73c   : > { %v2172_v28 = vadd.f32 %v2882_v3, %v2120_v26  ;;  %v2174_v57 = vadd.f32 %v2884_v55, %v2163_v29  ;;  %v2903_v26 = vld [vmem:[%s4334_s10 + $0x1c8] sm:$0xff]  ;;  %v2904_v55 = vld [vmem:[%s4334_s10 + $0x1d0] sm:$0xff] }
 0x73d   : > { %v2122_v31 = vpop.f32.mrf.mxu0  ;;  %v2165_v37 = vpop.f32.mrf.mxu1 }
 0x73e   : > { %v2890_v32 = vmul.f32 -1.442695, %v2172_v28  ;;  %v2173_v22 = vadd.f32 %v2883_v30, %v2122_v31  ;;  %v2175_v48 = vadd.f32 %v2885_v46, %v2165_v37  ;;  %v2906_v31 = vld [vmem:[%s4334_s10 + $0x1e0] sm:$0xff]  ;;  %v2909_v46 = vld [vmem:[%s4334_s10 + $0x1f8] sm:$0xff] }
 0x73f   : > { %v2124_v34 = vpop.f32.mrf.mxu0  ;;  %v2167_v43 = vpop.f32.mrf.mxu1 }
 0x740   : > { %3328 = vpow2.f32 %v2890_v32  ;;  %v2892_v35 = vmul.f32 -1.442695, %v2173_v22  ;;  %v2176_v38 = vadd.f32 %v2886_v33, %v2124_v34  ;;  %v2894_v36 = vmul.f32 -1.442695, %v2175_v48 }
 0x741   : > { %v2126_v40 = vpop.f32.mrf.mxu0  ;;  %v2169_v47 = vpop.f32.mrf.mxu1  ;;  %v2178_v14 = vadd.f32 %v2888_v11, %v2167_v43 }
 0x742   : > { %3330 = vpow2.f32 %v2892_v35  ;;  %v2891_v41 = vmul.f32 -1.442695, %v2176_v38  ;;  %v2177_v42 = vadd.f32 %v2887_v39, %v2126_v40  ;;  %v2179_v59 = vadd.f32 %v2889_v56, %v2169_v47  ;;  %v2907_v35 = vld [vmem:[%s4334_s10 + $0x1e8] sm:$0xff] }
 0x744   : > { %3332 = vpow2.f32 %v2891_v41  ;;  %v2893_v44 = vmul.f32 -1.442695, %v2177_v42  ;;  %v2895_v21 = vmul.f32 -1.442695, %v2179_v59  ;;  %v2905_v42 = vld [vmem:[%s4334_s10 + $0x1d8] sm:$0xff] }
 0x746   : > { %3334 = vpow2.f32 %v2893_v44 }
 0x747   : > { %3336 = vtanh.f32 %v2174_v57 }
 0x74d   : > { %v3329_v45 = vpop.eup %3328 }
 0x74e   : > { %v2186_v13 = vadd.f32 1.0, %v3329_v45 }
 0x74f   : > { %v3331_v53 = vpop.eup %3330 }
 0x750   : > { %3338 = vrcp.f32 %v2186_v13  ;;  %v2198_v18 = vadd.f32 1.0, %v3331_v53  ;;  %v2908_v53 = vld [vmem:[%s4334_s10 + $0x1f0] sm:$0xff] }
 0x751   : > { %v3333_v25 = vpop.eup %3332  ;;  %3340 = vpow2.f32 %v2894_v36 }
 0x752   : > { %3342 = vrcp.f32 %v2198_v18  ;;  %v2187_v49 = vadd.f32 1.0, %v3333_v25 }
 0x753   : > { %v3335_v52 = vpop.eup %3334  ;;  %3344 = vpow2.f32 %v2895_v21 }
 0x754   : > { %3346 = vrcp.f32 %v2187_v49  ;;  %v2199_v5 = vadd.f32 1.0, %v3335_v52  ;;  %v3337_v61 = vpop.eup %3336 }
 0x755   : > { %3348 = vtanh.f32 %v2178_v14 }
 0x756   : > { %3350 = vrcp.f32 %v2199_v5 }
 0x75d   : > { %v3339_v16 = vpop.eup %3338 }
 0x75e   : > { %v3341_v54 = vpop.eup %3340  ;;  %v2220_v20 = vmul.f32 %v3339_v16, %v3337_v61 }
 0x75f   : > { %v3343_v50 = vpop.eup %3342  ;;  %v2212_v6 = vadd.f32 1.0, %v3341_v54 }
 0x760   : > { %v3345_v51 = vpop.eup %3344  ;;  %v2218_v60 = vmul.f32 %v3343_v50, %v4271_v4 }
 0x761   : > { %v3347_v58 = vpop.eup %3346  ;;  %v2213_v1 = vadd.f32 1.0, %v3345_v51  ;;  %3352 = vrcp.f32 %v2212_v6 }
 0x762   : > { %v3349_v62 = vpop.eup %3348  ;;  %v4324_v63 = vadd.f32 %v2220_v20, %v2218_v60 }
 0x763   : > { %v3351_v0 = vpop.eup %3350  ;;  %v2221_v9 = vmul.f32 %v3349_v62, %v3347_v58 }
 0x764   : > { %v2219_v2 = vmul.f32 %v3351_v0, %v4274_v7  ;;  %3354 = vtanh.f32 %v4324_v63  ;;  %v2902_v7 = vld [vmem:[%s4334_s10 + $0x1c0] sm:$0xff] }
 0x765   : > { %3356 = vrcp.f32 %v2213_v1 }
 0x766   : > { %v4327_v17 = vadd.f32 %v2221_v9, %v2219_v2 }
 0x768   : > { %3358 = vtanh.f32 %v4327_v17 }
 0x76e   : > { %v3353_v4 = vpop.eup %3352 }
 0x771   : > { %v3355_v12 = vpop.eup %3354 }
 0x772   : > { %v3357_v10 = vpop.eup %3356  ;;  %v2226_v8 = vmul.f32 %v3355_v12, %v3353_v4 }
 0x775   : > { %v3359_v15 = vpop.eup %3358 }
 0x776   : > { %v2227_v19 = vmul.f32 %v3359_v15, %v3357_v10 }
 0x778   : > { %v2228_v27 = vpack.c.bf16 %v2227_v19, %v2226_v8 }
 0x77a   : > { %2996 = vst [vmem:[%s2612_s8 + $0x30] sm:$0xff] %v2228_v27   ;;  %2287 = vmatmul.mubr.bf16.vlgmr.msra.gmra.mxu0 %v2228_v27  ;;  %2330 = vmatmul.mubr.bf16.vlgmr.msra.gmra.mxu1 %v2228_v27 }
 0x83a   : > { %v2288_v23 = vpop.f32.mrf.mxu0  ;;  %v2331_v3 = vpop.f32.mrf.mxu1 }
 0x83b   : > { %v2340_v24 = vadd.f32 %v2902_v7, %v2288_v23  ;;  %v2342_v57 = vadd.f32 %v2904_v55, %v2331_v3 }
 0x83c   : > { %v2290_v28 = vpop.f32.mrf.mxu0  ;;  %v2333_v33 = vpop.f32.mrf.mxu1 }
 0x83d   : > { %v2910_v29 = vmul.f32 -1.442695, %v2340_v24  ;;  %v2341_v30 = vadd.f32 %v2903_v26, %v2290_v28  ;;  %v2343_v43 = vadd.f32 %v2905_v42, %v2333_v33 }
 0x83e   : > { %v2292_v32 = vpop.f32.mrf.mxu0  ;;  %v2335_v40 = vpop.f32.mrf.mxu1 }
 0x83f   : > { %3360 = vpow2.f32 %v2910_v29  ;;  %v2912_v22 = vmul.f32 -1.442695, %v2341_v30  ;;  %v2344_v34 = vadd.f32 %v2906_v31, %v2292_v32  ;;  %v2914_v47 = vmul.f32 -1.442695, %v2343_v43 }
 0x840   : > { %v2294_v37 = vpop.f32.mrf.mxu0  ;;  %v2337_v44 = vpop.f32.mrf.mxu1  ;;  %v2346_v18 = vadd.f32 %v2908_v53, %v2335_v40 }
 0x841   : > { %3362 = vpow2.f32 %v2912_v22  ;;  %v2911_v38 = vmul.f32 -1.442695, %v2344_v34  ;;  %v2345_v39 = vadd.f32 %v2907_v35, %v2294_v37  ;;  %v2347_v48 = vadd.f32 %v2909_v46, %v2337_v44 }
 0x843   : > { %3364 = vpow2.f32 %v2911_v38  ;;  %v2913_v41 = vmul.f32 -1.442695, %v2345_v39  ;;  %v2915_v36 = vmul.f32 -1.442695, %v2347_v48 }
 0x845   : > { %3366 = vpow2.f32 %v2913_v41 }
 0x846   : > { %3368 = vpow2.f32 %v2914_v47 }
 0x84c   : > { %v3361_v56 = vpop.eup %3360 }
 0x84d   : > { %v2354_v59 = vadd.f32 1.0, %v3361_v56 }
 0x84e   : > { %v3363_v45 = vpop.eup %3362 }
 0x84f   : > { %3370 = vrcp.f32 %v2354_v59  ;;  %v2366_v13 = vadd.f32 1.0, %v3363_v45 }
 0x850   : > { %v3365_v21 = vpop.eup %3364  ;;  %3372 = vtanh.f32 %v2342_v57 }
 0x851   : > { %3374 = vrcp.f32 %v2366_v13  ;;  %v2355_v11 = vadd.f32 1.0, %v3365_v21 }
 0x852   : > { %v3367_v25 = vpop.eup %3366  ;;  %3376 = vpow2.f32 %v2915_v36 }
 0x853   : > { %3378 = vrcp.f32 %v2355_v11  ;;  %v2367_v14 = vadd.f32 1.0, %v3367_v25  ;;  %v3369_v49 = vpop.eup %3368 }
 0x854   : > { %3380 = vtanh.f32 %v2346_v18  ;;  %v2380_v16 = vadd.f32 1.0, %v3369_v49 }
 0x855   : > { %3382 = vrcp.f32 %v2367_v14 }
 0x856   : > { %3384 = vrcp.f32 %v2380_v16 }
 0x85c   : > { %v3371_v52 = vpop.eup %3370 }
 0x85d   : > { %v3373_v5 = vpop.eup %3372 }
 0x85e   : > { %v3375_v61 = vpop.eup %3374  ;;  %v2388_v50 = vmul.f32 %v3373_v5, %v3371_v52 }
 0x85f   : > { %v3377_v54 = vpop.eup %3376  ;;  %v2386_v51 = vmul.f32 %v3375_v61, %v4324_v63 }
 0x860   : > { %v3379_v20 = vpop.eup %3378  ;;  %v2381_v62 = vadd.f32 1.0, %v3377_v54 }
 0x861   : > { %v3381_v60 = vpop.eup %3380  ;;  %v2390_v58 = vadd.f32 %v2388_v50, %v2386_v51 }
 0x862   : > { %v3383_v6 = vpop.eup %3382  ;;  %v2389_v0 = vmul.f32 %v3381_v60, %v3379_v20 }
 0x863   : > { %3386 = vtanh.f32 %v2390_v58  ;;  %2411 = vst [vmem:[#allocation3 + $0x8] sm:$0xff] %v2390_v58  ;;  %v2387_v1 = vmul.f32 %v3383_v6, %v4327_v17  ;;  %v3385_v2 = vpop.eup %3384 }
 0x864   : > { %3388 = vrcp.f32 %v2381_v62 }
 0x865   : > { %v2391_v9 = vadd.f32 %v2389_v0, %v2387_v1 }
 0x867   : > { %3390 = vtanh.f32 %v2391_v9  ;;  %2412 = vst [vmem:[#allocation3] sm:$0xff] %v2391_v9 }
 0x870   : > { %v3387_v4 = vpop.eup %3386 }
 0x871   : > { %v2394_v63 = vmul.f32 %v3387_v4, %v3385_v2  ;;  %v3389_v12 = vpop.eup %3388 }
 0x873   : > { %2409 = vst [vmem:[#allocation2] sm:$0xff] %v2394_v63 }
 0x874   : > { %v3391_v10 = vpop.eup %3390 }
 0x875   : > { %v2395_v15 = vmul.f32 %v3391_v10, %v3389_v12  ;;  %2419 = sbr.rel (!%p3559_p4) target bundleno = 2187 (0x88b), region = 44 }
 0x877   : > { %v2990_v8 = vpack.c.bf16 %v2395_v15, %v2394_v63  ;;  %2410 = vst [vmem:[#allocation2 + $0x8] sm:$0xff] %v2395_v15 }
 0x879   : > { %2997 = vst [vmem:[%s2620_s11 + $0x38] sm:$0xff] %v2990_v8  }
 0x880   : > { %v2445_v17 = vld [vmem:[%s3599_s19] sm:$0xf]  ;;  %v2447_v19 = vld [vmem:[%s3599_s19 + $0x4] sm:$0xf]  ;;  %v2449_v27 = vld [vmem:[%s3599_s19 + $0x8] sm:$0xf] }
 0x881   : > { %v2451_v7 = vld [vmem:[%s3599_s19 + $0xc] sm:$0xf]  ;;  %v2453_v23 = vld [vmem:[%s3599_s19 + $0x10] sm:$0xf]  ;;  %v2455_v24 = vld [vmem:[%s3599_s19 + $0x14] sm:$0xf] }
 0x882   : > { %v2457_v3 = vld [vmem:[%s3599_s19 + $0x18] sm:$0xf]  ;;  %v2459_v26 = vld [vmem:[%s3599_s19 + $0x1c] sm:$0xf]  ;;  %v2461_v28 = vld [vmem:[%s3599_s19 + $0x20] sm:$0xf] }
 0x883   : > { %v2463_v29 = vld [vmem:[%s3599_s19 + $0x24] sm:$0xf]  ;;  %2446 = vst [vmem:[%s2428_s28] sm:$0xf] %v2445_v17  ;;  %2448 = vst [vmem:[%s2428_s28 + $0x8] sm:$0xf] %v2447_v19 }
 0x884   : > { %2450 = vst [vmem:[%s2428_s28 + $0x10] sm:$0xf] %v2449_v27  ;;  %2452 = vst [vmem:[%s2428_s28 + $0x18] sm:$0xf] %v2451_v7  ;;  %v2465_v30 = vld [vmem:[%s3599_s19 + $0x28] sm:$0xf] }
 0x885   : > { %2454 = vst [vmem:[%s2428_s28 + $0x20] sm:$0xf] %v2453_v23  ;;  %2456 = vst [vmem:[%s2428_s28 + $0x28] sm:$0xf] %v2455_v24  ;;  %v2467_v31 = vld [vmem:[%s3599_s19 + $0x2c] sm:$0xf] }
 0x886   : > { %2458 = vst [vmem:[%s2428_s28 + $0x30] sm:$0xf] %v2457_v3  ;;  %2460 = vst [vmem:[%s2428_s28 + $0x38] sm:$0xf] %v2459_v26  ;;  %v2469_v32 = vld [vmem:[%s3599_s19 + $0x30] sm:$0xf] }
 0x887   : > { %2462 = vst [vmem:[%s2428_s28 + $0x40] sm:$0xf] %v2461_v28  ;;  %2464 = vst [vmem:[%s2428_s28 + $0x48] sm:$0xf] %v2463_v29  ;;  %v2471_v22 = vld [vmem:[%s3599_s19 + $0x34] sm:$0xf] }
 0x888   : > { %2466 = vst [vmem:[%s2428_s28 + $0x50] sm:$0xf] %v2465_v30  ;;  %2468 = vst [vmem:[%s2428_s28 + $0x58] sm:$0xf] %v2467_v31  ;;  %v2473_v33 = vld [vmem:[%s3599_s19 + $0x38] sm:$0xf] }
 0x889   : > { %2470 = vst [vmem:[%s2428_s28 + $0x60] sm:$0xf] %v2469_v32  ;;  %v2475_v34 = vld [vmem:[%s3599_s19 + $0x3c] sm:$0xf]  ;;  %2472 = vst [vmem:[%s2428_s28 + $0x68] sm:$0xf] %v2471_v22 }
 0x88a   : > { %2474 = vst [vmem:[%s2428_s28 + $0x70] sm:$0xf] %v2473_v33  ;;  %2476 = vst [vmem:[%s2428_s28 + $0x78] sm:$0xf] %v2475_v34 }
 0x88b PF: > { %s14_s21 = sadd.s32 1, %s3478_s21   ;;  %s4406_s17 = sld [smem:[#allocation6_spill]] }
 0x88c   : > { %p11_p12 = scmp.ge.s32.totalorder %s14_s21, 6   ;;  %s4407_s18 = sld [smem:[#allocation7_spill]] }
 0x88d   : > { %s4408_s19 = sld [smem:[#allocation8_spill]]  ;;  %s4410_s15 = smov %s3458_s16 }
 0x88e   : > { %s4409_s20 = sld [smem:[#allocation9_spill]]  ;;  %s4411_s16 = smov %s3568_s12 }
 0x88f   :  { %13 = sbr.rel (!%p11_p12) target bundleno = 4 (0x4), region = 136 }

// kernel: finetune_forward.10
= control target key start
LH: loop header
LB: loop body
LE: loop exit
PB: predicated region body
PF: predicated region fallthrough
CT: control target
= control target key end

     0   :  { %s4423_s3 = inlined_call_operand.vmem [shape: bf16[256,128], index: 3, kind: input, shape index: {}]   ;;  %s4424_s2 = inlined_call_operand.vmem [shape: bf16[256,128], index: 2, kind: input, shape index: {}]   ;;  %s4425_s1 = inlined_call_operand.vmem [shape: bf16[256,256], index: 1, kind: input, shape index: {}]   ;;  %s4426_s0 = inlined_call_operand.vmem [shape: bf16[256,256], index: 0, kind: input, shape index: {}]   ;;  %s4427_s4 = inlined_call_operand.vmem [shape: bf16[256,128], index: 4, kind: input, shape index: {}]   ;;  %s4428_s5 = inlined_call_operand.vmem [shape: bf16[256,128], index: 5, kind: input, shape index: {}]   ;;  %s4429_s6 = inlined_call_operand.vmem [shape: f32[1,128], index: 6, kind: input, shape index: {}]   ;;  %s4430_s7 = inlined_call_operand.vmem [shape: bf16[256,128], index: 7, kind: output, shape index: {}]  }
   0x1   :  { %v3246_v0 = vld [vmem:[%s4423_s3 + $0x78] sm:$0xff]   ;;  %v3250_v4 = vld [vmem:[%s4423_s3 + $0x70] sm:$0xff]   ;;  %v3254_v8 = vld [vmem:[%s4423_s3 + $0x68] sm:$0xff]  }
   0x2   :  { %v3247_v1 = vld [vmem:[%s4424_s2 + $0x78] sm:$0xff]   ;;  %2798 = vmatprep.subr.bf16.mxu0 %v3246_v0  ;;  %v3251_v5 = vld [vmem:[%s4424_s2 + $0x70] sm:$0xff]   ;;  %v3255_v9 = vld [vmem:[%s4424_s2 + $0x68] sm:$0xff]  }
   0x3   :  { %v3248_v2 = vld [vmem:[%s4423_s3 + $0x38] sm:$0xff]   ;;  %2910 = vmatprep.subr.bf16.mxu1 %v3247_v1  ;;  %v3252_v6 = vld [vmem:[%s4423_s3 + $0x30] sm:$0xff]   ;;  %v3256_v10 = vld [vmem:[%s4423_s3 + $0x28] sm:$0xff]  }
   0x4   :  { %v3249_v3 = vld [vmem:[%s4424_s2 + $0x38] sm:$0xff]   ;;  %2799 = vmatpush3.bf16.msra.mxu0 %v3248_v2  ;;  %v3253_v7 = vld [vmem:[%s4424_s2 + $0x30] sm:$0xff]   ;;  %v3257_v11 = vld [vmem:[%s4424_s2 + $0x28] sm:$0xff]  }
   0x5   :  { %2911 = vmatpush3.bf16.msra.mxu1 %v3249_v3  ;;  %2800 = vmatprep.subr.bf16.mxu0 %v3250_v4  ;;  %v3258_v12 = vld [vmem:[%s4423_s3 + $0x60] sm:$0xff]   ;;  %v3262_v16 = vld [vmem:[%s4423_s3 + $0x58] sm:$0xff]   ;;  %v3266_v20 = vld [vmem:[%s4423_s3 + $0x50] sm:$0xff]  }
   0x6   :  { %2912 = vmatprep.subr.bf16.mxu1 %v3251_v5  ;;  %v3259_v13 = vld [vmem:[%s4424_s2 + $0x60] sm:$0xff]   ;;  %v3263_v17 = vld [vmem:[%s4424_s2 + $0x58] sm:$0xff]   ;;  %v3267_v21 = vld [vmem:[%s4424_s2 + $0x50] sm:$0xff]  }
   0x7   :  { %v3260_v14 = vld [vmem:[%s4423_s3 + $0x20] sm:$0xff]   ;;  %v3264_v18 = vld [vmem:[%s4423_s3 + $0x18] sm:$0xff]   ;;  %v3268_v22 = vld [vmem:[%s4423_s3 + $0x10] sm:$0xff]  }
   0x8   :  { %2801 = vmatpush3.bf16.msra.mxu0 %v3252_v6  ;;  %v3261_v15 = vld [vmem:[%s4424_s2 + $0x20] sm:$0xff]   ;;  %v3265_v19 = vld [vmem:[%s4424_s2 + $0x18] sm:$0xff]   ;;  %v3269_v23 = vld [vmem:[%s4424_s2 + $0x10] sm:$0xff]  }
   0x9   :  { %2913 = vmatpush3.bf16.msra.mxu1 %v3253_v7  ;;  %2802 = vmatprep.subr.bf16.mxu0 %v3254_v8  ;;  %v3270_v24 = vld [vmem:[%s4423_s3 + $0x48] sm:$0xff]   ;;  %v3274_v28 = vld [vmem:[%s4423_s3 + $0x40] sm:$0xff]   ;;  %v3282_v42 = vld [vmem:[%s4427_s4 + $0x78] sm:$0xff]  }
   0xa   :  { %2914 = vmatprep.subr.bf16.mxu1 %v3255_v9  ;;  %v3271_v25 = vld [vmem:[%s4424_s2 + $0x48] sm:$0xff]   ;;  %v3275_v29 = vld [vmem:[%s4424_s2 + $0x40] sm:$0xff]   ;;  %v3283_v45 = vld [vmem:[%s4427_s4 + $0x38] sm:$0xff]  }
   0xb   :  { %v3272_v26 = vld [vmem:[%s4423_s3 + $0x8] sm:$0xff]   ;;  %v3276_v30 = vld [vmem:[%s4423_s3] sm:$0xff]   ;;  %v3284_v46 = vld [vmem:[%s4428_s5 + $0x78] sm:$0xff]  }
   0xc   :  { %2803 = vmatpush3.bf16.msra.mxu0 %v3256_v10  ;;  %v3273_v27 = vld [vmem:[%s4424_s2 + $0x8] sm:$0xff]   ;;  %v3277_v31 = vld [vmem:[%s4424_s2] sm:$0xff]   ;;  %v3285_v50 = vld [vmem:[%s4428_s5 + $0x38] sm:$0xff]  }
   0xd   :  { %2915 = vmatpush3.bf16.msra.mxu1 %v3257_v11  ;;  %2804 = vmatprep.subr.bf16.mxu0 %v3258_v12  ;;  %v287_v32 = vld [vmem:[%s4425_s1] sm:$0xff]  ;;  %v288_v33 = vld [vmem:[%s4425_s1 + $0x8] sm:$0xff]  ;;  %v289_v51 = vld [vmem:[%s4425_s1 + $0x10] sm:$0xff] }
   0xe   :  { %2916 = vmatprep.subr.bf16.mxu1 %v3259_v13  ;;  %v223_v34 = vld [vmem:[%s4426_s0] sm:$0xff]  ;;  %v2446_v35 = vcombine.low %v287_v32, %v288_v33  ;;  %v2447_v36 = vcombine.high %v287_v32, %v288_v33  ;;  %v224_v37 = vld [vmem:[%s4426_s0 + $0x8] sm:$0xff]  ;;  %v290_v52 = vld [vmem:[%s4425_s1 + $0x18] sm:$0xff] }
   0xf   :  { %v3522_v38 = vsub.bf16 %v223_v34, %v287_v32  ;;  %v3524_v39 = vmul.bf16 %v287_v32, %v223_v34  ;;  %v2494_v40 = vcombine.low %v223_v34, %v224_v37  ;;  %v2495_v41 = vcombine.high %v223_v34, %v224_v37  ;;  %v225_v55 = vld [vmem:[%s4426_s0 + $0x10] sm:$0xff]  ;;  %v226_v56 = vld [vmem:[%s4426_s0 + $0x18] sm:$0xff]  ;;  %v291_v57 = vld [vmem:[%s4425_s1 + $0x20] sm:$0xff] }
  0x10   :  { %2805 = vmatpush3.bf16.msra.mxu0 %v3260_v14  ;;  %v3529_v43 = vsub.bf16 %v224_v37, %v288_v33  ;;  %v3531_v44 = vmul.bf16 %v288_v33, %v224_v37  ;;  %639 = vmatprep.mubr.bf16.mxu0 %v2447_v36  ;;  %v2449_v54 = vcombine.high %v289_v51, %v290_v52  ;;  %v292_v59 = vld [vmem:[%s4425_s1 + $0x28] sm:$0xff]  ;;  %v227_v60 = vld [vmem:[%s4426_s0 + $0x20] sm:$0xff]  ;;  %v3294_v3 = vld [vmem:[%s4427_s4 + $0x70] sm:$0xff]  }
  0x11   :  { %2917 = vmatpush3.bf16.msra.mxu1 %v3261_v15  ;;  %2806 = vmatprep.subr.bf16.mxu0 %v3262_v16  ;;  %v2497_v58 = vcombine.high %v225_v55, %v226_v56  ;;  %v228_v61 = vld [vmem:[%s4426_s0 + $0x28] sm:$0xff]  ;;  %v3574_v62 = vsub.bf16 %v225_v55, %v289_v51  ;;  %v3576_v63 = vsub.bf16 %v226_v56, %v290_v52  ;;  %v3295_v4 = vld [vmem:[%s4427_s4 + $0x30] sm:$0xff]   ;;  %v294_v15 = vld [vmem:[%s4425_s1 + $0x38] sm:$0xff] }
  0x12   :  { %2918 = vmatprep.subr.bf16.mxu1 %v3263_v17  ;;  %1056 = vmatprep.mubr.bf16.mxu1 %v2495_v41  ;;  %v2448_v0 = vcombine.low %v289_v51, %v290_v52  ;;  %v2496_v1 = vcombine.low %v225_v55, %v226_v56  ;;  %v2451_v2 = vcombine.high %v291_v57, %v292_v59  ;;  %v3296_v10 = vld [vmem:[%s4428_s5 + $0x70] sm:$0xff]   ;;  %v295_v34 = vld [vmem:[%s4425_s1 + $0x40] sm:$0xff]  ;;  %v232_v37 = vld [vmem:[%s4426_s0 + $0x48] sm:$0xff] }
  0x13   :  { %v3586_v6 = vmul.bf16 %v289_v51, %v225_v55  ;;  %v3588_v7 = vmul.bf16 %v290_v52, %v226_v56  ;;  %v2499_v9 = vcombine.high %v227_v60, %v228_v61  ;;  %v3297_v11 = vld [vmem:[%s4428_s5 + $0x30] sm:$0xff]   ;;  %v3608_v16 = vsub.bf16 %v227_v60, %v291_v57  ;;  %v231_v36 = vld [vmem:[%s4426_s0 + $0x40] sm:$0xff] }
  0x14   :  { %2807 = vmatpush3.bf16.msra.mxu0 %v3264_v18  ;;  %v293_v14 = vld [vmem:[%s4425_s1 + $0x30] sm:$0xff]  ;;  %v230_v18 = vld [vmem:[%s4426_s0 + $0x38] sm:$0xff]  ;;  %v3320_v52 = vld [vmem:[%s4428_s5 + $0x60] sm:$0xff]  }
  0x15   :  { %2919 = vmatpush3.bf16.msra.mxu1 %v3265_v19  ;;  %2808 = vmatprep.subr.bf16.mxu0 %v3266_v20  ;;  %v229_v17 = vld [vmem:[%s4426_s0 + $0x30] sm:$0xff]  ;;  %v3306_v19 = vld [vmem:[%s4427_s4 + $0x68] sm:$0xff]   ;;  %v3619_v20 = vsub.bf16 %v228_v61, %v292_v59  ;;  %v2452_v51 = vcombine.low %v293_v14, %v294_v15 }
  0x16   :  { %2920 = vmatprep.subr.bf16.mxu1 %v3267_v21  ;;  %v2450_v21 = vcombine.low %v291_v57, %v292_v59  ;;  %v3657_v41 = vsub.bf16 %v229_v17, %v293_v14  ;;  %v2500_v56 = vcombine.low %v229_v17, %v230_v18 }
  0x18   :  { %2809 = vmatpush3.bf16.msra.mxu0 %v3268_v22  ;;  %v3307_v22 = vld [vmem:[%s4427_s4 + $0x28] sm:$0xff]  }
  0x19   :  { %2921 = vmatpush3.bf16.msra.mxu1 %v3269_v23  ;;  %2810 = vmatprep.subr.bf16.mxu0 %v3270_v24  ;;  %v3624_v23 = vmul.bf16 %v291_v57, %v227_v60  ;;  %v3626_v24 = vmul.bf16 %v292_v59, %v228_v61 }
  0x1a   :  { %2922 = vmatprep.subr.bf16.mxu1 %v3271_v25  ;;  %v2498_v25 = vcombine.low %v227_v60, %v228_v61  ;;  %v2503_v60 = vcombine.high %v231_v36, %v232_v37 }
  0x1c   :  { %2811 = vmatpush3.bf16.msra.mxu0 %v3272_v26  ;;  %v2453_v26 = vcombine.high %v293_v14, %v294_v15 }
  0x1d   :  { %2923 = vmatpush3.bf16.msra.mxu1 %v3273_v27  ;;  %2812 = vmatprep.subr.bf16.mxu0 %v3274_v28  ;;  %v3308_v27 = vld [vmem:[%s4428_s5 + $0x68] sm:$0xff]  }
  0x1e   :  { %2924 = vmatprep.subr.bf16.mxu1 %v3275_v29 }
  0x20   :  { %2813 = vmatpush3.bf16.msra.mxu0 %v3276_v30  ;;  %v2501_v30 = vcombine.high %v229_v17, %v230_v18 }
  0x21   :  { %2925 = vmatpush3.bf16.msra.mxu1 %v3277_v31  ;;  %3022 = vmatprep.subr.bf16.mxu0 %v3282_v42  ;;  %v3309_v31 = vld [vmem:[%s4428_s5 + $0x28] sm:$0xff]   ;;  %v3659_v42 = vsub.bf16 %v230_v18, %v294_v15 }
  0x22   :  { %3134 = vmatprep.subr.bf16.mxu1 %v3284_v46  ;;  %v3664_v46 = vmul.bf16 %v293_v14, %v229_v17  ;;  %v3704_v14 = vmul.bf16 %v295_v34, %v231_v36 }
  0x23   :  { %640 = vmatmul.mubr.bf16.vlgmr.msra.gmra.mxu0 %v2446_v35  ;;  %v296_v35 = vld [vmem:[%s4425_s1 + $0x48] sm:$0xff] }
  0x24   :  { %1057 = vmatmul.mubr.bf16.vlgmr.msra.gmra.mxu1 %v2494_v40  ;;  %3023 = vmatpush3.bf16.msra.mxu0 %v3283_v45  ;;  %v3318_v40 = vld [vmem:[%s4427_s4 + $0x60] sm:$0xff]   ;;  %v2455_v57 = vcombine.high %v295_v34, %v296_v35  ;;  %v3709_v17 = vmul.bf16 %v296_v35, %v232_v37 }
  0x25   :  { %3135 = vmatpush3.bf16.msra.mxu1 %v3285_v50  ;;  %647 = vmatprep.mubr.bf16.mxu0 %v2449_v54  ;;  %v3319_v45 = vld [vmem:[%s4427_s4 + $0x20] sm:$0xff]   ;;  %v3666_v50 = vmul.bf16 %v294_v15, %v230_v18  ;;  %v3332_v15 = vld [vmem:[%s4428_s5 + $0x58] sm:$0xff]  }
  0x26   :  { %1064 = vmatprep.mubr.bf16.mxu1 %v2497_v58  ;;  %3024 = vmatprep.subr.bf16.mxu0 %v3294_v3  ;;  %v3321_v58 = vld [vmem:[%s4428_s5 + $0x20] sm:$0xff]   ;;  %v233_v3 = vld [vmem:[%s4426_s0 + $0x50] sm:$0xff]  ;;  %v3333_v18 = vld [vmem:[%s4428_s5 + $0x18] sm:$0xff]  }
  0x27   :  { %3136 = vmatprep.subr.bf16.mxu1 %v3296_v10  ;;  %v3700_v10 = vsub.bf16 %v231_v36, %v295_v34 }
  0x28   :  { %3025 = vmatpush3.bf16.msra.mxu0 %v3295_v4  ;;  %v234_v4 = vld [vmem:[%s4426_s0 + $0x58] sm:$0xff] }
  0x29   :  { %3137 = vmatpush3.bf16.msra.mxu1 %v3297_v11  ;;  %3026 = vmatprep.subr.bf16.mxu0 %v3306_v19  ;;  %v3702_v11 = vsub.bf16 %v232_v37, %v296_v35 }
  0x2a   :  { %3138 = vmatprep.subr.bf16.mxu1 %v3308_v27 }
  0x2b   :  { %648 = vmatmul.mubr.bf16.gmra.mxu0 %v2448_v0  ;;  %v297_v0 = vld [vmem:[%s4425_s1 + $0x50] sm:$0xff] }
  0x2c   :  { %1065 = vmatmul.mubr.bf16.gmra.mxu1 %v2496_v1  ;;  %655 = vmatprep.mubr.bf16.mxu0 %v2451_v2  ;;  %v298_v1 = vld [vmem:[%s4425_s1 + $0x58] sm:$0xff] }
  0x2d   :  { %1072 = vmatprep.mubr.bf16.mxu1 %v2499_v9  ;;  %3027 = vmatpush3.bf16.msra.mxu0 %v3307_v22  ;;  %v3330_v2 = vld [vmem:[%s4427_s4 + $0x58] sm:$0xff]   ;;  %v2454_v22 = vcombine.low %v295_v34, %v296_v35  ;;  %v2457_v27 = vcombine.high %v297_v0, %v298_v1  ;;  %v299_v34 = vld [vmem:[%s4425_s1 + $0x60] sm:$0xff]  ;;  %v3343_v35 = vld [vmem:[%s4427_s4 + $0x10] sm:$0xff]  }
  0x2e   :  { %3139 = vmatpush3.bf16.msra.mxu1 %v3309_v31  ;;  %3028 = vmatprep.subr.bf16.mxu0 %v3318_v40  ;;  %v3331_v9 = vld [vmem:[%s4427_s4 + $0x18] sm:$0xff]   ;;  %v3342_v31 = vld [vmem:[%s4427_s4 + $0x50] sm:$0xff]   ;;  %v3367_v40 = vld [vmem:[%s4427_s4] sm:$0xff]  }
  0x2f   :  { %3140 = vmatprep.subr.bf16.mxu1 %v3320_v52  ;;  %v300_v52 = vld [vmem:[%s4425_s1 + $0x68] sm:$0xff] }
  0x31   :  { %3029 = vmatpush3.bf16.msra.mxu0 %v3319_v45  ;;  %v3736_v45 = vsub.bf16 %v234_v4, %v298_v1 }
  0x32   :  { %3141 = vmatpush3.bf16.msra.mxu1 %v3321_v58  ;;  %3030 = vmatprep.subr.bf16.mxu0 %v3330_v2  ;;  %v235_v58 = vld [vmem:[%s4426_s0 + $0x60] sm:$0xff] }
  0x33   :  { %656 = vmatmul.mubr.bf16.gmra.mxu0 %v2450_v21  ;;  %3142 = vmatprep.subr.bf16.mxu1 %v3332_v15  ;;  %v2456_v15 = vcombine.low %v297_v0, %v298_v1 }
  0x34   :  { %1073 = vmatmul.mubr.bf16.gmra.mxu1 %v2498_v25  ;;  %663 = vmatprep.mubr.bf16.mxu0 %v2453_v26  ;;  %v2502_v26 = vcombine.low %v231_v36, %v232_v37  ;;  %v3344_v36 = vld [vmem:[%s4428_s5 + $0x50] sm:$0xff]   ;;  %v3734_v37 = vsub.bf16 %v233_v3, %v297_v0 }
  0x35   :  { %1080 = vmatprep.mubr.bf16.mxu1 %v2501_v30  ;;  %3031 = vmatpush3.bf16.msra.mxu0 %v3331_v9  ;;  %v2505_v30 = vcombine.high %v233_v3, %v234_v4  ;;  %v2458_v9 = vcombine.low %v299_v34, %v300_v52 }
  0x36   :  { %3143 = vmatpush3.bf16.msra.mxu1 %v3333_v18  ;;  %3032 = vmatprep.subr.bf16.mxu0 %v3342_v31  ;;  %v2504_v18 = vcombine.low %v233_v3, %v234_v4  ;;  %v3355_v31 = vld [vmem:[%s4427_s4 + $0x8] sm:$0xff]  }
  0x37   :  { %3144 = vmatprep.subr.bf16.mxu1 %v3344_v36  ;;  %v3778_v36 = vmul.bf16 %v299_v34, %v235_v58 }
  0x39   :  { %3033 = vmatpush3.bf16.msra.mxu0 %v3343_v35 }
  0x3b   :  { %664 = vmatmul.mubr.bf16.gmra.mxu0 %v2452_v51  ;;  %v3738_v51 = vmul.bf16 %v297_v0, %v233_v3  ;;  %v3356_v0 = vld [vmem:[%s4428_s5 + $0x48] sm:$0xff]   ;;  %v3774_v3 = vsub.bf16 %v235_v58, %v299_v34 }
  0x3c   :  { %1081 = vmatmul.mubr.bf16.gmra.mxu1 %v2500_v56  ;;  %671 = vmatprep.mubr.bf16.mxu0 %v2455_v57  ;;  %v3345_v56 = vld [vmem:[%s4428_s5 + $0x10] sm:$0xff]   ;;  %v3746_v57 = vmul.bf16 %v298_v1, %v234_v4  ;;  %v3357_v1 = vld [vmem:[%s4428_s5 + $0x8] sm:$0xff]  }
  0x3d   :  { %1088 = vmatprep.mubr.bf16.mxu1 %v2503_v60  ;;  %v236_v60 = vld [vmem:[%s4426_s0 + $0x68] sm:$0xff]  ;;  %3145 = vmatpush3.bf16.msra.mxu1 %v3345_v56  ;;  %v301_v56 = vld [vmem:[%s4425_s1 + $0x70] sm:$0xff] }
  0x3e   :  { %v3776_v4 = vsub.bf16 %v236_v60, %v300_v52  ;;  %3146 = vmatprep.subr.bf16.mxu1 %v3356_v0 }
  0x41   :  { %3147 = vmatpush3.bf16.msra.mxu1 %v3357_v1  ;;  %v303_v1 = vld [vmem:[%s4425_s1 + $0x80] sm:$0xff] }
  0x43   :  { %672 = vmatmul.mubr.bf16.gmra.mxu0 %v2454_v22  ;;  %v2459_v22 = vcombine.high %v299_v34, %v300_v52  ;;  %v3368_v34 = vld [vmem:[%s4428_s5 + $0x40] sm:$0xff]  }
  0x44   :  { %1089 = vmatmul.mubr.bf16.gmra.mxu1 %v2502_v26  ;;  %679 = vmatprep.mubr.bf16.mxu0 %v2457_v27  ;;  %v2507_v27 = vcombine.high %v235_v58, %v236_v60  ;;  %v2506_v26 = vcombine.low %v235_v58, %v236_v60 }
  0x45   :  { %1096 = vmatprep.mubr.bf16.mxu1 %v2505_v30  ;;  %v3354_v30 = vld [vmem:[%s4427_s4 + $0x48] sm:$0xff]   ;;  %3148 = vmatprep.subr.bf16.mxu1 %v3368_v34 }
  0x46   :  { %3034 = vmatprep.subr.bf16.mxu0 %v3354_v30  ;;  %v238_v30 = vld [vmem:[%s4426_s0 + $0x78] sm:$0xff] }
  0x47   :  { %3035 = vmatpush3.bf16.msra.mxu0 %v3355_v31  ;;  %v3366_v31 = vld [vmem:[%s4427_s4 + $0x40] sm:$0xff]  }
  0x48   :  { %3036 = vmatprep.subr.bf16.mxu0 %v3366_v31 }
  0x4b   :  { %680 = vmatmul.mubr.bf16.gmra.mxu0 %v2456_v15  ;;  %v302_v15 = vld [vmem:[%s4425_s1 + $0x78] sm:$0xff] }
  0x4c   :  { %1097 = vmatmul.mubr.bf16.gmra.mxu1 %v2504_v18  ;;  %687 = vmatprep.mubr.bf16.mxu0 %v2459_v22  ;;  %v3786_v18 = vmul.bf16 %v300_v52, %v236_v60  ;;  %v237_v22 = vld [vmem:[%s4426_s0 + $0x70] sm:$0xff]  ;;  %v2461_v2 = vcombine.high %v301_v56, %v302_v15  ;;  %v3369_v52 = vld [vmem:[%s4428_s5] sm:$0xff]   ;;  %v3822_v31 = vsub.bf16 %v238_v30, %v302_v15 }
  0x4d   :  { %1104 = vmatprep.mubr.bf16.mxu1 %v2507_v27  ;;  %v2509_v21 = vcombine.high %v237_v22, %v238_v30  ;;  %3037 = vmatpush3.bf16.msra.mxu0 %v3367_v40  ;;  %v3814_v60 = vsub.bf16 %v237_v22, %v301_v56  ;;  %v304_v40 = vld [vmem:[%s4425_s1 + $0x88] sm:$0xff]  ;;  %v2460_v34 = vcombine.low %v301_v56, %v302_v15 }
  0x4e   :  { %3149 = vmatpush3.bf16.msra.mxu1 %v3369_v52  ;;  %v2508_v35 = vcombine.low %v237_v22, %v238_v30  ;;  %v2463_v0 = vcombine.high %v303_v1, %v304_v40 }
  0x53   :  { %688 = vmatmul.mubr.bf16.gmra.mxu0 %v2458_v9  ;;  %v239_v9 = vld [vmem:[%s4426_s0 + $0x80] sm:$0xff] }
  0x54   :  { %1105 = vmatmul.mubr.bf16.gmra.mxu1 %v2506_v26  ;;  %695 = vmatprep.mubr.bf16.mxu0 %v2461_v2  ;;  %v240_v2 = vld [vmem:[%s4426_s0 + $0x88] sm:$0xff]  ;;  %v3832_v26 = vmul.bf16 %v302_v15, %v238_v30  ;;  %v3842_v61 = vsub.bf16 %v239_v9, %v303_v1  ;;  %v3846_v15 = vmul.bf16 %v303_v1, %v239_v9  ;;  %v306_v30 = vld [vmem:[%s4425_s1 + $0x98] sm:$0xff] }
  0x55   :  { %1112 = vmatprep.mubr.bf16.mxu1 %v2509_v21  ;;  %v3830_v21 = vmul.bf16 %v301_v56, %v237_v22  ;;  %v2511_v25 = vcombine.high %v239_v9, %v240_v2  ;;  %v3844_v56 = vsub.bf16 %v240_v2, %v304_v40  ;;  %v305_v22 = vld [vmem:[%s4425_s1 + $0x90] sm:$0xff]  ;;  %v3854_v52 = vmul.bf16 %v304_v40, %v240_v2 }
  0x56   :  { %v2510_v27 = vcombine.low %v239_v9, %v240_v2  ;;  %v2465_v58 = vcombine.high %v305_v22, %v306_v30  ;;  %v2464_v9 = vcombine.low %v305_v22, %v306_v30  ;;  %v243_v2 = vld [vmem:[%s4426_s0 + $0xa0] sm:$0xff] }
  0x5b   :  { %696 = vmatmul.mubr.bf16.gmra.mxu0 %v2460_v34  ;;  %v2462_v34 = vcombine.low %v303_v1, %v304_v40  ;;  %v307_v1 = vld [vmem:[%s4425_s1 + $0xa0] sm:$0xff]  ;;  %v308_v40 = vld [vmem:[%s4425_s1 + $0xa8] sm:$0xff] }
  0x5c   :  { %1113 = vmatmul.mubr.bf16.gmra.mxu1 %v2508_v35  ;;  %703 = vmatprep.mubr.bf16.mxu0 %v2463_v0  ;;  %v241_v35 = vld [vmem:[%s4426_s0 + $0x90] sm:$0xff]  ;;  %v242_v0 = vld [vmem:[%s4426_s0 + $0x98] sm:$0xff]  ;;  %v2467_v19 = vcombine.high %v307_v1, %v308_v40 }
  0x5d   :  { %1120 = vmatprep.mubr.bf16.mxu1 %v2511_v25  ;;  %v2513_v55 = vcombine.high %v241_v35, %v242_v0  ;;  %v3888_v54 = vmul.bf16 %v306_v30, %v242_v0  ;;  %v2512_v59 = vcombine.low %v241_v35, %v242_v0 }
  0x63   :  { %704 = vmatmul.mubr.bf16.gmra.mxu0 %v2462_v34  ;;  %v244_v34 = vld [vmem:[%s4426_s0 + $0xa8] sm:$0xff] }
  0x64   :  { %1121 = vmatmul.mubr.bf16.gmra.mxu1 %v2510_v27  ;;  %711 = vmatprep.mubr.bf16.mxu0 %v2465_v58  ;;  %v3882_v27 = vsub.bf16 %v241_v35, %v305_v22  ;;  %v3886_v58 = vmul.bf16 %v305_v22, %v241_v35  ;;  %v2515_v25 = vcombine.high %v243_v2, %v244_v34  ;;  %v309_v22 = vld [vmem:[%s4425_s1 + $0xb0] sm:$0xff] }
  0x65   :  { %1128 = vmatprep.mubr.bf16.mxu1 %v2513_v55  ;;  %v3884_v55 = vsub.bf16 %v242_v0, %v306_v30  ;;  %v310_v30 = vld [vmem:[%s4425_s1 + $0xb8] sm:$0xff]  ;;  %v2466_v35 = vcombine.low %v307_v1, %v308_v40  ;;  %v245_v0 = vld [vmem:[%s4426_s0 + $0xb0] sm:$0xff]  ;;  %v3916_v28 = vmul.bf16 %v308_v40, %v244_v34  ;;  %v2514_v32 = vcombine.low %v243_v2, %v244_v34 }
  0x66   :  { %v2469_v29 = vcombine.high %v309_v22, %v310_v30 }
  0x6b   :  { %712 = vmatmul.mubr.bf16.gmra.mxu0 %v2464_v9  ;;  %v246_v9 = vld [vmem:[%s4426_s0 + $0xb8] sm:$0xff] }
  0x6c   :  { %1129 = vmatmul.mubr.bf16.gmra.mxu1 %v2512_v59  ;;  %719 = vmatprep.mubr.bf16.mxu0 %v2467_v19  ;;  %v3910_v59 = vsub.bf16 %v243_v2, %v307_v1  ;;  %v3912_v19 = vsub.bf16 %v244_v34, %v308_v40  ;;  %v2517_v33 = vcombine.high %v245_v0, %v246_v9  ;;  %v312_v40 = vld [vmem:[%s4425_s1 + $0xc8] sm:$0xff]  ;;  %v247_v34 = vld [vmem:[%s4426_s0 + $0xc0] sm:$0xff] }
  0x6d   :  { %1136 = vmatprep.mubr.bf16.mxu1 %v2515_v25  ;;  %v3914_v25 = vmul.bf16 %v307_v1, %v243_v2  ;;  %v311_v1 = vld [vmem:[%s4425_s1 + $0xc0] sm:$0xff]  ;;  %v2468_v2 = vcombine.low %v309_v22, %v310_v30  ;;  %v3944_v5 = vmul.bf16 %v310_v30, %v246_v9  ;;  %v2516_v12 = vcombine.low %v245_v0, %v246_v9 }
  0x6e   :  { %v2471_v8 = vcombine.high %v311_v1, %v312_v40 }
  0x6f   :  { %4456 = vst [vmem:[#allocation7_spill] sm:$0xff] %v3944_v5 }
  0x73   :  { %720 = vmatmul.mubr.bf16.gmra.mxu0 %v2466_v35  ;;  %v248_v35 = vld [vmem:[%s4426_s0 + $0xc8] sm:$0xff] }
  0x74   :  { %1137 = vmatmul.mubr.bf16.gmra.mxu1 %v2514_v32  ;;  %727 = vmatprep.mubr.bf16.mxu0 %v2469_v29  ;;  %v3938_v32 = vsub.bf16 %v245_v0, %v309_v22  ;;  %v3940_v29 = vsub.bf16 %v246_v9, %v310_v30  ;;  %v2519_v13 = vcombine.high %v247_v34, %v248_v35  ;;  %v314_v30 = vld [vmem:[%s4425_s1 + $0xd8] sm:$0xff]  ;;  %v249_v9 = vld [vmem:[%s4426_s0 + $0xd0] sm:$0xff] }
  0x75   :  { %1144 = vmatprep.mubr.bf16.mxu1 %v2517_v33  ;;  %v3942_v33 = vmul.bf16 %v309_v22, %v245_v0  ;;  %v313_v22 = vld [vmem:[%s4425_s1 + $0xd0] sm:$0xff]  ;;  %v2470_v0 = vcombine.low %v311_v1, %v312_v40  ;;  %v3972_v48 = vmul.bf16 %v312_v40, %v248_v35  ;;  %v2518_v53 = vcombine.low %v247_v34, %v248_v35 }
  0x76   :  { %4453 = vst [vmem:[#allocation4_spill] sm:$0xff] %v3938_v32  ;;  %4454 = vst [vmem:[#allocation5_spill] sm:$0xff] %v3940_v29  ;;  %v2473_v47 = vcombine.high %v313_v22, %v314_v30 }
  0x77   :  { %4455 = vst [vmem:[#allocation6_spill] sm:$0xff] %v3942_v33  ;;  %4460 = vst [vmem:[#allocation11_spill] sm:$0xff] %v3972_v48 }
  0x7b   :  { %728 = vmatmul.mubr.bf16.gmra.mxu0 %v2468_v2  ;;  %v250_v2 = vld [vmem:[%s4426_s0 + $0xd8] sm:$0xff] }
  0x7c   :  { %1145 = vmatmul.mubr.bf16.gmra.mxu1 %v2516_v12  ;;  %735 = vmatprep.mubr.bf16.mxu0 %v2471_v8  ;;  %v3966_v12 = vsub.bf16 %v247_v34, %v311_v1  ;;  %v3968_v8 = vsub.bf16 %v248_v35, %v312_v40  ;;  %v2521_v49 = vcombine.high %v249_v9, %v250_v2  ;;  %v316_v40 = vld [vmem:[%s4425_s1 + $0xe8] sm:$0xff]  ;;  %v251_v35 = vld [vmem:[%s4426_s0 + $0xe0] sm:$0xff] }
  0x7d   :  { %1152 = vmatprep.mubr.bf16.mxu1 %v2519_v13  ;;  %v3970_v13 = vmul.bf16 %v311_v1, %v247_v34  ;;  %v315_v1 = vld [vmem:[%s4425_s1 + $0xe0] sm:$0xff]  ;;  %v2472_v34 = vcombine.low %v313_v22, %v314_v30  ;;  %v4000_v32 = vmul.bf16 %v314_v30, %v250_v2  ;;  %v2520_v29 = vcombine.low %v249_v9, %v250_v2 }
  0x7e   :  { %4457 = vst [vmem:[#allocation8_spill] sm:$0xff] %v3966_v12  ;;  %4458 = vst [vmem:[#allocation9_spill] sm:$0xff] %v3968_v8  ;;  %v2475_v33 = vcombine.high %v315_v1, %v316_v40 }
  0x7f   :  { %4459 = vst [vmem:[#allocation10_spill] sm:$0xff] %v3970_v13  ;;  %4463 = vst [vmem:[#allocation14_spill] sm:$0xff] %v4000_v32 }
  0x83   :  { %736 = vmatmul.mubr.bf16.gmra.mxu0 %v2470_v0  ;;  %v252_v0 = vld [vmem:[%s4426_s0 + $0xe8] sm:$0xff] }
  0x84   :  { %1153 = vmatmul.mubr.bf16.gmra.mxu1 %v2518_v53  ;;  %743 = vmatprep.mubr.bf16.mxu0 %v2473_v47  ;;  %v3994_v53 = vsub.bf16 %v249_v9, %v313_v22  ;;  %v3996_v47 = vsub.bf16 %v250_v2, %v314_v30  ;;  %v2523_v5 = vcombine.high %v251_v35, %v252_v0  ;;  %v4018_v30 = vld [vmem:[%s4425_s1 + $0xf8] sm:$0xff]  ;;  %v4023_v2 = vld [vmem:[%s4426_s0 + $0xf0] sm:$0xff] }
  0x85   :  { %1160 = vmatprep.mubr.bf16.mxu1 %v2521_v49  ;;  %v3998_v49 = vmul.bf16 %v313_v22, %v249_v9  ;;  %v4013_v22 = vld [vmem:[%s4425_s1 + $0xf0] sm:$0xff]  ;;  %v2474_v9 = vcombine.low %v315_v1, %v316_v40  ;;  %v4036_v12 = vmul.bf16 %v316_v40, %v252_v0  ;;  %v2522_v8 = vcombine.low %v251_v35, %v252_v0 }
  0x86   :  { %4461 = vst [vmem:[#allocation12_spill] sm:$0xff] %v3996_v47  ;;  %v2477_v13 = vcombine.high %v4013_v22, %v4018_v30  ;;  %v4465_v47 = vcombine.high %v3524_v39, %v3531_v44 }
  0x87   :  { %4462 = vst [vmem:[#allocation13_spill] sm:$0xff] %v3998_v49 }
  0x8b   :  { %744 = vmatmul.mubr.bf16.gmra.mxu0 %v2472_v34  ;;  %v4034_v34 = vmul.bf16 %v315_v1, %v251_v35 }
  0x8c   :  { %1161 = vmatmul.mubr.bf16.gmra.mxu1 %v2520_v29  ;;  %751 = vmatprep.mubr.bf16.mxu0 %v2475_v33  ;;  %v4030_v29 = vsub.bf16 %v251_v35, %v315_v1  ;;  %v4032_v33 = vsub.bf16 %v252_v0, %v316_v40  ;;  %v2476_v40 = vcombine.low %v4013_v22, %v4018_v30 }
  0x8d   :  { %1168 = vmatprep.mubr.bf16.mxu1 %v2523_v5  ;;  %v4028_v5 = vld [vmem:[%s4426_s0 + $0xf8] sm:$0xff]  ;;  %v2619_v49 = vcombine.high %v4034_v34, %v4036_v12  ;;  %v2618_v1 = vcombine.low %v4034_v34, %v4036_v12  ;;  %v4464_v0 = vcombine.high %v3522_v38, %v3529_v43 }
  0x8e   :  { %v2525_v48 = vcombine.high %v4023_v2, %v4028_v5  ;;  %v2571_v32 = vcombine.high %v4030_v29, %v4032_v33  ;;  %v2524_v35 = vcombine.low %v4023_v2, %v4028_v5 }
  0x93   :  { %752 = vmatmul.mubr.bf16.gmra.mxu0 %v2474_v9  ;;  %v4469_v9 = vcombine.high %v3586_v6, %v3588_v7 }
  0x94   :  { %1169 = vmatmul.mubr.bf16.gmra.mxu1 %v2522_v8  ;;  %759 = vmatprep.mubr.bf16.mxu0 %v2477_v13  ;;  %v4466_v8 = vcombine.low %v3522_v38, %v3529_v43  ;;  %v4468_v13 = vcombine.high %v3574_v62, %v3576_v63  ;;  %v4471_v38 = vcombine.low %v3586_v6, %v3588_v7 }
  0x95   :  { %1176 = vmatprep.mubr.bf16.mxu1 %v2525_v48  ;;  %v4467_v48 = vcombine.low %v3524_v39, %v3531_v44  ;;  %v4472_v39 = vcombine.high %v3608_v16, %v3619_v20  ;;  %v4473_v43 = vcombine.high %v3624_v23, %v3626_v24  ;;  %v4474_v44 = vcombine.low %v3608_v16, %v3619_v20 }
  0x96   :  { %v4477_v6 = vcombine.high %v3664_v46, %v3666_v50  ;;  %v4478_v7 = vcombine.low %v3657_v41, %v3659_v42  ;;  %v4479_v16 = vcombine.low %v3664_v46, %v3666_v50  ;;  %v4480_v20 = vcombine.high %v3700_v10, %v3702_v11 }
  0x97   :  { %v4485_v46 = vcombine.high %v3738_v51, %v3746_v57  ;;  %v4486_v50 = vcombine.low %v3734_v37, %v3736_v45 }
  0x9b   :  { %760 = vmatmul.mubr.bf16.gmra.mxu0 %v2476_v40  ;;  %v4470_v40 = vcombine.low %v3574_v62, %v3576_v63  ;;  %v4475_v62 = vcombine.low %v3624_v23, %v3626_v24  ;;  %v4476_v63 = vcombine.high %v3657_v41, %v3659_v42  ;;  %v4481_v23 = vcombine.high %v3704_v14, %v3709_v17 }
  0x9c   :  { %1177 = vmatmul.mubr.bf16.gmra.mxu1 %v2524_v35  ;;  %1537 = vmatprep.mubr.bf16.mxu0 %v4464_v0  ;;  %v4482_v24 = vcombine.low %v3700_v10, %v3702_v11  ;;  %v4483_v41 = vcombine.low %v3704_v14, %v3709_v17  ;;  %v4484_v42 = vcombine.high %v3734_v37, %v3736_v45 }
  0x9d   :  { %2050 = vmatprep.mubr.bf16.mxu1 %v4465_v47  ;;  %v4487_v10 = vcombine.low %v3738_v51, %v3746_v57  ;;  %v4488_v11 = vcombine.high %v3774_v3, %v3776_v4  ;;  %v4489_v14 = vcombine.high %v3778_v36, %v3786_v18  ;;  %v4490_v17 = vcombine.low %v3774_v3, %v3776_v4 }
  0x9e   :  { %v4491_v37 = vcombine.low %v3778_v36, %v3786_v18  ;;  %v4492_v45 = vcombine.high %v3814_v60, %v3822_v31  ;;  %v4493_v51 = vcombine.high %v3830_v21, %v3832_v26  ;;  %v4494_v57 = vcombine.low %v3814_v60, %v3822_v31 }
  0x9f   :  { %v4495_v3 = vcombine.low %v3830_v21, %v3832_v26  ;;  %v4496_v4 = vcombine.high %v3842_v61, %v3844_v56  ;;  %v4497_v36 = vcombine.high %v3846_v15, %v3854_v52  ;;  %v4498_v47 = vcombine.low %v3842_v61, %v3844_v56 }
  0xa0   :  { %v4499_v60 = vcombine.low %v3846_v15, %v3854_v52  ;;  %v4500_v31 = vcombine.high %v3882_v27, %v3884_v55  ;;  %v4501_v26 = vcombine.high %v3886_v58, %v3888_v54 }
  0xa3   :  { %1538 = vmatmul.mubr.bf16.vlgmr.msra.gmra.mxu0 %v4466_v8 }
  0xa4   :  { %2051 = vmatmul.mubr.bf16.vlgmr.msra.gmra.mxu1 %v4467_v48  ;;  %1545 = vmatprep.mubr.bf16.mxu0 %v4468_v13 }
  0xa5   :  { %2058 = vmatprep.mubr.bf16.mxu1 %v4469_v9 }
  0xab   :  { %1546 = vmatmul.mubr.bf16.gmra.mxu0 %v4470_v40 }
  0xac   :  { %2059 = vmatmul.mubr.bf16.gmra.mxu1 %v4471_v38  ;;  %1553 = vmatprep.mubr.bf16.mxu0 %v4472_v39  ;;  %v4502_v39 = vcombine.low %v3882_v27, %v3884_v55 }
  0xad   :  { %2066 = vmatprep.mubr.bf16.mxu1 %v4473_v43 }
  0xb3   :  { %1554 = vmatmul.mubr.bf16.gmra.mxu0 %v4474_v44  ;;  %v4503_v44 = vcombine.low %v3886_v58, %v3888_v54 }
  0xb4   :  { %2067 = vmatmul.mubr.bf16.gmra.mxu1 %v4475_v62  ;;  %1561 = vmatprep.mubr.bf16.mxu0 %v4476_v63  ;;  %v4504_v62 = vcombine.high %v3910_v59, %v3912_v19 }
  0xb5   :  { %2074 = vmatprep.mubr.bf16.mxu1 %v4477_v6 }
  0xbb   :  { %1562 = vmatmul.mubr.bf16.gmra.mxu0 %v4478_v7  ;;  %v4505_v7 = vcombine.high %v3914_v25, %v3916_v28 }
  0xbc   :  { %2075 = vmatmul.mubr.bf16.gmra.mxu1 %v4479_v16  ;;  %1569 = vmatprep.mubr.bf16.mxu0 %v4480_v20 }
  0xbd   :  { %2082 = vmatprep.mubr.bf16.mxu1 %v4481_v23 }
  0xc3   :  { %1570 = vmatmul.mubr.bf16.gmra.mxu0 %v4482_v24 }
  0xc4   :  { %2083 = vmatmul.mubr.bf16.gmra.mxu1 %v4483_v41  ;;  %1577 = vmatprep.mubr.bf16.mxu0 %v4484_v42 }
  0xc5   :  { %2090 = vmatprep.mubr.bf16.mxu1 %v4485_v46 }
  0xcb   :  { %1578 = vmatmul.mubr.bf16.gmra.mxu0 %v4486_v50  ;;  %v4506_v50 = vcombine.low %v3910_v59, %v3912_v19 }
  0xcc   :  { %2091 = vmatmul.mubr.bf16.gmra.mxu1 %v4487_v10  ;;  %1585 = vmatprep.mubr.bf16.mxu0 %v4488_v11  ;;  %v4507_v11 = vcombine.low %v3914_v25, %v3916_v28 }
  0xcd   :  { %2098 = vmatprep.mubr.bf16.mxu1 %v4489_v14  ;;  %v4508_v14 = vld [vmem:[#allocation4_spill] sm:$0xff] }
  0xd3   :  { %1586 = vmatmul.mubr.bf16.gmra.mxu0 %v4490_v17  ;;  %v4509_v17 = vld [vmem:[#allocation5_spill] sm:$0xff] }
  0xd4   :  { %2099 = vmatmul.mubr.bf16.gmra.mxu1 %v4491_v37  ;;  %1593 = vmatprep.mubr.bf16.mxu0 %v4492_v45  ;;  %v4510_v37 = vcombine.high %v4508_v14, %v4509_v17 }
  0xd5   :  { %2106 = vmatprep.mubr.bf16.mxu1 %v4493_v51 }
  0xdb   :  { %1594 = vmatmul.mubr.bf16.gmra.mxu0 %v4494_v57  ;;  %v4511_v57 = vld [vmem:[#allocation6_spill] sm:$0xff] }
  0xdc   :  { %2107 = vmatmul.mubr.bf16.gmra.mxu1 %v4495_v3  ;;  %1601 = vmatprep.mubr.bf16.mxu0 %v4496_v4  ;;  %v4512_v3 = vld [vmem:[#allocation7_spill] sm:$0xff] }
  0xdd   :  { %2114 = vmatprep.mubr.bf16.mxu1 %v4497_v36  ;;  %v4513_v4 = vcombine.high %v4511_v57, %v4512_v3 }
  0xe3   :  { %v2814_v18 = vpop.f32.mrf.mxu0  ;;  %1602 = vmatmul.mubr.bf16.gmra.mxu0 %v4498_v47 }
  0xe4   :  { %v2926_v35 = vpop.f32.mrf.mxu1  ;;  %2115 = vmatmul.mubr.bf16.gmra.mxu1 %v4499_v60  ;;  %1609 = vmatprep.mubr.bf16.mxu0 %v4500_v31 }
  0xe5   :  { %v2815_v21 = vpop.f32.mrf.mxu0  ;;  %2122 = vmatprep.mubr.bf16.mxu1 %v4501_v26  ;;  %v4514_v26 = vcombine.low %v4508_v14, %v4509_v17  ;;  %v4527_v14 = vld [vmem:[#allocation14_spill] sm:$0xff] }
  0xe6   :  { %v2816_v0 = vadd.f32 %v2815_v21, %v2814_v18  ;;  %v2927_v8 = vpop.f32.mrf.mxu1 }
  0xe7   :  { %v2928_v48 = vadd.f32 %v2927_v8, %v2926_v35  ;;  %v2817_v13 = vpop.f32.mrf.mxu0  ;;  %v4515_v8 = vcombine.low %v4511_v57, %v4512_v3 }
  0xe8   :  { %v2929_v61 = vpop.f32.mrf.mxu1 }
  0xe9   :  { %v4168_v56 = vadd.f32 %v2928_v48, %v2816_v0  ;;  %v2818_v9 = vpop.f32.mrf.mxu0  ;;  %v4516_v48 = vld [vmem:[#allocation8_spill] sm:$0xff] }
  0xea   :  { %v2819_v40 = vadd.f32 %v2818_v9, %v2817_v13  ;;  %v2930_v52 = vpop.f32.mrf.mxu1  ;;  %v4517_v13 = vld [vmem:[#allocation9_spill] sm:$0xff] }
  0xeb   :  { %v2931_v15 = vadd.f32 %v2930_v52, %v2929_v61  ;;  %v2820_v38 = vpop.f32.mrf.mxu0  ;;  %1610 = vmatmul.mubr.bf16.gmra.mxu0 %v4502_v39  ;;  %v4518_v61 = vcombine.high %v4516_v48, %v4517_v13  ;;  %v4519_v52 = vld [vmem:[#allocation10_spill] sm:$0xff] }
  0xec   :  { %v2932_v43 = vpop.f32.mrf.mxu1  ;;  %2123 = vmatmul.mubr.bf16.gmra.mxu1 %v4503_v44  ;;  %1617 = vmatprep.mubr.bf16.mxu0 %v4504_v62 }
  0xed   :  { %v4179_v63 = vadd.f32 %v2931_v15, %v2819_v40  ;;  %v2821_v6 = vpop.f32.mrf.mxu0  ;;  %2130 = vmatprep.mubr.bf16.mxu1 %v4505_v7  ;;  %v4520_v15 = vld [vmem:[#allocation11_spill] sm:$0xff] }
  0xee   :  { %v2822_v16 = vadd.f32 %v2821_v6, %v2820_v38  ;;  %v2933_v20 = vpop.f32.mrf.mxu1  ;;  %v4521_v38 = vcombine.high %v4519_v52, %v4520_v15 }
  0xef   :  { %v2934_v27 = vadd.f32 %v2933_v20, %v2932_v43  ;;  %v2823_v55 = vpop.f32.mrf.mxu0 }
  0xf0   :  { %v2935_v23 = vpop.f32.mrf.mxu1 }
  0xf1   :  { %v4184_v24 = vadd.f32 %v2934_v27, %v2822_v16  ;;  %v2824_v54 = vpop.f32.mrf.mxu0 }
  0xf2   :  { %v2825_v58 = vadd.f32 %v2824_v54, %v2823_v55  ;;  %v2936_v41 = vpop.f32.mrf.mxu1  ;;  %v4522_v54 = vcombine.low %v4516_v48, %v4517_v13  ;;  %v190_v48 = vmul.bf16 %v4018_v30, %v4028_v5 }
  0xf3   :  { %v2937_v42 = vadd.f32 %v2936_v41, %v2935_v23  ;;  %v2826_v46 = vpop.f32.mrf.mxu0  ;;  %1618 = vmatmul.mubr.bf16.gmra.mxu0 %v4506_v50  ;;  %v4523_v41 = vcombine.low %v4519_v52, %v4520_v15 }
  0xf4   :  { %v2938_v10 = vpop.f32.mrf.mxu1  ;;  %2131 = vmatmul.mubr.bf16.gmra.mxu1 %v4507_v11  ;;  %1625 = vmatprep.mubr.bf16.mxu0 %v4510_v37  ;;  %v4526_v11 = vld [vmem:[#allocation13_spill] sm:$0xff] }
  0xf5   :  { %v4195_v45 = vadd.f32 %v2937_v42, %v2825_v58  ;;  %v2827_v51 = vpop.f32.mrf.mxu0  ;;  %2138 = vmatprep.mubr.bf16.mxu1 %v4513_v4  ;;  %v4524_v42 = vld [vmem:[#allocation12_spill] sm:$0xff]  ;;  %v4528_v17 = vcombine.high %v4526_v11, %v4527_v14 }
  0xf6   :  { %v2828_v36 = vadd.f32 %v2827_v51, %v2826_v46  ;;  %v2939_v18 = vpop.f32.mrf.mxu1  ;;  %v4525_v46 = vcombine.high %v3994_v53, %v4524_v42 }
  0xf7   :  { %v2940_v59 = vadd.f32 %v2939_v18, %v2938_v10  ;;  %v2829_v19 = vpop.f32.mrf.mxu0 }
  0xf8   :  { %v2941_v47 = vpop.f32.mrf.mxu1 }
  0xf9   :  { %v4200_v35 = vadd.f32 %v2940_v59, %v2828_v36  ;;  %v2830_v28 = vpop.f32.mrf.mxu0 }
  0xfa   :  { %v2831_v25 = vadd.f32 %v2830_v28, %v2829_v19  ;;  %v2942_v60 = vpop.f32.mrf.mxu1 }
  0xfb   :  { %v2943_v31 = vadd.f32 %v2942_v60, %v2941_v47  ;;  %v2832_v21 = vpop.f32.mrf.mxu0  ;;  %1626 = vmatmul.mubr.bf16.gmra.mxu0 %v4514_v26  ;;  %v126_v26 = vsub.bf16 %v4028_v5, %v4018_v30 }
  0xfc   :  { %v2944_v0 = vpop.f32.mrf.mxu1  ;;  %2139 = vmatmul.mubr.bf16.gmra.mxu1 %v4515_v8  ;;  %1633 = vmatprep.mubr.bf16.mxu0 %v4518_v61 }
  0xfd   :  { %v4211_v9 = vadd.f32 %v2943_v31, %v2831_v25  ;;  %v2833_v40 = vpop.f32.mrf.mxu0  ;;  %2146 = vmatprep.mubr.bf16.mxu1 %v4521_v38  ;;  %v4529_v25 = vcombine.low %v3994_v53, %v4524_v42  ;;  %v4530_v31 = vcombine.low %v4526_v11, %v4527_v14  ;;  %v189_v53 = vmul.bf16 %v4013_v22, %v4023_v2 }
  0xfe   :  { %v2834_v39 = vadd.f32 %v2833_v40, %v2832_v21  ;;  %v2945_v43 = vpop.f32.mrf.mxu1  ;;  %v125_v21 = vsub.bf16 %v4023_v2, %v4013_v22  ;;  %v4531_v22 = vcombine.low %v4030_v29, %v4032_v33 }
  0xff   :  { %v2946_v44 = vadd.f32 %v2945_v43, %v2944_v0  ;;  %v2835_v62 = vpop.f32.mrf.mxu0  ;;  %v2621_v43 = vcombine.high %v189_v53, %v190_v48 }
 0x100   :  { %v2947_v6 = vpop.f32.mrf.mxu1  ;;  %v2573_v15 = vcombine.high %v125_v21, %v126_v26 }
 0x101   :  { %v4216_v7 = vadd.f32 %v2946_v44, %v2834_v39  ;;  %v2836_v16 = vpop.f32.mrf.mxu0 }
 0x102   :  { %v2837_v20 = vadd.f32 %v2836_v16, %v2835_v62  ;;  %v2948_v27 = vpop.f32.mrf.mxu1 }
 0x103   :  { %v2949_v55 = vadd.f32 %v2948_v27, %v2947_v6  ;;  %v2838_v23 = vpop.f32.mrf.mxu0  ;;  %1634 = vmatmul.mubr.bf16.gmra.mxu0 %v4522_v54 }
 0x104   :  { %v2950_v58 = vpop.f32.mrf.mxu1  ;;  %2147 = vmatmul.mubr.bf16.gmra.mxu1 %v4523_v41  ;;  %1641 = vmatprep.mubr.bf16.mxu0 %v4525_v46 }
 0x105   :  { %v4227_v50 = vadd.f32 %v2949_v55, %v2837_v20  ;;  %v2839_v10 = vpop.f32.mrf.mxu0  ;;  %2154 = vmatprep.mubr.bf16.mxu1 %v4528_v17 }
 0x106   :  { %v2840_v37 = vadd.f32 %v2839_v10, %v2838_v23  ;;  %v2951_v51 = vpop.f32.mrf.mxu1  ;;  %v2572_v23 = vcombine.low %v125_v21, %v126_v26 }
 0x107   :  { %v2952_v57 = vadd.f32 %v2951_v51, %v2950_v58  ;;  %v2841_v3 = vpop.f32.mrf.mxu0  ;;  %v2620_v58 = vcombine.low %v189_v53, %v190_v48 }
 0x108   :  { %v2953_v4 = vpop.f32.mrf.mxu1 }
 0x109   :  { %v4232_v36 = vadd.f32 %v2952_v57, %v2840_v37  ;;  %v2842_v18 = vpop.f32.mrf.mxu0 }
 0x10a   :  { %v2843_v59 = vadd.f32 %v2842_v18, %v2841_v3  ;;  %v2954_v19 = vpop.f32.mrf.mxu1 }
 0x10b   :  { %v2955_v47 = vadd.f32 %v2954_v19, %v2953_v4  ;;  %v2844_v28 = vpop.f32.mrf.mxu0  ;;  %1642 = vmatmul.mubr.bf16.gmra.mxu0 %v4529_v25 }
 0x10c   :  { %v2956_v60 = vpop.f32.mrf.mxu1  ;;  %2155 = vmatmul.mubr.bf16.gmra.mxu1 %v4530_v31  ;;  %1649 = vmatprep.mubr.bf16.mxu0 %v2571_v32 }
 0x10d   :  { %v4247_v0 = vadd.f32 %v2955_v47, %v2843_v59  ;;  %v2845_v8 = vpop.f32.mrf.mxu0  ;;  %2162 = vmatprep.mubr.bf16.mxu1 %v2619_v49 }
 0x10e   :  { %v2846_v32 = vadd.f32 %v2845_v8, %v2844_v28  ;;  %v2957_v13 = vpop.f32.mrf.mxu1 }
 0x10f   :  { %v2958_v61 = vadd.f32 %v2957_v13, %v2956_v60  ;;  %v2847_v40 = vpop.f32.mrf.mxu0 }
 0x110   :  { %v2959_v52 = vpop.f32.mrf.mxu1 }
 0x111   :  { %v4256_v38 = vadd.f32 %v2958_v61, %v2846_v32  ;;  %v2848_v39 = vpop.f32.mrf.mxu0 }
 0x112   :  { %v2849_v44 = vadd.f32 %v2848_v39, %v2847_v40  ;;  %v2960_v62 = vpop.f32.mrf.mxu1 }
 0x113   :  { %v2961_v6 = vadd.f32 %v2960_v62, %v2959_v52  ;;  %v2850_v49 = vpop.f32.mrf.mxu0  ;;  %1650 = vmatmul.mubr.bf16.gmra.mxu0 %v4531_v22 }
 0x114   :  { %v2962_v2 = vpop.f32.mrf.mxu1  ;;  %2163 = vmatmul.mubr.bf16.gmra.mxu1 %v2618_v1  ;;  %1657 = vmatprep.mubr.bf16.mxu0 %v2573_v15 }
 0x115   :  { %v4264_v30 = vadd.f32 %v2961_v6, %v2849_v44  ;;  %v2851_v5 = vpop.f32.mrf.mxu0  ;;  %2170 = vmatprep.mubr.bf16.mxu1 %v2621_v43 }
 0x116   :  { %v2852_v16 = vadd.f32 %v2851_v5, %v2850_v49  ;;  %v2963_v20 = vpop.f32.mrf.mxu1 }
 0x117   :  { %v2964_v27 = vadd.f32 %v2963_v20, %v2962_v2  ;;  %v2853_v55 = vpop.f32.mrf.mxu0 }
 0x118   :  { %v2965_v54 = vpop.f32.mrf.mxu1 }
 0x119   :  { %v4266_v41 = vadd.f32 %v2964_v27, %v2852_v16  ;;  %v2854_v29 = vpop.f32.mrf.mxu0 }
 0x11a   :  { %v2855_v33 = vadd.f32 %v2854_v29, %v2853_v55  ;;  %v2966_v42 = vpop.f32.mrf.mxu1 }
 0x11b   :  { %v2967_v46 = vadd.f32 %v2966_v42, %v2965_v54  ;;  %v2856_v12 = vpop.f32.mrf.mxu0  ;;  %1658 = vmatmul.mubr.bf16.gmra.mxu0 %v2572_v23 }
 0x11c   :  { %v2968_v34 = vpop.f32.mrf.mxu1  ;;  %2171 = vmatmul.mubr.bf16.gmra.mxu1 %v2620_v58 }
 0x11d   :  { %v4268_v1 = vadd.f32 %v2967_v46, %v2855_v33  ;;  %v2857_v10 = vpop.f32.mrf.mxu0 }
 0x11e   :  { %v2858_v11 = vadd.f32 %v2857_v10, %v2856_v12  ;;  %v2969_v14 = vpop.f32.mrf.mxu1 }
 0x11f   :  { %v2970_v17 = vadd.f32 %v2969_v14, %v2968_v34  ;;  %v2859_v37 = vpop.f32.mrf.mxu0 }
 0x120   :  { %v2971_v51 = vpop.f32.mrf.mxu1 }
 0x121   :  { %v4270_v57 = vadd.f32 %v2970_v17, %v2858_v11  ;;  %v2860_v3 = vpop.f32.mrf.mxu0 }
 0x122   :  { %v2861_v4 = vadd.f32 %v2860_v3, %v2859_v37  ;;  %v2972_v18 = vpop.f32.mrf.mxu1 }
 0x123   :  { %v2973_v59 = vadd.f32 %v2972_v18, %v2971_v51  ;;  %v2862_v19 = vpop.f32.mrf.mxu0 }
 0x124   :  { %v2974_v47 = vpop.f32.mrf.mxu1 }
 0x125   :  { %v4272_v28 = vadd.f32 %v2973_v59, %v2861_v4  ;;  %v2863_v25 = vpop.f32.mrf.mxu0 }
 0x126   :  { %v2864_v60 = vadd.f32 %v2863_v25, %v2862_v19  ;;  %v2975_v31 = vpop.f32.mrf.mxu1 }
 0x127   :  { %v2976_v21 = vadd.f32 %v2975_v31, %v2974_v47  ;;  %v2865_v26 = vpop.f32.mrf.mxu0 }
 0x128   :  { %v2977_v8 = vpop.f32.mrf.mxu1 }
 0x129   :  { %v4274_v53 = vadd.f32 %v2976_v21, %v2864_v60  ;;  %v2866_v48 = vpop.f32.mrf.mxu0 }
 0x12a   :  { %v2867_v32 = vadd.f32 %v2866_v48, %v2865_v26  ;;  %v2978_v13 = vpop.f32.mrf.mxu1 }
 0x12b   :  { %v2979_v61 = vadd.f32 %v2978_v13, %v2977_v8  ;;  %v2868_v40 = vpop.f32.mrf.mxu0 }
 0x12c   :  { %v2980_v52 = vpop.f32.mrf.mxu1 }
 0x12d   :  { %v4276_v15 = vadd.f32 %v2979_v61, %v2867_v32  ;;  %v2869_v39 = vpop.f32.mrf.mxu0 }
 0x12e   :  { %v2870_v43 = vadd.f32 %v2869_v39, %v2868_v40  ;;  %v2981_v44 = vpop.f32.mrf.mxu1 }
 0x12f   :  { %v2982_v62 = vadd.f32 %v2981_v44, %v2980_v52  ;;  %v2871_v6 = vpop.f32.mrf.mxu0 }
 0x130   :  { %v2983_v49 = vpop.f32.mrf.mxu1 }
 0x131   :  { %v4278_v22 = vadd.f32 %v2982_v62, %v2870_v43  ;;  %v2872_v2 = vpop.f32.mrf.mxu0 }
 0x132   :  { %v2873_v5 = vadd.f32 %v2872_v2, %v2871_v6  ;;  %v2984_v16 = vpop.f32.mrf.mxu1 }
 0x133   :  { %v2985_v20 = vadd.f32 %v2984_v16, %v2983_v49  ;;  %v2874_v27 = vpop.f32.mrf.mxu0 }
 0x134   :  { %v2986_v55 = vpop.f32.mrf.mxu1 }
 0x135   :  { %v4280_v23 = vadd.f32 %v2985_v20, %v2873_v5  ;;  %v2875_v54 = vpop.f32.mrf.mxu0 }
 0x136   :  { %v2876_v58 = vadd.f32 %v2875_v54, %v2874_v27  ;;  %v2987_v29 = vpop.f32.mrf.mxu1 }
 0x137   :  { %v2988_v33 = vadd.f32 %v2987_v29, %v2986_v55  ;;  %v2877_v42 = vpop.f32.mrf.mxu0 }
 0x138   :  { %v2989_v46 = vpop.f32.mrf.mxu1 }
 0x139   :  { %v4282_v12 = vadd.f32 %v2988_v33, %v2876_v58  ;;  %v2878_v34 = vpop.f32.mrf.mxu0 }
 0x13a   :  { %v2879_v10 = vadd.f32 %v2878_v34, %v2877_v42  ;;  %v2990_v11 = vpop.f32.mrf.mxu1 }
 0x13b   :  { %v2991_v14 = vadd.f32 %v2990_v11, %v2989_v46  ;;  %v2880_v17 = vpop.f32.mrf.mxu0 }
 0x13c   :  { %v2992_v37 = vpop.f32.mrf.mxu1 }
 0x13d   :  { %v4284_v51 = vadd.f32 %v2991_v14, %v2879_v10  ;;  %v2881_v3 = vpop.f32.mrf.mxu0 }
 0x13e   :  { %v2882_v4 = vadd.f32 %v2881_v3, %v2880_v17  ;;  %v2993_v18 = vpop.f32.mrf.mxu1 }
 0x13f   :  { %v2994_v59 = vadd.f32 %v2993_v18, %v2992_v37  ;;  %v2883_v19 = vpop.f32.mrf.mxu0 }
 0x140   :  { %v2995_v47 = vpop.f32.mrf.mxu1 }
 0x141   :  { %v4286_v25 = vadd.f32 %v2994_v59, %v2882_v4  ;;  %v2884_v60 = vpop.f32.mrf.mxu0 }
 0x142   :  { %v2885_v31 = vadd.f32 %v2884_v60, %v2883_v19  ;;  %v2996_v21 = vpop.f32.mrf.mxu1 }
 0x143   :  { %v2997_v26 = vadd.f32 %v2996_v21, %v2995_v47  ;;  %v2886_v8 = vpop.f32.mrf.mxu0 }
 0x144   :  { %v2998_v48 = vpop.f32.mrf.mxu1 }
 0x145   :  { %v4288_v32 = vadd.f32 %v2997_v26, %v2885_v31  ;;  %v2887_v13 = vpop.f32.mrf.mxu0 }
 0x146   :  { %v2888_v61 = vadd.f32 %v2887_v13, %v2886_v8  ;;  %v2999_v40 = vpop.f32.mrf.mxu1 }
 0x147   :  { %v3000_v52 = vadd.f32 %v2999_v40, %v2998_v48  ;;  %v2889_v39 = vpop.f32.mrf.mxu0 }
 0x148   :  { %v3001_v43 = vpop.f32.mrf.mxu1 }
 0x149   :  { %v4290_v44 = vadd.f32 %v3000_v52, %v2888_v61  ;;  %v2890_v62 = vpop.f32.mrf.mxu0 }
 0x14a   :  { %v2891_v6 = vadd.f32 %v2890_v62, %v2889_v39  ;;  %v3002_v49 = vpop.f32.mrf.mxu1 }
 0x14b   :  { %v3003_v2 = vadd.f32 %v3002_v49, %v3001_v43  ;;  %v2892_v5 = vpop.f32.mrf.mxu0 }
 0x14c   :  { %v3004_v16 = vpop.f32.mrf.mxu1 }
 0x14d   :  { %v4292_v20 = vadd.f32 %v3003_v2, %v2891_v6  ;;  %v2893_v27 = vpop.f32.mrf.mxu0 }
 0x14e   :  { %v2894_v55 = vadd.f32 %v2893_v27, %v2892_v5  ;;  %v3005_v54 = vpop.f32.mrf.mxu1 }
 0x14f   :  { %v3006_v58 = vadd.f32 %v3005_v54, %v3004_v16  ;;  %v2895_v29 = vpop.f32.mrf.mxu0 }
 0x150   :  { %v3007_v33 = vpop.f32.mrf.mxu1 }
 0x151   :  { %v4294_v42 = vadd.f32 %v3006_v58, %v2894_v55  ;;  %v2896_v46 = vpop.f32.mrf.mxu0 }
 0x152   :  { %v2897_v34 = vadd.f32 %v2896_v46, %v2895_v29  ;;  %v3008_v10 = vpop.f32.mrf.mxu1 }
 0x153   :  { %v3009_v11 = vadd.f32 %v3008_v10, %v3007_v33  ;;  %v2898_v14 = vpop.f32.mrf.mxu0 }
 0x154   :  { %v3010_v17 = vpop.f32.mrf.mxu1 }
 0x155   :  { %v4296_v37 = vadd.f32 %v3009_v11, %v2897_v34  ;;  %v2899_v3 = vpop.f32.mrf.mxu0 }
 0x156   :  { %v2900_v4 = vadd.f32 %v2899_v3, %v2898_v14  ;;  %v3011_v18 = vpop.f32.mrf.mxu1 }
 0x157   :  { %v3012_v59 = vadd.f32 %v3011_v18, %v3010_v17  ;;  %v2901_v19 = vpop.f32.mrf.mxu0 }
 0x158   :  { %v3013_v47 = vpop.f32.mrf.mxu1 }
 0x159   :  { %v4298_v60 = vadd.f32 %v3012_v59, %v2900_v4  ;;  %v2902_v31 = vpop.f32.mrf.mxu0  ;;  %v4310_v59 = vld [vmem:[%s4429_s6] ss:$0 sm:$0xff] }
 0x15a   :  { %v2903_v21 = vadd.f32 %v2902_v31, %v2901_v19  ;;  %v3014_v26 = vpop.f32.mrf.mxu1 }
 0x15b   :  { %v3015_v8 = vadd.f32 %v3014_v26, %v3013_v47  ;;  %v2904_v48 = vpop.f32.mrf.mxu0 }
 0x15c   :  { %v3016_v13 = vpop.f32.mrf.mxu1 }
 0x15d   :  { %v4300_v61 = vadd.f32 %v3015_v8, %v2903_v21  ;;  %v2905_v40 = vpop.f32.mrf.mxu0 }
 0x15e   :  { %v2906_v52 = vadd.f32 %v2905_v40, %v2904_v48  ;;  %v3017_v39 = vpop.f32.mrf.mxu1 }
 0x15f   :  { %v3018_v43 = vadd.f32 %v3017_v39, %v3016_v13  ;;  %v2907_v62 = vpop.f32.mrf.mxu0 }
 0x160   :  { %v3019_v6 = vpop.f32.mrf.mxu1 }
 0x161   :  { %v4302_v49 = vadd.f32 %v3018_v43, %v2906_v52  ;;  %v2908_v2 = vpop.f32.mrf.mxu0 }
 0x162   :  { %v2909_v5 = vadd.f32 %v2908_v2, %v2907_v62  ;;  %v3020_v16 = vpop.f32.mrf.mxu1 }
 0x163   :  { %v3021_v27 = vadd.f32 %v3020_v16, %v3019_v6  ;;  %v3038_v55 = vpop.f32.mrf.mxu0 }
 0x164   :  { %v3150_v54 = vpop.f32.mrf.mxu1 }
 0x165   :  { %v4304_v58 = vadd.f32 %v3021_v27, %v2909_v5  ;;  %v3039_v29 = vpop.f32.mrf.mxu0 }
 0x166   :  { %v3040_v33 = vadd.f32 %v3039_v29, %v3038_v55  ;;  %v3151_v46 = vpop.f32.mrf.mxu1 }
 0x167   :  { %v3041_v34 = vpop.f32.mrf.mxu0  ;;  %v3152_v11 = vadd.f32 %v3151_v46, %v3150_v54 }
 0x168   :  { %v1666_v10 = vadd.f32 %v3040_v33, %v4168_v56  ;;  %v3153_v14 = vpop.f32.mrf.mxu1 }
 0x169   :  { %v3042_v17 = vpop.f32.mrf.mxu0 }
 0x16a   :  { %v2179_v3 = vadd.f32 %v3152_v11, %v1666_v10  ;;  %v3043_v4 = vadd.f32 %v3042_v17, %v3041_v34  ;;  %v3154_v18 = vpop.f32.mrf.mxu1 }
 0x16b   :  { %v3044_v19 = vpop.f32.mrf.mxu0  ;;  %v3155_v31 = vadd.f32 %v3154_v18, %v3153_v14 }
 0x16c   :  { %v1667_v47 = vadd.f32 %v3043_v4, %v4179_v63  ;;  %v3156_v21 = vpop.f32.mrf.mxu1  ;;  %v2218_v8 = vadd.f32 %v4310_v59, %v2179_v3 }
 0x16d   :  { %v3045_v26 = vpop.f32.mrf.mxu0 }
 0x16e   :  { %v2180_v56 = vadd.f32 %v3155_v31, %v1667_v47  ;;  %v3046_v48 = vadd.f32 %v3045_v26, %v3044_v19  ;;  %v3157_v13 = vpop.f32.mrf.mxu1  ;;  %v2250_v2 = vmax.f32 %v2218_v8, 0.0 }
 0x16f   :  { %v3047_v40 = vpop.f32.mrf.mxu0  ;;  %v3158_v43 = vadd.f32 %v3157_v13, %v3156_v21 }
 0x170   :  { %v2219_v52 = vadd.f32 %v4310_v59, %v2180_v56  ;;  %v1668_v39 = vadd.f32 %v3046_v48, %v4184_v24  ;;  %v3159_v62 = vpop.f32.mrf.mxu1 }
 0x171   :  { %v3048_v6 = vpop.f32.mrf.mxu0 }
 0x172   :  { %v2251_v5 = vmax.f32 %v2219_v52, 0.0  ;;  %v2181_v16 = vadd.f32 %v3158_v43, %v1668_v39  ;;  %v3049_v63 = vadd.f32 %v3048_v6, %v3047_v40  ;;  %v3160_v27 = vpop.f32.mrf.mxu1 }
 0x173   :  { %v3050_v55 = vpop.f32.mrf.mxu0  ;;  %v3161_v33 = vadd.f32 %v3160_v27, %v3159_v62 }
 0x174   :  { %v2706_v54 = vpack.c.bf16 %v2251_v5, %v2250_v2  ;;  %v1669_v29 = vadd.f32 %v3049_v63, %v4195_v45  ;;  %v3162_v46 = vpop.f32.mrf.mxu1  ;;  %v2220_v24 = vadd.f32 %v4310_v59, %v2181_v16 }
 0x175   :  { %v3051_v34 = vpop.f32.mrf.mxu0 }
 0x176   :  { %2707 = vst [vmem:[%s4430_s7] sm:$0xff] %v2706_v54   ;;  %v2182_v10 = vadd.f32 %v3161_v33, %v1669_v29  ;;  %v3052_v11 = vadd.f32 %v3051_v34, %v3050_v55  ;;  %v3163_v14 = vpop.f32.mrf.mxu1  ;;  %v2252_v47 = vmax.f32 %v2220_v24, 0.0 }
 0x177   :  { %v3053_v17 = vpop.f32.mrf.mxu0  ;;  %v3164_v18 = vadd.f32 %v3163_v14, %v3162_v46 }
 0x178   :  { %v2221_v3 = vadd.f32 %v4310_v59, %v2182_v10  ;;  %v1670_v4 = vadd.f32 %v3052_v11, %v4200_v35  ;;  %v3165_v19 = vpop.f32.mrf.mxu1 }
 0x179   :  { %v3054_v45 = vpop.f32.mrf.mxu0 }
 0x17a   :  { %v2253_v31 = vmax.f32 %v2221_v3, 0.0  ;;  %v2183_v21 = vadd.f32 %v3164_v18, %v1670_v4  ;;  %v3055_v26 = vadd.f32 %v3054_v45, %v3053_v17  ;;  %v3166_v8 = vpop.f32.mrf.mxu1 }
 0x17b   :  { %v3056_v56 = vpop.f32.mrf.mxu0  ;;  %v3167_v40 = vadd.f32 %v3166_v8, %v3165_v19 }
 0x17c   :  { %v2711_v48 = vpack.c.bf16 %v2253_v31, %v2252_v47  ;;  %v1671_v13 = vadd.f32 %v3055_v26, %v4211_v9  ;;  %v3168_v52 = vpop.f32.mrf.mxu1  ;;  %v2222_v35 = vadd.f32 %v4310_v59, %v2183_v21 }
 0x17d   :  { %v3057_v39 = vpop.f32.mrf.mxu0 }
 0x17e   :  { %2783 = vst [vmem:[%s4430_s7 + $0x8] sm:$0xff] %v2711_v48   ;;  %v2184_v43 = vadd.f32 %v3167_v40, %v1671_v13  ;;  %v3058_v62 = vadd.f32 %v3057_v39, %v3056_v56  ;;  %v3169_v6 = vpop.f32.mrf.mxu1  ;;  %v2254_v55 = vmax.f32 %v2222_v35, 0.0 }
 0x17f   :  { %v3059_v2 = vpop.f32.mrf.mxu0  ;;  %v3170_v63 = vadd.f32 %v3169_v6, %v3168_v52 }
 0x180   :  { %v2223_v5 = vadd.f32 %v4310_v59, %v2184_v43  ;;  %v1672_v16 = vadd.f32 %v3058_v62, %v4216_v7  ;;  %v3171_v27 = vpop.f32.mrf.mxu1 }
 0x181   :  { %v3060_v9 = vpop.f32.mrf.mxu0 }
 0x182   :  { %v2255_v54 = vmax.f32 %v2223_v5, 0.0  ;;  %v2185_v29 = vadd.f32 %v3170_v63, %v1672_v16  ;;  %v3061_v33 = vadd.f32 %v3060_v9, %v3059_v2  ;;  %v3172_v46 = vpop.f32.mrf.mxu1 }
 0x183   :  { %v3062_v34 = vpop.f32.mrf.mxu0  ;;  %v3173_v11 = vadd.f32 %v3172_v46, %v3171_v27 }
 0x184   :  { %v2716_v24 = vpack.c.bf16 %v2255_v54, %v2254_v55  ;;  %v1673_v10 = vadd.f32 %v3061_v33, %v4227_v50  ;;  %v3174_v14 = vpop.f32.mrf.mxu1  ;;  %v2224_v7 = vadd.f32 %v4310_v59, %v2185_v29 }
 0x185   :  { %v3063_v17 = vpop.f32.mrf.mxu0 }
 0x186   :  { %2784 = vst [vmem:[%s4430_s7 + $0x10] sm:$0xff] %v2716_v24   ;;  %v2186_v3 = vadd.f32 %v3173_v11, %v1673_v10  ;;  %v3064_v4 = vadd.f32 %v3063_v17, %v3062_v34  ;;  %v3175_v18 = vpop.f32.mrf.mxu1  ;;  %v2256_v26 = vmax.f32 %v2224_v7, 0.0 }
 0x187   :  { %v3065_v19 = vpop.f32.mrf.mxu0  ;;  %v3176_v31 = vadd.f32 %v3175_v18, %v3174_v14 }
 0x188   :  { %v2225_v45 = vadd.f32 %v4310_v59, %v2186_v3  ;;  %v1674_v47 = vadd.f32 %v3064_v4, %v4232_v36  ;;  %v3177_v21 = vpop.f32.mrf.mxu1 }
 0x189   :  { %v3066_v50 = vpop.f32.mrf.mxu0 }
 0x18a   :  { %v2257_v8 = vmax.f32 %v2225_v45, 0.0  ;;  %v2187_v56 = vadd.f32 %v3176_v31, %v1674_v47  ;;  %v3067_v48 = vadd.f32 %v3066_v50, %v3065_v19  ;;  %v3178_v13 = vpop.f32.mrf.mxu1 }
 0x18b   :  { %v3068_v40 = vpop.f32.mrf.mxu0  ;;  %v3179_v35 = vadd.f32 %v3178_v13, %v3177_v21 }
 0x18c   :  { %v2721_v52 = vpack.c.bf16 %v2257_v8, %v2256_v26  ;;  %v1675_v39 = vadd.f32 %v3067_v48, %v4247_v0  ;;  %v3180_v43 = vpop.f32.mrf.mxu1  ;;  %v2226_v36 = vadd.f32 %v4310_v59, %v2187_v56 }
 0x18d   :  { %v3069_v62 = vpop.f32.mrf.mxu0 }
 0x18e   :  { %2785 = vst [vmem:[%s4430_s7 + $0x18] sm:$0xff] %v2721_v52   ;;  %v2188_v6 = vadd.f32 %v3179_v35, %v1675_v39  ;;  %v3070_v2 = vadd.f32 %v3069_v62, %v3068_v40  ;;  %v3181_v5 = vpop.f32.mrf.mxu1  ;;  %v2258_v54 = vmax.f32 %v2226_v36, 0.0 }
 0x18f   :  { %v3071_v16 = vpop.f32.mrf.mxu0  ;;  %v3182_v9 = vadd.f32 %v3181_v5, %v3180_v43 }
 0x190   :  { %v2227_v63 = vadd.f32 %v4310_v59, %v2188_v6  ;;  %v1676_v27 = vadd.f32 %v3070_v2, %v4256_v38  ;;  %v3183_v55 = vpop.f32.mrf.mxu1 }
 0x191   :  { %v3072_v0 = vpop.f32.mrf.mxu0 }
 0x192   :  { %v2259_v29 = vmax.f32 %v2227_v63, 0.0  ;;  %v2189_v33 = vadd.f32 %v3182_v9, %v1676_v27  ;;  %v3073_v46 = vadd.f32 %v3072_v0, %v3071_v16  ;;  %v3184_v34 = vpop.f32.mrf.mxu1 }
 0x193   :  { %v3074_v24 = vpop.f32.mrf.mxu0  ;;  %v3185_v14 = vadd.f32 %v3184_v34, %v3183_v55 }
 0x194   :  { %v2726_v10 = vpack.c.bf16 %v2259_v29, %v2258_v54  ;;  %v1677_v11 = vadd.f32 %v3073_v46, %v4264_v30  ;;  %v3186_v17 = vpop.f32.mrf.mxu1  ;;  %v2228_v38 = vadd.f32 %v4310_v59, %v2189_v33 }
 0x195   :  { %v3075_v7 = vpop.f32.mrf.mxu0 }
 0x196   :  { %2786 = vst [vmem:[%s4430_s7 + $0x20] sm:$0xff] %v2726_v10   ;;  %v2190_v3 = vadd.f32 %v3185_v14, %v1677_v11  ;;  %v3076_v4 = vadd.f32 %v3075_v7, %v3074_v24  ;;  %v3187_v18 = vpop.f32.mrf.mxu1  ;;  %v2260_v50 = vmax.f32 %v2228_v38, 0.0 }
 0x197   :  { %v3077_v19 = vpop.f32.mrf.mxu0  ;;  %v3188_v31 = vadd.f32 %v3187_v18, %v3186_v17 }
 0x198   :  { %v2229_v45 = vadd.f32 %v4310_v59, %v2190_v3  ;;  %v1678_v47 = vadd.f32 %v3076_v4, %v4266_v41  ;;  %v3189_v21 = vpop.f32.mrf.mxu1 }
 0x199   :  { %v3078_v30 = vpop.f32.mrf.mxu0 }
 0x19a   :  { %v2261_v26 = vmax.f32 %v2229_v45, 0.0  ;;  %v2191_v8 = vadd.f32 %v3188_v31, %v1678_v47  ;;  %v3079_v56 = vadd.f32 %v3078_v30, %v3077_v19  ;;  %v3190_v48 = vpop.f32.mrf.mxu1 }
 0x19b   :  { %v3080_v13 = vpop.f32.mrf.mxu0  ;;  %v3191_v39 = vadd.f32 %v3190_v48, %v3189_v21 }
 0x19c   :  { %v2731_v40 = vpack.c.bf16 %v2261_v26, %v2260_v50  ;;  %v1679_v52 = vadd.f32 %v3079_v56, %v4268_v1  ;;  %v3192_v35 = vpop.f32.mrf.mxu1  ;;  %v2230_v41 = vadd.f32 %v4310_v59, %v2191_v8 }
 0x19d   :  { %v3081_v43 = vpop.f32.mrf.mxu0 }
 0x19e   :  { %2787 = vst [vmem:[%s4430_s7 + $0x28] sm:$0xff] %v2731_v40   ;;  %v2192_v62 = vadd.f32 %v3191_v39, %v1679_v52  ;;  %v3082_v36 = vadd.f32 %v3081_v43, %v3080_v13  ;;  %v3193_v6 = vpop.f32.mrf.mxu1  ;;  %v2262_v9 = vmax.f32 %v2230_v41, 0.0 }
 0x19f   :  { %v3083_v2 = vpop.f32.mrf.mxu0  ;;  %v3194_v63 = vadd.f32 %v3193_v6, %v3192_v35 }
 0x1a0   :  { %v2231_v5 = vadd.f32 %v4310_v59, %v2192_v62  ;;  %v1680_v16 = vadd.f32 %v3082_v36, %v4270_v57  ;;  %v3195_v27 = vpop.f32.mrf.mxu1 }
 0x1a1   :  { %v3084_v1 = vpop.f32.mrf.mxu0 }
 0x1a2   :  { %v2263_v55 = vmax.f32 %v2231_v5, 0.0  ;;  %v2193_v0 = vadd.f32 %v3194_v63, %v1680_v16  ;;  %v3085_v54 = vadd.f32 %v3084_v1, %v3083_v2  ;;  %v3196_v29 = vpop.f32.mrf.mxu1 }
 0x1a3   :  { %v3086_v33 = vpop.f32.mrf.mxu0  ;;  %v3197_v24 = vadd.f32 %v3196_v29, %v3195_v27 }
 0x1a4   :  { %v2736_v46 = vpack.c.bf16 %v2263_v55, %v2262_v9  ;;  %v1681_v34 = vadd.f32 %v3085_v54, %v4272_v28  ;;  %v3198_v10 = vpop.f32.mrf.mxu1  ;;  %v2232_v57 = vadd.f32 %v4310_v59, %v2193_v0 }
 0x1a5   :  { %v3087_v11 = vpop.f32.mrf.mxu0 }
 0x1a6   :  { %2788 = vst [vmem:[%s4430_s7 + $0x30] sm:$0xff] %v2736_v46   ;;  %v2194_v14 = vadd.f32 %v3197_v24, %v1681_v34  ;;  %v3088_v17 = vadd.f32 %v3087_v11, %v3086_v33  ;;  %v3199_v7 = vpop.f32.mrf.mxu1  ;;  %v2264_v45 = vmax.f32 %v2232_v57, 0.0 }
 0x1a7   :  { %v3089_v38 = vpop.f32.mrf.mxu0  ;;  %v3200_v18 = vadd.f32 %v3199_v7, %v3198_v10 }
 0x1a8   :  { %v2233_v3 = vadd.f32 %v4310_v59, %v2194_v14  ;;  %v1682_v4 = vadd.f32 %v3088_v17, %v4274_v53  ;;  %v3201_v19 = vpop.f32.mrf.mxu1 }
 0x1a9   :  { %v3090_v28 = vpop.f32.mrf.mxu0 }
 0x1aa   :  { %v2265_v47 = vmax.f32 %v2233_v3, 0.0  ;;  %v2195_v31 = vadd.f32 %v3200_v18, %v1682_v4  ;;  %v3091_v21 = vadd.f32 %v3090_v28, %v3089_v38  ;;  %v3202_v30 = vpop.f32.mrf.mxu1 }
 0x1ab   :  { %v3092_v50 = vpop.f32.mrf.mxu0  ;;  %v3203_v56 = vadd.f32 %v3202_v30, %v3201_v19 }
 0x1ac   :  { %v2741_v26 = vpack.c.bf16 %v2265_v47, %v2264_v45  ;;  %v1683_v8 = vadd.f32 %v3091_v21, %v4276_v15  ;;  %v3204_v48 = vpop.f32.mrf.mxu1  ;;  %v2234_v53 = vadd.f32 %v4310_v59, %v2195_v31 }
 0x1ad   :  { %v3093_v13 = vpop.f32.mrf.mxu0 }
 0x1ae   :  { %2789 = vst [vmem:[%s4430_s7 + $0x38] sm:$0xff] %v2741_v26   ;;  %v2196_v40 = vadd.f32 %v3203_v56, %v1683_v8  ;;  %v3094_v52 = vadd.f32 %v3093_v13, %v3092_v50  ;;  %v3205_v39 = vpop.f32.mrf.mxu1  ;;  %v2266_v6 = vmax.f32 %v2234_v53, 0.0 }
 0x1af   :  { %v3095_v35 = vpop.f32.mrf.mxu0  ;;  %v3206_v62 = vadd.f32 %v3205_v39, %v3204_v48 }
 0x1b0   :  { %v2235_v43 = vadd.f32 %v4310_v59, %v2196_v40  ;;  %v1684_v41 = vadd.f32 %v3094_v52, %v4278_v22  ;;  %v3207_v36 = vpop.f32.mrf.mxu1 }
 0x1b1   :  { %v3096_v15 = vpop.f32.mrf.mxu0 }
 0x1b2   :  { %v2267_v2 = vmax.f32 %v2235_v43, 0.0  ;;  %v2197_v5 = vadd.f32 %v3206_v62, %v1684_v41  ;;  %v3097_v16 = vadd.f32 %v3096_v15, %v3095_v35  ;;  %v3208_v63 = vpop.f32.mrf.mxu1 }
 0x1b3   :  { %v3098_v27 = vpop.f32.mrf.mxu0  ;;  %v3209_v55 = vadd.f32 %v3208_v63, %v3207_v36 }
 0x1b4   :  { %v2746_v1 = vpack.c.bf16 %v2267_v2, %v2266_v6  ;;  %v1685_v9 = vadd.f32 %v3097_v16, %v4280_v23  ;;  %v3210_v0 = vpop.f32.mrf.mxu1  ;;  %v2236_v22 = vadd.f32 %v4310_v59, %v2197_v5 }
 0x1b5   :  { %v3099_v54 = vpop.f32.mrf.mxu0 }
 0x1b6   :  { %2790 = vst [vmem:[%s4430_s7 + $0x40] sm:$0xff] %v2746_v1   ;;  %v2198_v29 = vadd.f32 %v3209_v55, %v1685_v9  ;;  %v3100_v33 = vadd.f32 %v3099_v54, %v3098_v27  ;;  %v3211_v46 = vpop.f32.mrf.mxu1  ;;  %v2268_v14 = vmax.f32 %v2236_v22, 0.0 }
 0x1b7   :  { %v3101_v34 = vpop.f32.mrf.mxu0  ;;  %v3212_v11 = vadd.f32 %v3211_v46, %v3210_v0 }
 0x1b8   :  { %v2237_v24 = vadd.f32 %v4310_v59, %v2198_v29  ;;  %v1686_v10 = vadd.f32 %v3100_v33, %v4282_v12  ;;  %v3213_v57 = vpop.f32.mrf.mxu1 }
 0x1b9   :  { %v3102_v23 = vpop.f32.mrf.mxu0 }
 0x1ba   :  { %v2269_v17 = vmax.f32 %v2237_v24, 0.0  ;;  %v2199_v7 = vadd.f32 %v3212_v11, %v1686_v10  ;;  %v3103_v38 = vadd.f32 %v3102_v23, %v3101_v34  ;;  %v3214_v3 = vpop.f32.mrf.mxu1 }
 0x1bb   :  { %v3104_v4 = vpop.f32.mrf.mxu0  ;;  %v3215_v28 = vadd.f32 %v3214_v3, %v3213_v57 }
 0x1bc   :  { %v2751_v18 = vpack.c.bf16 %v2269_v17, %v2268_v14  ;;  %v1687_v19 = vadd.f32 %v3103_v38, %v4284_v51  ;;  %v3216_v45 = vpop.f32.mrf.mxu1  ;;  %v2238_v12 = vadd.f32 %v4310_v59, %v2199_v7 }
 0x1bd   :  { %v3105_v47 = vpop.f32.mrf.mxu0 }
 0x1be   :  { %2791 = vst [vmem:[%s4430_s7 + $0x48] sm:$0xff] %v2751_v18   ;;  %v2200_v31 = vadd.f32 %v3215_v28, %v1687_v19  ;;  %v3106_v21 = vadd.f32 %v3105_v47, %v3104_v4  ;;  %v3217_v30 = vpop.f32.mrf.mxu1  ;;  %v2270_v13 = vmax.f32 %v2238_v12, 0.0 }
 0x1bf   :  { %v3107_v50 = vpop.f32.mrf.mxu0  ;;  %v3218_v56 = vadd.f32 %v3217_v30, %v3216_v45 }
 0x1c0   :  { %v2239_v26 = vadd.f32 %v4310_v59, %v2200_v31  ;;  %v1688_v8 = vadd.f32 %v3106_v21, %v4286_v25  ;;  %v3219_v48 = vpop.f32.mrf.mxu1 }
 0x1c1   :  { %v3108_v51 = vpop.f32.mrf.mxu0 }
 0x1c2   :  { %v2271_v53 = vmax.f32 %v2239_v26, 0.0  ;;  %v2201_v40 = vadd.f32 %v3218_v56, %v1688_v8  ;;  %v3109_v52 = vadd.f32 %v3108_v51, %v3107_v50  ;;  %v3220_v39 = vpop.f32.mrf.mxu1 }
 0x1c3   :  { %v3110_v35 = vpop.f32.mrf.mxu0  ;;  %v3221_v62 = vadd.f32 %v3220_v39, %v3219_v48 }
 0x1c4   :  { %v2756_v43 = vpack.c.bf16 %v2271_v53, %v2270_v13  ;;  %v1689_v41 = vadd.f32 %v3109_v52, %v4288_v32  ;;  %v3222_v36 = vpop.f32.mrf.mxu1  ;;  %v2240_v25 = vadd.f32 %v4310_v59, %v2201_v40 }
 0x1c5   :  { %v3111_v15 = vpop.f32.mrf.mxu0 }
 0x1c6   :  { %2792 = vst [vmem:[%s4430_s7 + $0x50] sm:$0xff] %v2756_v43   ;;  %v2202_v6 = vadd.f32 %v3221_v62, %v1689_v41  ;;  %v3112_v2 = vadd.f32 %v3111_v15, %v3110_v35  ;;  %v3223_v5 = vpop.f32.mrf.mxu1  ;;  %v2272_v55 = vmax.f32 %v2240_v25, 0.0 }
 0x1c7   :  { %v3113_v16 = vpop.f32.mrf.mxu0  ;;  %v3224_v1 = vadd.f32 %v3223_v5, %v3222_v36 }
 0x1c8   :  { %v2241_v63 = vadd.f32 %v4310_v59, %v2202_v6  ;;  %v1690_v27 = vadd.f32 %v3112_v2, %v4290_v44  ;;  %v3225_v9 = vpop.f32.mrf.mxu1 }
 0x1c9   :  { %v3114_v32 = vpop.f32.mrf.mxu0 }
 0x1ca   :  { %v2273_v0 = vmax.f32 %v2241_v63, 0.0  ;;  %v2203_v54 = vadd.f32 %v3224_v1, %v1690_v27  ;;  %v3115_v22 = vadd.f32 %v3114_v32, %v3113_v16  ;;  %v3226_v29 = vpop.f32.mrf.mxu1 }
 0x1cb   :  { %v3116_v33 = vpop.f32.mrf.mxu0  ;;  %v3227_v24 = vadd.f32 %v3226_v29, %v3225_v9 }
 0x1cc   :  { %v2761_v46 = vpack.c.bf16 %v2273_v0, %v2272_v55  ;;  %v1691_v34 = vadd.f32 %v3115_v22, %v4292_v20  ;;  %v3228_v10 = vpop.f32.mrf.mxu1  ;;  %v2242_v44 = vadd.f32 %v4310_v59, %v2203_v54 }
 0x1cd   :  { %v3117_v11 = vpop.f32.mrf.mxu0 }
 0x1ce   :  { %2793 = vst [vmem:[%s4430_s7 + $0x58] sm:$0xff] %v2761_v46   ;;  %v2204_v57 = vadd.f32 %v3227_v24, %v1691_v34  ;;  %v3118_v23 = vadd.f32 %v3117_v11, %v3116_v33  ;;  %v3229_v14 = vpop.f32.mrf.mxu1  ;;  %v2274_v18 = vmax.f32 %v2242_v44, 0.0 }
 0x1cf   :  { %v3119_v17 = vpop.f32.mrf.mxu0  ;;  %v3230_v3 = vadd.f32 %v3229_v14, %v3228_v10 }
 0x1d0   :  { %v2243_v7 = vadd.f32 %v4310_v59, %v2204_v57  ;;  %v1692_v38 = vadd.f32 %v3118_v23, %v4294_v42  ;;  %v3231_v4 = vpop.f32.mrf.mxu1 }
 0x1d1   :  { %v3120_v20 = vpop.f32.mrf.mxu0 }
 0x1d2   :  { %v2275_v19 = vmax.f32 %v2243_v7, 0.0  ;;  %v2205_v28 = vadd.f32 %v3230_v3, %v1692_v38  ;;  %v3121_v45 = vadd.f32 %v3120_v20, %v3119_v17  ;;  %v3232_v47 = vpop.f32.mrf.mxu1 }
 0x1d3   :  { %v3122_v12 = vpop.f32.mrf.mxu0  ;;  %v3233_v30 = vadd.f32 %v3232_v47, %v3231_v4 }
 0x1d4   :  { %v2766_v31 = vpack.c.bf16 %v2275_v19, %v2274_v18  ;;  %v1693_v21 = vadd.f32 %v3121_v45, %v4296_v37  ;;  %v3234_v50 = vpop.f32.mrf.mxu1  ;;  %v2244_v42 = vadd.f32 %v4310_v59, %v2205_v28 }
 0x1d5   :  { %v3123_v26 = vpop.f32.mrf.mxu0 }
 0x1d6   :  { %2794 = vst [vmem:[%s4430_s7 + $0x60] sm:$0xff] %v2766_v31   ;;  %v2206_v8 = vadd.f32 %v3233_v30, %v1693_v21  ;;  %v3124_v56 = vadd.f32 %v3123_v26, %v3122_v12  ;;  %v3235_v48 = vpop.f32.mrf.mxu1  ;;  %v2276_v39 = vmax.f32 %v2244_v42, 0.0 }
 0x1d7   :  { %v3125_v51 = vpop.f32.mrf.mxu0  ;;  %v3236_v40 = vadd.f32 %v3235_v48, %v3234_v50 }
 0x1d8   :  { %v2245_v13 = vadd.f32 %v4310_v59, %v2206_v8  ;;  %v1694_v53 = vadd.f32 %v3124_v56, %v4298_v60  ;;  %v3237_v52 = vpop.f32.mrf.mxu1 }
 0x1d9   :  { %v3126_v37 = vpop.f32.mrf.mxu0 }
 0x1da   :  { %v2277_v35 = vmax.f32 %v2245_v13, 0.0  ;;  %v2207_v43 = vadd.f32 %v3236_v40, %v1694_v53  ;;  %v3127_v41 = vadd.f32 %v3126_v37, %v3125_v51  ;;  %v3238_v62 = vpop.f32.mrf.mxu1 }
 0x1db   :  { %v3128_v36 = vpop.f32.mrf.mxu0  ;;  %v3239_v6 = vadd.f32 %v3238_v62, %v3237_v52 }
 0x1dc   :  { %v2771_v15 = vpack.c.bf16 %v2277_v35, %v2276_v39  ;;  %v1695_v25 = vadd.f32 %v3127_v41, %v4300_v61  ;;  %v3240_v2 = vpop.f32.mrf.mxu1  ;;  %v2246_v60 = vadd.f32 %v4310_v59, %v2207_v43 }
 0x1dd   :  { %v3129_v5 = vpop.f32.mrf.mxu0 }
 0x1de   :  { %2795 = vst [vmem:[%s4430_s7 + $0x68] sm:$0xff] %v2771_v15   ;;  %v2208_v16 = vadd.f32 %v3239_v6, %v1695_v25  ;;  %v3130_v63 = vadd.f32 %v3129_v5, %v3128_v36  ;;  %v3241_v27 = vpop.f32.mrf.mxu1  ;;  %v2278_v54 = vmax.f32 %v2246_v60, 0.0 }
 0x1df   :  { %v3131_v1 = vpop.f32.mrf.mxu0  ;;  %v3242_v55 = vadd.f32 %v3241_v27, %v3240_v2 }
 0x1e0   :  { %v2247_v9 = vadd.f32 %v4310_v59, %v2208_v16  ;;  %v1696_v32 = vadd.f32 %v3130_v63, %v4302_v49  ;;  %v3243_v0 = vpop.f32.mrf.mxu1 }
 0x1e1   :  { %v3132_v61 = vpop.f32.mrf.mxu0 }
 0x1e2   :  { %v2279_v22 = vmax.f32 %v2247_v9, 0.0  ;;  %v2209_v29 = vadd.f32 %v3242_v55, %v1696_v32  ;;  %v3133_v33 = vadd.f32 %v3132_v61, %v3131_v1  ;;  %v3244_v46 = vpop.f32.mrf.mxu1 }
 0x1e3   :  { %v3245_v10 = vadd.f32 %v3244_v46, %v3243_v0 }
 0x1e4   :  { %v2776_v34 = vpack.c.bf16 %v2279_v22, %v2278_v54  ;;  %v1697_v24 = vadd.f32 %v3133_v33, %v4304_v58  ;;  %v2248_v11 = vadd.f32 %v4310_v59, %v2209_v29 }
 0x1e6   :  { %2796 = vst [vmem:[%s4430_s7 + $0x70] sm:$0xff] %v2776_v34   ;;  %v2210_v44 = vadd.f32 %v3245_v10, %v1697_v24  ;;  %v2280_v57 = vmax.f32 %v2248_v11, 0.0 }
 0x1e8   :  { %v2249_v49 = vadd.f32 %v4310_v59, %v2210_v44 }
 0x1ea   :  { %v2281_v23 = vmax.f32 %v2249_v49, 0.0 }
 0x1ec   :  { %v2781_v14 = vpack.c.bf16 %v2281_v23, %v2280_v57 }
 0x1ee   :  { %2797 = vst [vmem:[%s4430_s7 + $0x78] sm:$0xff] %v2781_v14  }

// kernel: finetune_forward.11
= control target key start
LH: loop header
LB: loop body
LE: loop exit
PB: predicated region body
PF: predicated region fallthrough
CT: control target
= control target key end

     0   :  { %s3610_s15 = smov 0   ;;  %s3612_s16 = smov 0   ;;  %s4495_s0 = inlined_call_operand.vmem [shape: bf16[16,16,128], index: 0, kind: input, shape index: {}]   ;;  %s4496_s1 = inlined_call_operand.vmem [shape: bf16[2,128,512], index: 1, kind: input, shape index: {}]   ;;  %s4497_s2 = inlined_call_operand.vmem [shape: bf16[2,128,512], index: 2, kind: input, shape index: {}]   ;;  %s4498_s3 = inlined_call_operand.vmem [shape: f32[2,1,512], index: 3, kind: input, shape index: {}]   ;;  %s4499_s4 = inlined_call_operand.vmem [shape: bf16[16,16,256], index: 4, kind: output, shape index: {}]  }
   0x1   :  { %s3614_s17 = smov 0   ;;  %s3616_s18 = smov 0  }
   0x2   :  { %s3618_s19 = smov 0   ;;  %s3620_s20 = smov 0  }
   0x3   :  { %s3622_s21 = smov 0  }
   0x4 LB: > { %s23_s22 = sadd.s32 1, %s3573_s19  ;;  %s26_s23 = sadd.s32 1, %s3577_s20  ;;  %s3581_s21 = sphi %s3622_s21, %s14_s21   ;;  %s3577_s20 = sphi %s3620_s20, %s4512_s20   ;;  %s3573_s19 = sphi %s3618_s19, %s4511_s19   ;;  %s3569_s18 = sphi %s3616_s18, %s4510_s18   ;;  %s3565_s17 = sphi %s3614_s17, %s4509_s17   ;;  %s3561_s16 = sphi %s3612_s16, %s4508_s16   ;;  %s3557_s15 = sphi %s3610_s15, %s4507_s15  }
   0x5   : > { %p24_p0 = scmp.ge.s32.totalorder %s23_s22, 2  ;;  %s2764_s24 = sadd.s32 4294967295, %s3581_s21  }
   0x6   : > { %s2768_s25 = sshll.u32 %s3573_s19, 1  ;;  %p165_p2 = scmp.ne.s32.totalorder %s3561_s16, %s3557_s15 }
   0x7   : > { %s4514_s22 = smov (%p24_p0, %s23_s22), 0  ;;  %s4516_s23 = smov (!%p24_p0, %s26_s23), %s3577_s20 }
   0x8   : > { %4502 = sst [smem:[#allocation6_spill]] %s4514_s22  ;;  %s143_s26 = ssub.s32 1, %s2768_s25 }
   0x9   : > { %s2769_s27 = sshll.u32 %s4514_s22, 1  ;;  %p28_p1 = scmp.ge.s32.totalorder %s4516_s23, 2 }
   0xa   : > { %s144_s28 = smul.u32 %s3577_s20, %s143_s26  ;;  %s147_s29 = ssub.s32 1, %s2769_s27 }
   0xb   : > { %s4518_s23 = smov (%p28_p1, %s4516_s23), 0  ;;  %p166_p3 = scmp.eq.s32.totalorder %s2764_s24, 3 }
   0xc   : > { %4503 = sst [smem:[#allocation7_spill]] %s4518_s23  ;;  %s145_s30 = sadd.s32 %s3573_s19, %s144_s28 }
   0xd   : > { %s148_s5 = smul.u32 %s147_s29, %s4518_s23  ;;  %s151_s6 = ssub.s32 %s3577_s20, %s4518_s23 }
   0xe   : > { %p3662_p4 = por %p166_p3, %p165_p2  ;;  %p2772_p5 = scmp.ge.s32.totalorder %s3581_s21, 1 }
   0xf   : > { %s149_s8 = sadd.s32 %s148_s5, %s4514_s22  ;;  %p231_p6 = scmp.lt.s32.totalorder %s3581_s21, 5 }
  0x10   : > { %s150_s9 = ssub.s32 %s145_s30, %s149_s8  ;;  %s155_s10 = sadd.s32 1, %s3561_s16 }
  0x11   : > { %s152_s11 = sor.u32 %s151_s6, %s150_s9  ;;  %p232_p7 = pnand %p2772_p5, %p231_p6 }
  0x12   : > { %p153_p8 = scmp.eq.s32.totalorder %s152_s11, 0  ;;  %s272_s13 = sand.u32 (!%p232_p7), 1, %s3557_s15  }
  0x13   : > { %235 = sbr.rel (%p232_p7) target bundleno = 2198 (0x896), region = 36  ;;  %s2774_s14 = sshll.u32 (!%p232_p7), %s3565_s17, 1 }
  0x14   : > { %s3671_s12 = scalar_select %p153_p8, %s3561_s16, %s155_s10  }
  0x15   : > { %s2773_s24 = sshll.u32 (!%p232_p7), %s272_s13, 6  ;;  %s276_s25 = ssub.s32 (!%p232_p7), 1, %s2774_s14 }
  0x16   : > { %s277_s26 = smul.u32 (!%p232_p7), %s3569_s18, %s276_s25  ;;  %p290_p9 = scmp.lt.s32.totalorder (!%p232_p7), %s3569_s18, 1 }
  0x17   : > { %p2783_p11 = scmp.ne.s32.totalorder (!%p232_p7), %s3565_s17, 0 }
  0x18   : > { %s3678_s27 = sadd.s32 %s3565_s17, %s277_s26 }
  0x19   : > { %s2775_s28 = sshll.u32 %s3678_s27, 3 }
  0x1a   : > { %p280_p10 = scmp.lt.s32.totalorder %s2775_s28, 15 }
  0x1b   : > { %s291_s29 = scalar_select %p290_p9, %s3569_s18, 1 }
  0x1c   : > { %s4520_s28 = smov (!%p280_p10, %s2775_s28), 15  ;;  %313 = sbr.rel (%p2783_p11) target bundleno = 36 (0x24), region = 40 }
  0x1d   : > { %s3008_s30 = sshll.u32 %s291_s29, 8  ;;  %s2782_s5 = sshll.u32 %s291_s29, 2 }
  0x1e   : > { %s3007_s6 = sshll.u32 %s4520_s28, 3  ;;  %s3685_s10 = scalar_lea.vmem %s4496_s1, %s3008_s30 }
  0x1f   : > { %s3690_s13 = scalar_lea.vmem %s4495_s0, %s3007_s6  ;;  %s3695_s26 = scalar_lea.vmem %s4497_s2, %s3008_s30 }
  0x20   : > { %s3700_s29 = scalar_lea.vmem %s4498_s3, %s2782_s5  ;;  %s3702_s28 = scalar_lea.vmem [#allocation5], %s2773_s24 }
  0x21   : > { %v3583_v0 = vmov 0.0  }
  0x22   : > { %314 = vst [vmem:[#allocation2] sm:$0xff] %v3583_v0  ;;  %315 = vst [vmem:[#allocation2 + $0x8] sm:$0xff] %v3583_v0 }
  0x23   : > { %316 = vst [vmem:[#allocation3 + $0x8] sm:$0xff] %v3583_v0  ;;  %317 = vst [vmem:[#allocation3] sm:$0xff] %v3583_v0 }
  0x24 PF: > { %v3135_v1 = vld [vmem:[%s3685_s10 + $0xe4] ss:$16 sps:$4 sm:$0xff]   ;;  %v3137_v2 = vld [vmem:[%s3685_s10 + $0xec] ss:$16 sps:$4 sm:$0xff]   ;;  %v3584_v3 = vmov 0   ;;  %s3010_s17 = smul.u32 448, %s3569_s18 }
  0x25   : > { %606 = vmatprep.mubr.bf16.mxu0 %v3584_v3  ;;  %719 = vmatprep.mubr.bf16.mxu1 %v3584_v3  ;;  %v3139_v4 = vld [vmem:[%s3685_s10 + $0xe0] ss:$16 sps:$4 sm:$0xff]   ;;  %v3140_v5 = vld [vmem:[%s3685_s10 + $0xe8] ss:$16 sps:$4 sm:$0xff]   ;;  %v3141_v6 = vld [vmem:[%s3685_s10 + $0xc4] ss:$16 sps:$4 sm:$0xff]  }
  0x26   : > { %574 = vmatprep.subr.bf16.mxu0 %v3135_v1  ;;  %687 = vmatprep.subr.bf16.mxu1 %v3137_v2  ;;  %v3143_v7 = vld [vmem:[%s3685_s10 + $0xcc] ss:$16 sps:$4 sm:$0xff]   ;;  %v3145_v8 = vld [vmem:[%s3685_s10 + $0xc0] ss:$16 sps:$4 sm:$0xff]   ;;  %v3146_v9 = vld [vmem:[%s3685_s10 + $0xc8] ss:$16 sps:$4 sm:$0xff]  }
  0x27   : > { %575 = vmatpush1.bf16.msra.mxu0 %v3139_v4  ;;  %688 = vmatpush1.bf16.msra.mxu1 %v3140_v5  ;;  %v3147_v10 = vld [vmem:[%s3685_s10 + $0xa4] ss:$16 sps:$4 sm:$0xff]   ;;  %v3149_v11 = vld [vmem:[%s3685_s10 + $0xac] ss:$16 sps:$4 sm:$0xff]   ;;  %v3151_v12 = vld [vmem:[%s3685_s10 + $0xa0] ss:$16 sps:$4 sm:$0xff]  }
  0x28   : > { %576 = vmatprep.subr.bf16.mxu0 %v3141_v6  ;;  %689 = vmatprep.subr.bf16.mxu1 %v3143_v7  ;;  %v3152_v13 = vld [vmem:[%s3685_s10 + $0xa8] ss:$16 sps:$4 sm:$0xff]   ;;  %v3153_v14 = vld [vmem:[%s3685_s10 + $0x84] ss:$16 sps:$4 sm:$0xff]   ;;  %v3155_v15 = vld [vmem:[%s3685_s10 + $0x8c] ss:$16 sps:$4 sm:$0xff]  }
  0x29   : > { %v3157_v16 = vld [vmem:[%s3685_s10 + $0x80] ss:$16 sps:$4 sm:$0xff]   ;;  %v3158_v17 = vld [vmem:[%s3685_s10 + $0x88] ss:$16 sps:$4 sm:$0xff]   ;;  %v3159_v18 = vld [vmem:[%s3685_s10 + $0x64] ss:$16 sps:$4 sm:$0xff]  }
  0x2a   : > { %v3161_v19 = vld [vmem:[%s3685_s10 + $0x6c] ss:$16 sps:$4 sm:$0xff]   ;;  %v3163_v20 = vld [vmem:[%s3685_s10 + $0x60] ss:$16 sps:$4 sm:$0xff]   ;;  %v3164_v21 = vld [vmem:[%s3685_s10 + $0x68] ss:$16 sps:$4 sm:$0xff]  }
  0x2b   : > { %577 = vmatpush1.bf16.msra.mxu0 %v3145_v8  ;;  %690 = vmatpush1.bf16.msra.mxu1 %v3146_v9  ;;  %v3165_v22 = vld [vmem:[%s3685_s10 + $0x44] ss:$16 sps:$4 sm:$0xff]   ;;  %v3167_v23 = vld [vmem:[%s3685_s10 + $0x4c] ss:$16 sps:$4 sm:$0xff]   ;;  %v3169_v24 = vld [vmem:[%s3685_s10 + $0x40] ss:$16 sps:$4 sm:$0xff]  }
  0x2c   : > { %578 = vmatprep.subr.bf16.mxu0 %v3147_v10  ;;  %691 = vmatprep.subr.bf16.mxu1 %v3149_v11  ;;  %v3170_v25 = vld [vmem:[%s3685_s10 + $0x48] ss:$16 sps:$4 sm:$0xff]   ;;  %v3171_v26 = vld [vmem:[%s3685_s10 + $0x24] ss:$16 sps:$4 sm:$0xff]   ;;  %v3173_v27 = vld [vmem:[%s3685_s10 + $0x2c] ss:$16 sps:$4 sm:$0xff]  }
  0x2d   : > { %v3175_v28 = vld [vmem:[%s3685_s10 + $0x20] ss:$16 sps:$4 sm:$0xff]   ;;  %v3176_v29 = vld [vmem:[%s3685_s10 + $0x28] ss:$16 sps:$4 sm:$0xff]   ;;  %v3177_v30 = vld [vmem:[%s3685_s10 + $0x4] ss:$16 sps:$4 sm:$0xff]  }
  0x2e   : > { %v3179_v31 = vld [vmem:[%s3685_s10 + $0xc] ss:$16 sps:$4 sm:$0xff]   ;;  %v3181_v32 = vld [vmem:[%s3685_s10] ss:$16 sps:$4 sm:$0xff]   ;;  %v3182_v33 = vld [vmem:[%s3685_s10 + $0x8] ss:$16 sps:$4 sm:$0xff]  }
  0x2f   : > { %579 = vmatpush1.bf16.msra.mxu0 %v3151_v12  ;;  %692 = vmatpush1.bf16.msra.mxu1 %v3152_v13  ;;  %v3740_v34 = vld [vmem:[%s3695_s26 + $0xe4] ss:$16 sps:$4 sm:$0xff]   ;;  %v3743_v35 = vld [vmem:[%s3695_s26 + $0xec] ss:$16 sps:$4 sm:$0xff]   ;;  %v3747_v37 = vld [vmem:[%s3695_s26 + $0xe0] ss:$16 sps:$4 sm:$0xff]  }
  0x30   : > { %580 = vmatprep.subr.bf16.mxu0 %v3153_v14  ;;  %693 = vmatprep.subr.bf16.mxu1 %v3155_v15  ;;  %v3183_v36 = vld [vmem:[%s3690_s13] sm:$0xff]   ;;  %v3755_v39 = vld [vmem:[%s3695_s26 + $0xe8] ss:$16 sps:$4 sm:$0xff]   ;;  %v3758_v40 = vld [vmem:[%s3695_s26 + $0xcc] ss:$16 sps:$4 sm:$0xff]   ;;  %v802_v14 = vlaneseq  ;;  %s989_s22 = scalar_lea.vmem [#allocation4], %s3010_s17 }
  0x31   : > { %v3751_v38 = vld [vmem:[%s3695_s26 + $0xc4] ss:$16 sps:$4 sm:$0xff]   ;;  %v3763_v41 = vld [vmem:[%s3695_s26 + $0xc0] ss:$16 sps:$4 sm:$0xff]   ;;  %v3772_v43 = vld [vmem:[%s3695_s26 + $0xc8] ss:$16 sps:$4 sm:$0xff]  }
  0x32   : > { %v3768_v42 = vld [vmem:[%s3695_s26 + $0xa4] ss:$16 sps:$4 sm:$0xff]   ;;  %v3187_v44 = vld [vmem:[%s3690_s13 + $0x8] sm:$0xff]   ;;  %v3778_v45 = vld [vmem:[%s3695_s26 + $0xa0] ss:$16 sps:$4 sm:$0xff]   ;;  %v803_v15 = vshrl.u32 %v802_v14, 7 }
  0x33   : > { %581 = vmatpush1.bf16.msra.mxu0 %v3157_v16  ;;  %694 = vmatpush1.bf16.msra.mxu1 %v3158_v17  ;;  %v3782_v46 = vld [vmem:[%s3695_s26 + $0xac] ss:$16 sps:$4 sm:$0xff]   ;;  %v3785_v47 = vld [vmem:[%s3695_s26 + $0x84] ss:$16 sps:$4 sm:$0xff]   ;;  %v3789_v48 = vld [vmem:[%s3695_s26 + $0xa8] ss:$16 sps:$4 sm:$0xff]  }
  0x34   : > { %582 = vmatprep.subr.bf16.mxu0 %v3159_v18  ;;  %695 = vmatprep.subr.bf16.mxu1 %v3161_v19  ;;  %v3792_v49 = vld [vmem:[%s3695_s26 + $0x8c] ss:$16 sps:$4 sm:$0xff]   ;;  %v3798_v50 = vld [vmem:[%s3695_s26 + $0x80] ss:$16 sps:$4 sm:$0xff]   ;;  %v3801_v51 = vld [vmem:[%s3695_s26 + $0x64] ss:$16 sps:$4 sm:$0xff]  }
  0x35   : > { %v3807_v52 = vld [vmem:[%s3695_s26 + $0x88] ss:$16 sps:$4 sm:$0xff]   ;;  %v3191_v53 = vld [vmem:[%s3690_s13 + $0x10] sm:$0xff]   ;;  %v3816_v55 = vld [vmem:[%s3695_s26 + $0x6c] ss:$16 sps:$4 sm:$0xff]   ;;  %v804_v16 = vsub.s32 0, %v803_v15 }
  0x36   : > { %v3812_v54 = vld [vmem:[%s3695_s26 + $0x60] ss:$16 sps:$4 sm:$0xff]   ;;  %v3820_v56 = vld [vmem:[%s3695_s26 + $0x44] ss:$16 sps:$4 sm:$0xff]   ;;  %v3824_v57 = vld [vmem:[%s3695_s26 + $0x68] ss:$16 sps:$4 sm:$0xff]  }
  0x37   : > { %583 = vmatpush1.bf16.msra.mxu0 %v3163_v20  ;;  %696 = vmatpush1.bf16.msra.mxu1 %v3164_v21  ;;  %v3827_v58 = vld [vmem:[%s3695_s26 + $0x4c] ss:$16 sps:$4 sm:$0xff]   ;;  %v3833_v59 = vld [vmem:[%s3695_s26 + $0x40] ss:$16 sps:$4 sm:$0xff]   ;;  %v3838_v60 = vld [vmem:[%s3695_s26 + $0x24] ss:$16 sps:$4 sm:$0xff]  }
  0x38   : > { %584 = vmatprep.subr.bf16.mxu0 %v3165_v22  ;;  %697 = vmatprep.subr.bf16.mxu1 %v3167_v23  ;;  %v3842_v61 = vld [vmem:[%s3695_s26 + $0x48] ss:$16 sps:$4 sm:$0xff]   ;;  %v3848_v63 = vld [vmem:[%s3695_s26 + $0x20] ss:$16 sps:$4 sm:$0xff]   ;;  %v3851_v0 = vld [vmem:[%s3695_s26 + $0x2c] ss:$16 sps:$4 sm:$0xff]  }
  0x39   : > { %v3198_v62 = vld [vmem:[%s3690_s13 + $0x18] sm:$0xff]   ;;  %v3856_v1 = vld [vmem:[%s3695_s26 + $0x4] ss:$16 sps:$4 sm:$0xff]   ;;  %v3868_v5 = vld [vmem:[%s3695_s26] ss:$16 sps:$4 sm:$0xff]   ;;  %v812_v17 = vsub.s32 2, %v803_v15 }
  0x3a   : > { %v3859_v2 = vld [vmem:[%s3695_s26 + $0x28] ss:$16 sps:$4 sm:$0xff]   ;;  %v3862_v4 = vld [vmem:[%s3695_s26 + $0xc] ss:$16 sps:$4 sm:$0xff]   ;;  %v3205_v7 = vld [vmem:[%s3690_s13 + $0x20] sm:$0xff]   ;;  %v808_v19 = vsub.s32 1, %v803_v15 }
  0x3b   : > { %585 = vmatpush1.bf16.msra.mxu0 %v3169_v24  ;;  %698 = vmatpush1.bf16.msra.mxu1 %v3170_v25  ;;  %v3874_v6 = vld [vmem:[%s3695_s26 + $0x8] ss:$16 sps:$4 sm:$0xff]   ;;  %v3219_v9 = vld [vmem:[%s3690_s13 + $0x30] sm:$0xff]   ;;  %v982_v11 = vld [vmem:[#allocation2] sm:$0xff]  ;;  %v816_v20 = vsub.s32 3, %v803_v15  ;;  %s3013_s23 = smul.u32 56, %s3569_s18 }
  0x3c   : > { %586 = vmatprep.subr.bf16.mxu0 %v3171_v26  ;;  %699 = vmatprep.subr.bf16.mxu1 %v3173_v27  ;;  %v3212_v8 = vld [vmem:[%s3690_s13 + $0x28] sm:$0xff]   ;;  %v3229_v10 = vld [vmem:[%s3690_s13 + $0x38] sm:$0xff]   ;;  %v800_v18 = vld [vmem:[%s3700_s29] sm:$0xf]  ;;  %s2868_s30 = smul.u32 320, %s3569_s18  ;;  %s2908_s13 = sshll.u32 %s3569_s18, 6 }
  0x3d   : > { %v983_v12 = vld [vmem:[#allocation2 + $0x8] sm:$0xff]  ;;  %v3928_v21 = vrot.slane %v800_v18, %v804_v16  ;;  %v3930_v22 = vrot.slane %v800_v18, %v812_v17  ;;  %v3932_v23 = vrot.slane %v800_v18, %v808_v19  ;;  %v3934_v24 = vrot.slane %v800_v18, %v816_v20  ;;  %s1311_s24 = scalar_lea.vmem %s3702_s28, %s3013_s23 [#allocation5]  ;;  %s2885_s6 = smul.u32 40, %s3569_s18 }
  0x3e   : > { %v998_v13 = vpack.c.bf16 %v983_v12, %v982_v11  ;;  %s4044_s5 = scalar_lea.vmem [#allocation4], %s2868_s30  ;;  %s2888_s9 = smul.u32 192, %s3569_s18 }
  0x3f   : > { %587 = vmatpush1.bf16.msra.mxu0 %v3175_v28  ;;  %700 = vmatpush1.bf16.msra.mxu1 %v3176_v29  ;;  %s2657_s8 = scalar_lea.vmem %s3702_s28, %s2885_s6 [#allocation5]  ;;  %s2905_s15 = smul.u32 24, %s3569_s18 }
  0x40   : > { %588 = vmatprep.subr.bf16.mxu0 %v3177_v30  ;;  %701 = vmatprep.subr.bf16.mxu1 %v3179_v31  ;;  %s4183_s10 = scalar_lea.vmem [#allocation4], %s2888_s9  ;;  %s4250_s14 = scalar_lea.vmem [#allocation4], %s2908_s13 }
  0x41   : > { %s2665_s11 = scalar_lea.vmem %s3702_s28, %s2905_s15 [#allocation5]  ;;  %s2925_s25 = sshll.u32 %s3569_s18, 3 }
  0x42   : > { %s1817_s29 = ssub.s32 4, %s3569_s18  ;;  %s2940_s30 = smul.u32 4294967104, %s3569_s18 }
  0x43   : > { %589 = vmatpush1.bf16.msra.mxu0 %v3181_v32  ;;  %702 = vmatpush1.bf16.msra.mxu1 %v3182_v33  ;;  %s3020_s17 = sshll.u32 %s1817_s29, 6  ;;  %s3023_s23 = sshll.u32 %s1817_s29, 3 }
  0x44   : > { %1159 = vmatprep.subr.bf16.mxu0 %v3740_v34  ;;  %1202 = vmatprep.subr.bf16.mxu1 %v3743_v35  ;;  %s2957_s6 = smul.u32 4294967272, %s3569_s18  ;;  %s3030_s29 = sshll.u32 (%p3662_p4), %s3678_s27, 5 }
  0x45   : > { %s2960_s9 = smul.u32 4294966976, %s3569_s18 }
  0x46   : > { %607 = vmatmul.mubr.bf16.vlgmr.msra.gmra.mxu0 %v3183_v36  ;;  %720 = vmatmul.mubr.bf16.vlgmr.msra.gmra.mxu1 %v3183_v36  ;;  %s2977_s15 = smul.u32 4294967256, %s3569_s18 }
  0x47   : > { %1160 = vmatpush1.bf16.msra.mxu0 %v3747_v37  ;;  %616 = vmatprep.mubr.bf16.mxu0 %v3584_v3  ;;  %s2980_s13 = smul.u32 4294966848, %s3569_s18 }
  0x48   : > { %729 = vmatprep.mubr.bf16.mxu1 %v3584_v3  ;;  %1161 = vmatprep.subr.bf16.mxu0 %v3751_v38 }
  0x49   : > { %1203 = vmatpush1.bf16.msra.mxu1 %v3755_v39 }
  0x4a   : > { %1204 = vmatprep.subr.bf16.mxu1 %v3758_v40 }
  0x4b   : > { %1162 = vmatpush1.bf16.msra.mxu0 %v3763_v41 }
  0x4c   : > { %1163 = vmatprep.subr.bf16.mxu0 %v3768_v42 }
  0x4d   : > { %1205 = vmatpush1.bf16.msra.mxu1 %v3772_v43 }
  0x4e   : > { %617 = vmatmul.mubr.bf16.gmra.mxu0 %v3187_v44  ;;  %730 = vmatmul.mubr.bf16.gmra.mxu1 %v3187_v44 }
  0x4f   : > { %626 = vmatprep.mubr.bf16.mxu0 %v3584_v3  ;;  %739 = vmatprep.mubr.bf16.mxu1 %v3584_v3 }
  0x50   : > { %1164 = vmatpush1.bf16.msra.mxu0 %v3778_v45  ;;  %1206 = vmatprep.subr.bf16.mxu1 %v3782_v46 }
  0x51   : > { %1165 = vmatprep.subr.bf16.mxu0 %v3785_v47  ;;  %1207 = vmatpush1.bf16.msra.mxu1 %v3789_v48 }
  0x52   : > { %1208 = vmatprep.subr.bf16.mxu1 %v3792_v49 }
  0x54   : > { %1166 = vmatpush1.bf16.msra.mxu0 %v3798_v50 }
  0x55   : > { %1167 = vmatprep.subr.bf16.mxu0 %v3801_v51  ;;  %1209 = vmatpush1.bf16.msra.mxu1 %v3807_v52 }
  0x56   : > { %627 = vmatmul.mubr.bf16.gmra.mxu0 %v3191_v53  ;;  %740 = vmatmul.mubr.bf16.gmra.mxu1 %v3191_v53 }
  0x57   : > { %636 = vmatprep.mubr.bf16.mxu0 %v3584_v3  ;;  %749 = vmatprep.mubr.bf16.mxu1 %v3584_v3 }
  0x58   : > { %1168 = vmatpush1.bf16.msra.mxu0 %v3812_v54  ;;  %1210 = vmatprep.subr.bf16.mxu1 %v3816_v55 }
  0x59   : > { %1169 = vmatprep.subr.bf16.mxu0 %v3820_v56  ;;  %1211 = vmatpush1.bf16.msra.mxu1 %v3824_v57 }
  0x5a   : > { %1212 = vmatprep.subr.bf16.mxu1 %v3827_v58 }
  0x5c   : > { %1170 = vmatpush1.bf16.msra.mxu0 %v3833_v59 }
  0x5d   : > { %1171 = vmatprep.subr.bf16.mxu0 %v3838_v60  ;;  %1213 = vmatpush1.bf16.msra.mxu1 %v3842_v61 }
  0x5e   : > { %637 = vmatmul.mubr.bf16.gmra.mxu0 %v3198_v62  ;;  %750 = vmatmul.mubr.bf16.gmra.mxu1 %v3198_v62 }
  0x5f   : > { %646 = vmatprep.mubr.bf16.mxu0 %v3584_v3  ;;  %759 = vmatprep.mubr.bf16.mxu1 %v3584_v3 }
  0x60   : > { %1172 = vmatpush1.bf16.msra.mxu0 %v3848_v63  ;;  %1214 = vmatprep.subr.bf16.mxu1 %v3851_v0 }
  0x61   : > { %1173 = vmatprep.subr.bf16.mxu0 %v3856_v1  ;;  %1215 = vmatpush1.bf16.msra.mxu1 %v3859_v2 }
  0x62   : > { %1216 = vmatprep.subr.bf16.mxu1 %v3862_v4 }
  0x64   : > { %1174 = vmatpush1.bf16.msra.mxu0 %v3868_v5 }
  0x65   : > { %1217 = vmatpush1.bf16.msra.mxu1 %v3874_v6  ;;  %1327 = vmatprep.subr.bf16.mxu0 %v3740_v34 }
  0x66   : > { %647 = vmatmul.mubr.bf16.gmra.mxu0 %v3205_v7  ;;  %760 = vmatmul.mubr.bf16.gmra.mxu1 %v3205_v7 }
  0x67   : > { %656 = vmatprep.mubr.bf16.mxu0 %v3584_v3  ;;  %769 = vmatprep.mubr.bf16.mxu1 %v3584_v3 }
  0x68   : > { %1370 = vmatprep.subr.bf16.mxu1 %v3743_v35 }
  0x6e   : > { %657 = vmatmul.mubr.bf16.gmra.mxu0 %v3212_v8  ;;  %770 = vmatmul.mubr.bf16.gmra.mxu1 %v3212_v8 }
  0x6f   : > { %666 = vmatprep.mubr.bf16.mxu0 %v3584_v3  ;;  %779 = vmatprep.mubr.bf16.mxu1 %v3584_v3 }
  0x76   : > { %667 = vmatmul.mubr.bf16.gmra.mxu0 %v3219_v9  ;;  %780 = vmatmul.mubr.bf16.gmra.mxu1 %v3219_v9 }
  0x77   : > { %676 = vmatprep.mubr.bf16.mxu0 %v3584_v3  ;;  %789 = vmatprep.mubr.bf16.mxu1 %v3584_v3 }
  0x7e   : > { %677 = vmatmul.mubr.bf16.gmra.mxu0 %v3229_v10  ;;  %790 = vmatmul.mubr.bf16.gmra.mxu1 %v3229_v10 }
  0x7f   : > { %1191 = vmatprep.mubr.bf16.mxu0 %v3584_v3  ;;  %1234 = vmatprep.mubr.bf16.mxu1 %v3584_v3 }
  0x86   : > { %1192 = vmatmul.mubr.bf16.vlgmr.msra.gmra.mxu0 %v998_v13  ;;  %1235 = vmatmul.mubr.bf16.vlgmr.msra.gmra.mxu1 %v998_v13 }
  0x87   : > { %1328 = vmatpush1.bf16.msra.mxu0 %v3747_v37  ;;  %1371 = vmatpush1.bf16.msra.mxu1 %v3755_v39 }
  0x88   : > { %1329 = vmatprep.subr.bf16.mxu0 %v3751_v38  ;;  %1372 = vmatprep.subr.bf16.mxu1 %v3758_v40 }
  0x89   : > { %1359 = vmatprep.mubr.bf16.mxu0 %v3584_v3  ;;  %1402 = vmatprep.mubr.bf16.mxu1 %v3584_v3 }
  0x8b   : > { %1330 = vmatpush1.bf16.msra.mxu0 %v3763_v41  ;;  %1373 = vmatpush1.bf16.msra.mxu1 %v3772_v43 }
  0x8c   : > { %1331 = vmatprep.subr.bf16.mxu0 %v3768_v42  ;;  %1374 = vmatprep.subr.bf16.mxu1 %v3782_v46 }
  0x8f   : > { %1332 = vmatpush1.bf16.msra.mxu0 %v3778_v45  ;;  %1375 = vmatpush1.bf16.msra.mxu1 %v3789_v48 }
  0x90   : > { %1333 = vmatprep.subr.bf16.mxu0 %v3785_v47  ;;  %1376 = vmatprep.subr.bf16.mxu1 %v3792_v49 }
  0x93   : > { %1334 = vmatpush1.bf16.msra.mxu0 %v3798_v50  ;;  %1377 = vmatpush1.bf16.msra.mxu1 %v3807_v52 }
  0x94   : > { %1335 = vmatprep.subr.bf16.mxu0 %v3801_v51  ;;  %1378 = vmatprep.subr.bf16.mxu1 %v3816_v55 }
  0x97   : > { %1336 = vmatpush1.bf16.msra.mxu0 %v3812_v54  ;;  %1379 = vmatpush1.bf16.msra.mxu1 %v3824_v57 }
  0x98   : > { %1337 = vmatprep.subr.bf16.mxu0 %v3820_v56  ;;  %1380 = vmatprep.subr.bf16.mxu1 %v3827_v58 }
  0x9b   : > { %1338 = vmatpush1.bf16.msra.mxu0 %v3833_v59  ;;  %1381 = vmatpush1.bf16.msra.mxu1 %v3842_v61 }
  0x9c   : > { %1339 = vmatprep.subr.bf16.mxu0 %v3838_v60  ;;  %1382 = vmatprep.subr.bf16.mxu1 %v3851_v0 }
  0x9f   : > { %1340 = vmatpush1.bf16.msra.mxu0 %v3848_v63  ;;  %1383 = vmatpush1.bf16.msra.mxu1 %v3859_v2 }
  0xa0   : > { %1341 = vmatprep.subr.bf16.mxu0 %v3856_v1  ;;  %1384 = vmatprep.subr.bf16.mxu1 %v3862_v4 }
  0xa3   : > { %1342 = vmatpush1.bf16.msra.mxu0 %v3868_v5  ;;  %1385 = vmatpush1.bf16.msra.mxu1 %v3874_v6 }
  0xa4   : > { %1495 = vmatprep.subr.bf16.mxu0 %v3740_v34  ;;  %1538 = vmatprep.subr.bf16.mxu1 %v3743_v35 }
 0x106   : > { %v608_v25 = vpop.f32.mrf.mxu0  ;;  %v721_v26 = vpop.f32.mrf.mxu1 }
 0x107   : > { %v822_v27 = vadd.f32 %v3928_v21, %v608_v25  ;;  %v824_v28 = vadd.f32 %v3930_v22, %v721_v26 }
 0x108   : > { %v610_v29 = vpop.f32.mrf.mxu0  ;;  %v723_v30 = vpop.f32.mrf.mxu1 }
 0x109   : > { %886 = vst [vmem:[#allocation4] sm:$0xff] %v822_v27  ;;  %888 = vst [vmem:[#allocation4 + $0x10] sm:$0xff] %v824_v28  ;;  %v823_v31 = vadd.f32 %v3932_v23, %v610_v29  ;;  %v825_v32 = vadd.f32 %v3934_v24, %v723_v30 }
 0x10a   : > { %v612_v33 = vpop.f32.mrf.mxu0  ;;  %v725_v36 = vpop.f32.mrf.mxu1 }
 0x10b   : > { %887 = vst [vmem:[#allocation4 + $0x8] sm:$0xff] %v823_v31  ;;  %889 = vst [vmem:[#allocation4 + $0x18] sm:$0xff] %v825_v32  ;;  %v826_v44 = vadd.f32 %v3928_v21, %v612_v33  ;;  %v828_v53 = vadd.f32 %v3930_v22, %v725_v36 }
 0x10c   : > { %v614_v62 = vpop.f32.mrf.mxu0  ;;  %v727_v7 = vpop.f32.mrf.mxu1 }
 0x10d   : > { %890 = vst [vmem:[#allocation4 + $0x20] sm:$0xff] %v826_v44  ;;  %892 = vst [vmem:[#allocation4 + $0x30] sm:$0xff] %v828_v53  ;;  %v827_v8 = vadd.f32 %v3932_v23, %v614_v62  ;;  %v829_v9 = vadd.f32 %v3934_v24, %v727_v7 }
 0x10e   : > { %v618_v10 = vpop.f32.mrf.mxu0  ;;  %v731_v11 = vpop.f32.mrf.mxu1 }
 0x10f   : > { %891 = vst [vmem:[#allocation4 + $0x28] sm:$0xff] %v827_v8  ;;  %893 = vst [vmem:[#allocation4 + $0x38] sm:$0xff] %v829_v9  ;;  %v830_v12 = vadd.f32 %v3928_v21, %v618_v10  ;;  %v832_v13 = vadd.f32 %v3930_v22, %v731_v11 }
 0x110   : > { %v620_v14 = vpop.f32.mrf.mxu0  ;;  %v733_v15 = vpop.f32.mrf.mxu1 }
 0x111   : > { %894 = vst [vmem:[#allocation4 + $0x40] sm:$0xff] %v830_v12  ;;  %896 = vst [vmem:[#allocation4 + $0x50] sm:$0xff] %v832_v13  ;;  %v831_v16 = vadd.f32 %v3932_v23, %v620_v14  ;;  %v833_v17 = vadd.f32 %v3934_v24, %v733_v15 }
 0x112   : > { %v622_v18 = vpop.f32.mrf.mxu0  ;;  %v735_v19 = vpop.f32.mrf.mxu1 }
 0x113   : > { %895 = vst [vmem:[#allocation4 + $0x48] sm:$0xff] %v831_v16  ;;  %897 = vst [vmem:[#allocation4 + $0x58] sm:$0xff] %v833_v17  ;;  %v834_v20 = vadd.f32 %v3928_v21, %v622_v18  ;;  %v836_v25 = vadd.f32 %v3930_v22, %v735_v19 }
 0x114   : > { %v624_v26 = vpop.f32.mrf.mxu0  ;;  %v737_v27 = vpop.f32.mrf.mxu1 }
 0x115   : > { %898 = vst [vmem:[#allocation4 + $0x60] sm:$0xff] %v834_v20  ;;  %900 = vst [vmem:[#allocation4 + $0x70] sm:$0xff] %v836_v25  ;;  %v835_v28 = vadd.f32 %v3932_v23, %v624_v26  ;;  %v837_v29 = vadd.f32 %v3934_v24, %v737_v27 }
 0x116   : > { %v628_v30 = vpop.f32.mrf.mxu0  ;;  %v741_v31 = vpop.f32.mrf.mxu1 }
 0x117   : > { %899 = vst [vmem:[#allocation4 + $0x68] sm:$0xff] %v835_v28  ;;  %901 = vst [vmem:[#allocation4 + $0x78] sm:$0xff] %v837_v29  ;;  %v838_v32 = vadd.f32 %v3928_v21, %v628_v30  ;;  %v840_v33 = vadd.f32 %v3930_v22, %v741_v31 }
 0x118   : > { %v630_v36 = vpop.f32.mrf.mxu0  ;;  %v743_v44 = vpop.f32.mrf.mxu1 }
 0x119   : > { %902 = vst [vmem:[#allocation4 + $0x80] sm:$0xff] %v838_v32  ;;  %904 = vst [vmem:[#allocation4 + $0x90] sm:$0xff] %v840_v33  ;;  %v839_v53 = vadd.f32 %v3932_v23, %v630_v36  ;;  %v841_v62 = vadd.f32 %v3934_v24, %v743_v44 }
 0x11a   : > { %v632_v7 = vpop.f32.mrf.mxu0  ;;  %v745_v8 = vpop.f32.mrf.mxu1 }
 0x11b   : > { %903 = vst [vmem:[#allocation4 + $0x88] sm:$0xff] %v839_v53  ;;  %905 = vst [vmem:[#allocation4 + $0x98] sm:$0xff] %v841_v62  ;;  %v842_v9 = vadd.f32 %v3928_v21, %v632_v7  ;;  %v844_v10 = vadd.f32 %v3930_v22, %v745_v8 }
 0x11c   : > { %v634_v11 = vpop.f32.mrf.mxu0  ;;  %v747_v12 = vpop.f32.mrf.mxu1 }
 0x11d   : > { %906 = vst [vmem:[#allocation4 + $0xa0] sm:$0xff] %v842_v9  ;;  %908 = vst [vmem:[#allocation4 + $0xb0] sm:$0xff] %v844_v10  ;;  %v843_v13 = vadd.f32 %v3932_v23, %v634_v11  ;;  %v845_v14 = vadd.f32 %v3934_v24, %v747_v12 }
 0x11e   : > { %v638_v15 = vpop.f32.mrf.mxu0  ;;  %v751_v16 = vpop.f32.mrf.mxu1 }
 0x11f   : > { %907 = vst [vmem:[#allocation4 + $0xa8] sm:$0xff] %v843_v13  ;;  %909 = vst [vmem:[#allocation4 + $0xb8] sm:$0xff] %v845_v14  ;;  %v846_v17 = vadd.f32 %v3928_v21, %v638_v15  ;;  %v848_v18 = vadd.f32 %v3930_v22, %v751_v16 }
 0x120   : > { %v640_v19 = vpop.f32.mrf.mxu0  ;;  %v753_v20 = vpop.f32.mrf.mxu1 }
 0x121   : > { %910 = vst [vmem:[#allocation4 + $0xc0] sm:$0xff] %v846_v17  ;;  %912 = vst [vmem:[#allocation4 + $0xd0] sm:$0xff] %v848_v18  ;;  %v847_v25 = vadd.f32 %v3932_v23, %v640_v19  ;;  %v849_v26 = vadd.f32 %v3934_v24, %v753_v20 }
 0x122   : > { %v642_v27 = vpop.f32.mrf.mxu0  ;;  %v755_v28 = vpop.f32.mrf.mxu1 }
 0x123   : > { %911 = vst [vmem:[#allocation4 + $0xc8] sm:$0xff] %v847_v25  ;;  %913 = vst [vmem:[#allocation4 + $0xd8] sm:$0xff] %v849_v26  ;;  %v850_v29 = vadd.f32 %v3928_v21, %v642_v27  ;;  %v852_v30 = vadd.f32 %v3930_v22, %v755_v28 }
 0x124   : > { %v644_v31 = vpop.f32.mrf.mxu0  ;;  %v757_v32 = vpop.f32.mrf.mxu1 }
 0x125   : > { %914 = vst [vmem:[#allocation4 + $0xe0] sm:$0xff] %v850_v29  ;;  %916 = vst [vmem:[#allocation4 + $0xf0] sm:$0xff] %v852_v30  ;;  %v851_v33 = vadd.f32 %v3932_v23, %v644_v31  ;;  %v853_v36 = vadd.f32 %v3934_v24, %v757_v32 }
 0x126   : > { %v648_v44 = vpop.f32.mrf.mxu0  ;;  %v761_v53 = vpop.f32.mrf.mxu1 }
 0x127   : > { %915 = vst [vmem:[#allocation4 + $0xe8] sm:$0xff] %v851_v33  ;;  %917 = vst [vmem:[#allocation4 + $0xf8] sm:$0xff] %v853_v36  ;;  %v854_v62 = vadd.f32 %v3928_v21, %v648_v44  ;;  %v856_v7 = vadd.f32 %v3930_v22, %v761_v53 }
 0x128   : > { %v650_v8 = vpop.f32.mrf.mxu0  ;;  %v763_v9 = vpop.f32.mrf.mxu1 }
 0x129   : > { %918 = vst [vmem:[#allocation4 + $0x100] sm:$0xff] %v854_v62  ;;  %920 = vst [vmem:[#allocation4 + $0x110] sm:$0xff] %v856_v7  ;;  %v855_v10 = vadd.f32 %v3932_v23, %v650_v8  ;;  %v857_v11 = vadd.f32 %v3934_v24, %v763_v9 }
 0x12a   : > { %v652_v12 = vpop.f32.mrf.mxu0  ;;  %v765_v13 = vpop.f32.mrf.mxu1 }
 0x12b   : > { %919 = vst [vmem:[#allocation4 + $0x108] sm:$0xff] %v855_v10  ;;  %921 = vst [vmem:[#allocation4 + $0x118] sm:$0xff] %v857_v11  ;;  %v858_v14 = vadd.f32 %v3928_v21, %v652_v12  ;;  %v860_v15 = vadd.f32 %v3930_v22, %v765_v13 }
 0x12c   : > { %v654_v16 = vpop.f32.mrf.mxu0  ;;  %v767_v17 = vpop.f32.mrf.mxu1 }
 0x12d   : > { %922 = vst [vmem:[#allocation4 + $0x120] sm:$0xff] %v858_v14  ;;  %924 = vst [vmem:[#allocation4 + $0x130] sm:$0xff] %v860_v15  ;;  %v859_v18 = vadd.f32 %v3932_v23, %v654_v16  ;;  %v861_v19 = vadd.f32 %v3934_v24, %v767_v17 }
 0x12e   : > { %v658_v20 = vpop.f32.mrf.mxu0  ;;  %v771_v25 = vpop.f32.mrf.mxu1 }
 0x12f   : > { %923 = vst [vmem:[#allocation4 + $0x128] sm:$0xff] %v859_v18  ;;  %925 = vst [vmem:[#allocation4 + $0x138] sm:$0xff] %v861_v19  ;;  %v862_v26 = vadd.f32 %v3928_v21, %v658_v20  ;;  %v864_v27 = vadd.f32 %v3930_v22, %v771_v25 }
 0x130   : > { %v660_v28 = vpop.f32.mrf.mxu0  ;;  %v773_v29 = vpop.f32.mrf.mxu1 }
 0x131   : > { %926 = vst [vmem:[#allocation4 + $0x140] sm:$0xff] %v862_v26  ;;  %928 = vst [vmem:[#allocation4 + $0x150] sm:$0xff] %v864_v27  ;;  %v863_v30 = vadd.f32 %v3932_v23, %v660_v28  ;;  %v865_v31 = vadd.f32 %v3934_v24, %v773_v29 }
 0x132   : > { %v662_v32 = vpop.f32.mrf.mxu0  ;;  %v775_v33 = vpop.f32.mrf.mxu1 }
 0x133   : > { %927 = vst [vmem:[#allocation4 + $0x148] sm:$0xff] %v863_v30  ;;  %929 = vst [vmem:[#allocation4 + $0x158] sm:$0xff] %v865_v31  ;;  %v866_v36 = vadd.f32 %v3928_v21, %v662_v32  ;;  %v868_v44 = vadd.f32 %v3930_v22, %v775_v33 }
 0x134   : > { %v664_v53 = vpop.f32.mrf.mxu0  ;;  %v777_v62 = vpop.f32.mrf.mxu1 }
 0x135   : > { %930 = vst [vmem:[#allocation4 + $0x160] sm:$0xff] %v866_v36  ;;  %932 = vst [vmem:[#allocation4 + $0x170] sm:$0xff] %v868_v44  ;;  %v867_v7 = vadd.f32 %v3932_v23, %v664_v53  ;;  %v869_v8 = vadd.f32 %v3934_v24, %v777_v62 }
 0x136   : > { %v668_v9 = vpop.f32.mrf.mxu0  ;;  %v781_v10 = vpop.f32.mrf.mxu1 }
 0x137   : > { %931 = vst [vmem:[#allocation4 + $0x168] sm:$0xff] %v867_v7  ;;  %933 = vst [vmem:[#allocation4 + $0x178] sm:$0xff] %v869_v8  ;;  %v870_v11 = vadd.f32 %v3928_v21, %v668_v9  ;;  %v872_v12 = vadd.f32 %v3930_v22, %v781_v10 }
 0x138   : > { %v670_v13 = vpop.f32.mrf.mxu0  ;;  %v783_v14 = vpop.f32.mrf.mxu1 }
 0x139   : > { %934 = vst [vmem:[#allocation4 + $0x180] sm:$0xff] %v870_v11  ;;  %936 = vst [vmem:[#allocation4 + $0x190] sm:$0xff] %v872_v12  ;;  %v871_v15 = vadd.f32 %v3932_v23, %v670_v13  ;;  %v873_v16 = vadd.f32 %v3934_v24, %v783_v14 }
 0x13a   : > { %v672_v17 = vpop.f32.mrf.mxu0  ;;  %v785_v18 = vpop.f32.mrf.mxu1 }
 0x13b   : > { %935 = vst [vmem:[#allocation4 + $0x188] sm:$0xff] %v871_v15  ;;  %937 = vst [vmem:[#allocation4 + $0x198] sm:$0xff] %v873_v16  ;;  %v874_v19 = vadd.f32 %v3928_v21, %v672_v17  ;;  %v876_v20 = vadd.f32 %v3930_v22, %v785_v18 }
 0x13c   : > { %v674_v25 = vpop.f32.mrf.mxu0  ;;  %v787_v26 = vpop.f32.mrf.mxu1 }
 0x13d   : > { %938 = vst [vmem:[#allocation4 + $0x1a0] sm:$0xff] %v874_v19  ;;  %940 = vst [vmem:[#allocation4 + $0x1b0] sm:$0xff] %v876_v20  ;;  %v875_v27 = vadd.f32 %v3932_v23, %v674_v25  ;;  %v877_v28 = vadd.f32 %v3934_v24, %v787_v26 }
 0x13e   : > { %v678_v29 = vpop.f32.mrf.mxu0  ;;  %v791_v30 = vpop.f32.mrf.mxu1 }
 0x13f   : > { %939 = vst [vmem:[#allocation4 + $0x1a8] sm:$0xff] %v875_v27  ;;  %941 = vst [vmem:[#allocation4 + $0x1b8] sm:$0xff] %v877_v28  ;;  %v878_v31 = vadd.f32 %v3928_v21, %v678_v29  ;;  %v880_v32 = vadd.f32 %v3930_v22, %v791_v30 }
 0x140   : > { %v680_v33 = vpop.f32.mrf.mxu0  ;;  %v793_v36 = vpop.f32.mrf.mxu1 }
 0x141   : > { %942 = vst [vmem:[#allocation4 + $0x1c0] sm:$0xff] %v878_v31  ;;  %944 = vst [vmem:[#allocation4 + $0x1d0] sm:$0xff] %v880_v32  ;;  %v879_v44 = vadd.f32 %v3932_v23, %v680_v33  ;;  %v881_v53 = vadd.f32 %v3934_v24, %v793_v36 }
 0x142   : > { %v682_v62 = vpop.f32.mrf.mxu0  ;;  %v795_v7 = vpop.f32.mrf.mxu1 }
 0x143   : > { %943 = vst [vmem:[#allocation4 + $0x1c8] sm:$0xff] %v879_v44  ;;  %945 = vst [vmem:[#allocation4 + $0x1d8] sm:$0xff] %v881_v53  ;;  %v882_v8 = vadd.f32 %v3928_v21, %v682_v62  ;;  %v884_v9 = vadd.f32 %v3930_v22, %v795_v7 }
 0x144   : > { %v684_v10 = vpop.f32.mrf.mxu0  ;;  %v797_v11 = vpop.f32.mrf.mxu1 }
 0x145   : > { %946 = vst [vmem:[#allocation4 + $0x1e0] sm:$0xff] %v882_v8  ;;  %948 = vst [vmem:[#allocation4 + $0x1f0] sm:$0xff] %v884_v9  ;;  %v883_v12 = vadd.f32 %v3932_v23, %v684_v10  ;;  %v885_v13 = vadd.f32 %v3934_v24, %v797_v11 }
 0x146   : > { %v1193_v14 = vpop.f32.mrf.mxu0  ;;  %v1236_v16 = vpop.f32.mrf.mxu1 }
 0x147   : > { %947 = vst [vmem:[#allocation4 + $0x1e8] sm:$0xff] %v883_v12  ;;  %949 = vst [vmem:[#allocation4 + $0x1f8] sm:$0xff] %v885_v13 }
 0x148   : > { %v1195_v15 = vpop.f32.mrf.mxu0  ;;  %v1238_v25 = vpop.f32.mrf.mxu1 }
 0x14a   : > { %v1197_v17 = vpop.f32.mrf.mxu0  ;;  %v1240_v32 = vpop.f32.mrf.mxu1 }
 0x14c   : > { %v1199_v27 = vpop.f32.mrf.mxu0  ;;  %v1242_v44 = vpop.f32.mrf.mxu1 }
 0x14e   : > { %v990_v18 = vld [vmem:[%s989_s22] sm:$0xff]  ;;  %v991_v21 = vld [vmem:[%s989_s22 + $0x8] sm:$0xff]  ;;  %v993_v33 = vld [vmem:[%s989_s22 + $0x18] sm:$0xff] }
 0x14f   : > { %v1245_v19 = vadd.f32 %v1193_v14, %v990_v18  ;;  %v1246_v22 = vadd.f32 %v1195_v15, %v991_v21  ;;  %v994_v20 = vld [vmem:[%s989_s22 + $0x20] sm:$0xff]  ;;  %v995_v26 = vld [vmem:[%s989_s22 + $0x28] sm:$0xff]  ;;  %v997_v36 = vld [vmem:[%s989_s22 + $0x38] sm:$0xff]  ;;  %v1248_v62 = vadd.f32 %v1238_v25, %v993_v33 }
 0x150   : > { %v1249_v28 = vadd.f32 %v1197_v17, %v994_v20  ;;  %v1250_v23 = vadd.f32 %v1199_v27, %v995_v26  ;;  %v992_v53 = vld [vmem:[%s989_s22 + $0x10] sm:$0xff]  ;;  %v1252_v8 = vadd.f32 %v1242_v44, %v997_v36  ;;  %v984_v27 = vld [vmem:[#allocation3 + $0x8] sm:$0xff] }
 0x151   : > { %v2858_v29 = vmul.f32 -1.442695, %v1245_v19  ;;  %v2860_v24 = vmul.f32 -1.442695, %v1246_v22  ;;  %v996_v7 = vld [vmem:[%s989_s22 + $0x30] sm:$0xff]  ;;  %v1247_v9 = vadd.f32 %v1236_v16, %v992_v53  ;;  %s4307_s22 = scalar_lea.vmem [#allocation4], %s3020_s17  ;;  %s2505_s17 = sadd.s32 (%p3662_p4), %s3569_s18, %s3030_s29 }
 0x152   : > { %v2859_v30 = vmul.f32 -1.442695, %v1249_v28  ;;  %v2861_v31 = vmul.f32 -1.442695, %v1250_v23  ;;  %v2862_v10 = vmul.f32 -1.442695, %v1248_v62  ;;  %v1251_v11 = vadd.f32 %v1240_v32, %v996_v7 }
 0x153   : > { %3239 = vpow2.f32 %v2858_v29  ;;  %v2863_v12 = vmul.f32 -1.442695, %v1252_v8  ;;  %s3004_s7 = sshll.u32 (%p3662_p4), %s2505_s17, 2 }
 0x154   : > { %3241 = vpow2.f32 %v2860_v24 }
 0x155   : > { %3243 = vpow2.f32 %v2859_v30 }
 0x156   : > { %3245 = vpow2.f32 %v2861_v31  ;;  %v985_v31 = vld [vmem:[#allocation3] sm:$0xff] }
 0x157   : > { %3247 = vtanh.f32 %v1247_v9 }
 0x158   : > { %3249 = vpow2.f32 %v2862_v10 }
 0x159   : > { %3251 = vtanh.f32 %v1251_v11 }
 0x15a   : > { %3253 = vpow2.f32 %v2863_v12 }
 0x160   : > { %v3240_v13 = vpop.eup %3239 }
 0x161   : > { %v3242_v14 = vpop.eup %3241  ;;  %v1259_v15 = vadd.f32 1.0, %v3240_v13 }
 0x162   : > { %v3244_v17 = vpop.eup %3243  ;;  %v1271_v18 = vadd.f32 1.0, %v3242_v14 }
 0x163   : > { %3255 = vrcp.f32 %v1259_v15  ;;  %v1260_v21 = vadd.f32 1.0, %v3244_v17  ;;  %v3246_v19 = vpop.eup %3245 }
 0x164   : > { %3257 = vrcp.f32 %v1271_v18  ;;  %v1272_v22 = vadd.f32 1.0, %v3246_v19  ;;  %v3248_v16 = vpop.eup %3247  ;;  %v2875_v19 = vld [vmem:[%s4044_s5 + $0x70] sm:$0xff] }
 0x165   : > { %3259 = vrcp.f32 %v1260_v21  ;;  %v3250_v20 = vpop.eup %3249 }
 0x166   : > { %3261 = vrcp.f32 %v1272_v22  ;;  %v3252_v25 = vpop.eup %3251  ;;  %v1285_v32 = vadd.f32 1.0, %v3250_v20 }
 0x167   : > { %v3254_v26 = vpop.eup %3253 }
 0x168   : > { %v1286_v53 = vadd.f32 1.0, %v3254_v26 }
 0x170   : > { %v3256_v28 = vpop.eup %3255 }
 0x171   : > { %v3258_v23 = vpop.eup %3257  ;;  %v1293_v29 = vmul.f32 %v3256_v28, %v3248_v16 }
 0x172   : > { %v3260_v24 = vpop.eup %3259  ;;  %v1291_v30 = vmul.f32 %v3258_v23, %v984_v27 }
 0x173   : > { %v1294_v33 = vmul.f32 %v3260_v24, %v3252_v25  ;;  %v3262_v36 = vpop.eup %3261 }
 0x174   : > { %v4001_v44 = vadd.f32 %v1293_v29, %v1291_v30  ;;  %v1292_v62 = vmul.f32 %v3262_v36, %v985_v31 }
 0x176   : > { %3263 = vtanh.f32 %v4001_v44  ;;  %v4004_v7 = vadd.f32 %v1294_v33, %v1292_v62 }
 0x177   : > { %3265 = vrcp.f32 %v1285_v32 }
 0x178   : > { %3267 = vrcp.f32 %v1286_v53 }
 0x179   : > { %3269 = vtanh.f32 %v4004_v7 }
 0x183   : > { %v3264_v8 = vpop.eup %3263 }
 0x184   : > { %v3266_v9 = vpop.eup %3265 }
 0x185   : > { %v3268_v10 = vpop.eup %3267  ;;  %v1299_v11 = vmul.f32 %v3266_v9, %v3264_v8 }
 0x186   : > { %v3270_v12 = vpop.eup %3269 }
 0x187   : > { %v1300_v13 = vmul.f32 %v3270_v12, %v3268_v10 }
 0x189   : > { %v1301_v14 = vpack.c.bf16 %v1300_v13, %v1299_v11 }
 0x18b   : > { %3035 = vst [vmem:[%s1311_s24] sm:$0xff] %v1301_v14   ;;  %1360 = vmatmul.mubr.bf16.vlgmr.msra.gmra.mxu0 %v1301_v14  ;;  %1403 = vmatmul.mubr.bf16.vlgmr.msra.gmra.mxu1 %v1301_v14  ;;  %s1981_s24 = scalar_lea.vmem %s3702_s28, %s3023_s23 [#allocation5] }
 0x18c   : > { %1496 = vmatpush1.bf16.msra.mxu0 %v3747_v37  ;;  %1539 = vmatpush1.bf16.msra.mxu1 %v3755_v39  ;;  %v2869_v37 = vld [vmem:[%s4044_s5 + $0x40] sm:$0xff] }
 0x18d   : > { %1497 = vmatprep.subr.bf16.mxu0 %v3751_v38  ;;  %1540 = vmatprep.subr.bf16.mxu1 %v3758_v40 }
 0x18e   : > { %1527 = vmatprep.mubr.bf16.mxu0 %v3584_v3  ;;  %1570 = vmatprep.mubr.bf16.mxu1 %v3584_v3 }
 0x190   : > { %1498 = vmatpush1.bf16.msra.mxu0 %v3763_v41  ;;  %1541 = vmatpush1.bf16.msra.mxu1 %v3772_v43  ;;  %v2870_v41 = vld [vmem:[%s4044_s5 + $0x48] sm:$0xff] }
 0x191   : > { %1499 = vmatprep.subr.bf16.mxu0 %v3768_v42  ;;  %1542 = vmatprep.subr.bf16.mxu1 %v3782_v46  ;;  %v2873_v46 = vld [vmem:[%s4044_s5 + $0x60] sm:$0xff] }
 0x194   : > { %1500 = vmatpush1.bf16.msra.mxu0 %v3778_v45  ;;  %1543 = vmatpush1.bf16.msra.mxu1 %v3789_v48 }
 0x195   : > { %1501 = vmatprep.subr.bf16.mxu0 %v3785_v47  ;;  %1544 = vmatprep.subr.bf16.mxu1 %v3792_v49  ;;  %v2874_v49 = vld [vmem:[%s4044_s5 + $0x68] sm:$0xff] }
 0x198   : > { %1502 = vmatpush1.bf16.msra.mxu0 %v3798_v50  ;;  %1545 = vmatpush1.bf16.msra.mxu1 %v3807_v52 }
 0x199   : > { %1503 = vmatprep.subr.bf16.mxu0 %v3801_v51  ;;  %1546 = vmatprep.subr.bf16.mxu1 %v3816_v55 }
 0x19c   : > { %1504 = vmatpush1.bf16.msra.mxu0 %v3812_v54  ;;  %1547 = vmatpush1.bf16.msra.mxu1 %v3824_v57 }
 0x19d   : > { %1505 = vmatprep.subr.bf16.mxu0 %v3820_v56  ;;  %1548 = vmatprep.subr.bf16.mxu1 %v3827_v58  ;;  %v2872_v56 = vld [vmem:[%s4044_s5 + $0x58] sm:$0xff] }
 0x1a0   : > { %1506 = vmatpush1.bf16.msra.mxu0 %v3833_v59  ;;  %1549 = vmatpush1.bf16.msra.mxu1 %v3842_v61  ;;  %v2871_v59 = vld [vmem:[%s4044_s5 + $0x50] sm:$0xff] }
 0x1a1   : > { %1507 = vmatprep.subr.bf16.mxu0 %v3838_v60  ;;  %1550 = vmatprep.subr.bf16.mxu1 %v3851_v0  ;;  %v2876_v60 = vld [vmem:[%s4044_s5 + $0x78] sm:$0xff]  ;;  %s4363_s5 = scalar_lea.vmem [#allocation4], %s2940_s30 }
 0x1a4   : > { %1508 = vmatpush1.bf16.msra.mxu0 %v3848_v63  ;;  %1551 = vmatpush1.bf16.msra.mxu1 %v3859_v2 }
 0x1a5   : > { %1509 = vmatprep.subr.bf16.mxu0 %v3856_v1  ;;  %1552 = vmatprep.subr.bf16.mxu1 %v3862_v4 }
 0x1a8   : > { %1510 = vmatpush1.bf16.msra.mxu0 %v3868_v5  ;;  %1553 = vmatpush1.bf16.msra.mxu1 %v3874_v6 }
 0x1a9   : > { %1662 = vmatprep.subr.bf16.mxu0 %v3740_v34  ;;  %1705 = vmatprep.subr.bf16.mxu1 %v3743_v35 }
 0x24b   : > { %v1361_v38 = vpop.f32.mrf.mxu0  ;;  %v1404_v40 = vpop.f32.mrf.mxu1 }
 0x24c   : > { %v1413_v39 = vadd.f32 %v2869_v37, %v1361_v38  ;;  %v1415_v61 = vadd.f32 %v2871_v59, %v1404_v40  ;;  %v4069_v40 = vld [vmem:[%s3695_s26 + $0xe8] ss:$16 sps:$4 sm:$0xff]   ;;  %v4147_v59 = vld [vmem:[%s3695_s26 + $0x40] ss:$16 sps:$4 sm:$0xff]  }
 0x24d   : > { %v1363_v42 = vpop.f32.mrf.mxu0  ;;  %v1406_v47 = vpop.f32.mrf.mxu1 }
 0x24e   : > { %v2877_v43 = vmul.f32 -1.442695, %v1413_v39  ;;  %v1414_v45 = vadd.f32 %v2870_v41, %v1363_v42  ;;  %v1416_v58 = vadd.f32 %v2872_v56, %v1406_v47  ;;  %v4065_v39 = vld [vmem:[%s3695_s26 + $0xe0] ss:$16 sps:$4 sm:$0xff]   ;;  %v4073_v41 = vld [vmem:[%s3695_s26 + $0xc4] ss:$16 sps:$4 sm:$0xff]  }
 0x24f   : > { %v1365_v34 = vpop.f32.mrf.mxu0  ;;  %v1408_v54 = vpop.f32.mrf.mxu1  ;;  %v4077_v42 = vld [vmem:[%s3695_s26 + $0xcc] ss:$16 sps:$4 sm:$0xff]   ;;  %v4103_v47 = vld [vmem:[%s3695_s26 + $0xa8] ss:$16 sps:$4 sm:$0xff]  }
 0x250   : > { %3271 = vpow2.f32 %v2877_v43  ;;  %v2879_v35 = vmul.f32 -1.442695, %v1414_v45  ;;  %v1417_v48 = vadd.f32 %v2873_v46, %v1365_v34  ;;  %v2881_v1 = vmul.f32 -1.442695, %v1416_v58  ;;  %v4083_v43 = vld [vmem:[%s3695_s26 + $0xc0] ss:$16 sps:$4 sm:$0xff]  }
 0x251   : > { %v1367_v50 = vpop.f32.mrf.mxu0  ;;  %v1410_v57 = vpop.f32.mrf.mxu1  ;;  %v1419_v16 = vadd.f32 %v2875_v19, %v1408_v54  ;;  %v4087_v45 = vld [vmem:[%s3695_s26 + $0xc8] ss:$16 sps:$4 sm:$0xff]   ;;  %v4091_v46 = vld [vmem:[%s3695_s26 + $0xa4] ss:$16 sps:$4 sm:$0xff]   ;;  %v4095_v34 = vld [vmem:[%s3695_s26 + $0xac] ss:$16 sps:$4 sm:$0xff]  }
 0x252   : > { %3273 = vpow2.f32 %v2879_v35  ;;  %v2878_v51 = vmul.f32 -1.442695, %v1417_v48  ;;  %v1418_v52 = vadd.f32 %v2874_v49, %v1367_v50  ;;  %v1420_v63 = vadd.f32 %v2876_v60, %v1410_v57  ;;  %v4099_v35 = vld [vmem:[%s3695_s26 + $0xa0] ss:$16 sps:$4 sm:$0xff]   ;;  %v4107_v48 = vld [vmem:[%s3695_s26 + $0x84] ss:$16 sps:$4 sm:$0xff]  }
 0x253   : > { %v4111_v49 = vld [vmem:[%s3695_s26 + $0x8c] ss:$16 sps:$4 sm:$0xff]   ;;  %v4115_v50 = vld [vmem:[%s3695_s26 + $0x80] ss:$16 sps:$4 sm:$0xff]   ;;  %v4135_v56 = vld [vmem:[%s3695_s26 + $0x68] ss:$16 sps:$4 sm:$0xff]  }
 0x254   : > { %3275 = vpow2.f32 %v2878_v51  ;;  %v2880_v55 = vmul.f32 -1.442695, %v1418_v52  ;;  %v2882_v18 = vmul.f32 -1.442695, %v1420_v63  ;;  %v4119_v51 = vld [vmem:[%s3695_s26 + $0x88] ss:$16 sps:$4 sm:$0xff]  }
 0x255   : > { %v4123_v52 = vld [vmem:[%s3695_s26 + $0x64] ss:$16 sps:$4 sm:$0xff]   ;;  %v4127_v54 = vld [vmem:[%s3695_s26 + $0x6c] ss:$16 sps:$4 sm:$0xff]   ;;  %v4151_v60 = vld [vmem:[%s3695_s26 + $0x48] ss:$16 sps:$4 sm:$0xff]  }
 0x256   : > { %3277 = vpow2.f32 %v2880_v55  ;;  %v4131_v55 = vld [vmem:[%s3695_s26 + $0x60] ss:$16 sps:$4 sm:$0xff]   ;;  %v4139_v57 = vld [vmem:[%s3695_s26 + $0x44] ss:$16 sps:$4 sm:$0xff]   ;;  %v4143_v58 = vld [vmem:[%s3695_s26 + $0x4c] ss:$16 sps:$4 sm:$0xff]  }
 0x257   : > { %3279 = vtanh.f32 %v1415_v61  ;;  %v4155_v61 = vld [vmem:[%s3695_s26 + $0x24] ss:$16 sps:$4 sm:$0xff]   ;;  %v4159_v63 = vld [vmem:[%s3695_s26 + $0x2c] ss:$16 sps:$4 sm:$0xff]  }
 0x25d   : > { %v3272_v0 = vpop.eup %3271 }
 0x25e   : > { %v1427_v15 = vadd.f32 1.0, %v3272_v0  ;;  %v4163_v0 = vld [vmem:[%s3695_s26 + $0x20] ss:$16 sps:$4 sm:$0xff]  }
 0x25f   : > { %v3274_v17 = vpop.eup %3273 }
 0x260   : > { %3281 = vrcp.f32 %v1427_v15  ;;  %v1439_v21 = vadd.f32 1.0, %v3274_v17  ;;  %v4175_v15 = vld [vmem:[%s3695_s26 + $0xe4] ss:$16 sps:$4 sm:$0xff]   ;;  %v4179_v17 = vld [vmem:[%s3695_s26 + $0xec] ss:$16 sps:$4 sm:$0xff]  }
 0x261   : > { %v3276_v22 = vpop.eup %3275  ;;  %3283 = vpow2.f32 %v2881_v1  ;;  %v4168_v1 = vld [vmem:[%s3695_s26 + $0x4] ss:$16 sps:$4 sm:$0xff]  }
 0x262   : > { %3285 = vrcp.f32 %v1439_v21  ;;  %v1428_v20 = vadd.f32 1.0, %v3276_v22 }
 0x263   : > { %v3278_v25 = vpop.eup %3277  ;;  %3287 = vpow2.f32 %v2882_v18 }
 0x264   : > { %3289 = vrcp.f32 %v1428_v20  ;;  %v1440_v26 = vadd.f32 1.0, %v3278_v25  ;;  %v3280_v27 = vpop.eup %3279 }
 0x265   : > { %3291 = vtanh.f32 %v1419_v16  ;;  %v2893_v16 = vld [vmem:[%s4183_s10 + $0xa0] sm:$0xff] }
 0x266   : > { %3293 = vrcp.f32 %v1440_v26 }
 0x26d   : > { %v3282_v28 = vpop.eup %3281 }
 0x26e   : > { %v3284_v23 = vpop.eup %3283  ;;  %v1461_v30 = vmul.f32 %v3282_v28, %v3280_v27  ;;  %v2894_v28 = vld [vmem:[%s4183_s10 + $0xa8] sm:$0xff] }
 0x26f   : > { %v3286_v29 = vpop.eup %3285  ;;  %v1453_v33 = vadd.f32 1.0, %v3284_v23 }
 0x270   : > { %v3288_v24 = vpop.eup %3287  ;;  %v1459_v31 = vmul.f32 %v3286_v29, %v4001_v44 }
 0x271   : > { %v3290_v32 = vpop.eup %3289  ;;  %v1454_v8 = vadd.f32 1.0, %v3288_v24  ;;  %3295 = vrcp.f32 %v1453_v33 }
 0x272   : > { %v3292_v36 = vpop.eup %3291  ;;  %v4055_v53 = vadd.f32 %v1461_v30, %v1459_v31 }
 0x273   : > { %v3294_v62 = vpop.eup %3293  ;;  %v1462_v9 = vmul.f32 %v3292_v36, %v3290_v32  ;;  %v2892_v32 = vld [vmem:[%s4183_s10 + $0x98] sm:$0xff] }
 0x274   : > { %v1460_v10 = vmul.f32 %v3294_v62, %v4004_v7  ;;  %3297 = vtanh.f32 %v4055_v53  ;;  %v2891_v62 = vld [vmem:[%s4183_s10 + $0x90] sm:$0xff] }
 0x275   : > { %3299 = vrcp.f32 %v1454_v8  ;;  %v2896_v8 = vld [vmem:[%s4183_s10 + $0xb8] sm:$0xff] }
 0x276   : > { %v4058_v11 = vadd.f32 %v1462_v9, %v1460_v10 }
 0x278   : > { %3301 = vtanh.f32 %v4058_v11 }
 0x27e   : > { %v3296_v44 = vpop.eup %3295 }
 0x281   : > { %v3298_v12 = vpop.eup %3297 }
 0x282   : > { %v3300_v13 = vpop.eup %3299  ;;  %v1467_v37 = vmul.f32 %v3298_v12, %v3296_v44 }
 0x285   : > { %v3302_v14 = vpop.eup %3301 }
 0x286   : > { %v1468_v38 = vmul.f32 %v3302_v14, %v3300_v13 }
 0x288   : > { %v1469_v7 = vpack.c.bf16 %v1468_v38, %v1467_v37 }
 0x28a   : > { %3071 = vst [vmem:[%s2657_s8 + $0x8] sm:$0xff] %v1469_v7   ;;  %1528 = vmatmul.mubr.bf16.vlgmr.msra.gmra.mxu0 %v1469_v7  ;;  %1571 = vmatmul.mubr.bf16.vlgmr.msra.gmra.mxu1 %v1469_v7  ;;  %v2895_v7 = vld [vmem:[%s4183_s10 + $0xb0] sm:$0xff]  ;;  %s2683_s8 = scalar_lea.vmem %s3702_s28, %s2957_s6 [#allocation5] }
 0x28b   : > { %1663 = vmatpush1.bf16.msra.mxu0 %v4065_v39  ;;  %1706 = vmatpush1.bf16.msra.mxu1 %v4069_v40 }
 0x28c   : > { %1664 = vmatprep.subr.bf16.mxu0 %v4073_v41  ;;  %1707 = vmatprep.subr.bf16.mxu1 %v4077_v42 }
 0x28d   : > { %1694 = vmatprep.mubr.bf16.mxu0 %v3584_v3  ;;  %1737 = vmatprep.mubr.bf16.mxu1 %v3584_v3 }
 0x28f   : > { %1665 = vmatpush1.bf16.msra.mxu0 %v4083_v43  ;;  %1708 = vmatpush1.bf16.msra.mxu1 %v4087_v45 }
 0x290   : > { %1666 = vmatprep.subr.bf16.mxu0 %v4091_v46  ;;  %1709 = vmatprep.subr.bf16.mxu1 %v4095_v34 }
 0x293   : > { %1667 = vmatpush1.bf16.msra.mxu0 %v4099_v35  ;;  %1710 = vmatpush1.bf16.msra.mxu1 %v4103_v47 }
 0x294   : > { %1668 = vmatprep.subr.bf16.mxu0 %v4107_v48  ;;  %1711 = vmatprep.subr.bf16.mxu1 %v4111_v49 }
 0x297   : > { %1669 = vmatpush1.bf16.msra.mxu0 %v4115_v50  ;;  %1712 = vmatpush1.bf16.msra.mxu1 %v4119_v51 }
 0x298   : > { %1670 = vmatprep.subr.bf16.mxu0 %v4123_v52  ;;  %1713 = vmatprep.subr.bf16.mxu1 %v4127_v54 }
 0x29b   : > { %1671 = vmatpush1.bf16.msra.mxu0 %v4131_v55  ;;  %1714 = vmatpush1.bf16.msra.mxu1 %v4135_v56 }
 0x29c   : > { %1672 = vmatprep.subr.bf16.mxu0 %v4139_v57  ;;  %1715 = vmatprep.subr.bf16.mxu1 %v4143_v58 }
 0x29f   : > { %1673 = vmatpush1.bf16.msra.mxu0 %v4147_v59  ;;  %1716 = vmatpush1.bf16.msra.mxu1 %v4151_v60 }
 0x2a0   : > { %1674 = vmatprep.subr.bf16.mxu0 %v4155_v61  ;;  %1717 = vmatprep.subr.bf16.mxu1 %v4159_v63 }
 0x2a3   : > { %1675 = vmatpush1.bf16.msra.mxu0 %v4163_v0  ;;  %1718 = vmatpush1.bf16.msra.mxu1 %v3859_v2  ;;  %v2889_v2 = vld [vmem:[%s4183_s10 + $0x80] sm:$0xff] }
 0x2a4   : > { %1676 = vmatprep.subr.bf16.mxu0 %v4168_v1  ;;  %1719 = vmatprep.subr.bf16.mxu1 %v3862_v4 }
 0x2a7   : > { %1677 = vmatpush1.bf16.msra.mxu0 %v3868_v5  ;;  %1720 = vmatpush1.bf16.msra.mxu1 %v3874_v6  ;;  %v2890_v6 = vld [vmem:[%s4183_s10 + $0x88] sm:$0xff]  ;;  %s4416_s10 = scalar_lea.vmem [#allocation4], %s2960_s9 }
 0x2a8   : > { %1829 = vmatprep.subr.bf16.mxu0 %v4175_v15  ;;  %1872 = vmatprep.subr.bf16.mxu1 %v4179_v17 }
 0x34a   : > { %v1529_v4 = vpop.f32.mrf.mxu0  ;;  %v1572_v18 = vpop.f32.mrf.mxu1 }
 0x34b   : > { %v1581_v5 = vadd.f32 %v2889_v2, %v1529_v4  ;;  %v1583_v9 = vadd.f32 %v2891_v62, %v1572_v18 }
 0x34c   : > { %v1531_v21 = vpop.f32.mrf.mxu0  ;;  %v1574_v26 = vpop.f32.mrf.mxu1 }
 0x34d   : > { %v2897_v19 = vmul.f32 -1.442695, %v1581_v5  ;;  %v1582_v22 = vadd.f32 %v2890_v6, %v1531_v21  ;;  %v1584_v36 = vadd.f32 %v2892_v32, %v1574_v26 }
 0x34e   : > { %v1533_v20 = vpop.f32.mrf.mxu0  ;;  %v1576_v30 = vpop.f32.mrf.mxu1 }
 0x34f   : > { %3303 = vpow2.f32 %v2897_v19  ;;  %v2899_v25 = vmul.f32 -1.442695, %v1582_v22  ;;  %v1585_v27 = vadd.f32 %v2893_v16, %v1533_v20  ;;  %v2901_v12 = vmul.f32 -1.442695, %v1584_v36 }
 0x350   : > { %v1535_v23 = vpop.f32.mrf.mxu0  ;;  %v1578_v33 = vpop.f32.mrf.mxu1  ;;  %v1587_v4 = vadd.f32 %v2895_v7, %v1576_v30 }
 0x351   : > { %3305 = vpow2.f32 %v2899_v25  ;;  %v2898_v29 = vmul.f32 -1.442695, %v1585_v27  ;;  %v1586_v24 = vadd.f32 %v2894_v28, %v1535_v23  ;;  %v1588_v10 = vadd.f32 %v2896_v8, %v1578_v33 }
 0x353   : > { %3307 = vpow2.f32 %v2898_v29  ;;  %v2900_v31 = vmul.f32 -1.442695, %v1586_v24  ;;  %v2902_v37 = vmul.f32 -1.442695, %v1588_v10 }
 0x355   : > { %3309 = vpow2.f32 %v2900_v31 }
 0x356   : > { %3311 = vtanh.f32 %v1583_v9 }
 0x35c   : > { %v3304_v44 = vpop.eup %3303 }
 0x35d   : > { %v1595_v13 = vadd.f32 1.0, %v3304_v44 }
 0x35e   : > { %v3306_v14 = vpop.eup %3305 }
 0x35f   : > { %3313 = vrcp.f32 %v1595_v13  ;;  %v1607_v38 = vadd.f32 1.0, %v3306_v14  ;;  %v4240_v13 = vld [vmem:[%s3695_s26] ss:$16 sps:$4 sm:$0xff]   ;;  %v4244_v14 = vld [vmem:[%s3695_s26 + $0x8] ss:$16 sps:$4 sm:$0xff]  }
 0x360   : > { %v3308_v2 = vpop.eup %3307  ;;  %3315 = vpow2.f32 %v2901_v12  ;;  %v4236_v12 = vld [vmem:[%s3695_s26 + $0xc] ss:$16 sps:$4 sm:$0xff]  }
 0x361   : > { %3317 = vrcp.f32 %v1607_v38  ;;  %v1596_v5 = vadd.f32 1.0, %v3308_v2 }
 0x362   : > { %v3310_v6 = vpop.eup %3309  ;;  %3319 = vpow2.f32 %v2902_v37  ;;  %v2909_v37 = vld [vmem:[%s4250_s14 + $0xc0] sm:$0xff] }
 0x363   : > { %3321 = vrcp.f32 %v1596_v5  ;;  %v1608_v21 = vadd.f32 1.0, %v3310_v6  ;;  %v3312_v18 = vpop.eup %3311 }
 0x364   : > { %3323 = vtanh.f32 %v1587_v4  ;;  %v2910_v4 = vld [vmem:[%s4250_s14 + $0xc8] sm:$0xff] }
 0x365   : > { %3325 = vrcp.f32 %v1608_v21 }
 0x36c   : > { %v3314_v19 = vpop.eup %3313 }
 0x36d   : > { %v3316_v22 = vpop.eup %3315  ;;  %v1629_v25 = vmul.f32 %v3314_v19, %v3312_v18  ;;  %v2913_v18 = vld [vmem:[%s4250_s14 + $0xe0] sm:$0xff] }
 0x36e   : > { %v3318_v16 = vpop.eup %3317  ;;  %v1621_v28 = vadd.f32 1.0, %v3316_v22 }
 0x36f   : > { %v3320_v20 = vpop.eup %3319  ;;  %v1627_v26 = vmul.f32 %v3318_v16, %v4055_v53 }
 0x370   : > { %v3322_v27 = vpop.eup %3321  ;;  %v1622_v30 = vadd.f32 1.0, %v3320_v20  ;;  %3327 = vrcp.f32 %v1621_v28 }
 0x371   : > { %v3324_v23 = vpop.eup %3323  ;;  %v4194_v29 = vadd.f32 %v1629_v25, %v1627_v26  ;;  %v2914_v25 = vld [vmem:[%s4250_s14 + $0xe8] sm:$0xff] }
 0x372   : > { %v3326_v24 = vpop.eup %3325  ;;  %v1630_v31 = vmul.f32 %v3324_v23, %v3322_v27 }
 0x373   : > { %v1628_v32 = vmul.f32 %v3326_v24, %v4058_v11  ;;  %3329 = vtanh.f32 %v4194_v29  ;;  %v4231_v11 = vld [vmem:[%s3695_s26 + $0x28] ss:$16 sps:$4 sm:$0xff]   ;;  %s2671_s26 = scalar_lea.vmem %s3702_s28, %s2925_s25 [#allocation5]  ;;  %s2997_s25 = smul.u32 4294967240, %s3569_s18 }
 0x374   : > { %3331 = vrcp.f32 %v1622_v30  ;;  %v2912_v30 = vld [vmem:[%s4250_s14 + $0xd8] sm:$0xff] }
 0x375   : > { %v4197_v33 = vadd.f32 %v1630_v31, %v1628_v32 }
 0x377   : > { %3333 = vtanh.f32 %v4197_v33 }
 0x37d   : > { %v3328_v53 = vpop.eup %3327 }
 0x380   : > { %v3330_v36 = vpop.eup %3329 }
 0x381   : > { %v3332_v62 = vpop.eup %3331  ;;  %v1635_v9 = vmul.f32 %v3330_v36, %v3328_v53  ;;  %v2911_v53 = vld [vmem:[%s4250_s14 + $0xd0] sm:$0xff]  ;;  %v2916_v36 = vld [vmem:[%s4250_s14 + $0xf8] sm:$0xff] }
 0x384   : > { %v3334_v8 = vpop.eup %3333 }
 0x385   : > { %v1636_v10 = vmul.f32 %v3334_v8, %v3332_v62 }
 0x387   : > { %v1637_v44 = vpack.c.bf16 %v1636_v10, %v1635_v9 }
 0x389   : > { %3072 = vst [vmem:[%s2665_s11 + $0x10] sm:$0xff] %v1637_v44   ;;  %1695 = vmatmul.mubr.bf16.vlgmr.msra.gmra.mxu0 %v1637_v44  ;;  %1738 = vmatmul.mubr.bf16.vlgmr.msra.gmra.mxu1 %v1637_v44  ;;  %s2691_s11 = scalar_lea.vmem %s3702_s28, %s2977_s15 [#allocation5] }
 0x38a   : > { %1830 = vmatpush1.bf16.msra.mxu0 %v4065_v39  ;;  %1873 = vmatpush1.bf16.msra.mxu1 %v4069_v40 }
 0x38b   : > { %1831 = vmatprep.subr.bf16.mxu0 %v4073_v41  ;;  %1874 = vmatprep.subr.bf16.mxu1 %v4077_v42 }
 0x38c   : > { %1861 = vmatprep.mubr.bf16.mxu0 %v3584_v3  ;;  %1904 = vmatprep.mubr.bf16.mxu1 %v3584_v3 }
 0x38e   : > { %1832 = vmatpush1.bf16.msra.mxu0 %v4083_v43  ;;  %1875 = vmatpush1.bf16.msra.mxu1 %v4087_v45 }
 0x38f   : > { %1833 = vmatprep.subr.bf16.mxu0 %v4091_v46  ;;  %1876 = vmatprep.subr.bf16.mxu1 %v4095_v34 }
 0x392   : > { %1834 = vmatpush1.bf16.msra.mxu0 %v4099_v35  ;;  %1877 = vmatpush1.bf16.msra.mxu1 %v4103_v47 }
 0x393   : > { %1835 = vmatprep.subr.bf16.mxu0 %v4107_v48  ;;  %1878 = vmatprep.subr.bf16.mxu1 %v4111_v49 }
 0x396   : > { %1836 = vmatpush1.bf16.msra.mxu0 %v4115_v50  ;;  %1879 = vmatpush1.bf16.msra.mxu1 %v4119_v51 }
 0x397   : > { %1837 = vmatprep.subr.bf16.mxu0 %v4123_v52  ;;  %1880 = vmatprep.subr.bf16.mxu1 %v4127_v54 }
 0x39a   : > { %1838 = vmatpush1.bf16.msra.mxu0 %v4131_v55  ;;  %1881 = vmatpush1.bf16.msra.mxu1 %v4135_v56 }
 0x39b   : > { %1839 = vmatprep.subr.bf16.mxu0 %v4139_v57  ;;  %1882 = vmatprep.subr.bf16.mxu1 %v4143_v58 }
 0x39e   : > { %1840 = vmatpush1.bf16.msra.mxu0 %v4147_v59  ;;  %1883 = vmatpush1.bf16.msra.mxu1 %v4151_v60 }
 0x39f   : > { %1841 = vmatprep.subr.bf16.mxu0 %v4155_v61  ;;  %1884 = vmatprep.subr.bf16.mxu1 %v4159_v63 }
 0x3a2   : > { %1842 = vmatpush1.bf16.msra.mxu0 %v4163_v0  ;;  %1885 = vmatpush1.bf16.msra.mxu1 %v4231_v11 }
 0x3a3   : > { %1843 = vmatprep.subr.bf16.mxu0 %v4168_v1  ;;  %1886 = vmatprep.subr.bf16.mxu1 %v4236_v12 }
 0x3a6   : > { %1844 = vmatpush1.bf16.msra.mxu0 %v4240_v13  ;;  %1887 = vmatpush1.bf16.msra.mxu1 %v4244_v14 }
 0x3a7   : > { %1997 = vmatprep.subr.bf16.mxu0 %v4175_v15  ;;  %2040 = vmatprep.subr.bf16.mxu1 %v4179_v17 }
 0x449   : > { %v1696_v38 = vpop.f32.mrf.mxu0  ;;  %v1739_v2 = vpop.f32.mrf.mxu1 }
 0x44a   : > { %v1748_v7 = vadd.f32 %v2909_v37, %v1696_v38  ;;  %v1750_v62 = vadd.f32 %v2911_v53, %v1739_v2 }
 0x44b   : > { %v1698_v5 = vpop.f32.mrf.mxu0  ;;  %v1741_v16 = vpop.f32.mrf.mxu1 }
 0x44c   : > { %v2917_v6 = vmul.f32 -1.442695, %v1748_v7  ;;  %v1749_v21 = vadd.f32 %v2910_v4, %v1698_v5  ;;  %v1751_v32 = vadd.f32 %v2912_v30, %v1741_v16  ;;  %v2915_v4 = vld [vmem:[%s4250_s14 + $0xf0] sm:$0xff]  ;;  %s4437_s14 = scalar_lea.vmem [#allocation4], %s2980_s13 }
 0x44d   : > { %v1700_v19 = vpop.f32.mrf.mxu0  ;;  %v1743_v23 = vpop.f32.mrf.mxu1 }
 0x44e   : > { %3335 = vpow2.f32 %v2917_v6  ;;  %v2919_v22 = vmul.f32 -1.442695, %v1749_v21  ;;  %v1752_v20 = vadd.f32 %v2913_v18, %v1700_v19  ;;  %v2921_v10 = vmul.f32 -1.442695, %v1751_v32 }
 0x44f   : > { %v1702_v26 = vpop.f32.mrf.mxu0  ;;  %v1745_v31 = vpop.f32.mrf.mxu1  ;;  %v1754_v6 = vadd.f32 %v2915_v4, %v1743_v23 }
 0x450   : > { %3337 = vpow2.f32 %v2919_v22  ;;  %v2918_v27 = vmul.f32 -1.442695, %v1752_v20  ;;  %v1753_v28 = vadd.f32 %v2914_v25, %v1702_v26  ;;  %v1755_v8 = vadd.f32 %v2916_v36, %v1745_v31 }
 0x452   : > { %3339 = vpow2.f32 %v2918_v27  ;;  %v2920_v24 = vmul.f32 -1.442695, %v1753_v28  ;;  %v2922_v38 = vmul.f32 -1.442695, %v1755_v8 }
 0x454   : > { %3341 = vpow2.f32 %v2920_v24 }
 0x455   : > { %3343 = vtanh.f32 %v1750_v62 }
 0x45b   : > { %v3336_v9 = vpop.eup %3335 }
 0x45c   : > { %v1762_v44 = vadd.f32 1.0, %v3336_v9 }
 0x45d   : > { %v3338_v37 = vpop.eup %3337 }
 0x45e   : > { %3345 = vrcp.f32 %v1762_v44  ;;  %v1774_v7 = vadd.f32 1.0, %v3338_v37 }
 0x45f   : > { %v3340_v5 = vpop.eup %3339  ;;  %3347 = vpow2.f32 %v2921_v10 }
 0x460   : > { %3349 = vrcp.f32 %v1774_v7  ;;  %v1763_v21 = vadd.f32 1.0, %v3340_v5 }
 0x461   : > { %v3342_v18 = vpop.eup %3341  ;;  %3351 = vpow2.f32 %v2922_v38 }
 0x462   : > { %3353 = vrcp.f32 %v1763_v21  ;;  %v1775_v19 = vadd.f32 1.0, %v3342_v18  ;;  %v3344_v2 = vpop.eup %3343 }
 0x463   : > { %3355 = vtanh.f32 %v1754_v6  ;;  %v1822_v6 = vld [vmem:[%s4307_s22 + $0x8] sm:$0xff] }
 0x464   : > { %3357 = vrcp.f32 %v1775_v19 }
 0x46b   : > { %v3346_v22 = vpop.eup %3345 }
 0x46c   : > { %v3348_v16 = vpop.eup %3347  ;;  %v1796_v26 = vmul.f32 %v3346_v22, %v3344_v2  ;;  %v1825_v2 = vld [vmem:[%s4307_s22 + $0x20] sm:$0xff] }
 0x46d   : > { %v3350_v20 = vpop.eup %3349  ;;  %v1788_v24 = vadd.f32 1.0, %v3348_v16 }
 0x46e   : > { %v3352_v25 = vpop.eup %3351  ;;  %v1794_v27 = vmul.f32 %v3350_v20, %v4194_v29 }
 0x46f   : > { %v3354_v28 = vpop.eup %3353  ;;  %v1789_v32 = vadd.f32 1.0, %v3352_v25  ;;  %3359 = vrcp.f32 %v1788_v24 }
 0x470   : > { %v3356_v23 = vpop.eup %3355  ;;  %v4261_v30 = vadd.f32 %v1796_v26, %v1794_v27  ;;  %v1826_v26 = vld [vmem:[%s4307_s22 + $0x28] sm:$0xff] }
 0x471   : > { %v3358_v31 = vpop.eup %3357  ;;  %v1797_v53 = vmul.f32 %v3356_v23, %v3354_v28 }
 0x472   : > { %v1795_v36 = vmul.f32 %v3358_v31, %v4197_v33  ;;  %3361 = vtanh.f32 %v4261_v30  ;;  %v1821_v33 = vld [vmem:[%s4307_s22] sm:$0xff] }
 0x473   : > { %3363 = vrcp.f32 %v1789_v32  ;;  %v1824_v32 = vld [vmem:[%s4307_s22 + $0x18] sm:$0xff] }
 0x474   : > { %v4264_v62 = vadd.f32 %v1797_v53, %v1795_v36 }
 0x476   : > { %3365 = vtanh.f32 %v4264_v62 }
 0x47c   : > { %v3360_v29 = vpop.eup %3359 }
 0x47f   : > { %v3362_v8 = vpop.eup %3361 }
 0x480   : > { %v3364_v9 = vpop.eup %3363  ;;  %v1802_v44 = vmul.f32 %v3362_v8, %v3360_v29  ;;  %v1823_v29 = vld [vmem:[%s4307_s22 + $0x10] sm:$0xff]  ;;  %v1828_v8 = vld [vmem:[%s4307_s22 + $0x38] sm:$0xff] }
 0x483   : > { %v3366_v10 = vpop.eup %3365 }
 0x484   : > { %v1803_v37 = vmul.f32 %v3366_v10, %v3364_v9 }
 0x486   : > { %v1804_v38 = vpack.c.bf16 %v1803_v37, %v1802_v44 }
 0x488   : > { %3073 = vst [vmem:[%s2671_s26 + $0x18] sm:$0xff] %v1804_v38   ;;  %1862 = vmatmul.mubr.bf16.vlgmr.msra.gmra.mxu0 %v1804_v38  ;;  %1905 = vmatmul.mubr.bf16.vlgmr.msra.gmra.mxu1 %v1804_v38  ;;  %s2699_s26 = scalar_lea.vmem %s3702_s28, %s2997_s25 [#allocation5] }
 0x489   : > { %1998 = vmatpush1.bf16.msra.mxu0 %v4065_v39  ;;  %2041 = vmatpush1.bf16.msra.mxu1 %v4069_v40 }
 0x48a   : > { %1999 = vmatprep.subr.bf16.mxu0 %v4073_v41  ;;  %2042 = vmatprep.subr.bf16.mxu1 %v4077_v42 }
 0x48b   : > { %2029 = vmatprep.mubr.bf16.mxu0 %v3584_v3  ;;  %2072 = vmatprep.mubr.bf16.mxu1 %v3584_v3 }
 0x48d   : > { %2000 = vmatpush1.bf16.msra.mxu0 %v4083_v43  ;;  %2043 = vmatpush1.bf16.msra.mxu1 %v4087_v45 }
 0x48e   : > { %2001 = vmatprep.subr.bf16.mxu0 %v4091_v46  ;;  %2044 = vmatprep.subr.bf16.mxu1 %v4095_v34 }
 0x491   : > { %2002 = vmatpush1.bf16.msra.mxu0 %v4099_v35  ;;  %2045 = vmatpush1.bf16.msra.mxu1 %v4103_v47 }
 0x492   : > { %2003 = vmatprep.subr.bf16.mxu0 %v4107_v48  ;;  %2046 = vmatprep.subr.bf16.mxu1 %v4111_v49 }
 0x495   : > { %2004 = vmatpush1.bf16.msra.mxu0 %v4115_v50  ;;  %2047 = vmatpush1.bf16.msra.mxu1 %v4119_v51 }
 0x496   : > { %2005 = vmatprep.subr.bf16.mxu0 %v4123_v52  ;;  %2048 = vmatprep.subr.bf16.mxu1 %v4127_v54 }
 0x499   : > { %2006 = vmatpush1.bf16.msra.mxu0 %v4131_v55  ;;  %2049 = vmatpush1.bf16.msra.mxu1 %v4135_v56 }
 0x49a   : > { %2007 = vmatprep.subr.bf16.mxu0 %v4139_v57  ;;  %2050 = vmatprep.subr.bf16.mxu1 %v4143_v58 }
 0x49d   : > { %2008 = vmatpush1.bf16.msra.mxu0 %v4147_v59  ;;  %2051 = vmatpush1.bf16.msra.mxu1 %v4151_v60 }
 0x49e   : > { %2009 = vmatprep.subr.bf16.mxu0 %v4155_v61  ;;  %2052 = vmatprep.subr.bf16.mxu1 %v4159_v63 }
 0x4a1   : > { %2010 = vmatpush1.bf16.msra.mxu0 %v4163_v0  ;;  %2053 = vmatpush1.bf16.msra.mxu1 %v4231_v11 }
 0x4a2   : > { %2011 = vmatprep.subr.bf16.mxu0 %v4168_v1  ;;  %2054 = vmatprep.subr.bf16.mxu1 %v4236_v12 }
 0x4a5   : > { %2012 = vmatpush1.bf16.msra.mxu0 %v4240_v13  ;;  %2055 = vmatpush1.bf16.msra.mxu1 %v4244_v14 }
 0x4a6   : > { %2165 = vmatprep.subr.bf16.mxu0 %v4175_v15  ;;  %2208 = vmatprep.subr.bf16.mxu1 %v4179_v17 }
 0x548   : > { %v1863_v7 = vpop.f32.mrf.mxu0  ;;  %v1906_v5 = vpop.f32.mrf.mxu1 }
 0x549   : > { %v1915_v4 = vadd.f32 %v1863_v7, %v1821_v33  ;;  %v1917_v9 = vadd.f32 %v1906_v5, %v1823_v29 }
 0x54a   : > { %v1865_v21 = vpop.f32.mrf.mxu0  ;;  %v1908_v20 = vpop.f32.mrf.mxu1 }
 0x54b   : > { %v2930_v18 = vmul.f32 -1.442695, %v1915_v4  ;;  %v1916_v19 = vadd.f32 %v1865_v21, %v1822_v6  ;;  %v1918_v36 = vadd.f32 %v1908_v20, %v1824_v32  ;;  %v1827_v6 = vld [vmem:[%s4307_s22 + $0x30] sm:$0xff] }
 0x54c   : > { %v1867_v22 = vpop.f32.mrf.mxu0  ;;  %v1910_v23 = vpop.f32.mrf.mxu1 }
 0x54d   : > { %3367 = vpow2.f32 %v2930_v18  ;;  %v2932_v16 = vmul.f32 -1.442695, %v1916_v19  ;;  %v1919_v25 = vadd.f32 %v1867_v22, %v1825_v2  ;;  %v2934_v37 = vmul.f32 -1.442695, %v1918_v36 }
 0x54e   : > { %v1869_v27 = vpop.f32.mrf.mxu0  ;;  %v1912_v53 = vpop.f32.mrf.mxu1  ;;  %v1921_v18 = vadd.f32 %v1910_v23, %v1827_v6 }
 0x54f   : > { %3369 = vpow2.f32 %v2932_v16  ;;  %v2931_v28 = vmul.f32 -1.442695, %v1919_v25  ;;  %v1920_v24 = vadd.f32 %v1869_v27, %v1826_v26  ;;  %v1922_v10 = vadd.f32 %v1912_v53, %v1828_v8 }
 0x551   : > { %3371 = vpow2.f32 %v2931_v28  ;;  %v2933_v31 = vmul.f32 -1.442695, %v1920_v24  ;;  %v2935_v7 = vmul.f32 -1.442695, %v1922_v10 }
 0x553   : > { %3373 = vpow2.f32 %v2933_v31 }
 0x554   : > { %3375 = vtanh.f32 %v1917_v9 }
 0x55a   : > { %v3368_v44 = vpop.eup %3367 }
 0x55b   : > { %v1929_v38 = vadd.f32 1.0, %v3368_v44 }
 0x55c   : > { %v3370_v33 = vpop.eup %3369 }
 0x55d   : > { %3377 = vrcp.f32 %v1929_v38  ;;  %v1941_v4 = vadd.f32 1.0, %v3370_v33 }
 0x55e   : > { %v3372_v21 = vpop.eup %3371  ;;  %3379 = vpow2.f32 %v2934_v37 }
 0x55f   : > { %3381 = vrcp.f32 %v1941_v4  ;;  %v1930_v19 = vadd.f32 1.0, %v3372_v21 }
 0x560   : > { %v3374_v2 = vpop.eup %3373  ;;  %3383 = vpow2.f32 %v2935_v7 }
 0x561   : > { %3385 = vrcp.f32 %v1930_v19  ;;  %v1942_v22 = vadd.f32 1.0, %v3374_v2  ;;  %v3376_v5 = vpop.eup %3375 }
 0x562   : > { %3387 = vtanh.f32 %v1921_v18  ;;  %v2942_v18 = vld [vmem:[%s4363_s5 + $0x148] sm:$0xff] }
 0x563   : > { %3389 = vrcp.f32 %v1942_v22 }
 0x56a   : > { %v3378_v16 = vpop.eup %3377 }
 0x56b   : > { %v3380_v20 = vpop.eup %3379  ;;  %v1963_v27 = vmul.f32 %v3378_v16, %v3376_v5  ;;  %v2945_v5 = vld [vmem:[%s4363_s5 + $0x160] sm:$0xff] }
 0x56c   : > { %v3382_v25 = vpop.eup %3381  ;;  %v1955_v31 = vadd.f32 1.0, %v3380_v20 }
 0x56d   : > { %v3384_v26 = vpop.eup %3383  ;;  %v1961_v28 = vmul.f32 %v3382_v25, %v4261_v30  ;;  %v2946_v25 = vld [vmem:[%s4363_s5 + $0x168] sm:$0xff] }
 0x56e   : > { %v3386_v24 = vpop.eup %3385  ;;  %v1956_v36 = vadd.f32 1.0, %v3384_v26  ;;  %3391 = vrcp.f32 %v1955_v31 }
 0x56f   : > { %v3388_v23 = vpop.eup %3387  ;;  %v4318_v32 = vadd.f32 %v1963_v27, %v1961_v28 }
 0x570   : > { %v3390_v53 = vpop.eup %3389  ;;  %v1964_v29 = vmul.f32 %v3388_v23, %v3386_v24  ;;  %v2944_v23 = vld [vmem:[%s4363_s5 + $0x158] sm:$0xff] }
 0x571   : > { %v1962_v8 = vmul.f32 %v3390_v53, %v4264_v62  ;;  %3393 = vtanh.f32 %v4318_v32  ;;  %v2941_v62 = vld [vmem:[%s4363_s5 + $0x140] sm:$0xff] }
 0x572   : > { %3395 = vrcp.f32 %v1956_v36 }
 0x573   : > { %v4321_v9 = vadd.f32 %v1964_v29, %v1962_v8  ;;  %v2943_v29 = vld [vmem:[%s4363_s5 + $0x150] sm:$0xff]  ;;  %v2948_v8 = vld [vmem:[%s4363_s5 + $0x178] sm:$0xff] }
 0x575   : > { %3397 = vtanh.f32 %v4321_v9 }
 0x57b   : > { %v3392_v30 = vpop.eup %3391 }
 0x57e   : > { %v3394_v10 = vpop.eup %3393 }
 0x57f   : > { %v3396_v44 = vpop.eup %3395  ;;  %v1969_v38 = vmul.f32 %v3394_v10, %v3392_v30 }
 0x582   : > { %v3398_v37 = vpop.eup %3397 }
 0x583   : > { %v1970_v33 = vmul.f32 %v3398_v37, %v3396_v44 }
 0x585   : > { %v1971_v7 = vpack.c.bf16 %v1970_v33, %v1969_v38 }
 0x587   : > { %3055 = vst [vmem:[%s1981_s24] sm:$0xff] %v1971_v7   ;;  %2030 = vmatmul.mubr.bf16.vlgmr.msra.gmra.mxu0 %v1971_v7  ;;  %2073 = vmatmul.mubr.bf16.vlgmr.msra.gmra.mxu1 %v1971_v7  ;;  %s2507_s24 = scalar_lea.vmem (%p3662_p4), %s4499_s4, %s3004_s7 }
 0x588   : > { %2166 = vmatpush1.bf16.msra.mxu0 %v4065_v39  ;;  %2209 = vmatpush1.bf16.msra.mxu1 %v4069_v40 }
 0x589   : > { %2167 = vmatprep.subr.bf16.mxu0 %v4073_v41  ;;  %2210 = vmatprep.subr.bf16.mxu1 %v4077_v42 }
 0x58a   : > { %2197 = vmatprep.mubr.bf16.mxu0 %v3584_v3  ;;  %2240 = vmatprep.mubr.bf16.mxu1 %v3584_v3 }
 0x58c   : > { %2168 = vmatpush1.bf16.msra.mxu0 %v4083_v43  ;;  %2211 = vmatpush1.bf16.msra.mxu1 %v4087_v45 }
 0x58d   : > { %2169 = vmatprep.subr.bf16.mxu0 %v4091_v46  ;;  %2212 = vmatprep.subr.bf16.mxu1 %v4095_v34 }
 0x590   : > { %2170 = vmatpush1.bf16.msra.mxu0 %v4099_v35  ;;  %2213 = vmatpush1.bf16.msra.mxu1 %v4103_v47 }
 0x591   : > { %2171 = vmatprep.subr.bf16.mxu0 %v4107_v48  ;;  %2214 = vmatprep.subr.bf16.mxu1 %v4111_v49 }
 0x594   : > { %2172 = vmatpush1.bf16.msra.mxu0 %v4115_v50  ;;  %2215 = vmatpush1.bf16.msra.mxu1 %v4119_v51 }
 0x595   : > { %2173 = vmatprep.subr.bf16.mxu0 %v4123_v52  ;;  %2216 = vmatprep.subr.bf16.mxu1 %v4127_v54 }
 0x598   : > { %2174 = vmatpush1.bf16.msra.mxu0 %v4131_v55  ;;  %2217 = vmatpush1.bf16.msra.mxu1 %v4135_v56 }
 0x599   : > { %2175 = vmatprep.subr.bf16.mxu0 %v4139_v57  ;;  %2218 = vmatprep.subr.bf16.mxu1 %v4143_v58 }
 0x59c   : > { %2176 = vmatpush1.bf16.msra.mxu0 %v4147_v59  ;;  %2219 = vmatpush1.bf16.msra.mxu1 %v4151_v60 }
 0x59d   : > { %2177 = vmatprep.subr.bf16.mxu0 %v4155_v61  ;;  %2220 = vmatprep.subr.bf16.mxu1 %v4159_v63 }
 0x5a0   : > { %2178 = vmatpush1.bf16.msra.mxu0 %v4163_v0  ;;  %2221 = vmatpush1.bf16.msra.mxu1 %v4231_v11 }
 0x5a1   : > { %2179 = vmatprep.subr.bf16.mxu0 %v4168_v1  ;;  %2222 = vmatprep.subr.bf16.mxu1 %v4236_v12 }
 0x5a4   : > { %2180 = vmatpush1.bf16.msra.mxu0 %v4240_v13  ;;  %2223 = vmatpush1.bf16.msra.mxu1 %v4244_v14 }
 0x5a5   : > { %2333 = vmatprep.subr.bf16.mxu0 %v4175_v15  ;;  %2376 = vmatprep.subr.bf16.mxu1 %v4179_v17 }
 0x647   : > { %v2031_v4 = vpop.f32.mrf.mxu0  ;;  %v2074_v21 = vpop.f32.mrf.mxu1 }
 0x648   : > { %v2083_v6 = vadd.f32 %v2941_v62, %v2031_v4  ;;  %v2085_v30 = vadd.f32 %v2943_v29, %v2074_v21  ;;  %v2947_v4 = vld [vmem:[%s4363_s5 + $0x170] sm:$0xff] }
 0x649   : > { %v2033_v19 = vpop.f32.mrf.mxu0  ;;  %v2076_v16 = vpop.f32.mrf.mxu1 }
 0x64a   : > { %v2949_v2 = vmul.f32 -1.442695, %v2083_v6  ;;  %v2084_v22 = vadd.f32 %v2942_v18, %v2033_v19  ;;  %v2086_v36 = vadd.f32 %v2944_v23, %v2076_v16 }
 0x64b   : > { %v2035_v15 = vpop.f32.mrf.mxu0  ;;  %v2078_v24 = vpop.f32.mrf.mxu1 }
 0x64c   : > { %3399 = vpow2.f32 %v2949_v2  ;;  %v2951_v17 = vmul.f32 -1.442695, %v2084_v22  ;;  %v2087_v20 = vadd.f32 %v2945_v5, %v2035_v15  ;;  %v2953_v37 = vmul.f32 -1.442695, %v2086_v36 }
 0x64d   : > { %v2037_v26 = vpop.f32.mrf.mxu0  ;;  %v2080_v53 = vpop.f32.mrf.mxu1  ;;  %v2089_v18 = vadd.f32 %v2947_v4, %v2078_v24 }
 0x64e   : > { %3401 = vpow2.f32 %v2951_v17  ;;  %v2950_v27 = vmul.f32 -1.442695, %v2087_v20  ;;  %v2088_v28 = vadd.f32 %v2946_v25, %v2037_v26  ;;  %v2090_v10 = vadd.f32 %v2948_v8, %v2080_v53 }
 0x650   : > { %3403 = vpow2.f32 %v2950_v27  ;;  %v2952_v31 = vmul.f32 -1.442695, %v2088_v28  ;;  %v2954_v7 = vmul.f32 -1.442695, %v2090_v10 }
 0x652   : > { %3405 = vpow2.f32 %v2952_v31 }
 0x653   : > { %3407 = vtanh.f32 %v2085_v30 }
 0x659   : > { %v3400_v44 = vpop.eup %3399 }
 0x65a   : > { %v2097_v38 = vadd.f32 1.0, %v3400_v44 }
 0x65b   : > { %v3402_v33 = vpop.eup %3401 }
 0x65c   : > { %3409 = vrcp.f32 %v2097_v38  ;;  %v2109_v62 = vadd.f32 1.0, %v3402_v33  ;;  %v2967_v33 = vld [vmem:[%s4416_s10 + $0x1b0] sm:$0xff] }
 0x65d   : > { %v3404_v6 = vpop.eup %3403  ;;  %3411 = vpow2.f32 %v2953_v37 }
 0x65e   : > { %3413 = vrcp.f32 %v2109_v62  ;;  %v2098_v19 = vadd.f32 1.0, %v3404_v6 }
 0x65f   : > { %v3406_v2 = vpop.eup %3405  ;;  %3415 = vpow2.f32 %v2954_v7 }
 0x660   : > { %3417 = vrcp.f32 %v2098_v19  ;;  %v2110_v22 = vadd.f32 1.0, %v3406_v2  ;;  %v3408_v21 = vpop.eup %3407 }
 0x661   : > { %3419 = vtanh.f32 %v2089_v18 }
 0x662   : > { %3421 = vrcp.f32 %v2110_v22 }
 0x669   : > { %v3410_v5 = vpop.eup %3409 }
 0x66a   : > { %v3412_v15 = vpop.eup %3411  ;;  %v2131_v20 = vmul.f32 %v3410_v5, %v3408_v21 }
 0x66b   : > { %v3414_v17 = vpop.eup %3413  ;;  %v2123_v27 = vadd.f32 1.0, %v3412_v15 }
 0x66c   : > { %v3416_v16 = vpop.eup %3415  ;;  %v2129_v25 = vmul.f32 %v3414_v17, %v4318_v32 }
 0x66d   : > { %v3418_v26 = vpop.eup %3417  ;;  %v2124_v23 = vadd.f32 1.0, %v3416_v16  ;;  %3423 = vrcp.f32 %v2123_v27 }
 0x66e   : > { %v3420_v28 = vpop.eup %3419  ;;  %v4374_v24 = vadd.f32 %v2131_v20, %v2129_v25 }
 0x66f   : > { %v3422_v31 = vpop.eup %3421  ;;  %v2132_v53 = vmul.f32 %v3420_v28, %v3418_v26 }
 0x670   : > { %v2130_v36 = vmul.f32 %v3422_v31, %v4321_v9  ;;  %3425 = vtanh.f32 %v4374_v24 }
 0x671   : > { %3427 = vrcp.f32 %v2124_v23 }
 0x672   : > { %v4377_v29 = vadd.f32 %v2132_v53, %v2130_v36 }
 0x674   : > { %3429 = vtanh.f32 %v4377_v29 }
 0x67a   : > { %v3424_v32 = vpop.eup %3423 }
 0x67d   : > { %v3426_v8 = vpop.eup %3425 }
 0x67e   : > { %v3428_v30 = vpop.eup %3427  ;;  %v2137_v44 = vmul.f32 %v3426_v8, %v3424_v32 }
 0x681   : > { %v3430_v10 = vpop.eup %3429 }
 0x682   : > { %v2138_v37 = vmul.f32 %v3430_v10, %v3428_v30 }
 0x684   : > { %v2139_v38 = vpack.c.bf16 %v2138_v37, %v2137_v44 }
 0x686   : > { %3074 = vst [vmem:[%s2683_s8 + $0x28] sm:$0xff] %v2139_v38   ;;  %2198 = vmatmul.mubr.bf16.vlgmr.msra.gmra.mxu0 %v2139_v38  ;;  %2241 = vmatmul.mubr.bf16.vlgmr.msra.gmra.mxu1 %v2139_v38 }
 0x687   : > { %2334 = vmatpush1.bf16.msra.mxu0 %v4065_v39  ;;  %2377 = vmatpush1.bf16.msra.mxu1 %v4069_v40 }
 0x688   : > { %2335 = vmatprep.subr.bf16.mxu0 %v4073_v41  ;;  %2378 = vmatprep.subr.bf16.mxu1 %v4077_v42  ;;  %v2962_v42 = vld [vmem:[%s4416_s10 + $0x188] sm:$0xff] }
 0x689   : > { %2365 = vmatprep.mubr.bf16.mxu0 %v3584_v3  ;;  %2408 = vmatprep.mubr.bf16.mxu1 %v3584_v3  ;;  %v2961_v3 = vld [vmem:[%s4416_s10 + $0x180] sm:$0xff] }
 0x68b   : > { %2336 = vmatpush1.bf16.msra.mxu0 %v4083_v43  ;;  %2379 = vmatpush1.bf16.msra.mxu1 %v4087_v45 }
 0x68c   : > { %2337 = vmatprep.subr.bf16.mxu0 %v4091_v46  ;;  %2380 = vmatprep.subr.bf16.mxu1 %v4095_v34  ;;  %v2965_v34 = vld [vmem:[%s4416_s10 + $0x1a0] sm:$0xff] }
 0x68f   : > { %2338 = vmatpush1.bf16.msra.mxu0 %v4099_v35  ;;  %2381 = vmatpush1.bf16.msra.mxu1 %v4103_v47 }
 0x690   : > { %2339 = vmatprep.subr.bf16.mxu0 %v4107_v48  ;;  %2382 = vmatprep.subr.bf16.mxu1 %v4111_v49 }
 0x693   : > { %2340 = vmatpush1.bf16.msra.mxu0 %v4115_v50  ;;  %2383 = vmatpush1.bf16.msra.mxu1 %v4119_v51  ;;  %v2966_v50 = vld [vmem:[%s4416_s10 + $0x1a8] sm:$0xff] }
 0x694   : > { %2341 = vmatprep.subr.bf16.mxu0 %v4123_v52  ;;  %2384 = vmatprep.subr.bf16.mxu1 %v4127_v54 }
 0x697   : > { %2342 = vmatpush1.bf16.msra.mxu0 %v4131_v55  ;;  %2385 = vmatpush1.bf16.msra.mxu1 %v4135_v56 }
 0x698   : > { %2343 = vmatprep.subr.bf16.mxu0 %v4139_v57  ;;  %2386 = vmatprep.subr.bf16.mxu1 %v4143_v58  ;;  %v2964_v57 = vld [vmem:[%s4416_s10 + $0x198] sm:$0xff] }
 0x69b   : > { %2344 = vmatpush1.bf16.msra.mxu0 %v4147_v59  ;;  %2387 = vmatpush1.bf16.msra.mxu1 %v4151_v60  ;;  %v2963_v60 = vld [vmem:[%s4416_s10 + $0x190] sm:$0xff] }
 0x69c   : > { %2345 = vmatprep.subr.bf16.mxu0 %v4155_v61  ;;  %2388 = vmatprep.subr.bf16.mxu1 %v4159_v63  ;;  %v2968_v61 = vld [vmem:[%s4416_s10 + $0x1b8] sm:$0xff] }
 0x69f   : > { %2346 = vmatpush1.bf16.msra.mxu0 %v4163_v0  ;;  %2389 = vmatpush1.bf16.msra.mxu1 %v4231_v11 }
 0x6a0   : > { %2347 = vmatprep.subr.bf16.mxu0 %v4168_v1  ;;  %2390 = vmatprep.subr.bf16.mxu1 %v4236_v12 }
 0x6a3   : > { %2348 = vmatpush1.bf16.msra.mxu0 %v4240_v13  ;;  %2391 = vmatpush1.bf16.msra.mxu1 %v4244_v14 }
 0x746   : > { %v2199_v39 = vpop.f32.mrf.mxu0  ;;  %v2242_v41 = vpop.f32.mrf.mxu1 }
 0x747   : > { %v2251_v40 = vadd.f32 %v2961_v3, %v2199_v39  ;;  %v2253_v63 = vadd.f32 %v2963_v60, %v2242_v41  ;;  %v2982_v39 = vld [vmem:[%s4437_s14 + $0x1c8] sm:$0xff]  ;;  %v2983_v60 = vld [vmem:[%s4437_s14 + $0x1d0] sm:$0xff] }
 0x748   : > { %v2201_v43 = vpop.f32.mrf.mxu0  ;;  %v2244_v48 = vpop.f32.mrf.mxu1 }
 0x749   : > { %v2969_v45 = vmul.f32 -1.442695, %v2251_v40  ;;  %v2252_v46 = vadd.f32 %v2962_v42, %v2201_v43  ;;  %v2254_v59 = vadd.f32 %v2964_v57, %v2244_v48  ;;  %v2985_v43 = vld [vmem:[%s4437_s14 + $0x1e0] sm:$0xff]  ;;  %v2988_v57 = vld [vmem:[%s4437_s14 + $0x1f8] sm:$0xff] }
 0x74a   : > { %v2203_v35 = vpop.f32.mrf.mxu0  ;;  %v2246_v55 = vpop.f32.mrf.mxu1 }
 0x74b   : > { %3431 = vpow2.f32 %v2969_v45  ;;  %v2971_v47 = vmul.f32 -1.442695, %v2252_v46  ;;  %v2255_v49 = vadd.f32 %v2965_v34, %v2203_v35  ;;  %v2973_v11 = vmul.f32 -1.442695, %v2254_v59 }
 0x74c   : > { %v2205_v51 = vpop.f32.mrf.mxu0  ;;  %v2248_v58 = vpop.f32.mrf.mxu1  ;;  %v2257_v62 = vadd.f32 %v2967_v33, %v2246_v55 }
 0x74d   : > { %3433 = vpow2.f32 %v2971_v47  ;;  %v2970_v52 = vmul.f32 -1.442695, %v2255_v49  ;;  %v2256_v54 = vadd.f32 %v2966_v50, %v2205_v51  ;;  %v2258_v0 = vadd.f32 %v2968_v61, %v2248_v58  ;;  %v2986_v47 = vld [vmem:[%s4437_s14 + $0x1e8] sm:$0xff] }
 0x74f   : > { %3435 = vpow2.f32 %v2970_v52  ;;  %v2972_v56 = vmul.f32 -1.442695, %v2256_v54  ;;  %v2974_v14 = vmul.f32 -1.442695, %v2258_v0  ;;  %v2984_v54 = vld [vmem:[%s4437_s14 + $0x1d8] sm:$0xff] }
 0x751   : > { %3437 = vpow2.f32 %v2972_v56 }
 0x752   : > { %3439 = vtanh.f32 %v2253_v63 }
 0x758   : > { %v3432_v1 = vpop.eup %3431 }
 0x759   : > { %v2265_v12 = vadd.f32 1.0, %v3432_v1 }
 0x75a   : > { %v3434_v13 = vpop.eup %3433 }
 0x75b   : > { %3441 = vrcp.f32 %v2265_v12  ;;  %v2277_v9 = vadd.f32 1.0, %v3434_v13  ;;  %v2987_v13 = vld [vmem:[%s4437_s14 + $0x1f0] sm:$0xff] }
 0x75c   : > { %v3436_v7 = vpop.eup %3435  ;;  %3443 = vpow2.f32 %v2973_v11 }
 0x75d   : > { %3445 = vrcp.f32 %v2277_v9  ;;  %v2266_v4 = vadd.f32 1.0, %v3436_v7 }
 0x75e   : > { %v3438_v6 = vpop.eup %3437  ;;  %3447 = vpow2.f32 %v2974_v14 }
 0x75f   : > { %3449 = vrcp.f32 %v2266_v4  ;;  %v2278_v18 = vadd.f32 1.0, %v3438_v6  ;;  %v3440_v19 = vpop.eup %3439 }
 0x760   : > { %3451 = vtanh.f32 %v2257_v62 }
 0x761   : > { %3453 = vrcp.f32 %v2278_v18 }
 0x768   : > { %v3442_v2 = vpop.eup %3441 }
 0x769   : > { %v3444_v22 = vpop.eup %3443  ;;  %v2299_v15 = vmul.f32 %v3442_v2, %v3440_v19 }
 0x76a   : > { %v3446_v21 = vpop.eup %3445  ;;  %v2291_v20 = vadd.f32 1.0, %v3444_v22 }
 0x76b   : > { %v3448_v5 = vpop.eup %3447  ;;  %v2297_v17 = vmul.f32 %v3446_v21, %v4374_v24 }
 0x76c   : > { %v3450_v16 = vpop.eup %3449  ;;  %v2292_v28 = vadd.f32 1.0, %v3448_v5  ;;  %3455 = vrcp.f32 %v2291_v20 }
 0x76d   : > { %v3452_v25 = vpop.eup %3451  ;;  %v4427_v26 = vadd.f32 %v2299_v15, %v2297_v17 }
 0x76e   : > { %v3454_v27 = vpop.eup %3453  ;;  %v2300_v31 = vmul.f32 %v3452_v25, %v3450_v16 }
 0x76f   : > { %v2298_v23 = vmul.f32 %v3454_v27, %v4377_v29  ;;  %3457 = vtanh.f32 %v4427_v26  ;;  %v2981_v29 = vld [vmem:[%s4437_s14 + $0x1c0] sm:$0xff] }
 0x770   : > { %3459 = vrcp.f32 %v2292_v28 }
 0x771   : > { %v4430_v53 = vadd.f32 %v2300_v31, %v2298_v23 }
 0x773   : > { %3461 = vtanh.f32 %v4430_v53 }
 0x779   : > { %v3456_v24 = vpop.eup %3455 }
 0x77c   : > { %v3458_v36 = vpop.eup %3457 }
 0x77d   : > { %v3460_v32 = vpop.eup %3459  ;;  %v2305_v30 = vmul.f32 %v3458_v36, %v3456_v24 }
 0x780   : > { %v3462_v8 = vpop.eup %3461 }
 0x781   : > { %v2306_v10 = vmul.f32 %v3462_v8, %v3460_v32 }
 0x783   : > { %v2307_v44 = vpack.c.bf16 %v2306_v10, %v2305_v30 }
 0x785   : > { %3075 = vst [vmem:[%s2691_s11 + $0x30] sm:$0xff] %v2307_v44   ;;  %2366 = vmatmul.mubr.bf16.vlgmr.msra.gmra.mxu0 %v2307_v44  ;;  %2409 = vmatmul.mubr.bf16.vlgmr.msra.gmra.mxu1 %v2307_v44 }
 0x845   : > { %v2367_v37 = vpop.f32.mrf.mxu0  ;;  %v2410_v3 = vpop.f32.mrf.mxu1 }
 0x846   : > { %v2419_v38 = vadd.f32 %v2981_v29, %v2367_v37  ;;  %v2421_v63 = vadd.f32 %v2983_v60, %v2410_v3 }
 0x847   : > { %v2369_v40 = vpop.f32.mrf.mxu0  ;;  %v2412_v34 = vpop.f32.mrf.mxu1 }
 0x848   : > { %v2989_v41 = vmul.f32 -1.442695, %v2419_v38  ;;  %v2420_v42 = vadd.f32 %v2982_v39, %v2369_v40  ;;  %v2422_v55 = vadd.f32 %v2984_v54, %v2412_v34 }
 0x849   : > { %v2371_v45 = vpop.f32.mrf.mxu0  ;;  %v2414_v51 = vpop.f32.mrf.mxu1 }
 0x84a   : > { %3463 = vpow2.f32 %v2989_v41  ;;  %v2991_v46 = vmul.f32 -1.442695, %v2420_v42  ;;  %v2423_v35 = vadd.f32 %v2985_v43, %v2371_v45  ;;  %v2993_v58 = vmul.f32 -1.442695, %v2422_v55 }
 0x84b   : > { %v2373_v48 = vpop.f32.mrf.mxu0  ;;  %v2416_v56 = vpop.f32.mrf.mxu1  ;;  %v2425_v9 = vadd.f32 %v2987_v13, %v2414_v51 }
 0x84c   : > { %3465 = vpow2.f32 %v2991_v46  ;;  %v2990_v49 = vmul.f32 -1.442695, %v2423_v35  ;;  %v2424_v50 = vadd.f32 %v2986_v47, %v2373_v48  ;;  %v2426_v59 = vadd.f32 %v2988_v57, %v2416_v56 }
 0x84e   : > { %3467 = vpow2.f32 %v2990_v49  ;;  %v2992_v52 = vmul.f32 -1.442695, %v2424_v50  ;;  %v2994_v11 = vmul.f32 -1.442695, %v2426_v59 }
 0x850   : > { %3469 = vpow2.f32 %v2992_v52 }
 0x851   : > { %3471 = vpow2.f32 %v2993_v58 }
 0x857   : > { %v3464_v61 = vpop.eup %3463 }
 0x858   : > { %v2433_v0 = vadd.f32 1.0, %v3464_v61 }
 0x859   : > { %v3466_v1 = vpop.eup %3465 }
 0x85a   : > { %3473 = vrcp.f32 %v2433_v0  ;;  %v2445_v12 = vadd.f32 1.0, %v3466_v1 }
 0x85b   : > { %v3468_v14 = vpop.eup %3467  ;;  %3475 = vtanh.f32 %v2421_v63 }
 0x85c   : > { %3477 = vrcp.f32 %v2445_v12  ;;  %v2434_v33 = vadd.f32 1.0, %v3468_v14 }
 0x85d   : > { %v3470_v7 = vpop.eup %3469  ;;  %3479 = vpow2.f32 %v2994_v11 }
 0x85e   : > { %3481 = vrcp.f32 %v2434_v33  ;;  %v2446_v62 = vadd.f32 1.0, %v3470_v7  ;;  %v3472_v4 = vpop.eup %3471 }
 0x85f   : > { %3483 = vtanh.f32 %v2425_v9  ;;  %v2459_v2 = vadd.f32 1.0, %v3472_v4 }
 0x860   : > { %3485 = vrcp.f32 %v2446_v62 }
 0x861   : > { %3487 = vrcp.f32 %v2459_v2 }
 0x867   : > { %v3474_v6 = vpop.eup %3473 }
 0x868   : > { %v3476_v18 = vpop.eup %3475 }
 0x869   : > { %v3478_v19 = vpop.eup %3477  ;;  %v2467_v21 = vmul.f32 %v3476_v18, %v3474_v6 }
 0x86a   : > { %v3480_v22 = vpop.eup %3479  ;;  %v2465_v5 = vmul.f32 %v3478_v19, %v4427_v26 }
 0x86b   : > { %v3482_v15 = vpop.eup %3481  ;;  %v2460_v25 = vadd.f32 1.0, %v3480_v22 }
 0x86c   : > { %v3484_v17 = vpop.eup %3483  ;;  %v2469_v16 = vadd.f32 %v2467_v21, %v2465_v5 }
 0x86d   : > { %v3486_v20 = vpop.eup %3485  ;;  %v2468_v27 = vmul.f32 %v3484_v17, %v3482_v15 }
 0x86e   : > { %3489 = vtanh.f32 %v2469_v16  ;;  %2490 = vst [vmem:[#allocation3 + $0x8] sm:$0xff] %v2469_v16  ;;  %v2466_v28 = vmul.f32 %v3486_v20, %v4430_v53  ;;  %v3488_v23 = vpop.eup %3487 }
 0x86f   : > { %3491 = vrcp.f32 %v2460_v25 }
 0x870   : > { %v2470_v31 = vadd.f32 %v2468_v27, %v2466_v28 }
 0x872   : > { %3493 = vtanh.f32 %v2470_v31  ;;  %2491 = vst [vmem:[#allocation3] sm:$0xff] %v2470_v31 }
 0x87b   : > { %v3490_v24 = vpop.eup %3489 }
 0x87c   : > { %v2473_v26 = vmul.f32 %v3490_v24, %v3488_v23  ;;  %v3492_v36 = vpop.eup %3491 }
 0x87e   : > { %2488 = vst [vmem:[#allocation2] sm:$0xff] %v2473_v26 }
 0x87f   : > { %v3494_v32 = vpop.eup %3493 }
 0x880   : > { %v2474_v8 = vmul.f32 %v3494_v32, %v3492_v36  ;;  %2498 = sbr.rel (!%p3662_p4) target bundleno = 2198 (0x896), region = 44 }
 0x882   : > { %v3069_v30 = vpack.c.bf16 %v2474_v8, %v2473_v26  ;;  %2489 = vst [vmem:[#allocation2 + $0x8] sm:$0xff] %v2474_v8 }
 0x884   : > { %3076 = vst [vmem:[%s2699_s26 + $0x38] sm:$0xff] %v3069_v30  }
 0x88b   : > { %v2524_v53 = vld [vmem:[%s3702_s28] sm:$0xf]  ;;  %v2526_v10 = vld [vmem:[%s3702_s28 + $0x4] sm:$0xf]  ;;  %v2528_v44 = vld [vmem:[%s3702_s28 + $0x8] sm:$0xf] }
 0x88c   : > { %v2530_v29 = vld [vmem:[%s3702_s28 + $0xc] sm:$0xf]  ;;  %v2532_v37 = vld [vmem:[%s3702_s28 + $0x10] sm:$0xf]  ;;  %v2534_v38 = vld [vmem:[%s3702_s28 + $0x14] sm:$0xf] }
 0x88d   : > { %v2536_v3 = vld [vmem:[%s3702_s28 + $0x18] sm:$0xf]  ;;  %v2538_v39 = vld [vmem:[%s3702_s28 + $0x1c] sm:$0xf]  ;;  %v2540_v40 = vld [vmem:[%s3702_s28 + $0x20] sm:$0xf] }
 0x88e   : > { %v2542_v41 = vld [vmem:[%s3702_s28 + $0x24] sm:$0xf]  ;;  %2525 = vst [vmem:[%s2507_s24] sm:$0xf] %v2524_v53  ;;  %2527 = vst [vmem:[%s2507_s24 + $0x8] sm:$0xf] %v2526_v10 }
 0x88f   : > { %2529 = vst [vmem:[%s2507_s24 + $0x10] sm:$0xf] %v2528_v44  ;;  %2531 = vst [vmem:[%s2507_s24 + $0x18] sm:$0xf] %v2530_v29  ;;  %v2544_v42 = vld [vmem:[%s3702_s28 + $0x28] sm:$0xf] }
 0x890   : > { %2533 = vst [vmem:[%s2507_s24 + $0x20] sm:$0xf] %v2532_v37  ;;  %2535 = vst [vmem:[%s2507_s24 + $0x28] sm:$0xf] %v2534_v38  ;;  %v2546_v43 = vld [vmem:[%s3702_s28 + $0x2c] sm:$0xf] }
 0x891   : > { %2537 = vst [vmem:[%s2507_s24 + $0x30] sm:$0xf] %v2536_v3  ;;  %2539 = vst [vmem:[%s2507_s24 + $0x38] sm:$0xf] %v2538_v39  ;;  %v2548_v45 = vld [vmem:[%s3702_s28 + $0x30] sm:$0xf] }
 0x892   : > { %2541 = vst [vmem:[%s2507_s24 + $0x40] sm:$0xf] %v2540_v40  ;;  %2543 = vst [vmem:[%s2507_s24 + $0x48] sm:$0xf] %v2542_v41  ;;  %v2550_v46 = vld [vmem:[%s3702_s28 + $0x34] sm:$0xf] }
 0x893   : > { %2545 = vst [vmem:[%s2507_s24 + $0x50] sm:$0xf] %v2544_v42  ;;  %2547 = vst [vmem:[%s2507_s24 + $0x58] sm:$0xf] %v2546_v43  ;;  %v2552_v34 = vld [vmem:[%s3702_s28 + $0x38] sm:$0xf] }
 0x894   : > { %2549 = vst [vmem:[%s2507_s24 + $0x60] sm:$0xf] %v2548_v45  ;;  %v2554_v35 = vld [vmem:[%s3702_s28 + $0x3c] sm:$0xf]  ;;  %2551 = vst [vmem:[%s2507_s24 + $0x68] sm:$0xf] %v2550_v46 }
 0x895   : > { %2553 = vst [vmem:[%s2507_s24 + $0x70] sm:$0xf] %v2552_v34  ;;  %2555 = vst [vmem:[%s2507_s24 + $0x78] sm:$0xf] %v2554_v35 }
 0x896 PF: > { %s14_s21 = sadd.s32 1, %s3581_s21   ;;  %s4505_s27 = sld [smem:[#allocation6_spill]] }
 0x897   : > { %p11_p12 = scmp.ge.s32.totalorder %s14_s21, 6   ;;  %s4506_s30 = sld [smem:[#allocation7_spill]] }
 0x898   : > { %s4507_s15 = smov %s3561_s16  ;;  %s4508_s16 = smov %s3671_s12 }
 0x899   : > { %s4509_s17 = smov %s3573_s19  ;;  %s4510_s18 = smov %s3577_s20 }
 0x89a   :  { %13 = sbr.rel (!%p11_p12) target bundleno = 4 (0x4), region = 136 }
 0x89c   : > { %s4511_s19 = smov %s4505_s27 }
 0x89d   : > { %s4512_s20 = smov %s4506_s30 }

// kernel: finetune_forward.12
= control target key start
LH: loop header
LB: loop body
LE: loop exit
PB: predicated region body
PF: predicated region fallthrough
CT: control target
= control target key end

     0   :  { %vm425_vm0 = vcmask 7168   ;;  %v843_v0 = vmov 0   ;;  %s1791_s1 = inlined_call_operand.vmem [shape: f32[16,16,1], index: 1, kind: input, shape index: {}]   ;;  %s1792_s0 = inlined_call_operand.vmem [shape: bf16[16,16,256], index: 0, kind: input, shape index: {}]   ;;  %s1793_s2 = inlined_call_operand.vmem [shape: f32[16,256], index: 2, kind: output, shape index: {0}]   ;;  %s1794_s3 = inlined_call_operand.vmem [shape: f32[16,256], index: 3, kind: output, shape index: {1}]  }
   0x1   :  { %838 = vset.pattern.permute.xlu1 %v843_v0  ;;  %837 = vset.pattern.permute.xlu0 %v843_v0  ;;  %v111_v1 = vld [vmem:[%s1791_s1 + $0x10] sm:$0xff]  ;;  %v109_v2 = vld [vmem:[%s1791_s1] sm:$0xff]  ;;  %v112_v5 = vld [vmem:[%s1791_s1 + $0x18] sm:$0xff] }
   0x2   :  { %153 = vperm.xlu1 %838, %v111_v1   ;;  %v427_v3 = vsel %vm425_vm0, %v111_v1, 0.0  ;;  %143 = vperm.xlu0 %837, %v109_v2   ;;  %v426_v4 = vsel %vm425_vm0, %v109_v2, 0.0  ;;  %v880_v6 = vld [vmem:[%s1791_s1 + $0x8] sm:$0xff]  ;;  %v458_v7 = vsel %vm425_vm0, %v112_v5, 0.0  ;;  %v113_v10 = vld [vmem:[%s1791_s1 + $0x20] sm:$0xff]  ;;  %v115_v16 = vld [vmem:[%s1791_s1 + $0x30] sm:$0xff] }
   0x3   :  { %v457_v8 = vsel %vm425_vm0, %v880_v6, 0.0  ;;  %v428_v9 = vadd.f32 %v427_v3, %v426_v4  ;;  %v114_v12 = vld [vmem:[%s1791_s1 + $0x28] sm:$0xff]  ;;  %v429_v13 = vsel %vm425_vm0, %v113_v10, 0.0  ;;  %v116_v18 = vld [vmem:[%s1791_s1 + $0x38] sm:$0xff]  ;;  %v431_v19 = vsel %vm425_vm0, %v115_v16, 0.0  ;;  %v117_v21 = vld [vmem:[%s1791_s1 + $0x40] sm:$0xff] }
   0x4   :  { %v459_v11 = vadd.f32 %v458_v7, %v457_v8  ;;  %v460_v14 = vsel %vm425_vm0, %v114_v12, 0.0  ;;  %v462_v20 = vsel %vm425_vm0, %v116_v18, 0.0  ;;  %v433_v23 = vsel %vm425_vm0, %v117_v21, 0.0  ;;  %v118_v25 = vld [vmem:[%s1791_s1 + $0x48] sm:$0xff]  ;;  %v119_v29 = vld [vmem:[%s1791_s1 + $0x50] sm:$0xff]  ;;  %v120_v37 = vld [vmem:[%s1791_s1 + $0x58] sm:$0xff] }
   0x5   :  { %v430_v15 = vadd.f32 %v429_v13, %v428_v9  ;;  %vm508_vm1 = vcmp.gt.f32.partialorder %v109_v2, 0.0  ;;  %vm511_vm2 = vcmp.gt.f32.partialorder %v112_v5, 0.0  ;;  %vm510_vm3 = vcmp.gt.f32.partialorder %v111_v1, 0.0  ;;  %v122_v41 = vld [vmem:[%s1791_s1 + $0x68] sm:$0xff]  ;;  %v121_v42 = vld [vmem:[%s1791_s1 + $0x60] sm:$0xff]  ;;  %v124_v45 = vld [vmem:[%s1791_s1 + $0x78] sm:$0xff] }
   0x6   :  { %158 = vperm.xlu1 %838, %v112_v5   ;;  %148 = vperm.xlu0 %837, %v880_v6   ;;  %v461_v17 = vadd.f32 %v460_v14, %v459_v11  ;;  %v910_v26 = vsel %vm508_vm1, 1, %v843_v0  ;;  %v913_v27 = vsel %vm511_vm2, 1, %v843_v0  ;;  %v464_v28 = vsel %vm425_vm0, %v118_v25, 0.0  ;;  %v123_v49 = vld [vmem:[%s1791_s1 + $0x70] sm:$0xff]  ;;  %v126_v52 = vld [vmem:[%s1791_s1 + $0x88] sm:$0xff]  ;;  %v125_v53 = vld [vmem:[%s1791_s1 + $0x80] sm:$0xff] }
   0x7   :  { %v432_v22 = vadd.f32 %v431_v19, %v430_v15  ;;  %v920_v30 = vsel %vm510_vm3, 1, %v843_v0  ;;  %vm513_vm4 = vcmp.gt.f32.partialorder %v114_v12, 0.0  ;;  %vm512_vm5 = vcmp.gt.f32.partialorder %v113_v10, 0.0  ;;  %v983_v57 = vld [vmem:[%s1791_s1 + $0x98] sm:$0xff]  ;;  %v127_v60 = vld [vmem:[%s1791_s1 + $0x90] sm:$0xff]  ;;  %v995_v61 = vld [vmem:[%s1791_s1 + $0xa8] sm:$0xff] }
   0x8   :  { %v463_v24 = vadd.f32 %v462_v20, %v461_v17  ;;  %v435_v31 = vsel %vm425_vm0, %v119_v29, 0.0  ;;  %v924_v32 = vsel %vm513_vm4, 1, %v843_v0  ;;  %v927_v33 = vsel %vm512_vm5, 1, %v843_v0  ;;  %v129_v2 = vld [vmem:[%s1791_s1 + $0xa0] sm:$0xff]  ;;  %v132_v5 = vld [vmem:[%s1791_s1 + $0xb8] sm:$0xff]  ;;  %v131_v7 = vld [vmem:[%s1791_s1 + $0xb0] sm:$0xff] }
   0x9   :  { %vm515_vm6 = vcmp.gt.f32.partialorder %v116_v18, 0.0  ;;  %v434_v34 = vadd.f32 %v433_v23, %v432_v22  ;;  %vm514_vm7 = vcmp.gt.f32.partialorder %v115_v16, 0.0  ;;  %vm517_vm8 = vcmp.gt.f32.partialorder %v118_v25, 0.0  ;;  %v134_v11 = vld [vmem:[%s1791_s1 + $0xc8] sm:$0xff]  ;;  %v133_v13 = vld [vmem:[%s1791_s1 + $0xc0] sm:$0xff]  ;;  %v136_v14 = vld [vmem:[%s1791_s1 + $0xd8] sm:$0xff] }
   0xa   :  { %168 = vperm.xlu1 %838, %v114_v12   ;;  %163 = vperm.xlu0 %837, %v113_v10   ;;  %v930_v35 = vsel %vm515_vm6, 1, %v843_v0  ;;  %v465_v36 = vadd.f32 %v464_v28, %v463_v24  ;;  %v936_v38 = vsel %vm514_vm7, 1, %v843_v0  ;;  %v939_v39 = vsel %vm517_vm8, 1, %v843_v0 }
   0xb   :  { %vm516_vm9 = vcmp.gt.f32.partialorder %v117_v21, 0.0  ;;  %v466_v40 = vsel %vm425_vm0, %v120_v37, 0.0  ;;  %vm519_vm10 = vcmp.gt.f32.partialorder %v120_v37, 0.0  ;;  %vm518_vm11 = vcmp.gt.f32.partialorder %v119_v29, 0.0 }
   0xc   :  { %v949_v43 = vsel %vm516_vm9, 1, %v843_v0  ;;  %v437_v44 = vsel %vm425_vm0, %v121_v42, 0.0  ;;  %v956_v46 = vsel %vm519_vm10, 1, %v843_v0  ;;  %v959_v47 = vsel %vm518_vm11, 1, %v843_v0 }
   0xd   :  { %vm521_vm12 = vcmp.gt.f32.partialorder %v122_v41, 0.0  ;;  %v436_v48 = vadd.f32 %v435_v31, %v434_v34  ;;  %vm520_vm13 = vcmp.gt.f32.partialorder %v121_v42, 0.0  ;;  %vm523_vm14 = vcmp.gt.f32.partialorder %v124_v45, 0.0  ;;  %v140_v31 = vld [vmem:[%s1791_s1 + $0xf8] sm:$0xff] }
   0xe   :  { %178 = vperm.xlu1 %838, %v116_v18   ;;  %173 = vperm.xlu0 %837, %v115_v16   ;;  %v965_v50 = vsel %vm521_vm12, 1, %v843_v0  ;;  %v467_v51 = vadd.f32 %v466_v40, %v465_v36  ;;  %v974_v54 = vsel %vm520_vm13, 1, %v843_v0  ;;  %v977_v55 = vsel %vm523_vm14, 1, %v843_v0  ;;  %v135_v18 = vld [vmem:[%s1791_s1 + $0xd0] sm:$0xff] }
   0xf   :  { %vm522_vm15 = vcmp.gt.f32.partialorder %v123_v49, 0.0  ;;  %v468_v56 = vsel %vm425_vm0, %v122_v41, 0.0  ;;  %vm525_vm1 = vcmp.gt.f32.partialorder %v126_v52, 0.0  ;;  %vm524_vm2 = vcmp.gt.f32.partialorder %v125_v53, 0.0  ;;  %v139_v40 = vld [vmem:[%s1791_s1 + $0xf0] sm:$0xff] }
  0x10   :  { %v986_v58 = vsel %vm522_vm15, 1, %v843_v0  ;;  %v439_v59 = vsel %vm425_vm0, %v123_v49, 0.0  ;;  %v998_v62 = vsel %vm525_vm1, 1, %v843_v0  ;;  %v1001_v63 = vsel %vm524_vm2, 1, %v843_v0 }
  0x11   :  { %vm527_vm3 = vcmp.gt.f32.partialorder %v983_v57, 0.0  ;;  %v438_v1 = vadd.f32 %v437_v44, %v436_v48  ;;  %vm526_vm4 = vcmp.gt.f32.partialorder %v127_v60, 0.0  ;;  %vm529_vm5 = vcmp.gt.f32.partialorder %v995_v61, 0.0 }
  0x12   :  { %188 = vperm.xlu1 %838, %v118_v25   ;;  %183 = vperm.xlu0 %837, %v117_v21   ;;  %v1008_v3 = vsel %vm527_vm3, 1, %v843_v0  ;;  %v469_v4 = vadd.f32 %v468_v56, %v467_v51  ;;  %v1018_v8 = vsel %vm526_vm4, 1, %v843_v0  ;;  %v1021_v9 = vsel %vm529_vm5, 1, %v843_v0  ;;  %v138_v25 = vld [vmem:[%s1791_s1 + $0xe8] sm:$0xff] }
  0x13   :  { %vm528_vm6 = vcmp.gt.f32.partialorder %v129_v2, 0.0  ;;  %v470_v10 = vsel %vm425_vm0, %v124_v45, 0.0  ;;  %vm531_vm7 = vcmp.gt.f32.partialorder %v132_v5, 0.0  ;;  %vm530_vm8 = vcmp.gt.f32.partialorder %v131_v7, 0.0 }
  0x14   :  { %v1028_v12 = vsel %vm528_vm6, 1, %v843_v0  ;;  %v1037_v15 = vsel %vm531_vm7, 1, %v843_v0  ;;  %v1040_v16 = vsel %vm530_vm8, 1, %v843_v0  ;;  %vm533_vm9 = vcmp.gt.f32.partialorder %v134_v11, 0.0 }
  0x15   :  { %v440_v17 = vadd.f32 %v439_v59, %v438_v1  ;;  %v1046_v19 = vsel %vm533_vm9, 1, %v843_v0  ;;  %vm532_vm10 = vcmp.gt.f32.partialorder %v133_v13, 0.0  ;;  %vm535_vm11 = vcmp.gt.f32.partialorder %v136_v14, 0.0 }
  0x16   :  { %198 = vperm.xlu1 %838, %v120_v37   ;;  %193 = vperm.xlu0 %837, %v119_v29   ;;  %v471_v20 = vadd.f32 %v470_v10, %v469_v4  ;;  %v1049_v21 = vsel %vm532_vm10, 1, %v843_v0  ;;  %v1052_v22 = vsel %vm535_vm11, 1, %v843_v0  ;;  %vm534_vm12 = vcmp.gt.f32.partialorder %v135_v18, 0.0  ;;  %v137_v29 = vld [vmem:[%s1791_s1 + $0xe0] sm:$0xff] }
  0x17   :  { %v472_v23 = vsel %vm425_vm0, %v126_v52, 0.0  ;;  %v441_v24 = vsel %vm425_vm0, %v125_v53, 0.0  ;;  %v1060_v28 = vsel %vm534_vm12, 1, %v843_v0  ;;  %vm537_vm13 = vcmp.gt.f32.partialorder %v138_v25, 0.0 }
  0x18   :  { %v1069_v34 = vsel %vm537_vm13, 1, %v843_v0  ;;  %vm536_vm14 = vcmp.gt.f32.partialorder %v137_v29, 0.0  ;;  %v473_v36 = vadd.f32 %v472_v23, %v471_v20  ;;  %v442_v37 = vadd.f32 %v441_v24, %v440_v17 }
  0x19   :  { %vm539_vm15 = vcmp.gt.f32.partialorder %v140_v31, 0.0  ;;  %v443_v44 = vsel %vm425_vm0, %v127_v60, 0.0  ;;  %vm538_vm1 = vcmp.gt.f32.partialorder %v139_v40, 0.0  ;;  %v478_v1 = vsel %vm425_vm0, %v132_v5, 0.0 }
  0x1a   :  { %208 = vperm.xlu1 %838, %v122_v41   ;;  %203 = vperm.xlu0 %837, %v121_v42   ;;  %v1075_v41 = vsel %vm536_vm14, 1, %v843_v0  ;;  %v474_v42 = vsel %vm425_vm0, %v983_v57, 0.0  ;;  %v1084_v48 = vsel %vm538_vm1, 1, %v843_v0  ;;  %v444_v51 = vadd.f32 %v443_v44, %v442_v37 }
  0x1b   :  { %v447_v4 = vsel %vm425_vm0, %v131_v7, 0.0  ;;  %v449_v17 = vsel %vm425_vm0, %v133_v13, 0.0  ;;  %vm509_vm2 = vcmp.gt.f32.partialorder %v880_v6, 0.0 }
  0x1e   :  { %218 = vperm.xlu1 %838, %v124_v45   ;;  %213 = vperm.xlu0 %837, %v123_v49   ;;  %v1081_v45 = vsel %vm539_vm15, 1, %v843_v0  ;;  %v475_v49 = vadd.f32 %v474_v42, %v473_v36 }
  0x22   :  { %228 = vperm.xlu1 %838, %v126_v52   ;;  %223 = vperm.xlu0 %837, %v125_v53   ;;  %v476_v52 = vsel %vm425_vm0, %v995_v61, 0.0  ;;  %v445_v53 = vsel %vm425_vm0, %v129_v2, 0.0 }
  0x23   :  { %v477_v56 = vadd.f32 %v476_v52, %v475_v49  ;;  %v446_v59 = vadd.f32 %v445_v53, %v444_v51  ;;  %v1349_v53 = vld [vmem:[%s1792_s0 + $0xd8] sm:$0xff] }
  0x24   :  { %1824 = vst [vmem:[#allocation8_spill] sm:$0xff] %v1349_v53 }
  0x25   :  { %v479_v10 = vadd.f32 %v478_v1, %v477_v56  ;;  %v1238_v56 = vld [vmem:[%s1792_s0 + $0x50] sm:$0xff] }
  0x26   :  { %238 = vperm.xlu1 %838, %v983_v57   ;;  %233 = vperm.xlu0 %837, %v127_v60   ;;  %v448_v57 = vadd.f32 %v447_v4, %v446_v59  ;;  %v480_v60 = vsel %vm425_vm0, %v134_v11, 0.0  ;;  %v1243_v59 = vld [vmem:[%s1792_s0 + $0x68] sm:$0xff] }
  0x27   :  { %v481_v20 = vadd.f32 %v480_v60, %v479_v10 }
  0x28   :  { %v450_v23 = vadd.f32 %v449_v17, %v448_v57  ;;  %v1321_v17 = vld [vmem:[%s1792_s0 + $0xb8] sm:$0xff]  ;;  %v1335_v57 = vld [vmem:[%s1792_s0 + $0xc8] sm:$0xff] }
  0x2a   :  { %248 = vperm.xlu1 %838, %v995_v61   ;;  %243 = vperm.xlu0 %837, %v129_v2   ;;  %v482_v61 = vsel %vm425_vm0, %v136_v14, 0.0  ;;  %v451_v2 = vsel %vm425_vm0, %v135_v18, 0.0 }
  0x2b   :  { %v483_v24 = vadd.f32 %v482_v61, %v481_v20  ;;  %v452_v36 = vadd.f32 %v451_v2, %v450_v23  ;;  %v1256_v20 = vld [vmem:[%s1792_s0 + $0x60] sm:$0xff]  ;;  %v1261_v23 = vld [vmem:[%s1792_s0 + $0x78] sm:$0xff]  ;;  %v1307_v2 = vld [vmem:[%s1792_s0 + $0xa8] sm:$0xff] }
  0x2c   :  { %v1316_v61 = vld [vmem:[%s1792_s0 + $0xa0] sm:$0xff] }
  0x2e   :  { %258 = vperm.xlu1 %838, %v132_v5   ;;  %253 = vperm.xlu0 %837, %v131_v7   ;;  %v484_v5 = vsel %vm425_vm0, %v138_v25, 0.0  ;;  %v453_v7 = vsel %vm425_vm0, %v137_v29, 0.0 }
  0x2f   :  { %v485_v37 = vadd.f32 %v484_v5, %v483_v24  ;;  %v454_v42 = vadd.f32 %v453_v7, %v452_v36  ;;  %v1270_v5 = vld [vmem:[%s1792_s0 + $0x70] sm:$0xff]  ;;  %v1275_v7 = vld [vmem:[%s1792_s0 + $0x88] sm:$0xff] }
  0x30   :  { %v1302_v24 = vld [vmem:[%s1792_s0 + $0x90] sm:$0xff] }
  0x32   :  { %268 = vperm.xlu1 %838, %v134_v11   ;;  %263 = vperm.xlu0 %837, %v133_v13   ;;  %v486_v11 = vsel %vm425_vm0, %v140_v31, 0.0  ;;  %v455_v13 = vsel %vm425_vm0, %v139_v40, 0.0 }
  0x33   :  { %v487_v44 = vadd.f32 %v486_v11, %v485_v37  ;;  %v456_v49 = vadd.f32 %v455_v13, %v454_v42  ;;  %v1344_v11 = vld [vmem:[%s1792_s0 + $0xc0] sm:$0xff] }
  0x34   :  { %v1384_v42 = vld [vmem:[%s1792_s0 + $0xe0] sm:$0xff] }
  0x35   :  { %1827 = vst [vmem:[#allocation11_spill] sm:$0xff] %v1384_v42 }
  0x36   :  { %278 = vperm.xlu1 %838, %v136_v14   ;;  %273 = vperm.xlu0 %837, %v135_v18   ;;  %v541_v14 = vsel %vm509_vm2, 1, %v843_v0 }
  0x3a   :  { %288 = vperm.xlu1 %838, %v138_v25   ;;  %283 = vperm.xlu0 %837, %v137_v29   ;;  %v1210_v25 = vld [vmem:[%s1792_s0 + $0x30] sm:$0xff] }
  0x3e   :  { %298 = vperm.xlu1 %838, %v140_v31   ;;  %293 = vperm.xlu0 %837, %v139_v40   ;;  %v1367_v40 = vld [vmem:[%s1792_s0 + $0xe8] sm:$0xff] }
  0x3f   :  { %1826 = vst [vmem:[#allocation10_spill] sm:$0xff] %v1367_v40 }
  0x42   :  { %495 = vperm.xlu1 %838, %v487_v44   ;;  %490 = vperm.xlu0 %837, %v456_v49   ;;  %v1284_v44 = vld [vmem:[%s1792_s0 + $0x80] sm:$0xff]  ;;  %v1289_v49 = vld [vmem:[%s1792_s0 + $0x98] sm:$0xff] }
  0x46   :  { %576 = vperm.xlu1 %838, %v541_v14   ;;  %573 = vperm.xlu0 %837, %v910_v26   ;;  %v1330_v14 = vld [vmem:[%s1792_s0 + $0xb0] sm:$0xff] }
  0x4a   :  { %582 = vperm.xlu1 %838, %v913_v27   ;;  %579 = vperm.xlu0 %837, %v920_v30  }
  0x4e   :  { %588 = vperm.xlu1 %838, %v924_v32   ;;  %585 = vperm.xlu0 %837, %v927_v33  }
  0x52   :  { %594 = vperm.xlu1 %838, %v930_v35   ;;  %591 = vperm.xlu0 %837, %v936_v38  }
  0x56   :  { %600 = vperm.xlu1 %838, %v939_v39   ;;  %597 = vperm.xlu0 %837, %v949_v43  }
  0x5a   :  { %606 = vperm.xlu1 %838, %v956_v46   ;;  %603 = vperm.xlu0 %837, %v959_v47  }
  0x5e   :  { %612 = vperm.xlu1 %838, %v965_v50   ;;  %609 = vperm.xlu0 %837, %v974_v54   ;;  %v1165_v54 = vld [vmem:[%s1792_s0 + $0x10] sm:$0xff] }
  0x5f   :  { %1818 = vst [vmem:[#allocation2_spill] sm:$0xff] %v1165_v54  ;;  %v1829_v10 = vunpack.c.l.bf16 %v1165_v54 }
  0x62   :  { %618 = vperm.xlu1 %838, %v977_v55   ;;  %615 = vperm.xlu0 %837, %v986_v58   ;;  %v1170_v55 = vld [vmem:[%s1792_s0] sm:$0xff]  ;;  %v1175_v58 = vld [vmem:[%s1792_s0 + $0x18] sm:$0xff] }
  0x63   :  { %1819 = vst [vmem:[#allocation3_spill] sm:$0xff] %v1170_v55  ;;  %1820 = vst [vmem:[#allocation4_spill] sm:$0xff] %v1175_v58  ;;  %v1831_v37 = vunpack.c.l.bf16 %v1170_v55 }
  0x66   :  { %624 = vperm.xlu1 %838, %v998_v62   ;;  %621 = vperm.xlu0 %837, %v1001_v63   ;;  %v1180_v62 = vld [vmem:[%s1792_s0 + $0x8] sm:$0xff] }
  0x67   :  { %1821 = vst [vmem:[#allocation5_spill] sm:$0xff] %v1180_v62  ;;  %v1185_v63 = vld [vmem:[%s1792_s0 + $0x28] sm:$0xff]  ;;  %v1797_v29 = vunpack.c.l.bf16 %v1180_v62 }
  0x68   :  { %1822 = vst [vmem:[#allocation6_spill] sm:$0xff] %v1185_v63 }
  0x6a   :  { %630 = vperm.xlu1 %838, %v1008_v3   ;;  %627 = vperm.xlu0 %837, %v1018_v8  }
  0x6e   :  { %636 = vperm.xlu1 %838, %v1021_v9   ;;  %633 = vperm.xlu0 %837, %v1028_v12  }
  0x72   :  { %642 = vperm.xlu1 %838, %v1037_v15   ;;  %639 = vperm.xlu0 %837, %v1040_v16   ;;  %v1196_v15 = vld [vmem:[%s1792_s0 + $0x20] sm:$0xff]  ;;  %v1201_v16 = vld [vmem:[%s1792_s0 + $0x38] sm:$0xff] }
  0x73   :  { %1823 = vst [vmem:[#allocation7_spill] sm:$0xff] %v1196_v15 }
  0x76   :  { %648 = vperm.xlu1 %838, %v1046_v19   ;;  %645 = vperm.xlu0 %837, %v1049_v21   ;;  %v1795_v21 = vunpack.c.l.bf16 %v1175_v58 }
  0x7a   :  { %654 = vperm.xlu1 %838, %v1052_v22   ;;  %651 = vperm.xlu0 %837, %v1060_v28   ;;  %v1796_v22 = vunpack.c.h.bf16 %v1175_v58  ;;  %v1215_v28 = vld [vmem:[%s1792_s0 + $0x48] sm:$0xff] }
  0x7d   :  { %v1130_v0 = vpop.permute.xlu1 %153  ;;  %v1132_v6 = vpop.permute.xlu0 %143 }
  0x7e   :  { %660 = vperm.xlu1 %838, %v1069_v34   ;;  %657 = vperm.xlu0 %837, %v1075_v41   ;;  %v1224_v41 = vld [vmem:[%s1792_s0 + $0x40] sm:$0xff]  ;;  %v1828_v34 = vunpack.c.h.bf16 %v1180_v62  ;;  %v1833_v62 = vunpack.c.l.bf16 %v1185_v63 }
  0x81   :  { %v1136_v26 = vpop.permute.xlu1 %158  ;;  %v1138_v27 = vpop.permute.xlu0 %148 }
  0x82   :  { %666 = vperm.xlu1 %838, %v1081_v45   ;;  %663 = vperm.xlu0 %837, %v1084_v48   ;;  %v1229_v45 = vld [vmem:[%s1792_s0 + $0x58] sm:$0xff]  ;;  %v1362_v48 = vld [vmem:[%s1792_s0 + $0xd0] sm:$0xff]  ;;  %v307_v19 = vmul.f32 %v1136_v26, %v1795_v21  ;;  %v308_v12 = vmul.f32 %v1136_v26, %v1796_v22  ;;  %v303_v31 = vmul.f32 %v1138_v27, %v1797_v29  ;;  %v1830_v22 = vunpack.c.h.bf16 %v1165_v54 }
  0x83   :  { %1825 = vst [vmem:[#allocation9_spill] sm:$0xff] %v1362_v48  ;;  %v304_v60 = vmul.f32 %v1138_v27, %v1828_v34  ;;  %v1405_v21 = vld [vmem:[%s1792_s0 + $0xf8] sm:$0xff]  ;;  %v305_v26 = vmul.f32 %v1130_v0, %v1829_v10  ;;  %v301_v27 = vmul.f32 %v1132_v6, %v1831_v37  ;;  %v1832_v34 = vunpack.c.h.bf16 %v1170_v55 }
  0x84   :  { %v306_v29 = vmul.f32 %v1130_v0, %v1830_v22  ;;  %v1834_v48 = vunpack.c.h.bf16 %v1185_v63  ;;  %v1835_v22 = vunpack.c.l.bf16 %v1196_v15  ;;  %v1836_v55 = vunpack.c.h.bf16 %v1196_v15 }
  0x85   :  { %v1142_v30 = vpop.permute.xlu1 %168  ;;  %v1144_v32 = vpop.permute.xlu0 %163  ;;  %v302_v58 = vmul.f32 %v1132_v6, %v1832_v34  ;;  %v395_v53 = vadd.f32 %v307_v19, %v303_v31  ;;  %v410_v63 = vadd.f32 %v308_v12, %v304_v60  ;;  %v1838_v0 = vunpack.c.h.bf16 %v1201_v16 }
  0x86   :  { %v311_v40 = vmul.f32 %v1142_v30, %v1833_v62  ;;  %v312_v10 = vmul.f32 %v1142_v30, %v1834_v48  ;;  %v309_v37 = vmul.f32 %v1144_v32, %v1835_v22  ;;  %v310_v6 = vmul.f32 %v1144_v32, %v1836_v55 }
  0x87   :  { %v1837_v30 = vunpack.c.l.bf16 %v1201_v16  ;;  %v365_v15 = vadd.f32 %v305_v26, %v301_v27  ;;  %v380_v32 = vadd.f32 %v306_v29, %v302_v58  ;;  %v1839_v55 = vunpack.c.l.bf16 %v1210_v25 }
  0x88   :  { %v1840_v12 = vunpack.c.h.bf16 %v1210_v25  ;;  %v396_v31 = vadd.f32 %v395_v53, %v311_v40  ;;  %v411_v60 = vadd.f32 %v410_v63, %v312_v10  ;;  %v1843_v29 = vunpack.c.l.bf16 %v1224_v41 }
  0x89   :  { %v1146_v33 = vpop.permute.xlu1 %178  ;;  %v1148_v35 = vpop.permute.xlu0 %173  ;;  %v366_v26 = vadd.f32 %v365_v15, %v309_v37  ;;  %v381_v58 = vadd.f32 %v380_v32, %v310_v6  ;;  %v1845_v53 = vunpack.c.l.bf16 %v1229_v45 }
  0x8a   :  { %v315_v48 = vmul.f32 %v1146_v33, %v1837_v30  ;;  %v316_v54 = vmul.f32 %v1146_v33, %v1838_v0  ;;  %v313_v62 = vmul.f32 %v1148_v35, %v1839_v55  ;;  %v314_v19 = vmul.f32 %v1148_v35, %v1840_v12 }
  0x8b   :  { %v1841_v30 = vunpack.c.l.bf16 %v1215_v28  ;;  %v1842_v0 = vunpack.c.h.bf16 %v1215_v28  ;;  %v1844_v55 = vunpack.c.h.bf16 %v1224_v41  ;;  %v1846_v12 = vunpack.c.h.bf16 %v1229_v45 }
  0x8c   :  { %v397_v40 = vadd.f32 %v396_v31, %v315_v48  ;;  %v412_v63 = vadd.f32 %v411_v60, %v316_v54  ;;  %v367_v6 = vadd.f32 %v366_v26, %v313_v62  ;;  %v382_v32 = vadd.f32 %v381_v58, %v314_v19 }
  0x8d   :  { %v1150_v38 = vpop.permute.xlu1 %188  ;;  %v1152_v39 = vpop.permute.xlu0 %183  ;;  %v1848_v54 = vunpack.c.h.bf16 %v1238_v56  ;;  %v1851_v26 = vunpack.c.l.bf16 %v1256_v20 }
  0x8e   :  { %v319_v33 = vmul.f32 %v1150_v38, %v1841_v30  ;;  %v320_v34 = vmul.f32 %v1150_v38, %v1842_v0  ;;  %v317_v27 = vmul.f32 %v1152_v39, %v1843_v29  ;;  %v318_v35 = vmul.f32 %v1152_v39, %v1844_v55 }
  0x8f   :  { %v1847_v30 = vunpack.c.l.bf16 %v1238_v56  ;;  %v1849_v0 = vunpack.c.l.bf16 %v1243_v59  ;;  %v1850_v29 = vunpack.c.h.bf16 %v1243_v59 }
  0x90   :  { %v398_v31 = vadd.f32 %v397_v40, %v319_v33  ;;  %v413_v60 = vadd.f32 %v412_v63, %v320_v34  ;;  %v368_v62 = vadd.f32 %v367_v6, %v317_v27  ;;  %v383_v19 = vadd.f32 %v382_v32, %v318_v35 }
  0x91   :  { %v1154_v43 = vpop.permute.xlu1 %198  ;;  %v1156_v46 = vpop.permute.xlu0 %193  ;;  %v1853_v40 = vunpack.c.l.bf16 %v1261_v23 }
  0x92   :  { %v323_v10 = vmul.f32 %v1154_v43, %v1845_v53  ;;  %v324_v38 = vmul.f32 %v1154_v43, %v1846_v12  ;;  %v321_v39 = vmul.f32 %v1156_v46, %v1847_v30  ;;  %v322_v48 = vmul.f32 %v1156_v46, %v1848_v54 }
  0x93   :  { %v1852_v53 = vunpack.c.h.bf16 %v1256_v20  ;;  %v1854_v12 = vunpack.c.h.bf16 %v1261_v23  ;;  %v1855_v30 = vunpack.c.l.bf16 %v1270_v5 }
  0x94   :  { %v399_v33 = vadd.f32 %v398_v31, %v323_v10  ;;  %v414_v34 = vadd.f32 %v413_v60, %v324_v38  ;;  %v369_v6 = vadd.f32 %v368_v62, %v321_v39  ;;  %v384_v32 = vadd.f32 %v383_v19, %v322_v48  ;;  %v1516_v39 = vld [vmem:[%s1792_s0 + $0xf0] sm:$0xff] }
  0x95   :  { %v1158_v47 = vpop.permute.xlu1 %208  ;;  %v1160_v50 = vpop.permute.xlu0 %203  ;;  %v1856_v10 = vunpack.c.h.bf16 %v1270_v5  ;;  %v1857_v60 = vunpack.c.l.bf16 %v1275_v7  ;;  %v1859_v19 = vunpack.c.l.bf16 %v1284_v44 }
  0x96   :  { %v327_v43 = vmul.f32 %v1158_v47, %v1849_v0  ;;  %v328_v55 = vmul.f32 %v1158_v47, %v1850_v29  ;;  %v325_v58 = vmul.f32 %v1160_v50, %v1851_v26  ;;  %v326_v46 = vmul.f32 %v1160_v50, %v1852_v53 }
  0x97   :  { %v1858_v0 = vunpack.c.h.bf16 %v1275_v7 }
  0x98   :  { %v400_v54 = vadd.f32 %v399_v33, %v327_v43  ;;  %v415_v31 = vadd.f32 %v414_v34, %v328_v55  ;;  %v370_v48 = vadd.f32 %v369_v6, %v325_v58  ;;  %v385_v62 = vadd.f32 %v384_v32, %v326_v46 }
  0x99   :  { %v1187_v3 = vpop.permute.xlu1 %218  ;;  %v1189_v8 = vpop.permute.xlu0 %213  ;;  %v1860_v43 = vunpack.c.h.bf16 %v1284_v44  ;;  %v1861_v33 = vunpack.c.l.bf16 %v1289_v49  ;;  %v1862_v34 = vunpack.c.h.bf16 %v1289_v49  ;;  %v1863_v32 = vunpack.c.l.bf16 %v1302_v24 }
  0x9a   :  { %v331_v63 = vmul.f32 %v1187_v3, %v1853_v40  ;;  %v332_v47 = vmul.f32 %v1187_v3, %v1854_v12  ;;  %v329_v50 = vmul.f32 %v1189_v8, %v1855_v30  ;;  %v330_v38 = vmul.f32 %v1189_v8, %v1856_v10 }
  0x9b   :  { %v1864_v10 = vunpack.c.h.bf16 %v1302_v24 }
  0x9c   :  { %v401_v26 = vadd.f32 %v400_v54, %v331_v63  ;;  %v416_v53 = vadd.f32 %v415_v31, %v332_v47  ;;  %v371_v12 = vadd.f32 %v370_v48, %v329_v50  ;;  %v386_v6 = vadd.f32 %v385_v62, %v330_v38 }
  0x9d   :  { %v1245_v1 = vpop.permute.xlu1 %228  ;;  %v1247_v4 = vpop.permute.xlu0 %223  ;;  %v106_v31 = vunpack.c.h.bf16 %v1516_v39  ;;  %v1866_v38 = vunpack.c.h.bf16 %v1307_v2 }
  0x9e   :  { %v335_v3 = vmul.f32 %v1245_v1, %v1857_v60  ;;  %v336_v29 = vmul.f32 %v1245_v1, %v1858_v0  ;;  %v333_v8 = vmul.f32 %v1247_v4, %v1859_v19  ;;  %v334_v55 = vmul.f32 %v1247_v4, %v1860_v43 }
  0x9f   :  { %v105_v4 = vunpack.c.l.bf16 %v1516_v39  ;;  %v1865_v0 = vunpack.c.l.bf16 %v1307_v2 }
  0xa0   :  { %v402_v63 = vadd.f32 %v401_v26, %v335_v3  ;;  %v417_v47 = vadd.f32 %v416_v53, %v336_v29  ;;  %v372_v60 = vadd.f32 %v371_v12, %v333_v8  ;;  %v1867_v3 = vunpack.c.l.bf16 %v1316_v61 }
  0xa1   :  { %v1295_v36 = vpop.permute.xlu1 %238  ;;  %v1297_v13 = vpop.permute.xlu0 %233  ;;  %v1869_v53 = vunpack.c.l.bf16 %v1321_v17 }
  0xa2   :  { %v339_v1 = vmul.f32 %v1295_v36, %v1861_v33  ;;  %v340_v40 = vmul.f32 %v1295_v36, %v1862_v34  ;;  %v337_v30 = vmul.f32 %v1297_v13, %v1863_v32  ;;  %v338_v54 = vmul.f32 %v1297_v13, %v1864_v10 }
  0xa3   :  { %v387_v36 = vadd.f32 %v386_v6, %v334_v55  ;;  %v1868_v13 = vunpack.c.h.bf16 %v1316_v61  ;;  %v1870_v34 = vunpack.c.h.bf16 %v1321_v17  ;;  %v1872_v6 = vunpack.c.h.bf16 %v1330_v14 }
  0xa4   :  { %v403_v62 = vadd.f32 %v402_v63, %v339_v1  ;;  %v418_v19 = vadd.f32 %v417_v47, %v340_v40  ;;  %v373_v26 = vadd.f32 %v372_v60, %v337_v30  ;;  %v1871_v40 = vunpack.c.l.bf16 %v1330_v14 }
  0xa5   :  { %v1351_v52 = vpop.permute.xlu1 %248  ;;  %v1353_v51 = vpop.permute.xlu0 %243  ;;  %v388_v1 = vadd.f32 %v387_v36, %v338_v54  ;;  %v1873_v63 = vunpack.c.l.bf16 %v1335_v57  ;;  %v1874_v10 = vunpack.c.h.bf16 %v1335_v57  ;;  %v1875_v36 = vunpack.c.l.bf16 %v1344_v11 }
  0xa6   :  { %v343_v50 = vmul.f32 %v1351_v52, %v1865_v0  ;;  %v344_v48 = vmul.f32 %v1351_v52, %v1866_v38  ;;  %v341_v29 = vmul.f32 %v1353_v51, %v1867_v3  ;;  %v342_v43 = vmul.f32 %v1353_v51, %v1868_v13  ;;  %v1877_v3 = vld [vmem:[#allocation8_spill] sm:$0xff] }
  0xa7   :  { %v1876_v38 = vunpack.c.h.bf16 %v1344_v11  ;;  %v1878_v13 = vunpack.c.l.bf16 %v1877_v3 }
  0xa8   :  { %v404_v32 = vadd.f32 %v403_v62, %v343_v50  ;;  %v419_v30 = vadd.f32 %v418_v19, %v344_v48  ;;  %v374_v54 = vadd.f32 %v373_v26, %v341_v29  ;;  %v389_v60 = vadd.f32 %v388_v1, %v342_v43  ;;  %v1880_v26 = vld [vmem:[#allocation9_spill] sm:$0xff] }
  0xa9   :  { %v1398_v9 = vpop.permute.xlu1 %258  ;;  %v1400_v18 = vpop.permute.xlu0 %253  ;;  %v1879_v29 = vunpack.c.h.bf16 %v1877_v3 }
  0xaa   :  { %v347_v33 = vmul.f32 %v1398_v9, %v1869_v53  ;;  %v348_v52 = vmul.f32 %v1398_v9, %v1870_v34  ;;  %v345_v12 = vmul.f32 %v1400_v18, %v1871_v40  ;;  %v346_v51 = vmul.f32 %v1400_v18, %v1872_v6  ;;  %v1883_v40 = vld [vmem:[#allocation10_spill] sm:$0xff] }
  0xab   :  { %v1881_v53 = vunpack.c.l.bf16 %v1880_v26  ;;  %v1882_v34 = vunpack.c.h.bf16 %v1880_v26  ;;  %v1884_v6 = vunpack.c.l.bf16 %v1883_v40 }
  0xac   :  { %v405_v62 = vadd.f32 %v404_v32, %v347_v33  ;;  %v420_v19 = vadd.f32 %v419_v30, %v348_v52  ;;  %v1885_v30 = vunpack.c.h.bf16 %v1883_v40 }
  0xad   :  { %v1441_v42 = vpop.permute.xlu1 %268  ;;  %v1443_v22 = vpop.permute.xlu0 %263 }
  0xae   :  { %v351_v47 = vmul.f32 %v1441_v42, %v1873_v63  ;;  %v352_v9 = vmul.f32 %v1441_v42, %v1874_v10  ;;  %v349_v0 = vmul.f32 %v1443_v22, %v1875_v36  ;;  %v350_v18 = vmul.f32 %v1443_v22, %v1876_v38  ;;  %v1886_v63 = vld [vmem:[#allocation11_spill] sm:$0xff] }
  0xaf   :  { %v1887_v10 = vunpack.c.l.bf16 %v1886_v63 }
  0xb0   :  { %v406_v33 = vadd.f32 %v405_v62, %v351_v47  ;;  %v421_v52 = vadd.f32 %v420_v19, %v352_v9  ;;  %v1889_v62 = vunpack.c.l.bf16 %v1405_v21 }
  0xb1   :  { %v1469_v15 = vpop.permute.xlu1 %278  ;;  %v1471_v37 = vpop.permute.xlu0 %273 }
  0xb2   :  { %v355_v42 = vmul.f32 %v1469_v15, %v1878_v13  ;;  %v356_v43 = vmul.f32 %v1469_v15, %v1879_v29  ;;  %v353_v22 = vmul.f32 %v1471_v37, %v1881_v53  ;;  %v354_v1 = vmul.f32 %v1471_v37, %v1882_v34 }
  0xb3   :  { %v1890_v13 = vunpack.c.h.bf16 %v1405_v21 }
  0xb4   :  { %v407_v36 = vadd.f32 %v406_v33, %v355_v42  ;;  %v422_v38 = vadd.f32 %v421_v52, %v356_v43 }
  0xb5   :  { %v1497_v27 = vpop.permute.xlu1 %288  ;;  %v1499_v35 = vpop.permute.xlu0 %283 }
  0xb6   :  { %v359_v32 = vmul.f32 %v1497_v27, %v1884_v6  ;;  %v360_v15 = vmul.f32 %v1497_v27, %v1885_v30 }
  0xb9   :  { %v299_v58 = vpop.permute.xlu1 %298  ;;  %v294_v46 = vpop.permute.xlu0 %293 }
  0xba   :  { %v363_v19 = vmul.f32 %v299_v58, %v1889_v62  ;;  %v364_v27 = vmul.f32 %v299_v58, %v1890_v13  ;;  %v361_v29 = vmul.f32 %v294_v46, %v105_v4 }
  0xbd   :  { %v496_v8 = vpop.permute.xlu1 %495  ;;  %v491_v55 = vpop.permute.xlu0 %490 }
  0xbe   :  { %839 = vrcp.f32 %v496_v8  ;;  %v375_v8 = vadd.f32 %v374_v54, %v345_v12  ;;  %v357_v54 = vmul.f32 %v1499_v35, %v1887_v10 }
  0xbf   :  { %841 = vrcp.f32 %v491_v55  ;;  %v390_v55 = vadd.f32 %v389_v60, %v346_v51  ;;  %v1888_v60 = vunpack.c.h.bf16 %v1886_v63 }
  0xc0   :  { %v376_v12 = vadd.f32 %v375_v8, %v349_v0  ;;  %v362_v8 = vmul.f32 %v294_v46, %v106_v31 }
  0xc1   :  { %v1574_v50 = vpop.permute.xlu1 %576  ;;  %v1576_v48 = vpop.permute.xlu0 %573  ;;  %v391_v51 = vadd.f32 %v390_v55, %v350_v18  ;;  %v358_v37 = vmul.f32 %v1499_v35, %v1888_v60  ;;  %v408_v55 = vadd.f32 %v407_v36, %v359_v32  ;;  %v423_v35 = vadd.f32 %v422_v38, %v360_v15 }
  0xc2   :  { %v377_v0 = vadd.f32 %v376_v12, %v353_v22  ;;  %vm669_vm0 = vcmp.eq.s32.totalorder %v1574_v50, 1  ;;  %vm668_vm5 = vcmp.eq.s32.totalorder %v1576_v48, 1 }
  0xc3   :  { %v392_v18 = vadd.f32 %v391_v51, %v354_v1  ;;  %v409_v33 = vadd.f32 %v408_v55, %v363_v19  ;;  %v424_v52 = vadd.f32 %v423_v35, %v364_v27 }
  0xc4   :  { %v378_v53 = vadd.f32 %v377_v0, %v357_v54 }
  0xc5   :  { %v583_v47 = vpop.permute.xlu1 %582  ;;  %v580_v9 = vpop.permute.xlu0 %579  ;;  %v393_v34 = vadd.f32 %v392_v18, %v358_v37  ;;  %v1891_v37 = vld [vmem:[#allocation5_spill] sm:$0xff]  ;;  %v1894_v18 = vld [vmem:[#allocation4_spill] sm:$0xff] }
  0xc6   :  { %v379_v30 = vadd.f32 %v378_v53, %v361_v29  ;;  %vm671_vm3 = vcmp.eq.s32.totalorder %v583_v47, 1  ;;  %vm670_vm4 = vcmp.eq.s32.totalorder %v580_v9, 1  ;;  %v1892_v36 = vunpack.c.l.bf16 %v1891_v37  ;;  %v1897_v47 = vld [vmem:[#allocation2_spill] sm:$0xff]  ;;  %v1899_v53 = vld [vmem:[#allocation3_spill] sm:$0xff] }
  0xc7   :  { %v394_v10 = vadd.f32 %v393_v34, %v362_v8  ;;  %v1893_v27 = vunpack.c.h.bf16 %v1891_v37  ;;  %v1895_v29 = vunpack.c.l.bf16 %v1894_v18  ;;  %v1896_v55 = vunpack.c.h.bf16 %v1894_v18 }
  0xc8   :  { %v702_v38 = vsel %vm669_vm0, %v1892_v36, -1000000.0  ;;  %v1898_v9 = vunpack.c.l.bf16 %v1897_v47  ;;  %v1900_v34 = vunpack.c.l.bf16 %v1899_v53 }
  0xc9   :  { %v589_v42 = vpop.permute.xlu1 %588  ;;  %v586_v43 = vpop.permute.xlu0 %585  ;;  %v703_v0 = vsel %vm669_vm0, %v1893_v27, -1000000.0  ;;  %v706_v8 = vsel %vm671_vm3, %v1895_v29, -1000000.0  ;;  %v707_v50 = vsel %vm671_vm3, %v1896_v55, -1000000.0 }
  0xca   :  { %vm673_vm6 = vcmp.eq.s32.totalorder %v589_v42, 1  ;;  %v704_v35 = vsel %vm670_vm4, %v1898_v9, -1000000.0  ;;  %vm672_vm7 = vcmp.eq.s32.totalorder %v586_v43, 1  ;;  %v700_v48 = vsel %vm668_vm5, %v1900_v34, -1000000.0 }
  0xcb   :  { %v840_v6 = vpop.eup %839  ;;  %v764_v37 = vmax.f32 %v700_v48, %v704_v35  ;;  %v1906_v27 = vld [vmem:[#allocation7_spill] sm:$0xff]  ;;  %v1910_v34 = vunpack.c.h.bf16 %v1201_v16 }
  0xcc   :  { %v842_v58 = vpop.eup %841  ;;  %v502_v22 = vmul.f32 %v840_v6, %v409_v33  ;;  %v503_v1 = vmul.f32 %v840_v6, %v424_v52  ;;  %v1901_v33 = vunpack.c.h.bf16 %v1897_v47  ;;  %v1902_v6 = vunpack.c.h.bf16 %v1899_v53 }
  0xcd   :  { %v499_v12 = vmul.f32 %v842_v58, %v379_v30  ;;  %v500_v51 = vmul.f32 %v842_v58, %v394_v10  ;;  %v595_v60 = vpop.permute.xlu1 %594  ;;  %v592_v62 = vpop.permute.xlu0 %591  ;;  %v794_v10 = vmax.f32 %v702_v38, %v706_v8  ;;  %v1903_v58 = vld [vmem:[#allocation6_spill] sm:$0xff]  ;;  %v1907_v18 = vunpack.c.l.bf16 %v1906_v27 }
  0xce   :  { %506 = vst [vmem:[%s1793_s2 + $0x10] sm:$0xff] %v502_v22  ;;  %507 = vst [vmem:[%s1793_s2 + $0x18] sm:$0xff] %v503_v1  ;;  %v705_v52 = vsel %vm670_vm4, %v1901_v33, -1000000.0  ;;  %vm675_vm8 = vcmp.eq.s32.totalorder %v595_v60, 1  ;;  %v1904_v42 = vunpack.c.l.bf16 %v1903_v58  ;;  %vm674_vm9 = vcmp.eq.s32.totalorder %v592_v62, 1 }
  0xcf   :  { %504 = vst [vmem:[%s1793_s2] sm:$0xff] %v499_v12  ;;  %505 = vst [vmem:[%s1793_s2 + $0x8] sm:$0xff] %v500_v51  ;;  %v701_v30 = vsel %vm668_vm5, %v1902_v6, -1000000.0  ;;  %v809_v51 = vmax.f32 %v703_v0, %v707_v50  ;;  %v1905_v43 = vunpack.c.h.bf16 %v1903_v58  ;;  %v708_v29 = vsel %vm672_vm7, %v1907_v18, -1000000.0 }
  0xd0   :  { %v710_v22 = vsel %vm673_vm6, %v1904_v42, -1000000.0  ;;  %v779_v55 = vmax.f32 %v701_v30, %v705_v52  ;;  %v1908_v47 = vunpack.c.h.bf16 %v1906_v27  ;;  %v1909_v38 = vunpack.c.l.bf16 %v1201_v16 }
  0xd1   :  { %v601_v46 = vpop.permute.xlu1 %600  ;;  %v598_v32 = vpop.permute.xlu0 %597  ;;  %v711_v36 = vsel %vm673_vm6, %v1905_v43, -1000000.0  ;;  %v795_v53 = vmax.f32 %v794_v10, %v710_v22  ;;  %v715_v0 = vsel %vm675_vm8, %v1910_v34, -1000000.0  ;;  %v1911_v50 = vunpack.c.l.bf16 %v1210_v25 }
  0xd2   :  { %v709_v9 = vsel %vm672_vm7, %v1908_v47, -1000000.0  ;;  %v714_v8 = vsel %vm675_vm8, %v1909_v38, -1000000.0  ;;  %vm677_vm10 = vcmp.eq.s32.totalorder %v601_v46, 1  ;;  %vm676_vm11 = vcmp.eq.s32.totalorder %v598_v32, 1 }
  0xd3   :  { %v712_v35 = vsel %vm674_vm9, %v1911_v50, -1000000.0  ;;  %v810_v48 = vmax.f32 %v809_v51, %v711_v36  ;;  %v765_v33 = vmax.f32 %v764_v37, %v708_v29  ;;  %v1912_v52 = vunpack.c.h.bf16 %v1210_v25 }
  0xd4   :  { %v780_v42 = vmax.f32 %v779_v55, %v709_v9  ;;  %v796_v10 = vmax.f32 %v795_v53, %v714_v8  ;;  %v1913_v16 = vunpack.c.l.bf16 %v1215_v28  ;;  %v1914_v27 = vunpack.c.h.bf16 %v1215_v28 }
  0xd5   :  { %v607_v15 = vpop.permute.xlu1 %606  ;;  %v604_v54 = vpop.permute.xlu0 %603  ;;  %v713_v6 = vsel %vm674_vm9, %v1912_v52, -1000000.0  ;;  %v811_v22 = vmax.f32 %v810_v48, %v715_v0  ;;  %v766_v43 = vmax.f32 %v765_v33, %v712_v35  ;;  %v1915_v25 = vunpack.c.l.bf16 %v1224_v41 }
  0xd6   :  { %vm679_vm12 = vcmp.eq.s32.totalorder %v607_v15, 1  ;;  %v718_v60 = vsel %vm677_vm10, %v1913_v16, -1000000.0  ;;  %vm678_vm13 = vcmp.eq.s32.totalorder %v604_v54, 1  ;;  %v719_v51 = vsel %vm677_vm10, %v1914_v27, -1000000.0 }
  0xd7   :  { %v716_v62 = vsel %vm676_vm11, %v1915_v25, -1000000.0  ;;  %v781_v37 = vmax.f32 %v780_v42, %v713_v6  ;;  %v1916_v36 = vunpack.c.h.bf16 %v1224_v41  ;;  %v1917_v29 = vunpack.c.l.bf16 %v1229_v45 }
  0xd8   :  { %v797_v47 = vmax.f32 %v796_v10, %v718_v60  ;;  %v1918_v9 = vunpack.c.h.bf16 %v1229_v45  ;;  %v1919_v46 = vunpack.c.l.bf16 %v1238_v56  ;;  %v812_v32 = vmax.f32 %v811_v22, %v719_v51 }
  0xd9   :  { %v613_v19 = vpop.permute.xlu1 %612  ;;  %v1626_v13 = vpop.permute.xlu0 %609  ;;  %v717_v18 = vsel %vm676_vm11, %v1916_v36, -1000000.0  ;;  %v722_v55 = vsel %vm679_vm12, %v1917_v29, -1000000.0  ;;  %v767_v53 = vmax.f32 %v766_v43, %v716_v62  ;;  %v1920_v34 = vunpack.c.h.bf16 %v1238_v56 }
  0xda   :  { %vm681_vm14 = vcmp.eq.s32.totalorder %v613_v19, 1  ;;  %v723_v28 = vsel %vm679_vm12, %v1918_v9, -1000000.0  ;;  %v720_v38 = vsel %vm678_vm13, %v1919_v46, -1000000.0  ;;  %vm680_vm15 = vcmp.eq.s32.totalorder %v1626_v13, 1 }
  0xdb   :  { %v721_v0 = vsel %vm678_vm13, %v1920_v34, -1000000.0  ;;  %v782_v19 = vmax.f32 %v781_v37, %v717_v18  ;;  %v798_v50 = vmax.f32 %v797_v47, %v722_v55  ;;  %v1921_v45 = vunpack.c.l.bf16 %v1243_v59 }
  0xdc   :  { %v1922_v35 = vunpack.c.h.bf16 %v1243_v59  ;;  %v813_v33 = vmax.f32 %v812_v32, %v723_v28  ;;  %v768_v52 = vmax.f32 %v767_v53, %v720_v38  ;;  %v1923_v6 = vunpack.c.l.bf16 %v1256_v20 }
  0xdd   :  { %v619_v1 = vpop.permute.xlu1 %618  ;;  %v616_v12 = vpop.permute.xlu0 %615  ;;  %v726_v15 = vsel %vm681_vm14, %v1921_v45, -1000000.0  ;;  %v783_v56 = vmax.f32 %v782_v19, %v721_v0  ;;  %v1924_v54 = vunpack.c.h.bf16 %v1256_v20  ;;  %v1925_v16 = vunpack.c.l.bf16 %v1261_v23 }
  0xde   :  { %vm683_vm1 = vcmp.eq.s32.totalorder %v619_v1, 1  ;;  %v727_v48 = vsel %vm681_vm14, %v1922_v35, -1000000.0  ;;  %v724_v42 = vsel %vm680_vm15, %v1923_v6, -1000000.0  ;;  %vm682_vm2 = vcmp.eq.s32.totalorder %v616_v12, 1 }
  0xdf   :  { %v725_v10 = vsel %vm680_vm15, %v1924_v54, -1000000.0  ;;  %v730_v60 = vsel %vm683_vm1, %v1925_v16, -1000000.0  ;;  %v799_v43 = vmax.f32 %v798_v50, %v726_v15  ;;  %v814_v27 = vmax.f32 %v813_v33, %v727_v48 }
  0xe0   :  { %v1926_v51 = vunpack.c.h.bf16 %v1261_v23  ;;  %v769_v12 = vmax.f32 %v768_v52, %v724_v42  ;;  %v1927_v20 = vunpack.c.l.bf16 %v1270_v5  ;;  %v1928_v13 = vunpack.c.h.bf16 %v1270_v5 }
  0xe1   :  { %v625_v30 = vpop.permute.xlu1 %624  ;;  %v622_v58 = vpop.permute.xlu0 %621  ;;  %v784_v36 = vmax.f32 %v783_v56, %v725_v10  ;;  %v800_v18 = vmax.f32 %v799_v43, %v730_v60  ;;  %v1930_v55 = vunpack.c.h.bf16 %v1275_v7  ;;  %v1931_v1 = vunpack.c.l.bf16 %v1284_v44 }
  0xe2   :  { %vm685_vm0 = vcmp.eq.s32.totalorder %v625_v30, 1  ;;  %v731_v25 = vsel %vm683_vm1, %v1926_v51, -1000000.0  ;;  %vm684_vm3 = vcmp.eq.s32.totalorder %v622_v58, 1  ;;  %v728_v62 = vsel %vm682_vm2, %v1927_v20, -1000000.0 }
  0xe3   :  { %v729_v37 = vsel %vm682_vm2, %v1928_v13, -1000000.0  ;;  %v1929_v30 = vunpack.c.l.bf16 %v1275_v7  ;;  %v735_v47 = vsel %vm685_vm0, %v1930_v55, -1000000.0  ;;  %v815_v23 = vmax.f32 %v814_v27, %v731_v25 }
  0xe4   :  { %v732_v9 = vsel %vm684_vm3, %v1931_v1, -1000000.0  ;;  %v770_v5 = vmax.f32 %v769_v12, %v728_v62  ;;  %v785_v38 = vmax.f32 %v784_v36, %v729_v37  ;;  %v1932_v32 = vunpack.c.h.bf16 %v1284_v44 }
  0xe5   :  { %v631_v8 = vpop.permute.xlu1 %630  ;;  %v628_v41 = vpop.permute.xlu0 %627  ;;  %v734_v29 = vsel %vm685_vm0, %v1929_v30, -1000000.0  ;;  %v1933_v34 = vunpack.c.l.bf16 %v1289_v49  ;;  %v816_v19 = vmax.f32 %v815_v23, %v735_v47  ;;  %v1934_v50 = vunpack.c.h.bf16 %v1289_v49 }
  0xe6   :  { %vm687_vm4 = vcmp.eq.s32.totalorder %v631_v8, 1  ;;  %vm686_vm5 = vcmp.eq.s32.totalorder %v628_v41, 1  ;;  %v733_v53 = vsel %vm684_vm3, %v1932_v32, -1000000.0  ;;  %v801_v0 = vmax.f32 %v800_v18, %v734_v29 }
  0xe7   :  { %v738_v7 = vsel %vm687_vm4, %v1933_v34, -1000000.0  ;;  %v739_v45 = vsel %vm687_vm4, %v1934_v50, -1000000.0  ;;  %v771_v41 = vmax.f32 %v770_v5, %v732_v9  ;;  %v1935_v15 = vunpack.c.l.bf16 %v1302_v24 }
  0xe8   :  { %v1936_v48 = vunpack.c.h.bf16 %v1302_v24  ;;  %v1937_v58 = vunpack.c.l.bf16 %v1307_v2  ;;  %v786_v52 = vmax.f32 %v785_v38, %v733_v53  ;;  %v802_v6 = vmax.f32 %v801_v0, %v738_v7 }
  0xe9   :  { %v637_v59 = vpop.permute.xlu1 %636  ;;  %v634_v22 = vpop.permute.xlu0 %633  ;;  %v736_v35 = vsel %vm686_vm5, %v1935_v15, -1000000.0  ;;  %v1938_v42 = vunpack.c.h.bf16 %v1307_v2  ;;  %v817_v54 = vmax.f32 %v816_v19, %v739_v45  ;;  %v1939_v10 = vunpack.c.l.bf16 %v1316_v61 }
  0xea   :  { %vm689_vm6 = vcmp.eq.s32.totalorder %v637_v59, 1  ;;  %vm688_vm7 = vcmp.eq.s32.totalorder %v634_v22, 1  ;;  %v737_v44 = vsel %vm686_vm5, %v1936_v48, -1000000.0  ;;  %v1940_v24 = vunpack.c.h.bf16 %v1316_v61 }
  0xeb   :  { %v742_v33 = vsel %vm689_vm6, %v1937_v58, -1000000.0  ;;  %v743_v49 = vsel %vm689_vm6, %v1938_v42, -1000000.0  ;;  %v740_v16 = vsel %vm688_vm7, %v1939_v10, -1000000.0  ;;  %v772_v22 = vmax.f32 %v771_v41, %v736_v35 }
  0xec   :  { %v741_v60 = vsel %vm688_vm7, %v1940_v24, -1000000.0  ;;  %v787_v43 = vmax.f32 %v786_v52, %v737_v44  ;;  %v803_v27 = vmax.f32 %v802_v6, %v742_v33  ;;  %v818_v51 = vmax.f32 %v817_v54, %v743_v49 }
  0xed   :  { %v643_v28 = vpop.permute.xlu1 %642  ;;  %v640_v46 = vpop.permute.xlu0 %639  ;;  %v1941_v2 = vunpack.c.l.bf16 %v1321_v17  ;;  %v1942_v25 = vunpack.c.h.bf16 %v1321_v17  ;;  %v773_v20 = vmax.f32 %v772_v22, %v740_v16  ;;  %v1943_v13 = vunpack.c.l.bf16 %v1330_v14 }
  0xee   :  { %vm691_vm8 = vcmp.eq.s32.totalorder %v643_v28, 1  ;;  %vm690_vm9 = vcmp.eq.s32.totalorder %v640_v46, 1  ;;  %v788_v62 = vmax.f32 %v787_v43, %v741_v60  ;;  %v1944_v61 = vunpack.c.h.bf16 %v1330_v14 }
  0xef   :  { %v746_v59 = vsel %vm691_vm8, %v1941_v2, -1000000.0  ;;  %v747_v12 = vsel %vm691_vm8, %v1942_v25, -1000000.0  ;;  %v744_v37 = vsel %vm690_vm9, %v1943_v13, -1000000.0  ;;  %v1945_v29 = vunpack.c.l.bf16 %v1335_v57 }
  0xf0   :  { %v745_v36 = vsel %vm690_vm9, %v1944_v61, -1000000.0  ;;  %v1946_v47 = vunpack.c.h.bf16 %v1335_v57  ;;  %v804_v17 = vmax.f32 %v803_v27, %v746_v59  ;;  %v819_v1 = vmax.f32 %v818_v51, %v747_v12 }
  0xf1   :  { %v649_v8 = vpop.permute.xlu1 %648  ;;  %v646_v56 = vpop.permute.xlu0 %645  ;;  %v1947_v9 = vunpack.c.l.bf16 %v1344_v11  ;;  %v1948_v46 = vunpack.c.h.bf16 %v1344_v11  ;;  %v774_v14 = vmax.f32 %v773_v20, %v744_v37  ;;  %v789_v38 = vmax.f32 %v788_v62, %v745_v36 }
  0xf2   :  { %vm693_vm10 = vcmp.eq.s32.totalorder %v649_v8, 1  ;;  %vm692_vm11 = vcmp.eq.s32.totalorder %v646_v56, 1  ;;  %v1949_v32 = vunpack.c.l.bf16 %v1877_v3  ;;  %v1950_v57 = vunpack.c.h.bf16 %v1877_v3 }
  0xf3   :  { %v750_v55 = vsel %vm693_vm10, %v1945_v29, -1000000.0  ;;  %v751_v23 = vsel %vm693_vm10, %v1946_v47, -1000000.0  ;;  %v748_v28 = vsel %vm692_vm11, %v1947_v9, -1000000.0  ;;  %v1951_v19 = vunpack.c.l.bf16 %v1880_v26 }
  0xf4   :  { %v749_v5 = vsel %vm692_vm11, %v1948_v46, -1000000.0  ;;  %v805_v34 = vmax.f32 %v804_v17, %v750_v55  ;;  %v820_v7 = vmax.f32 %v819_v1, %v751_v23  ;;  %v775_v41 = vmax.f32 %v774_v14, %v748_v28 }
  0xf5   :  { %v655_v18 = vpop.permute.xlu1 %654  ;;  %v652_v30 = vpop.permute.xlu0 %651  ;;  %v790_v15 = vmax.f32 %v789_v38, %v749_v5  ;;  %v1952_v35 = vunpack.c.h.bf16 %v1880_v26  ;;  %v1953_v58 = vunpack.c.l.bf16 %v1883_v40  ;;  %v1954_v52 = vunpack.c.h.bf16 %v1883_v40 }
  0xf6   :  { %vm695_vm12 = vcmp.eq.s32.totalorder %v655_v18, 1  ;;  %vm694_vm13 = vcmp.eq.s32.totalorder %v652_v30, 1  ;;  %v1955_v49 = vunpack.c.l.bf16 %v1886_v63  ;;  %v1956_v56 = vunpack.c.h.bf16 %v1886_v63 }
  0xf7   :  { %v754_v53 = vsel %vm695_vm12, %v1949_v32, -1000000.0  ;;  %v755_v0 = vsel %vm695_vm12, %v1950_v57, -1000000.0  ;;  %v752_v50 = vsel %vm694_vm13, %v1951_v19, -1000000.0  ;;  %v1957_v40 = vunpack.c.l.bf16 %v1405_v21 }
  0xf8   :  { %v753_v11 = vsel %vm694_vm13, %v1952_v35, -1000000.0  ;;  %v806_v44 = vmax.f32 %v805_v34, %v754_v53  ;;  %v821_v3 = vmax.f32 %v820_v7, %v755_v0  ;;  %v776_v42 = vmax.f32 %v775_v41, %v752_v50 }
  0xf9   :  { %v661_v45 = vpop.permute.xlu1 %660  ;;  %v658_v48 = vpop.permute.xlu0 %657  ;;  %v791_v26 = vmax.f32 %v790_v15, %v753_v11  ;;  %v1958_v51 = vunpack.c.h.bf16 %v1405_v21 }
  0xfa   :  { %vm697_vm14 = vcmp.eq.s32.totalorder %v661_v45, 1  ;;  %vm696_vm15 = vcmp.eq.s32.totalorder %v658_v48, 1 }
  0xfb   :  { %v758_v33 = vsel %vm697_vm14, %v1953_v58, -1000000.0  ;;  %v759_v6 = vsel %vm697_vm14, %v1954_v52, -1000000.0  ;;  %v756_v8 = vsel %vm696_vm15, %v1955_v49, -1000000.0 }
  0xfc   :  { %v757_v54 = vsel %vm696_vm15, %v1956_v56, -1000000.0  ;;  %v807_v16 = vmax.f32 %v806_v44, %v758_v33  ;;  %v822_v24 = vmax.f32 %v821_v3, %v759_v6  ;;  %v777_v60 = vmax.f32 %v776_v42, %v756_v8 }
  0xfd   :  { %v667_v10 = vpop.permute.xlu1 %666  ;;  %v664_v22 = vpop.permute.xlu0 %663  ;;  %v792_v43 = vmax.f32 %v791_v26, %v757_v54 }
  0xfe   :  { %vm699_vm1 = vcmp.eq.s32.totalorder %v667_v10, 1  ;;  %vm698_vm2 = vcmp.eq.s32.totalorder %v664_v22, 1 }
  0xff   :  { %v762_v27 = vsel %vm699_vm1, %v1957_v40, -1000000.0  ;;  %v763_v2 = vsel %vm699_vm1, %v1958_v51, -1000000.0  ;;  %v760_v63 = vsel %vm698_vm2, %v105_v4, -1000000.0 }
 0x100   :  { %v808_v59 = vmax.f32 %v807_v16, %v762_v27  ;;  %v823_v25 = vmax.f32 %v822_v24, %v763_v2  ;;  %v761_v12 = vsel %vm698_vm2, %v106_v31, -1000000.0  ;;  %v778_v20 = vmax.f32 %v777_v60, %v760_v63 }
 0x101   :  { %v793_v62 = vmax.f32 %v792_v43, %v761_v12 }
 0x102   :  { %826 = vst [vmem:[%s1794_s3 + $0x10] sm:$0xff] %v808_v59  ;;  %827 = vst [vmem:[%s1794_s3 + $0x18] sm:$0xff] %v823_v25 }
 0x103   :  { %824 = vst [vmem:[%s1794_s3] sm:$0xff] %v778_v20  ;;  %825 = vst [vmem:[%s1794_s3 + $0x8] sm:$0xff] %v793_v62 }

// kernel: finetune_forward.13
= control target key start
LH: loop header
LB: loop body
LE: loop exit
PB: predicated region body
PF: predicated region fallthrough
CT: control target
= control target key end

     0   :  { %s943_s12 = smov 0   ;;  %s945_s13 = smov 0   ;;  %s1026_s0 = inlined_call_operand.vmem [shape: bf16[8,1024], index: 0, kind: input, shape index: {}]   ;;  %s1027_s1 = inlined_call_operand.vmem [shape: bf16[1024,128], index: 1, kind: input, shape index: {}]   ;;  %s1028_s2 = inlined_call_operand.vmem [shape: f32[1,128], index: 2, kind: input, shape index: {}]   ;;  %s1029_s3 = inlined_call_operand.vmem [shape: f32[8,128], index: 3, kind: output, shape index: {}]  }
   0x1   :  { %s947_s14 = smov 0  }
   0x2 LB: > { %s25_s15 = sadd.s32 1, %s916_s13  ;;  %p744_p0 = scmp.ge.s32.totalorder %s920_s14, 1  ;;  %s920_s14 = sphi %s947_s14, %s13_s14   ;;  %s916_s13 = sphi %s945_s13, %s1031_s13   ;;  %s912_s12 = sphi %s943_s12, %s1030_s12  }
   0x3   : > { %p26_p1 = scmp.ge.s32.totalorder %s25_s15, 2  ;;  %p189_p2 = scmp.lt.s32.totalorder %s920_s14, 3 }
   0x5   : > { %s1033_s15 = smov (%p26_p1, %s25_s15), 0  ;;  %p190_p3 = pnand %p744_p0, %p189_p2 }
   0x6   : > { %s745_s16 = sshll.u32 (!%p190_p3), %s912_s12, 2  ;;  %s747_s17 = sshll.u32 (!%p190_p3), %s912_s12, 6 }
   0x7   : > { %193 = sbr.rel (%p190_p3) target bundleno = 283 (0x11b), region = 32  ;;  %p233_p4 = scmp.lt.s32.totalorder (!%p190_p3), %s745_s16, 7 }
   0x8   : > { %p241_p5 = scmp.lt.s32.totalorder (!%p190_p3), %s747_s17, 127  ;;  %p749_p6 = scmp.ne.s32.totalorder (!%p190_p3), %s912_s12, 0 }
   0xc   : > { %s1035_s16 = smov (!%p233_p4, %s745_s16), 7  ;;  %s1037_s17 = smov (!%p241_p5, %s747_s17), 127 }
   0xd   : > { %s746_s18 = sshll.u32 %s1035_s16, 2  ;;  %s748_s22 = sshll.u32 %s1037_s17, 2 }
   0xe   : > { %s968_s21 = scalar_lea.vmem %s1026_s0, %s746_s18  ;;  %s973_s25 = scalar_lea.vmem %s1027_s1, %s748_s22 }
   0xf   : > { %263 = sbr.rel (%p749_p6) target bundleno = 22 (0x16), region = 36 }
  0x14   : > { %v922_v0 = vmov 0.0  }
  0x15   : > { %264 = vst [vmem:[#allocation2] sm:$0xff] %v922_v0 }
  0x16 PF: > { %v860_v1 = vld [vmem:[%s973_s25 + $0x78] sm:$0xff]   ;;  %v864_v5 = vld [vmem:[%s973_s25 + $0x70] sm:$0xff]   ;;  %v868_v9 = vld [vmem:[%s973_s25 + $0x68] sm:$0xff]   ;;  %p786_p7 = scmp.ne.s32.totalorder %s912_s12, 1 }
  0x17   : > { %v861_v2 = vld [vmem:[%s973_s25 + $0xf8] sm:$0xff]   ;;  %791 = vmatprep.subr.bf16.mxu0 %v860_v1  ;;  %v865_v6 = vld [vmem:[%s973_s25 + $0xf0] sm:$0xff]   ;;  %v869_v10 = vld [vmem:[%s973_s25 + $0xe8] sm:$0xff]  }
  0x18   : > { %v862_v3 = vld [vmem:[%s973_s25 + $0x38] sm:$0xff]   ;;  %813 = vmatprep.subr.bf16.mxu1 %v861_v2  ;;  %v866_v7 = vld [vmem:[%s973_s25 + $0x30] sm:$0xff]   ;;  %v870_v11 = vld [vmem:[%s973_s25 + $0x28] sm:$0xff]  }
  0x19   : > { %v863_v4 = vld [vmem:[%s973_s25 + $0xb8] sm:$0xff]   ;;  %792 = vmatpush3.bf16.msra.mxu0 %v862_v3  ;;  %v867_v8 = vld [vmem:[%s973_s25 + $0xb0] sm:$0xff]   ;;  %v871_v12 = vld [vmem:[%s973_s25 + $0xa8] sm:$0xff]  }
  0x1a   : > { %814 = vmatpush3.bf16.msra.mxu1 %v863_v4  ;;  %793 = vmatprep.subr.bf16.mxu0 %v864_v5  ;;  %v872_v13 = vld [vmem:[%s973_s25 + $0x60] sm:$0xff]   ;;  %v876_v17 = vld [vmem:[%s973_s25 + $0x58] sm:$0xff]   ;;  %v880_v21 = vld [vmem:[%s973_s25 + $0x50] sm:$0xff]  }
  0x1b   : > { %815 = vmatprep.subr.bf16.mxu1 %v865_v6  ;;  %v873_v14 = vld [vmem:[%s973_s25 + $0xe0] sm:$0xff]   ;;  %v877_v18 = vld [vmem:[%s973_s25 + $0xd8] sm:$0xff]   ;;  %v881_v22 = vld [vmem:[%s973_s25 + $0xd0] sm:$0xff]  }
  0x1c   : > { %v874_v15 = vld [vmem:[%s973_s25 + $0x20] sm:$0xff]   ;;  %v878_v19 = vld [vmem:[%s973_s25 + $0x18] sm:$0xff]   ;;  %v882_v23 = vld [vmem:[%s973_s25 + $0x10] sm:$0xff]  }
  0x1d   : > { %794 = vmatpush3.bf16.msra.mxu0 %v866_v7  ;;  %v875_v16 = vld [vmem:[%s973_s25 + $0xa0] sm:$0xff]   ;;  %v879_v20 = vld [vmem:[%s973_s25 + $0x98] sm:$0xff]   ;;  %v883_v24 = vld [vmem:[%s973_s25 + $0x90] sm:$0xff]  }
  0x1e   : > { %816 = vmatpush3.bf16.msra.mxu1 %v867_v8  ;;  %795 = vmatprep.subr.bf16.mxu0 %v868_v9  ;;  %v884_v25 = vld [vmem:[%s973_s25 + $0x48] sm:$0xff]   ;;  %v888_v29 = vld [vmem:[%s973_s25 + $0x40] sm:$0xff]  }
  0x1f   : > { %817 = vmatprep.subr.bf16.mxu1 %v869_v10  ;;  %v885_v26 = vld [vmem:[%s973_s25 + $0xc8] sm:$0xff]   ;;  %v889_v30 = vld [vmem:[%s973_s25 + $0xc0] sm:$0xff]  }
  0x20   : > { %v886_v27 = vld [vmem:[%s973_s25 + $0x8] sm:$0xff]   ;;  %v890_v31 = vld [vmem:[%s973_s25] sm:$0xff]  }
  0x21   : > { %796 = vmatpush3.bf16.msra.mxu0 %v870_v11  ;;  %v887_v28 = vld [vmem:[%s973_s25 + $0x88] sm:$0xff]   ;;  %v891_v32 = vld [vmem:[%s973_s25 + $0x80] sm:$0xff]  }
  0x22   : > { %818 = vmatpush3.bf16.msra.mxu1 %v871_v12  ;;  %797 = vmatprep.subr.bf16.mxu0 %v872_v13  ;;  %v266_v33 = vld [vmem:[%s968_s21] sm:$0xff]  ;;  %v267_v34 = vld [vmem:[%s968_s21 + $0x8] sm:$0xff] }
  0x23   : > { %819 = vmatprep.subr.bf16.mxu1 %v873_v14  ;;  %v750_v35 = vcombine.low %v266_v33, %v266_v33  ;;  %v751_v36 = vcombine.high %v266_v33, %v266_v33  ;;  %v752_v37 = vcombine.low %v267_v34, %v267_v34  ;;  %v753_v38 = vcombine.high %v267_v34, %v267_v34  ;;  %v265_v45 = vld [vmem:[#allocation2] sm:$0xff] }
  0x25   : > { %798 = vmatpush3.bf16.msra.mxu0 %v874_v15  ;;  %570 = vmatprep.mubr.bf16.mxu0 %v751_v36 }
  0x26   : > { %820 = vmatpush3.bf16.msra.mxu1 %v875_v16  ;;  %799 = vmatprep.subr.bf16.mxu0 %v876_v17 }
  0x27   : > { %821 = vmatprep.subr.bf16.mxu1 %v877_v18  ;;  %610 = vmatprep.mubr.bf16.mxu1 %v753_v38 }
  0x29   : > { %800 = vmatpush3.bf16.msra.mxu0 %v878_v19 }
  0x2a   : > { %822 = vmatpush3.bf16.msra.mxu1 %v879_v20  ;;  %801 = vmatprep.subr.bf16.mxu0 %v880_v21 }
  0x2b   : > { %823 = vmatprep.subr.bf16.mxu1 %v881_v22 }
  0x2d   : > { %802 = vmatpush3.bf16.msra.mxu0 %v882_v23 }
  0x2e   : > { %824 = vmatpush3.bf16.msra.mxu1 %v883_v24  ;;  %803 = vmatprep.subr.bf16.mxu0 %v884_v25 }
  0x2f   : > { %825 = vmatprep.subr.bf16.mxu1 %v885_v26 }
  0x31   : > { %804 = vmatpush3.bf16.msra.mxu0 %v886_v27 }
  0x32   : > { %826 = vmatpush3.bf16.msra.mxu1 %v887_v28  ;;  %805 = vmatprep.subr.bf16.mxu0 %v888_v29 }
  0x33   : > { %827 = vmatprep.subr.bf16.mxu1 %v889_v30 }
  0x35   : > { %806 = vmatpush3.bf16.msra.mxu0 %v890_v31 }
  0x36   : > { %828 = vmatpush3.bf16.msra.mxu1 %v891_v32 }
  0x38   : > { %571 = vmatmul.mubr.bf16.vlgmr.msra.gmra.mxu0 %v750_v35 }
  0x39   : > { %611 = vmatmul.mubr.bf16.vlgmr.msra.gmra.mxu1 %v752_v37 }
  0xf8   : > { %v807_v39 = vpop.f32.mrf.mxu0 }
  0xf9   : > { %v829_v40 = vpop.f32.mrf.mxu1 }
  0xfa   : > { %v808_v41 = vpop.f32.mrf.mxu0 }
  0xfb   : > { %v830_v42 = vpop.f32.mrf.mxu1  ;;  %v809_v43 = vadd.f32 %v808_v41, %v807_v39 }
  0xfc   : > { %v831_v44 = vadd.f32 %v830_v42, %v829_v40  ;;  %v810_v46 = vpop.f32.mrf.mxu0 }
  0xfd   : > { %v832_v47 = vpop.f32.mrf.mxu1 }
  0xfe   : > { %v613_v48 = vadd.f32 %v831_v44, %v809_v43  ;;  %v811_v49 = vpop.f32.mrf.mxu0  ;;  %623 = sbr.rel (%p786_p7) target bundleno = 283 (0x11b), region = 40 }
  0xff   : > { %v833_v50 = vpop.f32.mrf.mxu1 }
 0x100   : > { %v618_v51 = vadd.f32 %v613_v48, %v265_v45 }
 0x102   : > { %619 = vst [vmem:[#allocation2] sm:$0xff] %v618_v51 }
 0x103   : > { %v787_v53 = vld [vmem:[%s1028_s2] ss:$0 sm:$0xff] }
 0x109   : > { %v624_v52 = vld [vmem:[#allocation2] sm:$0xff] }
 0x10a   : > { %v632_v54 = vadd.f32 %v787_v53, %v624_v52 }
 0x10c   : > { %896 = vtanh.f32 %v632_v54 }
 0x119   : > { %v897_v55 = vpop.eup %896 }
 0x11a   : > { %634 = vst [vmem:[%s1029_s3] sm:$0xff] %v897_v55 }
 0x11b PF: > { %s13_s14 = sadd.s32 1, %s920_s14   ;;  %s1030_s12 = smov %s916_s13 }
 0x11c   : > { %p10_p8 = scmp.ge.s32.totalorder %s13_s14, 4   ;;  %s1031_s13 = smov %s1033_s15 }
 0x11e   :  { %12 = sbr.rel (!%p10_p8) target bundleno = 2 (0x2), region = 76 }

// kernel: finetune_forward.15
= control target key start
LH: loop header
LB: loop body
LE: loop exit
PB: predicated region body
PF: predicated region fallthrough
CT: control target
= control target key end

     0   :  { %vm9_vm0 = vcmask 23552   ;;  %s50_s0 = inlined_call_operand.vmem [shape: f32[8,3], index: 0, kind: input, shape index: {}]   ;;  %s51_s1 = inlined_call_operand.vmem [shape: f32[8,3], index: 1, kind: output, shape index: {}]  }
   0x1   :  { %v8_v0 = vld [vmem:[%s50_s0] sm:$0xff] }
   0x2   :  { %v10_v1 = vsel %vm9_vm0, %v8_v0, -inf }
   0x3   :  { %11 = vmax.xlane.f32.xlu0 %v10_v1 }
  0x8c   :  { %v12_v2 = vpop.xlane.xlu0 %11 }
  0x8d   :  { %v13_v3 = vsub.f32 %v8_v0, %v12_v2 }
  0x8f   :  { %v14_v4 = vmul.f32 1.442695, %v13_v3 }
  0x91   :  { %27 = vpow2.f32 %v14_v4 }
  0x9e   :  { %v28_v5 = vpop.eup %27 }
  0x9f   :  { %v16_v6 = vsel %vm9_vm0, %v28_v5, 0.0 }
  0xa0   :  { %17 = vadd.xlane.f32.xlu0 %v16_v6 }
 0x129   :  { %v18_v7 = vpop.xlane.xlu0 %17 }
 0x12a   :  { %29 = vlog2.f32 %v18_v7 }
 0x137   :  { %v30_v8 = vpop.eup %29 }
 0x138   :  { %v20_v9 = vmul.f32 0.6931472, %v30_v8 }
 0x13a   :  { %v21_v10 = vsub.f32 %v13_v3, %v20_v9 }
 0x13c   :  { %22 = vst.msk [vmem:[%s51_s1] sm:$0xff] %vm9_vm0, %v21_v10 }

// kernel: finetune_forward.14
= control target key start
LH: loop header
LB: loop body
LE: loop exit
PB: predicated region body
PF: predicated region fallthrough
CT: control target
= control target key end

     0   :  { %v193_v0 = vmov 0.0   ;;  %vm194_vm0 = vmmov 0   ;;  %s248_s1 = inlined_call_operand.vmem [shape: bf16[128,128], index: 1, kind: input, shape index: {}]   ;;  %s249_s0 = inlined_call_operand.vmem [shape: bf16[8,128], index: 0, kind: input, shape index: {}]   ;;  %s250_s2 = inlined_call_operand.vmem [shape: f32[1,128], index: 2, kind: input, shape index: {}]   ;;  %s251_s3 = inlined_call_operand.vmem [shape: f32[8,128], index: 3, kind: output, shape index: {}]  }
   0x1   :  { %163 = vmatprep.subr.bf16.mxu0 %v193_v0  ;;  %v185_v1 = vld [vmem:[%s248_s1 + $0x38] sm:$0xff]   ;;  %179 = vmatprep.mubr.msk.bf16.mxu0 %vm194_vm0, %v193_v0  ;;  %v186_v2 = vld [vmem:[%s248_s1 + $0x30] sm:$0xff]   ;;  %v187_v3 = vld [vmem:[%s248_s1 + $0x28] sm:$0xff]  }
   0x2   :  { %164 = vmatpush3.bf16.msra.mxu0 %v185_v1  ;;  %v188_v4 = vld [vmem:[%s248_s1 + $0x20] sm:$0xff]   ;;  %v189_v5 = vld [vmem:[%s248_s1 + $0x18] sm:$0xff]   ;;  %v190_v6 = vld [vmem:[%s248_s1 + $0x10] sm:$0xff]  }
   0x3   :  { %165 = vmatprep.subr.bf16.mxu0 %v193_v0  ;;  %v191_v7 = vld [vmem:[%s248_s1 + $0x8] sm:$0xff]   ;;  %v192_v8 = vld [vmem:[%s248_s1] sm:$0xff]  }
   0x4   :  { %v21_v9 = vld [vmem:[%s249_s0] sm:$0xf] }
   0x5   :  { %v153_v10 = vld [vmem:[%s250_s2] ss:$0 sm:$0xff] }
   0x6   :  { %166 = vmatpush3.bf16.msra.mxu0 %v186_v2 }
   0x7   :  { %167 = vmatprep.subr.bf16.mxu0 %v193_v0 }
   0xa   :  { %168 = vmatpush3.bf16.msra.mxu0 %v187_v3 }
   0xb   :  { %169 = vmatprep.subr.bf16.mxu0 %v193_v0 }
   0xe   :  { %170 = vmatpush3.bf16.msra.mxu0 %v188_v4 }
   0xf   :  { %171 = vmatprep.subr.bf16.mxu0 %v193_v0 }
  0x12   :  { %172 = vmatpush3.bf16.msra.mxu0 %v189_v5 }
  0x13   :  { %173 = vmatprep.subr.bf16.mxu0 %v193_v0 }
  0x16   :  { %174 = vmatpush3.bf16.msra.mxu0 %v190_v6 }
  0x17   :  { %175 = vmatprep.subr.bf16.mxu0 %v193_v0 }
  0x1a   :  { %176 = vmatpush3.bf16.msra.mxu0 %v191_v7 }
  0x1b   :  { %177 = vmatprep.subr.bf16.mxu0 %v193_v0 }
  0x1e   :  { %178 = vmatpush3.bf16.msra.mxu0 %v192_v8 }
  0x21   :  { %180 = vmatmul.mubr.bf16.vlgmr.msra.gmra.mxu0 %v21_v9 }
  0xe1   :  { %v120_v11 = vpop.f32.mrf.mxu0 }
  0xe2   :  { %v139_v12 = vadd.f32 %v153_v10, %v120_v11 }
  0xe3   :  { %v181_v13 = vpop.f32.mrf.mxu0 }
  0xe4   :  { %140 = vst [vmem:[%s251_s3] sm:$0xff] %v139_v12 }
  0xe5   :  { %v123_v14 = vpop.f32.mrf.mxu0 }
  0xe7   :  { %v182_v15 = vpop.f32.mrf.mxu0 }

</bundles_post_ra>
